<compile_context>
chip_gen: v6e
topology: v6e:2x2x1
jax: 0.10.0
libtpu: 0.0.40
codegen_flags: <defaults>
</compile_context>

<pallas_src>
import functools
import math

import jax
import jax.numpy as jnp
from jax import lax
from jax.experimental import pallas as pl
from jax.experimental.pallas import tpu as pltpu


def _attention_layer_kernel(q_ref, k_ref, v_ref,
                            wq_ref, bq_ref, wk_ref, bk_ref, wv_ref, bv_ref,
                            wo_ref, bo_ref, gamma_ref, beta_ref,
                            o_ref,
                            *, num_heads, dim_q, dim_k, eps):
    B, S, D = q_ref.shape
    BS = B * S

    # Fold batch into the matmul M dimension (sublane concat, relayout-free).
    x_q = jnp.concatenate([q_ref[b] for b in range(B)], axis=0)       # (BS, D) f32
    x_k = jnp.concatenate([k_ref[b] for b in range(B)], axis=0)
    x_v = jnp.concatenate([v_ref[b] for b in range(B)], axis=0)

    # Head-fused projections: bf16 operands, f32 accumulation, f32 bias.
    # (The 1/sqrt(dim_q) attention scale is folded into wq/bq at init.)
    q_all = jnp.dot(x_q.astype(jnp.bfloat16), wq_ref[...],
                    preferred_element_type=jnp.float32) + bq_ref[...]  # (BS, H*dq)
    k_all = jnp.dot(x_k.astype(jnp.bfloat16), wk_ref[...],
                    preferred_element_type=jnp.float32) + bk_ref[...]  # (BS, H*dk)
    v_all = jnp.dot(x_v.astype(jnp.bfloat16), wv_ref[...],
                    preferred_element_type=jnp.float32) + bv_ref[...]  # (BS, H*dk)

    # Multi-head scaled dot-product attention; the output projection is
    # accumulated per head against sublane-aligned row slices of wo
    # (no lane-misaligned concat of head outputs).
    attn = jnp.zeros((BS, D), jnp.float32)
    for h in range(num_heads):                         # static, fully unrolled
        qcols = slice(h * dim_q, (h + 1) * dim_q)
        kcols = slice(h * dim_k, (h + 1) * dim_k)
        head_rows = []
        for b in range(B):                             # static, fully unrolled
            rows = slice(b * S, (b + 1) * S)
            qh = q_all[rows, qcols]                    # (S, dq) f32, scale folded
            kh = k_all[rows, kcols]                    # (S, dk) f32
            vh = v_all[rows, kcols]                    # (S, dk) f32
            # q @ k^T contracting the last dims (no transposed copy of k).
            s = lax.dot_general(qh, kh, (((1,), (1,)), ((), ())),
                                preferred_element_type=jnp.float32)    # (S, S)
            s = s - jnp.max(s, axis=-1, keepdims=True)
            e = jnp.exp(s)
            p = e / jnp.sum(e, axis=-1, keepdims=True)  # exact softmax (no approx rcp)
            head_rows.append(jnp.dot(p, vh, preferred_element_type=jnp.float32))
        head = jnp.concatenate(head_rows, axis=0).astype(jnp.bfloat16)  # (BS, dk)
        attn = attn + jnp.dot(head, wo_ref[h * dim_k:(h + 1) * dim_k, :],
                              preferred_element_type=jnp.float32)
    attn = attn + bo_ref[...]

    # Residual + LayerNorm (fused; dropout is identity at inference).
    # TODO(synk): nn.Dropout(p=0.1) training-mode masking is not implemented.
    y = x_q + attn
    mean = jnp.mean(y, axis=-1, keepdims=True)
    centered = y - mean
    var = jnp.mean(centered * centered, axis=-1, keepdims=True)
    out = centered / jnp.sqrt(var + eps) * gamma_ref[...] + beta_ref[...]
    for b in range(B):
        o_ref[b] = out[b * S:(b + 1) * S, :].astype(o_ref.dtype)


def attention_layer(query, key, value, params, *, num_heads, dim_q, dim_k, eps=1e-5):
    """query/key/value: (B, S, dim_in) float32. params: packed bf16/f32 weights."""
    B, S, D = query.shape

    kernel = functools.partial(
        _attention_layer_kernel,
        num_heads=num_heads, dim_q=dim_q, dim_k=dim_k, eps=eps)

    # No grid at these shapes: whole arrays are resident in VMEM for the
    # single kernel invocation (~5 MiB total with bf16 weights), so each
    # weight block is DMA'd exactly once and no vmem_limit override is needed.
    vmem = pl.BlockSpec(memory_space=pltpu.MemorySpace.VMEM)

    return pl.pallas_call(
        kernel,
        out_shape=jax.ShapeDtypeStruct((B, S, D), jnp.float32),
        in_specs=[vmem] * 13,
        out_specs=vmem,
    )(query, key, value,
      params["wq"], params["bq"], params["wk"], params["bk"],
      params["wv"], params["bv"], params["wo"], params["bo"],
      params["gamma"], params["beta"])


def init_params(key, num_heads, dim_in, dim_q, dim_k):
    """Head-fused, pre-transposed weights (x @ W + b == nn.Linear), with the
    1/sqrt(dim_q) attention scale folded into wq/bq and matmul weights
    quantized to bf16 (biases / LayerNorm affine kept in f32)."""
    ks = jax.random.split(key, 10)
    s = 0.05
    scale = 1.0 / math.sqrt(float(dim_q))

    def w(k, shape):
        return s * jax.random.normal(k, shape, jnp.float32)

    return {
        "wq": (w(ks[0], (dim_in, num_heads * dim_q)) * scale).astype(jnp.bfloat16),
        "bq": w(ks[1], (1, num_heads * dim_q)) * scale,
        "wk": w(ks[2], (dim_in, num_heads * dim_k)).astype(jnp.bfloat16),
        "bk": w(ks[3], (1, num_heads * dim_k)),
        "wv": w(ks[4], (dim_in, num_heads * dim_k)).astype(jnp.bfloat16),
        "bv": w(ks[5], (1, num_heads * dim_k)),
        "wo": w(ks[6], (num_heads * dim_k, dim_in)).astype(jnp.bfloat16),
        "bo": w(ks[7], (1, dim_in)),
        "gamma": 1.0 + 0.05 * jax.random.normal(ks[8], (1, dim_in), jnp.float32),
        "beta": 0.05 * jax.random.normal(ks[9], (1, dim_in), jnp.float32),
    }


def reference_attention_layer(query, key, value, params, *,
                              num_heads, dim_q, dim_k, eps=1e-5):
    """Pure-JAX reference for the PyTorch attention_Layer forward (eval mode),
    evaluated at the same mixed precision as the kernel: bf16 weights / matmul
    operands with f32 accumulation, f32 softmax and LayerNorm."""
    f32, bf16 = jnp.float32, jnp.bfloat16
    hi = jax.lax.Precision.HIGHEST
    q_all = jnp.dot(query.astype(bf16), params["wq"],
                    preferred_element_type=f32) + params["bq"][0]
    k_all = jnp.dot(key.astype(bf16), params["wk"],
                    preferred_element_type=f32) + params["bk"][0]
    v_all = jnp.dot(value.astype(bf16), params["wv"],
                    preferred_element_type=f32) + params["bv"][0]
    heads = []
    for h in range(num_heads):
        q = q_all[..., h * dim_q:(h + 1) * dim_q]     # scale already folded in
        k = k_all[..., h * dim_k:(h + 1) * dim_k]
        v = v_all[..., h * dim_k:(h + 1) * dim_k]
        scores = jnp.einsum("bqd,bkd->bqk", q, k, precision=hi,
                            preferred_element_type=f32)
        p = jax.nn.softmax(scores, axis=-1)
        heads.append(jnp.einsum("bqk,bkd->bqd", p, v, precision=hi,
                                preferred_element_type=f32))
    concat = jnp.concatenate(heads, axis=-1).astype(bf16)
    attn = jnp.dot(concat, params["wo"],
                   preferred_element_type=f32) + params["bo"][0]
    y = query + attn                      # dropout == identity at inference
    mean = jnp.mean(y, axis=-1, keepdims=True)
    var = jnp.mean((y - mean) ** 2, axis=-1, keepdims=True)
    return (y - mean) / jnp.sqrt(var + eps) * params["gamma"][0] + params["beta"][0]


if __name__ == "__main__":
    # Shapes implied by attention_Layer(): dim_model=768, num_heads=4,
    # dim_q = dim_k = 768 // 4 = 192; small batch/sequence for the demo.
    B, S = 2, 8
    DIM_MODEL, NUM_HEADS = 768, 4
    DIM_Q = DIM_K = DIM_MODEL // NUM_HEADS

    root = jax.random.PRNGKey(0)
    kq, kk, kv, kp = jax.random.split(root, 4)
    query = jax.random.normal(kq, (B, S, DIM_MODEL), jnp.float32)
    key_t = jax.random.normal(kk, (B, S, DIM_MODEL), jnp.float32)
    value = jax.random.normal(kv, (B, S, DIM_MODEL), jnp.float32)
    params = init_params(kp, NUM_HEADS, DIM_MODEL, DIM_Q, DIM_K)

    out = attention_layer(query, key_t, value, params,
                          num_heads=NUM_HEADS, dim_q=DIM_Q, dim_k=DIM_K)
    out = jax.block_until_ready(out)

    ref = reference_attention_layer(query, key_t, value, params,
                                    num_heads=NUM_HEADS, dim_q=DIM_Q, dim_k=DIM_K)
    assert out.shape == (B, S, DIM_MODEL)
    err = float(jnp.max(jnp.abs(out - ref)))
    assert jnp.allclose(out, ref, atol=2e-3, rtol=2e-3), \
        f"mismatch vs JAX reference (max abs err {err:.3e})"

    print("KERNEL_OK")
</pallas_src>

<mosaic_0001>
module attributes {stable_mosaic.version = 11 : i64} {
  func.func @_attention_layer_kernel(%arg0: memref<2x8x768xf32, #tpu.memory_space<vmem>>, %arg1: memref<2x8x768xf32, #tpu.memory_space<vmem>>, %arg2: memref<2x8x768xf32, #tpu.memory_space<vmem>>, %arg3: memref<768x768xbf16, #tpu.memory_space<vmem>>, %arg4: memref<1x768xf32, #tpu.memory_space<vmem>>, %arg5: memref<768x768xbf16, #tpu.memory_space<vmem>>, %arg6: memref<1x768xf32, #tpu.memory_space<vmem>>, %arg7: memref<768x768xbf16, #tpu.memory_space<vmem>>, %arg8: memref<1x768xf32, #tpu.memory_space<vmem>>, %arg9: memref<768x768xbf16, #tpu.memory_space<vmem>>, %arg10: memref<1x768xf32, #tpu.memory_space<vmem>>, %arg11: memref<1x768xf32, #tpu.memory_space<vmem>>, %arg12: memref<1x768xf32, #tpu.memory_space<vmem>>, %arg13: memref<2x8x768xf32, #tpu.memory_space<vmem>>) attributes {dimension_semantics = [], scalar_prefetch = 0 : i64, scratch_operands = 0 : i64, tpu.core_type = #tpu.core_type<tc>} {
    %c0 = arith.constant 0 : index
    %c0_0 = arith.constant 0 : index
    %c0_1 = arith.constant 0 : index
    %0 = vector.load %arg0[%c0, %c0_0, %c0_1] : memref<2x8x768xf32, #tpu.memory_space<vmem>>, vector<1x8x768xf32>
    %1 = vector.shape_cast %0 : vector<1x8x768xf32> to vector<8x768xf32>
    %c1 = arith.constant 1 : index
    %c0_2 = arith.constant 0 : index
    %c0_3 = arith.constant 0 : index
    %2 = vector.load %arg0[%c1, %c0_2, %c0_3] : memref<2x8x768xf32, #tpu.memory_space<vmem>>, vector<1x8x768xf32>
    %3 = vector.shape_cast %2 : vector<1x8x768xf32> to vector<8x768xf32>
    %4 = tpu.concatenate %1, %3 in 0 : vector<8x768xf32>, vector<8x768xf32> -> vector<16x768xf32>
    %c0_4 = arith.constant 0 : index
    %c0_5 = arith.constant 0 : index
    %c0_6 = arith.constant 0 : index
    %5 = vector.load %arg1[%c0_4, %c0_5, %c0_6] : memref<2x8x768xf32, #tpu.memory_space<vmem>>, vector<1x8x768xf32>
    %6 = vector.shape_cast %5 : vector<1x8x768xf32> to vector<8x768xf32>
    %c1_7 = arith.constant 1 : index
    %c0_8 = arith.constant 0 : index
    %c0_9 = arith.constant 0 : index
    %7 = vector.load %arg1[%c1_7, %c0_8, %c0_9] : memref<2x8x768xf32, #tpu.memory_space<vmem>>, vector<1x8x768xf32>
    %8 = vector.shape_cast %7 : vector<1x8x768xf32> to vector<8x768xf32>
    %9 = tpu.concatenate %6, %8 in 0 : vector<8x768xf32>, vector<8x768xf32> -> vector<16x768xf32>
    %c0_10 = arith.constant 0 : index
    %c0_11 = arith.constant 0 : index
    %c0_12 = arith.constant 0 : index
    %10 = vector.load %arg2[%c0_10, %c0_11, %c0_12] : memref<2x8x768xf32, #tpu.memory_space<vmem>>, vector<1x8x768xf32>
    %11 = vector.shape_cast %10 : vector<1x8x768xf32> to vector<8x768xf32>
    %c1_13 = arith.constant 1 : index
    %c0_14 = arith.constant 0 : index
    %c0_15 = arith.constant 0 : index
    %12 = vector.load %arg2[%c1_13, %c0_14, %c0_15] : memref<2x8x768xf32, #tpu.memory_space<vmem>>, vector<1x8x768xf32>
    %13 = vector.shape_cast %12 : vector<1x8x768xf32> to vector<8x768xf32>
    %14 = tpu.concatenate %11, %13 in 0 : vector<8x768xf32>, vector<8x768xf32> -> vector<16x768xf32>
    %15 = arith.truncf %4 : vector<16x768xf32> to vector<16x768xbf16>
    %c0_16 = arith.constant 0 : index
    %c0_17 = arith.constant 0 : index
    %16 = vector.load %arg3[%c0_16, %c0_17] : memref<768x768xbf16, #tpu.memory_space<vmem>>, vector<768x768xbf16>
    %cst = arith.constant dense<0.000000e+00> : vector<16x768xf32>
    %17 = tpu.matmul %15, %16, %cst {dimension_numbers = #tpu.dot_dimension_numbers<[1], [0], [0], [1], [0, 0, 1, 1], [], []>} : vector<16x768xbf16>, vector<768x768xbf16>, vector<16x768xf32> -> vector<16x768xf32>
    %c0_18 = arith.constant 0 : index
    %c0_19 = arith.constant 0 : index
    %18 = vector.load %arg4[%c0_18, %c0_19] : memref<1x768xf32, #tpu.memory_space<vmem>>, vector<1x768xf32>
    %19 = vector.broadcast %18 : vector<1x768xf32> to vector<16x768xf32>
    %20 = arith.addf %17, %19 : vector<16x768xf32>
    %21 = arith.truncf %9 : vector<16x768xf32> to vector<16x768xbf16>
    %c0_20 = arith.constant 0 : index
    %c0_21 = arith.constant 0 : index
    %22 = vector.load %arg5[%c0_20, %c0_21] : memref<768x768xbf16, #tpu.memory_space<vmem>>, vector<768x768xbf16>
    %cst_22 = arith.constant dense<0.000000e+00> : vector<16x768xf32>
    %23 = tpu.matmul %21, %22, %cst_22 {dimension_numbers = #tpu.dot_dimension_numbers<[1], [0], [0], [1], [0, 0, 1, 1], [], []>} : vector<16x768xbf16>, vector<768x768xbf16>, vector<16x768xf32> -> vector<16x768xf32>
    %c0_23 = arith.constant 0 : index
    %c0_24 = arith.constant 0 : index
    %24 = vector.load %arg6[%c0_23, %c0_24] : memref<1x768xf32, #tpu.memory_space<vmem>>, vector<1x768xf32>
    %25 = vector.broadcast %24 : vector<1x768xf32> to vector<16x768xf32>
    %26 = arith.addf %23, %25 : vector<16x768xf32>
    %27 = arith.truncf %14 : vector<16x768xf32> to vector<16x768xbf16>
    %c0_25 = arith.constant 0 : index
    %c0_26 = arith.constant 0 : index
    %28 = vector.load %arg7[%c0_25, %c0_26] : memref<768x768xbf16, #tpu.memory_space<vmem>>, vector<768x768xbf16>
    %cst_27 = arith.constant dense<0.000000e+00> : vector<16x768xf32>
    %29 = tpu.matmul %27, %28, %cst_27 {dimension_numbers = #tpu.dot_dimension_numbers<[1], [0], [0], [1], [0, 0, 1, 1], [], []>} : vector<16x768xbf16>, vector<768x768xbf16>, vector<16x768xf32> -> vector<16x768xf32>
    %c0_28 = arith.constant 0 : index
    %c0_29 = arith.constant 0 : index
    %30 = vector.load %arg8[%c0_28, %c0_29] : memref<1x768xf32, #tpu.memory_space<vmem>>, vector<1x768xf32>
    %31 = vector.broadcast %30 : vector<1x768xf32> to vector<16x768xf32>
    %32 = arith.addf %29, %31 : vector<16x768xf32>
    %cst_30 = arith.constant 0.000000e+00 : f32
    %33 = vector.broadcast %cst_30 : f32 to vector<16x768xf32>
    %34 = vector.extract_strided_slice %20 {offsets = [0, 0], sizes = [8, 192], strides = [1, 1]} : vector<16x768xf32> to vector<8x192xf32>
    %35 = vector.extract_strided_slice %26 {offsets = [0, 0], sizes = [8, 192], strides = [1, 1]} : vector<16x768xf32> to vector<8x192xf32>
    %36 = vector.extract_strided_slice %32 {offsets = [0, 0], sizes = [8, 192], strides = [1, 1]} : vector<16x768xf32> to vector<8x192xf32>
    %cst_31 = arith.constant dense<0.000000e+00> : vector<8x8xf32>
    %37 = tpu.matmul %34, %35, %cst_31 {dimension_numbers = #tpu.dot_dimension_numbers<[1], [1], [0], [0], [0, 0, 1, 0], [], []>} : vector<8x192xf32>, vector<8x192xf32>, vector<8x8xf32> -> vector<8x8xf32>
    %cst_32 = arith.constant dense<0xFF800000> : vector<8xf32>
    %38 = vector.multi_reduction <maximumf>, %37, %cst_32 [1] : vector<8x8xf32> to vector<8xf32>
    %39 = vector.shape_cast %38 : vector<8xf32> to vector<8x1xf32>
    %40 = vector.broadcast %39 : vector<8x1xf32> to vector<8x8xf32>
    %41 = arith.subf %37, %40 : vector<8x8xf32>
    %42 = math.exp %41 : vector<8x8xf32>
    %cst_33 = arith.constant dense<0.000000e+00> : vector<8xf32>
    %43 = vector.multi_reduction <add>, %42, %cst_33 [1] : vector<8x8xf32> to vector<8xf32>
    %44 = vector.shape_cast %43 : vector<8xf32> to vector<8x1xf32>
    %45 = vector.broadcast %44 : vector<8x1xf32> to vector<8x8xf32>
    %46 = arith.divf %42, %45 : vector<8x8xf32>
    %cst_34 = arith.constant dense<0.000000e+00> : vector<8x192xf32>
    %47 = tpu.matmul %46, %36, %cst_34 {dimension_numbers = #tpu.dot_dimension_numbers<[1], [0], [0], [1], [0, 0, 1, 1], [], []>} : vector<8x8xf32>, vector<8x192xf32>, vector<8x192xf32> -> vector<8x192xf32>
    %48 = vector.extract_strided_slice %20 {offsets = [8, 0], sizes = [8, 192], strides = [1, 1]} : vector<16x768xf32> to vector<8x192xf32>
    %49 = vector.extract_strided_slice %26 {offsets = [8, 0], sizes = [8, 192], strides = [1, 1]} : vector<16x768xf32> to vector<8x192xf32>
    %50 = vector.extract_strided_slice %32 {offsets = [8, 0], sizes = [8, 192], strides = [1, 1]} : vector<16x768xf32> to vector<8x192xf32>
    %cst_35 = arith.constant dense<0.000000e+00> : vector<8x8xf32>
    %51 = tpu.matmul %48, %49, %cst_35 {dimension_numbers = #tpu.dot_dimension_numbers<[1], [1], [0], [0], [0, 0, 1, 0], [], []>} : vector<8x192xf32>, vector<8x192xf32>, vector<8x8xf32> -> vector<8x8xf32>
    %cst_36 = arith.constant dense<0xFF800000> : vector<8xf32>
    %52 = vector.multi_reduction <maximumf>, %51, %cst_36 [1] : vector<8x8xf32> to vector<8xf32>
    %53 = vector.shape_cast %52 : vector<8xf32> to vector<8x1xf32>
    %54 = vector.broadcast %53 : vector<8x1xf32> to vector<8x8xf32>
    %55 = arith.subf %51, %54 : vector<8x8xf32>
    %56 = math.exp %55 : vector<8x8xf32>
    %cst_37 = arith.constant dense<0.000000e+00> : vector<8xf32>
    %57 = vector.multi_reduction <add>, %56, %cst_37 [1] : vector<8x8xf32> to vector<8xf32>
    %58 = vector.shape_cast %57 : vector<8xf32> to vector<8x1xf32>
    %59 = vector.broadcast %58 : vector<8x1xf32> to vector<8x8xf32>
    %60 = arith.divf %56, %59 : vector<8x8xf32>
    %cst_38 = arith.constant dense<0.000000e+00> : vector<8x192xf32>
    %61 = tpu.matmul %60, %50, %cst_38 {dimension_numbers = #tpu.dot_dimension_numbers<[1], [0], [0], [1], [0, 0, 1, 1], [], []>} : vector<8x8xf32>, vector<8x192xf32>, vector<8x192xf32> -> vector<8x192xf32>
    %62 = tpu.concatenate %47, %61 in 0 : vector<8x192xf32>, vector<8x192xf32> -> vector<16x192xf32>
    %63 = arith.truncf %62 : vector<16x192xf32> to vector<16x192xbf16>
    %c0_39 = arith.constant 0 : index
    %c0_40 = arith.constant 0 : index
    %64 = vector.load %arg9[%c0_39, %c0_40] : memref<768x768xbf16, #tpu.memory_space<vmem>>, vector<192x768xbf16>
    %cst_41 = arith.constant dense<0.000000e+00> : vector<16x768xf32>
    %65 = tpu.matmul %63, %64, %cst_41 {dimension_numbers = #tpu.dot_dimension_numbers<[1], [0], [0], [1], [0, 0, 1, 1], [], []>} : vector<16x192xbf16>, vector<192x768xbf16>, vector<16x768xf32> -> vector<16x768xf32>
    %66 = arith.addf %33, %65 : vector<16x768xf32>
    %67 = vector.extract_strided_slice %20 {offsets = [0, 192], sizes = [8, 192], strides = [1, 1]} : vector<16x768xf32> to vector<8x192xf32>
    %68 = vector.extract_strided_slice %26 {offsets = [0, 192], sizes = [8, 192], strides = [1, 1]} : vector<16x768xf32> to vector<8x192xf32>
    %69 = vector.extract_strided_slice %32 {offsets = [0, 192], sizes = [8, 192], strides = [1, 1]} : vector<16x768xf32> to vector<8x192xf32>
    %cst_42 = arith.constant dense<0.000000e+00> : vector<8x8xf32>
    %70 = tpu.matmul %67, %68, %cst_42 {dimension_numbers = #tpu.dot_dimension_numbers<[1], [1], [0], [0], [0, 0, 1, 0], [], []>} : vector<8x192xf32>, vector<8x192xf32>, vector<8x8xf32> -> vector<8x8xf32>
    %cst_43 = arith.constant dense<0xFF800000> : vector<8xf32>
    %71 = vector.multi_reduction <maximumf>, %70, %cst_43 [1] : vector<8x8xf32> to vector<8xf32>
    %72 = vector.shape_cast %71 : vector<8xf32> to vector<8x1xf32>
    %73 = vector.broadcast %72 : vector<8x1xf32> to vector<8x8xf32>
    %74 = arith.subf %70, %73 : vector<8x8xf32>
    %75 = math.exp %74 : vector<8x8xf32>
    %cst_44 = arith.constant dense<0.000000e+00> : vector<8xf32>
    %76 = vector.multi_reduction <add>, %75, %cst_44 [1] : vector<8x8xf32> to vector<8xf32>
    %77 = vector.shape_cast %76 : vector<8xf32> to vector<8x1xf32>
    %78 = vector.broadcast %77 : vector<8x1xf32> to vector<8x8xf32>
    %79 = arith.divf %75, %78 : vector<8x8xf32>
    %cst_45 = arith.constant dense<0.000000e+00> : vector<8x192xf32>
    %80 = tpu.matmul %79, %69, %cst_45 {dimension_numbers = #tpu.dot_dimension_numbers<[1], [0], [0], [1], [0, 0, 1, 1], [], []>} : vector<8x8xf32>, vector<8x192xf32>, vector<8x192xf32> -> vector<8x192xf32>
    %81 = vector.extract_strided_slice %20 {offsets = [8, 192], sizes = [8, 192], strides = [1, 1]} : vector<16x768xf32> to vector<8x192xf32>
    %82 = vector.extract_strided_slice %26 {offsets = [8, 192], sizes = [8, 192], strides = [1, 1]} : vector<16x768xf32> to vector<8x192xf32>
    %83 = vector.extract_strided_slice %32 {offsets = [8, 192], sizes = [8, 192], strides = [1, 1]} : vector<16x768xf32> to vector<8x192xf32>
    %cst_46 = arith.constant dense<0.000000e+00> : vector<8x8xf32>
    %84 = tpu.matmul %81, %82, %cst_46 {dimension_numbers = #tpu.dot_dimension_numbers<[1], [1], [0], [0], [0, 0, 1, 0], [], []>} : vector<8x192xf32>, vector<8x192xf32>, vector<8x8xf32> -> vector<8x8xf32>
    %cst_47 = arith.constant dense<0xFF800000> : vector<8xf32>
    %85 = vector.multi_reduction <maximumf>, %84, %cst_47 [1] : vector<8x8xf32> to vector<8xf32>
    %86 = vector.shape_cast %85 : vector<8xf32> to vector<8x1xf32>
    %87 = vector.broadcast %86 : vector<8x1xf32> to vector<8x8xf32>
    %88 = arith.subf %84, %87 : vector<8x8xf32>
    %89 = math.exp %88 : vector<8x8xf32>
    %cst_48 = arith.constant dense<0.000000e+00> : vector<8xf32>
    %90 = vector.multi_reduction <add>, %89, %cst_48 [1] : vector<8x8xf32> to vector<8xf32>
    %91 = vector.shape_cast %90 : vector<8xf32> to vector<8x1xf32>
    %92 = vector.broadcast %91 : vector<8x1xf32> to vector<8x8xf32>
    %93 = arith.divf %89, %92 : vector<8x8xf32>
    %cst_49 = arith.constant dense<0.000000e+00> : vector<8x192xf32>
    %94 = tpu.matmul %93, %83, %cst_49 {dimension_numbers = #tpu.dot_dimension_numbers<[1], [0], [0], [1], [0, 0, 1, 1], [], []>} : vector<8x8xf32>, vector<8x192xf32>, vector<8x192xf32> -> vector<8x192xf32>
    %95 = tpu.concatenate %80, %94 in 0 : vector<8x192xf32>, vector<8x192xf32> -> vector<16x192xf32>
    %96 = arith.truncf %95 : vector<16x192xf32> to vector<16x192xbf16>
    %c192 = arith.constant 192 : index
    %c0_50 = arith.constant 0 : index
    %97 = vector.load %arg9[%c192, %c0_50] : memref<768x768xbf16, #tpu.memory_space<vmem>>, vector<192x768xbf16>
    %cst_51 = arith.constant dense<0.000000e+00> : vector<16x768xf32>
    %98 = tpu.matmul %96, %97, %cst_51 {dimension_numbers = #tpu.dot_dimension_numbers<[1], [0], [0], [1], [0, 0, 1, 1], [], []>} : vector<16x192xbf16>, vector<192x768xbf16>, vector<16x768xf32> -> vector<16x768xf32>
    %99 = arith.addf %66, %98 : vector<16x768xf32>
    %100 = vector.extract_strided_slice %20 {offsets = [0, 384], sizes = [8, 192], strides = [1, 1]} : vector<16x768xf32> to vector<8x192xf32>
    %101 = vector.extract_strided_slice %26 {offsets = [0, 384], sizes = [8, 192], strides = [1, 1]} : vector<16x768xf32> to vector<8x192xf32>
    %102 = vector.extract_strided_slice %32 {offsets = [0, 384], sizes = [8, 192], strides = [1, 1]} : vector<16x768xf32> to vector<8x192xf32>
    %cst_52 = arith.constant dense<0.000000e+00> : vector<8x8xf32>
    %103 = tpu.matmul %100, %101, %cst_52 {dimension_numbers = #tpu.dot_dimension_numbers<[1], [1], [0], [0], [0, 0, 1, 0], [], []>} : vector<8x192xf32>, vector<8x192xf32>, vector<8x8xf32> -> vector<8x8xf32>
    %cst_53 = arith.constant dense<0xFF800000> : vector<8xf32>
    %104 = vector.multi_reduction <maximumf>, %103, %cst_53 [1] : vector<8x8xf32> to vector<8xf32>
    %105 = vector.shape_cast %104 : vector<8xf32> to vector<8x1xf32>
    %106 = vector.broadcast %105 : vector<8x1xf32> to vector<8x8xf32>
    %107 = arith.subf %103, %106 : vector<8x8xf32>
    %108 = math.exp %107 : vector<8x8xf32>
    %cst_54 = arith.constant dense<0.000000e+00> : vector<8xf32>
    %109 = vector.multi_reduction <add>, %108, %cst_54 [1] : vector<8x8xf32> to vector<8xf32>
    %110 = vector.shape_cast %109 : vector<8xf32> to vector<8x1xf32>
    %111 = vector.broadcast %110 : vector<8x1xf32> to vector<8x8xf32>
    %112 = arith.divf %108, %111 : vector<8x8xf32>
    %cst_55 = arith.constant dense<0.000000e+00> : vector<8x192xf32>
    %113 = tpu.matmul %112, %102, %cst_55 {dimension_numbers = #tpu.dot_dimension_numbers<[1], [0], [0], [1], [0, 0, 1, 1], [], []>} : vector<8x8xf32>, vector<8x192xf32>, vector<8x192xf32> -> vector<8x192xf32>
    %114 = vector.extract_strided_slice %20 {offsets = [8, 384], sizes = [8, 192], strides = [1, 1]} : vector<16x768xf32> to vector<8x192xf32>
    %115 = vector.extract_strided_slice %26 {offsets = [8, 384], sizes = [8, 192], strides = [1, 1]} : vector<16x768xf32> to vector<8x192xf32>
    %116 = vector.extract_strided_slice %32 {offsets = [8, 384], sizes = [8, 192], strides = [1, 1]} : vector<16x768xf32> to vector<8x192xf32>
    %cst_56 = arith.constant dense<0.000000e+00> : vector<8x8xf32>
    %117 = tpu.matmul %114, %115, %cst_56 {dimension_numbers = #tpu.dot_dimension_numbers<[1], [1], [0], [0], [0, 0, 1, 0], [], []>} : vector<8x192xf32>, vector<8x192xf32>, vector<8x8xf32> -> vector<8x8xf32>
    %cst_57 = arith.constant dense<0xFF800000> : vector<8xf32>
    %118 = vector.multi_reduction <maximumf>, %117, %cst_57 [1] : vector<8x8xf32> to vector<8xf32>
    %119 = vector.shape_cast %118 : vector<8xf32> to vector<8x1xf32>
    %120 = vector.broadcast %119 : vector<8x1xf32> to vector<8x8xf32>
    %121 = arith.subf %117, %120 : vector<8x8xf32>
    %122 = math.exp %121 : vector<8x8xf32>
    %cst_58 = arith.constant dense<0.000000e+00> : vector<8xf32>
    %123 = vector.multi_reduction <add>, %122, %cst_58 [1] : vector<8x8xf32> to vector<8xf32>
    %124 = vector.shape_cast %123 : vector<8xf32> to vector<8x1xf32>
    %125 = vector.broadcast %124 : vector<8x1xf32> to vector<8x8xf32>
    %126 = arith.divf %122, %125 : vector<8x8xf32>
    %cst_59 = arith.constant dense<0.000000e+00> : vector<8x192xf32>
    %127 = tpu.matmul %126, %116, %cst_59 {dimension_numbers = #tpu.dot_dimension_numbers<[1], [0], [0], [1], [0, 0, 1, 1], [], []>} : vector<8x8xf32>, vector<8x192xf32>, vector<8x192xf32> -> vector<8x192xf32>
    %128 = tpu.concatenate %113, %127 in 0 : vector<8x192xf32>, vector<8x192xf32> -> vector<16x192xf32>
    %129 = arith.truncf %128 : vector<16x192xf32> to vector<16x192xbf16>
    %c384 = arith.constant 384 : index
    %c0_60 = arith.constant 0 : index
    %130 = vector.load %arg9[%c384, %c0_60] : memref<768x768xbf16, #tpu.memory_space<vmem>>, vector<192x768xbf16>
    %cst_61 = arith.constant dense<0.000000e+00> : vector<16x768xf32>
    %131 = tpu.matmul %129, %130, %cst_61 {dimension_numbers = #tpu.dot_dimension_numbers<[1], [0], [0], [1], [0, 0, 1, 1], [], []>} : vector<16x192xbf16>, vector<192x768xbf16>, vector<16x768xf32> -> vector<16x768xf32>
    %132 = arith.addf %99, %131 : vector<16x768xf32>
    %133 = vector.extract_strided_slice %20 {offsets = [0, 576], sizes = [8, 192], strides = [1, 1]} : vector<16x768xf32> to vector<8x192xf32>
    %134 = vector.extract_strided_slice %26 {offsets = [0, 576], sizes = [8, 192], strides = [1, 1]} : vector<16x768xf32> to vector<8x192xf32>
    %135 = vector.extract_strided_slice %32 {offsets = [0, 576], sizes = [8, 192], strides = [1, 1]} : vector<16x768xf32> to vector<8x192xf32>
    %cst_62 = arith.constant dense<0.000000e+00> : vector<8x8xf32>
    %136 = tpu.matmul %133, %134, %cst_62 {dimension_numbers = #tpu.dot_dimension_numbers<[1], [1], [0], [0], [0, 0, 1, 0], [], []>} : vector<8x192xf32>, vector<8x192xf32>, vector<8x8xf32> -> vector<8x8xf32>
    %cst_63 = arith.constant dense<0xFF800000> : vector<8xf32>
    %137 = vector.multi_reduction <maximumf>, %136, %cst_63 [1] : vector<8x8xf32> to vector<8xf32>
    %138 = vector.shape_cast %137 : vector<8xf32> to vector<8x1xf32>
    %139 = vector.broadcast %138 : vector<8x1xf32> to vector<8x8xf32>
    %140 = arith.subf %136, %139 : vector<8x8xf32>
    %141 = math.exp %140 : vector<8x8xf32>
    %cst_64 = arith.constant dense<0.000000e+00> : vector<8xf32>
    %142 = vector.multi_reduction <add>, %141, %cst_64 [1] : vector<8x8xf32> to vector<8xf32>
    %143 = vector.shape_cast %142 : vector<8xf32> to vector<8x1xf32>
    %144 = vector.broadcast %143 : vector<8x1xf32> to vector<8x8xf32>
    %145 = arith.divf %141, %144 : vector<8x8xf32>
    %cst_65 = arith.constant dense<0.000000e+00> : vector<8x192xf32>
    %146 = tpu.matmul %145, %135, %cst_65 {dimension_numbers = #tpu.dot_dimension_numbers<[1], [0], [0], [1], [0, 0, 1, 1], [], []>} : vector<8x8xf32>, vector<8x192xf32>, vector<8x192xf32> -> vector<8x192xf32>
    %147 = vector.extract_strided_slice %20 {offsets = [8, 576], sizes = [8, 192], strides = [1, 1]} : vector<16x768xf32> to vector<8x192xf32>
    %148 = vector.extract_strided_slice %26 {offsets = [8, 576], sizes = [8, 192], strides = [1, 1]} : vector<16x768xf32> to vector<8x192xf32>
    %149 = vector.extract_strided_slice %32 {offsets = [8, 576], sizes = [8, 192], strides = [1, 1]} : vector<16x768xf32> to vector<8x192xf32>
    %cst_66 = arith.constant dense<0.000000e+00> : vector<8x8xf32>
    %150 = tpu.matmul %147, %148, %cst_66 {dimension_numbers = #tpu.dot_dimension_numbers<[1], [1], [0], [0], [0, 0, 1, 0], [], []>} : vector<8x192xf32>, vector<8x192xf32>, vector<8x8xf32> -> vector<8x8xf32>
    %cst_67 = arith.constant dense<0xFF800000> : vector<8xf32>
    %151 = vector.multi_reduction <maximumf>, %150, %cst_67 [1] : vector<8x8xf32> to vector<8xf32>
    %152 = vector.shape_cast %151 : vector<8xf32> to vector<8x1xf32>
    %153 = vector.broadcast %152 : vector<8x1xf32> to vector<8x8xf32>
    %154 = arith.subf %150, %153 : vector<8x8xf32>
    %155 = math.exp %154 : vector<8x8xf32>
    %cst_68 = arith.constant dense<0.000000e+00> : vector<8xf32>
    %156 = vector.multi_reduction <add>, %155, %cst_68 [1] : vector<8x8xf32> to vector<8xf32>
    %157 = vector.shape_cast %156 : vector<8xf32> to vector<8x1xf32>
    %158 = vector.broadcast %157 : vector<8x1xf32> to vector<8x8xf32>
    %159 = arith.divf %155, %158 : vector<8x8xf32>
    %cst_69 = arith.constant dense<0.000000e+00> : vector<8x192xf32>
    %160 = tpu.matmul %159, %149, %cst_69 {dimension_numbers = #tpu.dot_dimension_numbers<[1], [0], [0], [1], [0, 0, 1, 1], [], []>} : vector<8x8xf32>, vector<8x192xf32>, vector<8x192xf32> -> vector<8x192xf32>
    %161 = tpu.concatenate %146, %160 in 0 : vector<8x192xf32>, vector<8x192xf32> -> vector<16x192xf32>
    %162 = arith.truncf %161 : vector<16x192xf32> to vector<16x192xbf16>
    %c576 = arith.constant 576 : index
    %c0_70 = arith.constant 0 : index
    %163 = vector.load %arg9[%c576, %c0_70] : memref<768x768xbf16, #tpu.memory_space<vmem>>, vector<192x768xbf16>
    %cst_71 = arith.constant dense<0.000000e+00> : vector<16x768xf32>
    %164 = tpu.matmul %162, %163, %cst_71 {dimension_numbers = #tpu.dot_dimension_numbers<[1], [0], [0], [1], [0, 0, 1, 1], [], []>} : vector<16x192xbf16>, vector<192x768xbf16>, vector<16x768xf32> -> vector<16x768xf32>
    %165 = arith.addf %132, %164 : vector<16x768xf32>
    %c0_72 = arith.constant 0 : index
    %c0_73 = arith.constant 0 : index
    %166 = vector.load %arg10[%c0_72, %c0_73] : memref<1x768xf32, #tpu.memory_space<vmem>>, vector<1x768xf32>
    %167 = vector.broadcast %166 : vector<1x768xf32> to vector<16x768xf32>
    %168 = arith.addf %165, %167 : vector<16x768xf32>
    %169 = arith.addf %4, %168 : vector<16x768xf32>
    %cst_74 = arith.constant dense<0.000000e+00> : vector<16xf32>
    %170 = vector.multi_reduction <add>, %169, %cst_74 [1] : vector<16x768xf32> to vector<16xf32>
    %171 = vector.shape_cast %170 : vector<16xf32> to vector<16x1xf32>
    %cst_75 = arith.constant 7.680000e+02 : f32
    %172 = vector.broadcast %cst_75 : f32 to vector<16x1xf32>
    %173 = arith.divf %171, %172 : vector<16x1xf32>
    %174 = vector.broadcast %173 : vector<16x1xf32> to vector<16x768xf32>
    %175 = arith.subf %169, %174 : vector<16x768xf32>
    %176 = arith.mulf %175, %175 : vector<16x768xf32>
    %cst_76 = arith.constant dense<0.000000e+00> : vector<16xf32>
    %177 = vector.multi_reduction <add>, %176, %cst_76 [1] : vector<16x768xf32> to vector<16xf32>
    %178 = vector.shape_cast %177 : vector<16xf32> to vector<16x1xf32>
    %cst_77 = arith.constant 7.680000e+02 : f32
    %179 = vector.broadcast %cst_77 : f32 to vector<16x1xf32>
    %180 = arith.divf %178, %179 : vector<16x1xf32>
    %cst_78 = arith.constant 9.99999974E-6 : f32
    %181 = vector.broadcast %cst_78 : f32 to vector<16x1xf32>
    %182 = arith.addf %180, %181 : vector<16x1xf32>
    %183 = math.sqrt %182 : vector<16x1xf32>
    %184 = vector.broadcast %183 : vector<16x1xf32> to vector<16x768xf32>
    %185 = arith.divf %175, %184 : vector<16x768xf32>
    %c0_79 = arith.constant 0 : index
    %c0_80 = arith.constant 0 : index
    %186 = vector.load %arg11[%c0_79, %c0_80] : memref<1x768xf32, #tpu.memory_space<vmem>>, vector<1x768xf32>
    %187 = vector.broadcast %186 : vector<1x768xf32> to vector<16x768xf32>
    %188 = arith.mulf %185, %187 : vector<16x768xf32>
    %c0_81 = arith.constant 0 : index
    %c0_82 = arith.constant 0 : index
    %189 = vector.load %arg12[%c0_81, %c0_82] : memref<1x768xf32, #tpu.memory_space<vmem>>, vector<1x768xf32>
    %190 = vector.broadcast %189 : vector<1x768xf32> to vector<16x768xf32>
    %191 = arith.addf %188, %190 : vector<16x768xf32>
    %192 = vector.extract_strided_slice %191 {offsets = [0, 0], sizes = [8, 768], strides = [1, 1]} : vector<16x768xf32> to vector<8x768xf32>
    %c0_83 = arith.constant 0 : index
    %c0_84 = arith.constant 0 : index
    %c0_85 = arith.constant 0 : index
    %193 = vector.load %arg13[%c0_83, %c0_84, %c0_85] : memref<2x8x768xf32, #tpu.memory_space<vmem>>, vector<1x8x768xf32>
    %194 = vector.shape_cast %193 : vector<1x8x768xf32> to vector<8x768xf32>
    %195 = vector.shape_cast %192 : vector<8x768xf32> to vector<1x8x768xf32>
    tpu.vector_store %arg13[%c0_83, %c0_84, %c0_85], %195 {strides = array<i32>} : memref<2x8x768xf32, #tpu.memory_space<vmem>>, vector<1x8x768xf32>,
    %196 = vector.extract_strided_slice %191 {offsets = [8, 0], sizes = [8, 768], strides = [1, 1]} : vector<16x768xf32> to vector<8x768xf32>
    %c1_86 = arith.constant 1 : index
    %c0_87 = arith.constant 0 : index
    %c0_88 = arith.constant 0 : index
    %197 = vector.load %arg13[%c1_86, %c0_87, %c0_88] : memref<2x8x768xf32, #tpu.memory_space<vmem>>, vector<1x8x768xf32>
    %198 = vector.shape_cast %197 : vector<1x8x768xf32> to vector<8x768xf32>
    %199 = vector.shape_cast %196 : vector<8x768xf32> to vector<1x8x768xf32>
    tpu.vector_store %arg13[%c1_86, %c0_87, %c0_88], %199 {strides = array<i32>} : memref<2x8x768xf32, #tpu.memory_space<vmem>>, vector<1x8x768xf32>,
    return
  }
}

</mosaic_0001>

<bundles_post_ra>
// kernel: tpu_custom_call.1
= control target key start
LH: loop header
LB: loop body
LE: loop exit
PB: predicated region body
PF: predicated region fallthrough
CT: control target
= control target key end

     0   :  { %18 = vsyncpa [#allocation3], 0  ;;  %s14795_s0 = inlined_call_operand.hbm [shape: f32[2,8,768], index: 0, kind: input, shape index: {}]   ;;  %s14796_s1 = inlined_call_operand.hbm [shape: f32[2,8,768], index: 1, kind: input, shape index: {}]   ;;  %s14797_s2 = inlined_call_operand.hbm [shape: f32[2,8,768], index: 2, kind: input, shape index: {}]   ;;  %s14798_s3 = inlined_call_operand.hbm [shape: bf16[768,768], index: 3, kind: input, shape index: {}]   ;;  %s14799_s4 = inlined_call_operand.hbm [shape: f32[1,768], index: 4, kind: input, shape index: {}]   ;;  %s14800_s5 = inlined_call_operand.hbm [shape: bf16[768,768], index: 5, kind: input, shape index: {}]   ;;  %s14801_s6 = inlined_call_operand.hbm [shape: f32[1,768], index: 6, kind: input, shape index: {}]   ;;  %s14802_s7 = inlined_call_operand.hbm [shape: bf16[768,768], index: 7, kind: input, shape index: {}]   ;;  %s14803_s8 = inlined_call_operand.hbm [shape: f32[1,768], index: 8, kind: input, shape index: {}]   ;;  %s14804_s9 = inlined_call_operand.hbm [shape: bf16[768,768], index: 9, kind: input, shape index: {}]   ;;  %s14805_s10 = inlined_call_operand.hbm [shape: f32[1,768], index: 10, kind: input, shape index: {}]   ;;  %s14806_s11 = inlined_call_operand.hbm [shape: f32[1,768], index: 11, kind: input, shape index: {}]   ;;  %s14807_s12 = inlined_call_operand.hbm [shape: f32[1,768], index: 12, kind: input, shape index: {}]   ;;  %s14808_s13 = inlined_call_operand.hbm [shape: f32[2,8,768], index: 13, kind: output, shape index: {}]  }
   0x1   :  { %19 = vsyncpa [#allocation6], 0 }
   0x2   :  { %20 = vsyncpa [#allocation9], 0 }
   0x3   :  { %21 = vsyncpa [#allocation12], 0 }
   0x4   :  { %22 = vsyncpa [#allocation15], 0 }
   0x5   :  { %23 = vsyncpa [#allocation18], 0 }
   0x6   :  { %24 = vsyncpa [#allocation21], 0 }
   0x7   :  { %25 = vsyncpa [#allocation4], 0  ;;  %s13923_s25 = smov [#allocation5]   ;;  %s13924_s27 = smov [#allocation8]  }
   0x8   :  { %s43_s26 = sshll.u32 %s13923_s25, 4  ;;  %s67_s28 = sshll.u32 %s13924_s27, 4  ;;  %s44_s26 = int_to_ptr.vmem [resolvable:$true] %s43_s26  ;;  %s68_s28 = int_to_ptr.vmem [resolvable:$true] %s67_s28 }
   0x9   :  { %s13635_s29 = scalar_lea.vmem %s44_s26, 1536  ;;  %p13640_p1 = scmp.lt.s32.totalorder %s44_s26, %s44_s26 }
   0xa   :  { %p13636_p0 = scmp.ne.s32.totalorder %s44_s26, %s13635_s29  ;;  %p13641_p2 = scmp.lt.s32.totalorder %s13635_s29, %s13635_s29 }
   0xc   :  { %p13642_p3 = por %p13641_p2, %p13640_p1 }
   0xe   :  { %p13643_p4 = pnand %p13642_p3, %p13636_p0 }
  0x10   :  { %13646 = shalt.err (!%p13643_p4)
}
  0x11   :  { %s13925_s30 = smov 768   ;;  %s13926_s14 = smov 48  }
  0x12   :  { %49 = dma.hbm_to_vmem [thread:$0]  %s14796_s1, 1536, %s44_s26, [#allocation6], %s13925_s30, %s13925_s30, %s13926_s14  }
  0x13   :  { %s13655_s17 = scalar_lea.vmem %s68_s28, 36864  ;;  %p13660_p6 = scmp.lt.s32.totalorder %s68_s28, %s68_s28 }
  0x14   :  { %p13656_p5 = scmp.ne.s32.totalorder %s68_s28, %s13655_s17  ;;  %p13661_p7 = scmp.lt.s32.totalorder %s13655_s17, %s13655_s17 }
  0x16   :  { %p13662_p8 = por %p13661_p7, %p13660_p6 }
  0x18   :  { %p13663_p9 = pnand %p13662_p8, %p13656_p5 }
  0x1a   :  { %13666 = shalt.err (!%p13663_p9)
}
  0x1b   :  { %s13927_s18 = smov 384   ;;  %s13928_s19 = smov 24  }
  0x1c   :  { %73 = dma.hbm_to_vmem [thread:$0]  %s14798_s3, 36864, %s68_s28, [#allocation9], %s13927_s18, %s13927_s18, %s13928_s19  }
  0x1d   :  { %s13929_s22 = smov [#allocation11]   ;;  %s13930_s24 = smov [#allocation14]  }
  0x1e   :  { %s89_s23 = sshll.u32 %s13929_s22, 4  ;;  %s111_s1 = sshll.u32 %s13930_s24, 4  ;;  %s90_s23 = int_to_ptr.vmem [resolvable:$true] %s89_s23  ;;  %s112_s1 = int_to_ptr.vmem [resolvable:$true] %s111_s1 }
  0x1f   :  { %s13675_s25 = scalar_lea.vmem %s90_s23, 36864  ;;  %p13680_p11 = scmp.lt.s32.totalorder %s90_s23, %s90_s23 }
  0x20   :  { %p13676_p10 = scmp.ne.s32.totalorder %s90_s23, %s13675_s25  ;;  %p13681_p12 = scmp.lt.s32.totalorder %s13675_s25, %s13675_s25 }
  0x22   :  { %p13682_p13 = por %p13681_p12, %p13680_p11 }
  0x24   :  { %p13683_p0 = pnand %p13682_p13, %p13676_p10 }
  0x26   :  { %13686 = shalt.err (!%p13683_p0)
}
  0x27   :  { %95 = dma.hbm_to_vmem [thread:$0]  %s14800_s5, 36864, %s90_s23, [#allocation12], %s13927_s18, %s13927_s18, %s13928_s19  }
  0x28   :  { %s13695_s3 = scalar_lea.vmem %s112_s1, 36864  ;;  %p13700_p2 = scmp.lt.s32.totalorder %s112_s1, %s112_s1 }
  0x29   :  { %p13696_p1 = scmp.ne.s32.totalorder %s112_s1, %s13695_s3  ;;  %p13701_p3 = scmp.lt.s32.totalorder %s13695_s3, %s13695_s3 }
  0x2b   :  { %p13702_p4 = por %p13701_p3, %p13700_p2 }
  0x2d   :  { %p13703_p5 = pnand %p13702_p4, %p13696_p1 }
  0x2f   :  { %13706 = shalt.err (!%p13703_p5)
}
  0x30   :  { %117 = dma.hbm_to_vmem [thread:$0]  %s14802_s7, 36864, %s112_s1, [#allocation15], %s13927_s18, %s13927_s18, %s13928_s19  }
  0x31   :  { %s13931_s15 = smov [#allocation17]   ;;  %s13932_s17 = smov [#allocation20]  }
  0x32   :  { %s133_s16 = sshll.u32 %s13931_s15, 4  ;;  %s156_s20 = sshll.u32 %s13932_s17, 4  ;;  %s134_s16 = int_to_ptr.vmem [resolvable:$true] %s133_s16  ;;  %s157_s20 = int_to_ptr.vmem [resolvable:$true] %s156_s20 }
  0x33   :  { %s13715_s5 = scalar_lea.vmem %s134_s16, 36864  ;;  %p13720_p7 = scmp.lt.s32.totalorder %s134_s16, %s134_s16 }
  0x34   :  { %p13716_p6 = scmp.ne.s32.totalorder %s134_s16, %s13715_s5  ;;  %p13721_p8 = scmp.lt.s32.totalorder %s13715_s5, %s13715_s5 }
  0x36   :  { %p13722_p9 = por %p13721_p8, %p13720_p7 }
  0x38   :  { %p13723_p10 = pnand %p13722_p9, %p13716_p6 }
  0x3a   :  { %13726 = shalt.err (!%p13723_p10)
}
  0x3b   :  { %139 = dma.hbm_to_vmem [thread:$0]  %s14804_s9, 36864, %s134_s16, [#allocation18], %s13927_s18, %s13927_s18, %s13928_s19  }
  0x3c   :  { %s13735_s7 = scalar_lea.vmem %s157_s20, 96  ;;  %p13740_p12 = scmp.lt.s32.totalorder %s157_s20, %s157_s20 }
  0x3d   :  { %p13736_p11 = scmp.ne.s32.totalorder %s157_s20, %s13735_s7  ;;  %p13741_p13 = scmp.lt.s32.totalorder %s13735_s7, %s13735_s7 }
  0x3f   :  { %p13742_p0 = por %p13741_p13, %p13740_p12 }
  0x41   :  { %p13743_p1 = pnand %p13742_p0, %p13736_p11 }
  0x43   :  { %13746 = shalt.err (!%p13743_p1)
}
  0x44   :  { %159 = dma.hbm_to_vmem [thread:$0]  %s14806_s11, 96, %s157_s20, [#allocation21]  }
  0x45   :  { %s13933_s1 = smov [#allocation2]   ;;  %s13934_s26 = smov [#allocation7]  }
  0x46   :  { %s31_s25 = sshll.u32 %s13933_s1, 4  ;;  %s55_s27 = sshll.u32 %s13934_s26, 4  ;;  %s32_s25 = int_to_ptr.vmem [resolvable:$true] %s31_s25  ;;  %s56_s27 = int_to_ptr.vmem [resolvable:$true] %s55_s27 }
  0x47   :  { %s13755_s3 = scalar_lea.vmem %s32_s25, 1536  ;;  %p13760_p3 = scmp.lt.s32.totalorder %s32_s25, %s32_s25 }
  0x48   :  { %p13756_p2 = scmp.ne.s32.totalorder %s32_s25, %s13755_s3  ;;  %p13761_p4 = scmp.lt.s32.totalorder %s13755_s3, %s13755_s3 }
  0x4a   :  { %p13762_p5 = por %p13761_p4, %p13760_p3 }
  0x4c   :  { %p13763_p6 = pnand %p13762_p5, %p13756_p2 }
  0x4e   :  { %13766 = shalt.err (!%p13763_p6)
}
  0x4f   :  { %37 = dma.hbm_to_vmem [thread:$0]  %s14795_s0, 1536, %s32_s25, [#allocation3], %s13925_s30, %s13925_s30, %s13926_s14  }
  0x50   :  { %s13775_s11 = scalar_lea.vmem %s56_s27, 1536  ;;  %p13780_p8 = scmp.lt.s32.totalorder %s56_s27, %s56_s27 }
  0x51   :  { %p13776_p7 = scmp.ne.s32.totalorder %s56_s27, %s13775_s11  ;;  %p13781_p9 = scmp.lt.s32.totalorder %s13775_s11, %s13775_s11 }
  0x53   :  { %p13782_p10 = por %p13781_p9, %p13780_p8 }
  0x55   :  { %p13783_p11 = pnand %p13782_p10, %p13776_p7 }
  0x57   :  { %13786 = shalt.err (!%p13783_p11)
}
  0x58   :  { %61 = dma.hbm_to_vmem [thread:$0]  %s14797_s2, 1536, %s56_s27, [#allocation6], %s13925_s30, %s13925_s30, %s13926_s14  }
  0x59   :  { %s13935_s29 = smov [#allocation10]   ;;  %s13936_s16 = smov [#allocation13]  }
  0x5a   :  { %s80_s15 = sshll.u32 %s13935_s29, 4  ;;  %s102_s17 = sshll.u32 %s13936_s16, 4  ;;  %s81_s15 = int_to_ptr.vmem [resolvable:$true] %s80_s15  ;;  %s103_s17 = int_to_ptr.vmem [resolvable:$true] %s102_s17 }
  0x5b   :  { %s13795_s0 = scalar_lea.vmem %s81_s15, 96  ;;  %p13800_p13 = scmp.lt.s32.totalorder %s81_s15, %s81_s15 }
  0x5c   :  { %p13796_p12 = scmp.ne.s32.totalorder %s81_s15, %s13795_s0  ;;  %p13801_p0 = scmp.lt.s32.totalorder %s13795_s0, %s13795_s0 }
  0x5e   :  { %p13802_p1 = por %p13801_p0, %p13800_p13 }
  0x60   :  { %p13803_p2 = pnand %p13802_p1, %p13796_p12 }
  0x62   :  { %13806 = shalt.err (!%p13803_p2)
}
  0x63   :  { %83 = dma.hbm_to_vmem [thread:$0]  %s14799_s4, 96, %s81_s15, [#allocation9]  }
  0x64   :  { %s13815_s21 = scalar_lea.vmem %s103_s17, 96  ;;  %p13820_p4 = scmp.lt.s32.totalorder %s103_s17, %s103_s17 }
  0x65   :  { %p13816_p3 = scmp.ne.s32.totalorder %s103_s17, %s13815_s21  ;;  %p13821_p5 = scmp.lt.s32.totalorder %s13815_s21, %s13815_s21 }
  0x67   :  { %p13822_p6 = por %p13821_p5, %p13820_p4 }
  0x69   :  { %p13823_p7 = pnand %p13822_p6, %p13816_p3 }
  0x6b   :  { %13826 = shalt.err (!%p13823_p7)
}
  0x6c   :  { %105 = dma.hbm_to_vmem [thread:$0]  %s14801_s6, 96, %s103_s17, [#allocation12]  }
  0x6d   :  { %s13937_s7 = smov [#allocation16]   ;;  %s13938_s24 = smov [#allocation19]  }
  0x6e   :  { %s124_s23 = sshll.u32 %s13937_s7, 4  ;;  %s146_s1 = sshll.u32 %s13938_s24, 4  ;;  %s125_s23 = int_to_ptr.vmem [resolvable:$true] %s124_s23  ;;  %s147_s1 = int_to_ptr.vmem [resolvable:$true] %s146_s1 }
  0x6f   :  { %s13835_s25 = scalar_lea.vmem %s125_s23, 96  ;;  %p13840_p9 = scmp.lt.s32.totalorder %s125_s23, %s125_s23 }
  0x70   :  { %p13836_p8 = scmp.ne.s32.totalorder %s125_s23, %s13835_s25  ;;  %p13841_p10 = scmp.lt.s32.totalorder %s13835_s25, %s13835_s25 }
  0x72   :  { %p13842_p11 = por %p13841_p10, %p13840_p9 }
  0x74   :  { %p13843_p12 = pnand %p13842_p11, %p13836_p8 }
  0x76   :  { %13846 = shalt.err (!%p13843_p12)
}
  0x77   :  { %127 = dma.hbm_to_vmem [thread:$0]  %s14803_s8, 96, %s125_s23, [#allocation15]  }
  0x78   :  { %s13855_s27 = scalar_lea.vmem %s147_s1, 96  ;;  %p13860_p0 = scmp.lt.s32.totalorder %s147_s1, %s147_s1 }
  0x79   :  { %p13856_p13 = scmp.ne.s32.totalorder %s147_s1, %s13855_s27  ;;  %p13861_p1 = scmp.lt.s32.totalorder %s13855_s27, %s13855_s27 }
  0x7b   :  { %p13862_p2 = por %p13861_p1, %p13860_p0 }
  0x7d   :  { %p13863_p3 = pnand %p13862_p2, %p13856_p13 }
  0x7f   :  { %13866 = shalt.err (!%p13863_p3)
}
  0x80   :  { %149 = dma.hbm_to_vmem [thread:$0]  %s14805_s10, 96, %s147_s1, [#allocation18]  }
  0x81   :  { %s13939_s9 = smov [#allocation22]  }
  0x82   :  { %s166_s18 = sshll.u32 %s13939_s9, 4  ;;  %s167_s18 = int_to_ptr.vmem [resolvable:$true] %s166_s18 }
  0x83   :  { %s13875_s11 = scalar_lea.vmem %s167_s18, 96  ;;  %p13880_p5 = scmp.lt.s32.totalorder %s167_s18, %s167_s18 }
  0x84   :  { %p13876_p4 = scmp.ne.s32.totalorder %s167_s18, %s13875_s11  ;;  %p13881_p6 = scmp.lt.s32.totalorder %s13875_s11, %s13875_s11 }
  0x86   :  { %p13882_p7 = por %p13881_p6, %p13880_p5 }
  0x88   :  { %p13883_p8 = pnand %p13882_p7, %p13876_p4 }
  0x8a   :  { %13886 = shalt.err (!%p13883_p8)
}
  0x8b   :  { %169 = dma.hbm_to_vmem [thread:$0]  %s14807_s12, 96, %s167_s18, [#allocation21]  }
  0x8c   :  { %13907 = dma.done.wait [#allocation3], 1536  }
  0x8d   :  { %13908 = vsyncadd [#allocation3], 4294965760 }
  0x8e   :  { %13909 = dma.done.wait [#allocation6], 3072  }
  0x8f   :  { %13910 = vsyncadd [#allocation6], 4294964224 }
  0x90   :  { %13911 = dma.done.wait [#allocation9], 36960  }
  0x91   :  { %13912 = vsyncadd [#allocation9], 4294930336 }
  0x92   :  { %13913 = dma.done.wait [#allocation12], 36960  }
  0x93   :  { %13914 = vsyncadd [#allocation12], 4294930336 }
  0x94   :  { %13915 = dma.done.wait [#allocation15], 36960  }
  0x95   :  { %13916 = vsyncadd [#allocation15], 4294930336 }
  0x96   :  { %13917 = dma.done.wait [#allocation18], 36960  }
  0x97   :  { %13918 = vsyncadd [#allocation18], 4294930336 }
  0x98   :  { %13919 = dma.done.wait [#allocation21], 192  }
  0x99   :  { %13920 = vsyncadd [#allocation21], 4294967104  ;;  %v11845_v0 = vld [vmem:[#allocation8 + $0x154] ss:$24 sps:$4 sm:$0xff]   ;;  %v11849_v2 = vld [vmem:[#allocation8 + $0x150] ss:$24 sps:$4 sm:$0xff]  }
  0x9a   :  { %v11847_v1 = vld [vmem:[#allocation8 + $0x454] ss:$24 sps:$4 sm:$0xff]   ;;  %2015 = vmatprep.subr.bf16.mxu0 %v11845_v0  ;;  %v11850_v3 = vld [vmem:[#allocation8 + $0x450] ss:$24 sps:$4 sm:$0xff]   ;;  %v11851_v4 = vld [vmem:[#allocation8 + $0x124] ss:$24 sps:$4 sm:$0xff]  }
  0x9b   :  { %2058 = vmatprep.subr.bf16.mxu1 %v11847_v1  ;;  %2016 = vmatpush1.bf16.msra.mxu0 %v11849_v2  ;;  %v11853_v5 = vld [vmem:[#allocation8 + $0x424] ss:$24 sps:$4 sm:$0xff]   ;;  %v11855_v6 = vld [vmem:[#allocation8 + $0x120] ss:$24 sps:$4 sm:$0xff]   ;;  %v11857_v8 = vld [vmem:[#allocation8 + $0xf4] ss:$24 sps:$4 sm:$0xff]  }
  0x9c   :  { %2059 = vmatpush1.bf16.msra.mxu1 %v11850_v3  ;;  %2017 = vmatprep.subr.bf16.mxu0 %v11851_v4  ;;  %v11856_v7 = vld [vmem:[#allocation8 + $0x420] ss:$24 sps:$4 sm:$0xff]   ;;  %v11859_v9 = vld [vmem:[#allocation8 + $0x3f4] ss:$24 sps:$4 sm:$0xff]   ;;  %v11861_v10 = vld [vmem:[#allocation8 + $0xf0] ss:$24 sps:$4 sm:$0xff]  }
  0x9d   :  { %2060 = vmatprep.subr.bf16.mxu1 %v11853_v5  ;;  %v11862_v11 = vld [vmem:[#allocation8 + $0x3f0] ss:$24 sps:$4 sm:$0xff]   ;;  %v11863_v12 = vld [vmem:[#allocation8 + $0xc4] ss:$24 sps:$4 sm:$0xff]   ;;  %v11867_v14 = vld [vmem:[#allocation8 + $0xc0] ss:$24 sps:$4 sm:$0xff]  }
  0x9e   :  { %v11865_v13 = vld [vmem:[#allocation8 + $0x3c4] ss:$24 sps:$4 sm:$0xff]   ;;  %v11868_v15 = vld [vmem:[#allocation8 + $0x3c0] ss:$24 sps:$4 sm:$0xff]   ;;  %v11869_v16 = vld [vmem:[#allocation8 + $0x94] ss:$24 sps:$4 sm:$0xff]  }
  0x9f   :  { %2018 = vmatpush1.bf16.msra.mxu0 %v11855_v6  ;;  %v11871_v17 = vld [vmem:[#allocation8 + $0x394] ss:$24 sps:$4 sm:$0xff]   ;;  %v11873_v18 = vld [vmem:[#allocation8 + $0x90] ss:$24 sps:$4 sm:$0xff]   ;;  %v11875_v20 = vld [vmem:[#allocation8 + $0x64] ss:$24 sps:$4 sm:$0xff]  }
  0xa0   :  { %2061 = vmatpush1.bf16.msra.mxu1 %v11856_v7  ;;  %2019 = vmatprep.subr.bf16.mxu0 %v11857_v8  ;;  %v11874_v19 = vld [vmem:[#allocation8 + $0x390] ss:$24 sps:$4 sm:$0xff]   ;;  %v11877_v21 = vld [vmem:[#allocation8 + $0x364] ss:$24 sps:$4 sm:$0xff]   ;;  %v11879_v22 = vld [vmem:[#allocation8 + $0x60] ss:$24 sps:$4 sm:$0xff]  }
  0xa1   :  { %2062 = vmatprep.subr.bf16.mxu1 %v11859_v9  ;;  %v11880_v23 = vld [vmem:[#allocation8 + $0x360] ss:$24 sps:$4 sm:$0xff]   ;;  %v11881_v24 = vld [vmem:[#allocation8 + $0x34] ss:$24 sps:$4 sm:$0xff]   ;;  %v11885_v26 = vld [vmem:[#allocation8 + $0x30] ss:$24 sps:$4 sm:$0xff]  }
  0xa2   :  { %v11883_v25 = vld [vmem:[#allocation8 + $0x334] ss:$24 sps:$4 sm:$0xff]   ;;  %v11886_v27 = vld [vmem:[#allocation8 + $0x330] ss:$24 sps:$4 sm:$0xff]   ;;  %v11887_v28 = vld [vmem:[#allocation8 + $0x4] ss:$24 sps:$4 sm:$0xff]  }
  0xa3   :  { %2020 = vmatpush1.bf16.msra.mxu0 %v11861_v10  ;;  %v11889_v29 = vld [vmem:[#allocation8 + $0x304] ss:$24 sps:$4 sm:$0xff]   ;;  %v11891_v30 = vld [vmem:[#allocation8] ss:$24 sps:$4 sm:$0xff]   ;;  %v11893_v32 = vld [vmem:[#allocation8 + $0x2d4] ss:$24 sps:$4 sm:$0xff]  }
  0xa4   :  { %2063 = vmatpush1.bf16.msra.mxu1 %v11862_v11  ;;  %2021 = vmatprep.subr.bf16.mxu0 %v11863_v12  ;;  %v11892_v31 = vld [vmem:[#allocation8 + $0x300] ss:$24 sps:$4 sm:$0xff]   ;;  %v11895_v33 = vld [vmem:[#allocation8 + $0x5d4] ss:$24 sps:$4 sm:$0xff]   ;;  %v11897_v34 = vld [vmem:[#allocation8 + $0x2d0] ss:$24 sps:$4 sm:$0xff]  }
  0xa5   :  { %2064 = vmatprep.subr.bf16.mxu1 %v11865_v13  ;;  %v11898_v35 = vld [vmem:[#allocation8 + $0x5d0] ss:$24 sps:$4 sm:$0xff]   ;;  %v11899_v36 = vld [vmem:[#allocation8 + $0x2a4] ss:$24 sps:$4 sm:$0xff]   ;;  %v11903_v38 = vld [vmem:[#allocation8 + $0x2a0] ss:$24 sps:$4 sm:$0xff]  }
  0xa6   :  { %v11901_v37 = vld [vmem:[#allocation8 + $0x5a4] ss:$24 sps:$4 sm:$0xff]   ;;  %v11904_v39 = vld [vmem:[#allocation8 + $0x5a0] ss:$24 sps:$4 sm:$0xff]   ;;  %v11905_v40 = vld [vmem:[#allocation8 + $0x274] ss:$24 sps:$4 sm:$0xff]  }
  0xa7   :  { %2022 = vmatpush1.bf16.msra.mxu0 %v11867_v14  ;;  %v11907_v41 = vld [vmem:[#allocation8 + $0x574] ss:$24 sps:$4 sm:$0xff]   ;;  %v11909_v42 = vld [vmem:[#allocation8 + $0x270] ss:$24 sps:$4 sm:$0xff]   ;;  %v11911_v44 = vld [vmem:[#allocation8 + $0x244] ss:$24 sps:$4 sm:$0xff]  }
  0xa8   :  { %2065 = vmatpush1.bf16.msra.mxu1 %v11868_v15  ;;  %2023 = vmatprep.subr.bf16.mxu0 %v11869_v16  ;;  %v11910_v43 = vld [vmem:[#allocation8 + $0x570] ss:$24 sps:$4 sm:$0xff]   ;;  %v11913_v45 = vld [vmem:[#allocation8 + $0x544] ss:$24 sps:$4 sm:$0xff]   ;;  %v11915_v50 = vld [vmem:[#allocation8 + $0x240] ss:$24 sps:$4 sm:$0xff]  }
  0xa9   :  { %2066 = vmatprep.subr.bf16.mxu1 %v11871_v17  ;;  %v211_v46 = vld [vmem:[#allocation2 + $0x8] sm:$0xff]  ;;  %v218_v47 = vld [vmem:[#allocation2 + $0x38] sm:$0xff]  ;;  %v210_v6 = vld [vmem:[#allocation2] sm:$0xff]  ;;  %vm6708_vm0 = vcmask 523264   ;;  %vm6785_vm1 = vcmask 64512   ;;  %s13941_s10 = smov 64  }
  0xaa   :  { %v213_v48 = vld [vmem:[#allocation2 + $0x18] sm:$0xff]  ;;  %v220_v49 = vld [vmem:[#allocation2 + $0x48] sm:$0xff]  ;;  %v14073_v53 = vpack.c.bf16 %v218_v47, %v211_v46  ;;  %v217_v7 = vld [vmem:[#allocation2 + $0x30] sm:$0xff]  ;;  %s13942_s12 = smov [#allocation23]  }
  0xab   :  { %2024 = vmatpush1.bf16.msra.mxu0 %v11873_v18  ;;  %v11916_v51 = vld [vmem:[#allocation8 + $0x540] ss:$24 sps:$4 sm:$0xff]   ;;  %v11917_v52 = vld [vmem:[#allocation8 + $0x214] ss:$24 sps:$4 sm:$0xff]   ;;  %v14075_v54 = vpack.c.bf16 %v220_v49, %v213_v48  ;;  %v11921_v56 = vld [vmem:[#allocation8 + $0x210] ss:$24 sps:$4 sm:$0xff]   ;;  %v14079_v12 = vpack.c.bf16 %v217_v7, %v210_v6 }
  0xac   :  { %2067 = vmatpush1.bf16.msra.mxu1 %v11874_v19  ;;  %2025 = vmatprep.subr.bf16.mxu0 %v11875_v20  ;;  %v11919_v55 = vld [vmem:[#allocation8 + $0x514] ss:$24 sps:$4 sm:$0xff]   ;;  %v11922_v57 = vld [vmem:[#allocation8 + $0x510] ss:$24 sps:$4 sm:$0xff]   ;;  %v11923_v58 = vld [vmem:[#allocation8 + $0x1e4] ss:$24 sps:$4 sm:$0xff]  }
  0xad   :  { %2068 = vmatprep.subr.bf16.mxu1 %v11877_v21  ;;  %2047 = vmatprep.mubr.bf16.mxu0 %v14073_v53  ;;  %v11925_v59 = vld [vmem:[#allocation8 + $0x4e4] ss:$24 sps:$4 sm:$0xff]   ;;  %v11927_v60 = vld [vmem:[#allocation8 + $0x1e0] ss:$24 sps:$4 sm:$0xff]   ;;  %v11929_v62 = vld [vmem:[#allocation8 + $0x1b4] ss:$24 sps:$4 sm:$0xff]  }
  0xae   :  { %2090 = vmatprep.mubr.bf16.mxu1 %v14075_v54  ;;  %v11928_v61 = vld [vmem:[#allocation8 + $0x4e0] ss:$24 sps:$4 sm:$0xff]   ;;  %v11931_v63 = vld [vmem:[#allocation8 + $0x4b4] ss:$24 sps:$4 sm:$0xff]   ;;  %v11933_v0 = vld [vmem:[#allocation8 + $0x1b0] ss:$24 sps:$4 sm:$0xff]  }
  0xaf   :  { %2026 = vmatpush1.bf16.msra.mxu0 %v11879_v22  ;;  %v11934_v1 = vld [vmem:[#allocation8 + $0x4b0] ss:$24 sps:$4 sm:$0xff]   ;;  %v11935_v2 = vld [vmem:[#allocation8 + $0x184] ss:$24 sps:$4 sm:$0xff]   ;;  %v11939_v4 = vld [vmem:[#allocation8 + $0x180] ss:$24 sps:$4 sm:$0xff]  }
  0xb0   :  { %2069 = vmatpush1.bf16.msra.mxu1 %v11880_v23  ;;  %2027 = vmatprep.subr.bf16.mxu0 %v11881_v24  ;;  %v11937_v3 = vld [vmem:[#allocation8 + $0x484] ss:$24 sps:$4 sm:$0xff]   ;;  %v11940_v5 = vld [vmem:[#allocation8 + $0x480] ss:$24 sps:$4 sm:$0xff]   ;;  %v212_v8 = vld [vmem:[#allocation2 + $0x10] sm:$0xff]  ;;  %s10619_s28 = sshll.u32 %s13942_s12, 4  ;;  %s10620_s28 = int_to_ptr.vmem [resolvable:$true] %s10619_s28 }
  0xb1   :  { %2070 = vmatprep.subr.bf16.mxu1 %v11883_v25  ;;  %v219_v9 = vld [vmem:[#allocation2 + $0x40] sm:$0xff]  ;;  %v11943_v10 = vld [vmem:[#allocation8 + $0x754] ss:$24 sps:$4 sm:$0xff]   ;;  %v11941_v14 = vld [vmem:[#allocation8 + $0x750] ss:$24 sps:$4 sm:$0xff]   ;;  %s13887_s29 = scalar_lea.vmem %s10620_s28, 1536  ;;  %p13892_p10 = scmp.lt.s32.totalorder %s10620_s28, %s10620_s28 }
  0xb2   :  { %v11946_v11 = vld [vmem:[#allocation8 + $0x15c] ss:$24 sps:$4 sm:$0xff]   ;;  %v14081_v13 = vpack.c.bf16 %v219_v9, %v212_v8  ;;  %v11944_v15 = vld [vmem:[#allocation8 + $0x158] ss:$24 sps:$4 sm:$0xff]   ;;  %v11952_v17 = vld [vmem:[#allocation8 + $0x12c] ss:$24 sps:$4 sm:$0xff]   ;;  %p13888_p9 = scmp.ne.s32.totalorder %s10620_s28, %s13887_s29  ;;  %p13893_p11 = scmp.lt.s32.totalorder %s13887_s29, %s13887_s29 }
  0xb3   :  { %2028 = vmatpush1.bf16.msra.mxu0 %v11885_v26  ;;  %v11949_v16 = vld [vmem:[#allocation8 + $0x724] ss:$24 sps:$4 sm:$0xff]   ;;  %v11947_v18 = vld [vmem:[#allocation8 + $0x720] ss:$24 sps:$4 sm:$0xff]   ;;  %v11955_v20 = vld [vmem:[#allocation8 + $0x6f4] ss:$24 sps:$4 sm:$0xff]  }
  0xb4   :  { %2071 = vmatpush1.bf16.msra.mxu1 %v11886_v27  ;;  %2029 = vmatprep.subr.bf16.mxu0 %v11887_v28  ;;  %v11950_v19 = vld [vmem:[#allocation8 + $0x128] ss:$24 sps:$4 sm:$0xff]   ;;  %v11958_v21 = vld [vmem:[#allocation8 + $0xfc] ss:$24 sps:$4 sm:$0xff]   ;;  %v11956_v23 = vld [vmem:[#allocation8 + $0xf8] ss:$24 sps:$4 sm:$0xff]   ;;  %p13894_p12 = por %p13893_p11, %p13892_p10 }
  0xb5   :  { %2072 = vmatprep.subr.bf16.mxu1 %v11889_v29  ;;  %v11953_v22 = vld [vmem:[#allocation8 + $0x6f0] ss:$24 sps:$4 sm:$0xff]   ;;  %v11961_v24 = vld [vmem:[#allocation8 + $0x6c4] ss:$24 sps:$4 sm:$0xff]   ;;  %v11959_v26 = vld [vmem:[#allocation8 + $0x6c0] ss:$24 sps:$4 sm:$0xff]  }
  0xb6   :  { %v11964_v25 = vld [vmem:[#allocation8 + $0xcc] ss:$24 sps:$4 sm:$0xff]   ;;  %v11962_v27 = vld [vmem:[#allocation8 + $0xc8] ss:$24 sps:$4 sm:$0xff]   ;;  %v11970_v29 = vld [vmem:[#allocation8 + $0x9c] ss:$24 sps:$4 sm:$0xff]   ;;  %p13895_p13 = pnand %p13894_p12, %p13888_p9 }
  0xb7   :  { %2030 = vmatpush1.bf16.msra.mxu0 %v11891_v30  ;;  %v11967_v28 = vld [vmem:[#allocation8 + $0x694] ss:$24 sps:$4 sm:$0xff]   ;;  %v11965_v30 = vld [vmem:[#allocation8 + $0x690] ss:$24 sps:$4 sm:$0xff]   ;;  %v12019_v7 = vld [vmem:[#allocation8 + $0x7e0] ss:$24 sps:$4 sm:$0xff]  }
  0xb8   :  { %2073 = vmatpush1.bf16.msra.mxu1 %v11892_v31  ;;  %2031 = vmatprep.subr.bf16.mxu0 %v11893_v32  ;;  %v11968_v31 = vld [vmem:[#allocation8 + $0x98] ss:$24 sps:$4 sm:$0xff]   ;;  %v11973_v32 = vld [vmem:[#allocation8 + $0x664] ss:$24 sps:$4 sm:$0xff]   ;;  %v11986_v46 = vld [vmem:[#allocation8 + $0x8] ss:$24 sps:$4 sm:$0xff]  }
  0xb9   :  { %2074 = vmatprep.subr.bf16.mxu1 %v11895_v33  ;;  %v11976_v33 = vld [vmem:[#allocation8 + $0x6c] ss:$24 sps:$4 sm:$0xff]   ;;  %v11994_v48 = vld [vmem:[#allocation8 + $0x2dc] ss:$24 sps:$4 sm:$0xff]   ;;  %v11989_v49 = vld [vmem:[#allocation8 + $0x8d0] ss:$24 sps:$4 sm:$0xff]  }
  0xba   :  { %v11991_v47 = vld [vmem:[#allocation8 + $0x8d4] ss:$24 sps:$4 sm:$0xff]   ;;  %v12022_v8 = vld [vmem:[#allocation8 + $0x1e8] ss:$24 sps:$4 sm:$0xff]  }
  0xbb   :  { %2032 = vmatpush2.bf16.msra.mxu0 %v11897_v34  ;;  %v11971_v34 = vld [vmem:[#allocation8 + $0x660] ss:$24 sps:$4 sm:$0xff]   ;;  %v12024_v6 = vld [vmem:[#allocation8 + $0x1ec] ss:$24 sps:$4 sm:$0xff]  }
  0xbc   :  { %2075 = vmatpush2.bf16.msra.mxu1 %v11898_v35  ;;  %2033 = vmatprep.subr.bf16.mxu0 %v11899_v36  ;;  %v11974_v35 = vld [vmem:[#allocation8 + $0x68] ss:$24 sps:$4 sm:$0xff]   ;;  %v11979_v36 = vld [vmem:[#allocation8 + $0x634] ss:$24 sps:$4 sm:$0xff]  }
  0xbd   :  { %2076 = vmatprep.subr.bf16.mxu1 %v11901_v37  ;;  %v11982_v37 = vld [vmem:[#allocation8 + $0x3c] ss:$24 sps:$4 sm:$0xff]  }
  0xbe   :  { %v12027_v9 = vld [vmem:[#allocation8 + $0x7b4] ss:$24 sps:$4 sm:$0xff]  }
  0xbf   :  { %2034 = vmatpush2.bf16.msra.mxu0 %v11903_v38  ;;  %v11977_v38 = vld [vmem:[#allocation8 + $0x630] ss:$24 sps:$4 sm:$0xff]  }
  0xc0   :  { %2077 = vmatpush2.bf16.msra.mxu1 %v11904_v39  ;;  %2035 = vmatprep.subr.bf16.mxu0 %v11905_v40  ;;  %v11980_v39 = vld [vmem:[#allocation8 + $0x38] ss:$24 sps:$4 sm:$0xff]   ;;  %v11985_v40 = vld [vmem:[#allocation8 + $0x604] ss:$24 sps:$4 sm:$0xff]  }
  0xc1   :  { %2078 = vmatprep.subr.bf16.mxu1 %v11907_v41  ;;  %v215_v41 = vld [vmem:[#allocation2 + $0x28] sm:$0xff] }
  0xc3   :  { %2036 = vmatpush2.bf16.msra.mxu0 %v11909_v42  ;;  %v222_v42 = vld [vmem:[#allocation2 + $0x58] sm:$0xff] }
  0xc4   :  { %2079 = vmatpush2.bf16.msra.mxu1 %v11910_v43  ;;  %2037 = vmatprep.subr.bf16.mxu0 %v11911_v44  ;;  %v11988_v43 = vld [vmem:[#allocation8 + $0xc] ss:$24 sps:$4 sm:$0xff]   ;;  %v14086_v44 = vpack.c.bf16 %v222_v42, %v215_v41  ;;  %v12064_v41 = vld [vmem:[#allocation8 + $0x698] ss:$24 sps:$4 sm:$0xff]  }
  0xc5   :  { %2080 = vmatprep.subr.bf16.mxu1 %v11913_v45  ;;  %v11983_v45 = vld [vmem:[#allocation8 + $0x600] ss:$24 sps:$4 sm:$0xff]   ;;  %v12069_v42 = vld [vmem:[#allocation8 + $0x36c] ss:$24 sps:$4 sm:$0xff]  }
  0xc7   :  { %2038 = vmatpush2.bf16.msra.mxu0 %v11915_v50  ;;  %v11992_v50 = vld [vmem:[#allocation8 + $0x2d8] ss:$24 sps:$4 sm:$0xff]  }
  0xc8   :  { %2081 = vmatpush2.bf16.msra.mxu1 %v11916_v51  ;;  %2039 = vmatprep.subr.bf16.mxu0 %v11917_v52  ;;  %v11997_v51 = vld [vmem:[#allocation8 + $0x8a4] ss:$24 sps:$4 sm:$0xff]  }
  0xc9   :  { %2082 = vmatprep.subr.bf16.mxu1 %v11919_v55  ;;  %v12000_v52 = vld [vmem:[#allocation8 + $0x2ac] ss:$24 sps:$4 sm:$0xff]   ;;  %v11995_v55 = vld [vmem:[#allocation8 + $0x8a0] ss:$24 sps:$4 sm:$0xff]  }
  0xcb   :  { %2040 = vmatpush2.bf16.msra.mxu0 %v11921_v56  ;;  %v11998_v56 = vld [vmem:[#allocation8 + $0x2a8] ss:$24 sps:$4 sm:$0xff]  }
  0xcc   :  { %2083 = vmatpush2.bf16.msra.mxu1 %v11922_v57  ;;  %2041 = vmatprep.subr.bf16.mxu0 %v11923_v58  ;;  %v12003_v57 = vld [vmem:[#allocation8 + $0x874] ss:$24 sps:$4 sm:$0xff]  }
  0xcd   :  { %2084 = vmatprep.subr.bf16.mxu1 %v11925_v59  ;;  %v12006_v58 = vld [vmem:[#allocation8 + $0x27c] ss:$24 sps:$4 sm:$0xff]   ;;  %v12001_v59 = vld [vmem:[#allocation8 + $0x870] ss:$24 sps:$4 sm:$0xff]  }
  0xcf   :  { %2042 = vmatpush2.bf16.msra.mxu0 %v11927_v60  ;;  %v12004_v60 = vld [vmem:[#allocation8 + $0x278] ss:$24 sps:$4 sm:$0xff]  }
  0xd0   :  { %2085 = vmatpush2.bf16.msra.mxu1 %v11928_v61  ;;  %2043 = vmatprep.subr.bf16.mxu0 %v11929_v62  ;;  %v12009_v61 = vld [vmem:[#allocation8 + $0x844] ss:$24 sps:$4 sm:$0xff]  }
  0xd1   :  { %2086 = vmatprep.subr.bf16.mxu1 %v11931_v63  ;;  %v12012_v62 = vld [vmem:[#allocation8 + $0x24c] ss:$24 sps:$4 sm:$0xff]   ;;  %v12007_v63 = vld [vmem:[#allocation8 + $0x840] ss:$24 sps:$4 sm:$0xff]  }
  0xd3   :  { %2044 = vmatpush2.bf16.msra.mxu0 %v11933_v0  ;;  %v12010_v0 = vld [vmem:[#allocation8 + $0x248] ss:$24 sps:$4 sm:$0xff]  }
  0xd4   :  { %2087 = vmatpush2.bf16.msra.mxu1 %v11934_v1  ;;  %2045 = vmatprep.subr.bf16.mxu0 %v11935_v2  ;;  %v12015_v1 = vld [vmem:[#allocation8 + $0x814] ss:$24 sps:$4 sm:$0xff]  }
  0xd5   :  { %2088 = vmatprep.subr.bf16.mxu1 %v11937_v3  ;;  %v12018_v2 = vld [vmem:[#allocation8 + $0x21c] ss:$24 sps:$4 sm:$0xff]   ;;  %v12013_v3 = vld [vmem:[#allocation8 + $0x810] ss:$24 sps:$4 sm:$0xff]  }
  0xd7   :  { %2046 = vmatpush2.bf16.msra.mxu0 %v11939_v4  ;;  %v12016_v4 = vld [vmem:[#allocation8 + $0x218] ss:$24 sps:$4 sm:$0xff]  }
  0xd8   :  { %2089 = vmatpush2.bf16.msra.mxu1 %v11940_v5  ;;  %2101 = vmatprep.subr.bf16.mxu0 %v11943_v10  ;;  %v12021_v5 = vld [vmem:[#allocation8 + $0x7e4] ss:$24 sps:$4 sm:$0xff]  }
  0xd9   :  { %2144 = vmatprep.subr.bf16.mxu1 %v11946_v11  ;;  %v12030_v10 = vld [vmem:[#allocation8 + $0x1bc] ss:$24 sps:$4 sm:$0xff]   ;;  %v12025_v11 = vld [vmem:[#allocation8 + $0x7b0] ss:$24 sps:$4 sm:$0xff]  }
  0xda   :  { %2048 = vmatmul.mubr.bf16.vlgmr.msra.gmra.mxu0 %v14079_v12 }
  0xdb   :  { %2091 = vmatmul.mubr.bf16.vlgmr.msra.gmra.mxu1 %v14081_v13  ;;  %2102 = vmatpush1.bf16.msra.mxu0 %v11941_v14  ;;  %v12028_v14 = vld [vmem:[#allocation8 + $0x1b8] ss:$24 sps:$4 sm:$0xff]  }
  0xdc   :  { %2145 = vmatpush1.bf16.msra.mxu1 %v11944_v15  ;;  %2103 = vmatprep.subr.bf16.mxu0 %v11949_v16  ;;  %v12033_v15 = vld [vmem:[#allocation8 + $0x784] ss:$24 sps:$4 sm:$0xff]  }
  0xdd   :  { %2146 = vmatprep.subr.bf16.mxu1 %v11952_v17  ;;  %2176 = vmatprep.mubr.bf16.mxu1 %v14073_v53  ;;  %v12036_v16 = vld [vmem:[#allocation8 + $0x18c] ss:$24 sps:$4 sm:$0xff]   ;;  %v12031_v17 = vld [vmem:[#allocation8 + $0x780] ss:$24 sps:$4 sm:$0xff]  }
  0xde   :  { %2133 = vmatprep.mubr.bf16.mxu0 %v14086_v44 }
  0xdf   :  { %2104 = vmatpush1.bf16.msra.mxu0 %v11947_v18  ;;  %v12034_v18 = vld [vmem:[#allocation8 + $0x188] ss:$24 sps:$4 sm:$0xff]  }
  0xe0   :  { %2147 = vmatpush1.bf16.msra.mxu1 %v11950_v19  ;;  %2105 = vmatprep.subr.bf16.mxu0 %v11955_v20  ;;  %v214_v19 = vld [vmem:[#allocation2 + $0x20] sm:$0xff]  ;;  %v221_v20 = vld [vmem:[#allocation2 + $0x50] sm:$0xff] }
  0xe1   :  { %2148 = vmatprep.subr.bf16.mxu1 %v11958_v21  ;;  %v12039_v21 = vld [vmem:[#allocation8 + $0x45c] ss:$24 sps:$4 sm:$0xff]  }
  0xe3   :  { %2106 = vmatpush1.bf16.msra.mxu0 %v11953_v22  ;;  %v12042_v22 = vld [vmem:[#allocation8 + $0x75c] ss:$24 sps:$4 sm:$0xff]  }
  0xe4   :  { %2149 = vmatpush1.bf16.msra.mxu1 %v11956_v23  ;;  %2107 = vmatprep.subr.bf16.mxu0 %v11961_v24  ;;  %v14089_v23 = vpack.c.bf16 %v221_v20, %v214_v19  ;;  %v12037_v24 = vld [vmem:[#allocation8 + $0x458] ss:$24 sps:$4 sm:$0xff]   ;;  %v12123_v19 = vld [vmem:[#allocation8 + $0x4bc] ss:$24 sps:$4 sm:$0xff]  }
  0xe5   :  { %2150 = vmatprep.subr.bf16.mxu1 %v11964_v25  ;;  %v12040_v25 = vld [vmem:[#allocation8 + $0x758] ss:$24 sps:$4 sm:$0xff]   ;;  %v12126_v20 = vld [vmem:[#allocation8 + $0x7bc] ss:$24 sps:$4 sm:$0xff]  }
  0xe7   :  { %2108 = vmatpush1.bf16.msra.mxu0 %v11959_v26  ;;  %v12045_v26 = vld [vmem:[#allocation8 + $0x42c] ss:$24 sps:$4 sm:$0xff]  }
  0xe8   :  { %2151 = vmatpush1.bf16.msra.mxu1 %v11962_v27  ;;  %2109 = vmatprep.subr.bf16.mxu0 %v11967_v28  ;;  %v12048_v27 = vld [vmem:[#allocation8 + $0x72c] ss:$24 sps:$4 sm:$0xff]   ;;  %v12043_v28 = vld [vmem:[#allocation8 + $0x428] ss:$24 sps:$4 sm:$0xff]  }
  0xe9   :  { %2152 = vmatprep.subr.bf16.mxu1 %v11970_v29  ;;  %v12046_v29 = vld [vmem:[#allocation8 + $0x728] ss:$24 sps:$4 sm:$0xff]  }
  0xeb   :  { %2110 = vmatpush1.bf16.msra.mxu0 %v11965_v30  ;;  %v12051_v30 = vld [vmem:[#allocation8 + $0x3fc] ss:$24 sps:$4 sm:$0xff]  }
  0xec   :  { %2153 = vmatpush1.bf16.msra.mxu1 %v11968_v31  ;;  %2111 = vmatprep.subr.bf16.mxu0 %v11973_v32  ;;  %v12054_v31 = vld [vmem:[#allocation8 + $0x6fc] ss:$24 sps:$4 sm:$0xff]   ;;  %v12049_v32 = vld [vmem:[#allocation8 + $0x3f8] ss:$24 sps:$4 sm:$0xff]  }
  0xed   :  { %2154 = vmatprep.subr.bf16.mxu1 %v11976_v33  ;;  %v12052_v33 = vld [vmem:[#allocation8 + $0x6f8] ss:$24 sps:$4 sm:$0xff]  }
  0xef   :  { %2112 = vmatpush1.bf16.msra.mxu0 %v11971_v34  ;;  %v12057_v34 = vld [vmem:[#allocation8 + $0x3cc] ss:$24 sps:$4 sm:$0xff]  }
  0xf0   :  { %2155 = vmatpush1.bf16.msra.mxu1 %v11974_v35  ;;  %2113 = vmatprep.subr.bf16.mxu0 %v11979_v36  ;;  %v12060_v35 = vld [vmem:[#allocation8 + $0x6cc] ss:$24 sps:$4 sm:$0xff]   ;;  %v12055_v36 = vld [vmem:[#allocation8 + $0x3c8] ss:$24 sps:$4 sm:$0xff]  }
  0xf1   :  { %2156 = vmatprep.subr.bf16.mxu1 %v11982_v37  ;;  %v12058_v37 = vld [vmem:[#allocation8 + $0x6c8] ss:$24 sps:$4 sm:$0xff]  }
  0xf3   :  { %2114 = vmatpush1.bf16.msra.mxu0 %v11977_v38  ;;  %v12063_v38 = vld [vmem:[#allocation8 + $0x39c] ss:$24 sps:$4 sm:$0xff]  }
  0xf4   :  { %2157 = vmatpush1.bf16.msra.mxu1 %v11980_v39  ;;  %2115 = vmatprep.subr.bf16.mxu0 %v11985_v40  ;;  %v12066_v39 = vld [vmem:[#allocation8 + $0x69c] ss:$24 sps:$4 sm:$0xff]   ;;  %v12061_v40 = vld [vmem:[#allocation8 + $0x398] ss:$24 sps:$4 sm:$0xff]  }
  0xf5   :  { %2158 = vmatprep.subr.bf16.mxu1 %v11988_v43  ;;  %v12072_v43 = vld [vmem:[#allocation8 + $0x66c] ss:$24 sps:$4 sm:$0xff]  }
  0xf7   :  { %2116 = vmatpush1.bf16.msra.mxu0 %v11983_v45  ;;  %v12067_v45 = vld [vmem:[#allocation8 + $0x368] ss:$24 sps:$4 sm:$0xff]  }
  0xf8   :  { %2159 = vmatpush1.bf16.msra.mxu1 %v11986_v46  ;;  %2117 = vmatprep.subr.bf16.mxu0 %v11991_v47  ;;  %v12070_v46 = vld [vmem:[#allocation8 + $0x668] ss:$24 sps:$4 sm:$0xff]   ;;  %v12075_v47 = vld [vmem:[#allocation8 + $0x33c] ss:$24 sps:$4 sm:$0xff]  }
  0xf9   :  { %2160 = vmatprep.subr.bf16.mxu1 %v11994_v48  ;;  %v12078_v48 = vld [vmem:[#allocation8 + $0x63c] ss:$24 sps:$4 sm:$0xff]  }
  0xfb   :  { %2118 = vmatpush2.bf16.msra.mxu0 %v11989_v49  ;;  %v12073_v49 = vld [vmem:[#allocation8 + $0x338] ss:$24 sps:$4 sm:$0xff]  }
  0xfc   :  { %2161 = vmatpush2.bf16.msra.mxu1 %v11992_v50  ;;  %2119 = vmatprep.subr.bf16.mxu0 %v11997_v51  ;;  %v12076_v50 = vld [vmem:[#allocation8 + $0x638] ss:$24 sps:$4 sm:$0xff]   ;;  %v12081_v51 = vld [vmem:[#allocation8 + $0x30c] ss:$24 sps:$4 sm:$0xff]  }
  0xfd   :  { %2162 = vmatprep.subr.bf16.mxu1 %v12000_v52  ;;  %v12084_v52 = vld [vmem:[#allocation8 + $0x60c] ss:$24 sps:$4 sm:$0xff]  }
  0xff   :  { %2120 = vmatpush2.bf16.msra.mxu0 %v11995_v55  ;;  %v12079_v55 = vld [vmem:[#allocation8 + $0x308] ss:$24 sps:$4 sm:$0xff]  }
 0x100   :  { %2163 = vmatpush2.bf16.msra.mxu1 %v11998_v56  ;;  %2121 = vmatprep.subr.bf16.mxu0 %v12003_v57  ;;  %v12082_v56 = vld [vmem:[#allocation8 + $0x608] ss:$24 sps:$4 sm:$0xff]   ;;  %v12087_v57 = vld [vmem:[#allocation8 + $0x5dc] ss:$24 sps:$4 sm:$0xff]  }
 0x101   :  { %2164 = vmatprep.subr.bf16.mxu1 %v12006_v58  ;;  %v12090_v58 = vld [vmem:[#allocation8 + $0x8dc] ss:$24 sps:$4 sm:$0xff]  }
 0x103   :  { %2122 = vmatpush2.bf16.msra.mxu0 %v12001_v59  ;;  %v12085_v59 = vld [vmem:[#allocation8 + $0x5d8] ss:$24 sps:$4 sm:$0xff]  }
 0x104   :  { %2165 = vmatpush2.bf16.msra.mxu1 %v12004_v60  ;;  %2123 = vmatprep.subr.bf16.mxu0 %v12009_v61  ;;  %v12088_v60 = vld [vmem:[#allocation8 + $0x8d8] ss:$24 sps:$4 sm:$0xff]   ;;  %v12093_v61 = vld [vmem:[#allocation8 + $0x5ac] ss:$24 sps:$4 sm:$0xff]  }
 0x105   :  { %2166 = vmatprep.subr.bf16.mxu1 %v12012_v62  ;;  %v12096_v62 = vld [vmem:[#allocation8 + $0x8ac] ss:$24 sps:$4 sm:$0xff]  }
 0x107   :  { %2124 = vmatpush2.bf16.msra.mxu0 %v12007_v63  ;;  %v12091_v63 = vld [vmem:[#allocation8 + $0x5a8] ss:$24 sps:$4 sm:$0xff]  }
 0x108   :  { %2167 = vmatpush2.bf16.msra.mxu1 %v12010_v0  ;;  %2125 = vmatprep.subr.bf16.mxu0 %v12015_v1  ;;  %v12094_v0 = vld [vmem:[#allocation8 + $0x8a8] ss:$24 sps:$4 sm:$0xff]   ;;  %v12099_v1 = vld [vmem:[#allocation8 + $0x57c] ss:$24 sps:$4 sm:$0xff]  }
 0x109   :  { %2168 = vmatprep.subr.bf16.mxu1 %v12018_v2  ;;  %v12102_v2 = vld [vmem:[#allocation8 + $0x87c] ss:$24 sps:$4 sm:$0xff]  }
 0x10b   :  { %2126 = vmatpush2.bf16.msra.mxu0 %v12013_v3  ;;  %v12097_v3 = vld [vmem:[#allocation8 + $0x578] ss:$24 sps:$4 sm:$0xff]  }
 0x10c   :  { %2169 = vmatpush2.bf16.msra.mxu1 %v12016_v4  ;;  %2127 = vmatprep.subr.bf16.mxu0 %v12021_v5  ;;  %v12100_v4 = vld [vmem:[#allocation8 + $0x878] ss:$24 sps:$4 sm:$0xff]   ;;  %v12105_v5 = vld [vmem:[#allocation8 + $0x54c] ss:$24 sps:$4 sm:$0xff]  }
 0x10d   :  { %2170 = vmatprep.subr.bf16.mxu1 %v12024_v6  ;;  %v12108_v6 = vld [vmem:[#allocation8 + $0x84c] ss:$24 sps:$4 sm:$0xff]  }
 0x10f   :  { %2128 = vmatpush2.bf16.msra.mxu0 %v12019_v7  ;;  %v12103_v7 = vld [vmem:[#allocation8 + $0x548] ss:$24 sps:$4 sm:$0xff]  }
 0x110   :  { %2171 = vmatpush2.bf16.msra.mxu1 %v12022_v8  ;;  %2129 = vmatprep.subr.bf16.mxu0 %v12027_v9  ;;  %v12106_v8 = vld [vmem:[#allocation8 + $0x848] ss:$24 sps:$4 sm:$0xff]   ;;  %v12111_v9 = vld [vmem:[#allocation8 + $0x51c] ss:$24 sps:$4 sm:$0xff]  }
 0x111   :  { %2172 = vmatprep.subr.bf16.mxu1 %v12030_v10  ;;  %v12114_v10 = vld [vmem:[#allocation8 + $0x81c] ss:$24 sps:$4 sm:$0xff]  }
 0x113   :  { %2130 = vmatpush2.bf16.msra.mxu0 %v12025_v11  ;;  %v12109_v11 = vld [vmem:[#allocation8 + $0x518] ss:$24 sps:$4 sm:$0xff]  }
 0x114   :  { %2173 = vmatpush2.bf16.msra.mxu1 %v12028_v14  ;;  %2131 = vmatprep.subr.bf16.mxu0 %v12033_v15  ;;  %v12112_v14 = vld [vmem:[#allocation8 + $0x818] ss:$24 sps:$4 sm:$0xff]   ;;  %v12117_v15 = vld [vmem:[#allocation8 + $0x4ec] ss:$24 sps:$4 sm:$0xff]  }
 0x115   :  { %2174 = vmatprep.subr.bf16.mxu1 %v12036_v16  ;;  %v12120_v16 = vld [vmem:[#allocation8 + $0x7ec] ss:$24 sps:$4 sm:$0xff]  }
 0x117   :  { %2132 = vmatpush2.bf16.msra.mxu0 %v12031_v17  ;;  %v12115_v17 = vld [vmem:[#allocation8 + $0x4e8] ss:$24 sps:$4 sm:$0xff]  }
 0x118   :  { %2175 = vmatpush2.bf16.msra.mxu1 %v12034_v18  ;;  %2187 = vmatprep.subr.bf16.mxu0 %v12039_v21  ;;  %v12118_v18 = vld [vmem:[#allocation8 + $0x7e8] ss:$24 sps:$4 sm:$0xff]   ;;  %v12121_v21 = vld [vmem:[#allocation8 + $0x4b8] ss:$24 sps:$4 sm:$0xff]  }
 0x119   :  { %2230 = vmatprep.subr.bf16.mxu1 %v12042_v22  ;;  %v12124_v22 = vld [vmem:[#allocation8 + $0x7b8] ss:$24 sps:$4 sm:$0xff]  }
 0x11a   :  { %2134 = vmatmul.mubr.bf16.vlgmr.msra.gmra.mxu0 %v14089_v23 }
 0x11b   :  { %2177 = vmatmul.mubr.bf16.vlgmr.msra.gmra.mxu1 %v14079_v12  ;;  %2188 = vmatpush1.bf16.msra.mxu0 %v12037_v24  ;;  %v12129_v24 = vld [vmem:[#allocation8 + $0x48c] ss:$24 sps:$4 sm:$0xff]  }
 0x11c   :  { %2231 = vmatpush1.bf16.msra.mxu1 %v12040_v25  ;;  %2189 = vmatprep.subr.bf16.mxu0 %v12045_v26  ;;  %v12132_v25 = vld [vmem:[#allocation8 + $0x78c] ss:$24 sps:$4 sm:$0xff]   ;;  %v12127_v26 = vld [vmem:[#allocation8 + $0x488] ss:$24 sps:$4 sm:$0xff]  }
 0x11d   :  { %2232 = vmatprep.subr.bf16.mxu1 %v12048_v27  ;;  %2219 = vmatprep.mubr.bf16.mxu0 %v14075_v54  ;;  %v12130_v27 = vld [vmem:[#allocation8 + $0x788] ss:$24 sps:$4 sm:$0xff]  }
 0x11e   :  { %2262 = vmatprep.mubr.bf16.mxu1 %v14086_v44 }
 0x11f   :  { %2190 = vmatpush1.bf16.msra.mxu0 %v12043_v28  ;;  %v12135_v28 = vld [vmem:[#allocation8 + $0x164] ss:$24 sps:$4 sm:$0xff]  }
 0x120   :  { %2233 = vmatpush1.bf16.msra.mxu1 %v12046_v29  ;;  %2191 = vmatprep.subr.bf16.mxu0 %v12051_v30  ;;  %v12138_v29 = vld [vmem:[#allocation8 + $0x464] ss:$24 sps:$4 sm:$0xff]   ;;  %v12133_v30 = vld [vmem:[#allocation8 + $0x160] ss:$24 sps:$4 sm:$0xff]  }
 0x121   :  { %2234 = vmatprep.subr.bf16.mxu1 %v12054_v31  ;;  %v12136_v31 = vld [vmem:[#allocation8 + $0x460] ss:$24 sps:$4 sm:$0xff]  }
 0x123   :  { %2192 = vmatpush1.bf16.msra.mxu0 %v12049_v32  ;;  %v12141_v32 = vld [vmem:[#allocation8 + $0x134] ss:$24 sps:$4 sm:$0xff]  }
 0x124   :  { %2235 = vmatpush1.bf16.msra.mxu1 %v12052_v33  ;;  %2193 = vmatprep.subr.bf16.mxu0 %v12057_v34  ;;  %v12144_v33 = vld [vmem:[#allocation8 + $0x434] ss:$24 sps:$4 sm:$0xff]   ;;  %v12139_v34 = vld [vmem:[#allocation8 + $0x130] ss:$24 sps:$4 sm:$0xff]  }
 0x125   :  { %2236 = vmatprep.subr.bf16.mxu1 %v12060_v35  ;;  %v12142_v35 = vld [vmem:[#allocation8 + $0x430] ss:$24 sps:$4 sm:$0xff]  }
 0x127   :  { %2194 = vmatpush1.bf16.msra.mxu0 %v12055_v36  ;;  %v12147_v36 = vld [vmem:[#allocation8 + $0x104] ss:$24 sps:$4 sm:$0xff]  }
 0x128   :  { %2237 = vmatpush1.bf16.msra.mxu1 %v12058_v37  ;;  %2195 = vmatprep.subr.bf16.mxu0 %v12063_v38  ;;  %v12150_v37 = vld [vmem:[#allocation8 + $0x404] ss:$24 sps:$4 sm:$0xff]   ;;  %v12145_v38 = vld [vmem:[#allocation8 + $0x100] ss:$24 sps:$4 sm:$0xff]  }
 0x129   :  { %2238 = vmatprep.subr.bf16.mxu1 %v12066_v39  ;;  %v12148_v39 = vld [vmem:[#allocation8 + $0x400] ss:$24 sps:$4 sm:$0xff]  }
 0x12b   :  { %2196 = vmatpush1.bf16.msra.mxu0 %v12061_v40  ;;  %v12153_v40 = vld [vmem:[#allocation8 + $0xd4] ss:$24 sps:$4 sm:$0xff]  }
 0x12c   :  { %2239 = vmatpush1.bf16.msra.mxu1 %v12064_v41  ;;  %2197 = vmatprep.subr.bf16.mxu0 %v12069_v42  ;;  %v12156_v41 = vld [vmem:[#allocation8 + $0x3d4] ss:$24 sps:$4 sm:$0xff]   ;;  %v12151_v42 = vld [vmem:[#allocation8 + $0xd0] ss:$24 sps:$4 sm:$0xff]  }
 0x12d   :  { %2240 = vmatprep.subr.bf16.mxu1 %v12072_v43  ;;  %v12154_v43 = vld [vmem:[#allocation8 + $0x3d0] ss:$24 sps:$4 sm:$0xff]  }
 0x12f   :  { %2198 = vmatpush1.bf16.msra.mxu0 %v12067_v45  ;;  %v12159_v45 = vld [vmem:[#allocation8 + $0xa4] ss:$24 sps:$4 sm:$0xff]  }
 0x130   :  { %2241 = vmatpush1.bf16.msra.mxu1 %v12070_v46  ;;  %2199 = vmatprep.subr.bf16.mxu0 %v12075_v47  ;;  %v12162_v46 = vld [vmem:[#allocation8 + $0x3a4] ss:$24 sps:$4 sm:$0xff]   ;;  %v12157_v47 = vld [vmem:[#allocation8 + $0xa0] ss:$24 sps:$4 sm:$0xff]  }
 0x131   :  { %2242 = vmatprep.subr.bf16.mxu1 %v12078_v48  ;;  %v12168_v48 = vld [vmem:[#allocation8 + $0x374] ss:$24 sps:$4 sm:$0xff]  }
 0x133   :  { %2200 = vmatpush1.bf16.msra.mxu0 %v12073_v49  ;;  %v12163_v49 = vld [vmem:[#allocation8 + $0x70] ss:$24 sps:$4 sm:$0xff]  }
 0x134   :  { %2243 = vmatpush1.bf16.msra.mxu1 %v12076_v50  ;;  %2201 = vmatprep.subr.bf16.mxu0 %v12081_v51  ;;  %v12166_v50 = vld [vmem:[#allocation8 + $0x370] ss:$24 sps:$4 sm:$0xff]   ;;  %v12171_v51 = vld [vmem:[#allocation8 + $0x44] ss:$24 sps:$4 sm:$0xff]  }
 0x135   :  { %2244 = vmatprep.subr.bf16.mxu1 %v12084_v52  ;;  %v12174_v52 = vld [vmem:[#allocation8 + $0x344] ss:$24 sps:$4 sm:$0xff]  }
 0x137   :  { %2202 = vmatpush1.bf16.msra.mxu0 %v12079_v55  ;;  %v12169_v55 = vld [vmem:[#allocation8 + $0x40] ss:$24 sps:$4 sm:$0xff]  }
 0x138   :  { %2245 = vmatpush1.bf16.msra.mxu1 %v12082_v56  ;;  %2203 = vmatprep.subr.bf16.mxu0 %v12087_v57  ;;  %v12172_v56 = vld [vmem:[#allocation8 + $0x340] ss:$24 sps:$4 sm:$0xff]   ;;  %v12177_v57 = vld [vmem:[#allocation8 + $0x14] ss:$24 sps:$4 sm:$0xff]  }
 0x139   :  { %2246 = vmatprep.subr.bf16.mxu1 %v12090_v58  ;;  %v12180_v58 = vld [vmem:[#allocation8 + $0x314] ss:$24 sps:$4 sm:$0xff]  }
 0x13b   :  { %2204 = vmatpush2.bf16.msra.mxu0 %v12085_v59  ;;  %v12175_v59 = vld [vmem:[#allocation8 + $0x10] ss:$24 sps:$4 sm:$0xff]  }
 0x13c   :  { %2247 = vmatpush2.bf16.msra.mxu1 %v12088_v60  ;;  %2205 = vmatprep.subr.bf16.mxu0 %v12093_v61  ;;  %v12178_v60 = vld [vmem:[#allocation8 + $0x310] ss:$24 sps:$4 sm:$0xff]   ;;  %v12183_v61 = vld [vmem:[#allocation8 + $0x2e4] ss:$24 sps:$4 sm:$0xff]  }
 0x13d   :  { %2248 = vmatprep.subr.bf16.mxu1 %v12096_v62  ;;  %v12186_v62 = vld [vmem:[#allocation8 + $0x5e4] ss:$24 sps:$4 sm:$0xff]  }
 0x13f   :  { %2206 = vmatpush2.bf16.msra.mxu0 %v12091_v63  ;;  %v12181_v63 = vld [vmem:[#allocation8 + $0x2e0] ss:$24 sps:$4 sm:$0xff]  }
 0x140   :  { %2249 = vmatpush2.bf16.msra.mxu1 %v12094_v0  ;;  %2207 = vmatprep.subr.bf16.mxu0 %v12099_v1  ;;  %v12184_v0 = vld [vmem:[#allocation8 + $0x5e0] ss:$24 sps:$4 sm:$0xff]   ;;  %v12189_v1 = vld [vmem:[#allocation8 + $0x2b4] ss:$24 sps:$4 sm:$0xff]  }
 0x141   :  { %2250 = vmatprep.subr.bf16.mxu1 %v12102_v2  ;;  %v12192_v2 = vld [vmem:[#allocation8 + $0x5b4] ss:$24 sps:$4 sm:$0xff]  }
 0x143   :  { %2208 = vmatpush2.bf16.msra.mxu0 %v12097_v3  ;;  %v12187_v3 = vld [vmem:[#allocation8 + $0x2b0] ss:$24 sps:$4 sm:$0xff]  }
 0x144   :  { %2251 = vmatpush2.bf16.msra.mxu1 %v12100_v4  ;;  %2209 = vmatprep.subr.bf16.mxu0 %v12105_v5  ;;  %v12190_v4 = vld [vmem:[#allocation8 + $0x5b0] ss:$24 sps:$4 sm:$0xff]   ;;  %v12195_v5 = vld [vmem:[#allocation8 + $0x284] ss:$24 sps:$4 sm:$0xff]  }
 0x145   :  { %2252 = vmatprep.subr.bf16.mxu1 %v12108_v6  ;;  %v12198_v6 = vld [vmem:[#allocation8 + $0x584] ss:$24 sps:$4 sm:$0xff]  }
 0x147   :  { %2210 = vmatpush2.bf16.msra.mxu0 %v12103_v7  ;;  %v12193_v7 = vld [vmem:[#allocation8 + $0x280] ss:$24 sps:$4 sm:$0xff]  }
 0x148   :  { %2253 = vmatpush2.bf16.msra.mxu1 %v12106_v8  ;;  %2211 = vmatprep.subr.bf16.mxu0 %v12111_v9  ;;  %v12196_v8 = vld [vmem:[#allocation8 + $0x580] ss:$24 sps:$4 sm:$0xff]   ;;  %v12201_v9 = vld [vmem:[#allocation8 + $0x254] ss:$24 sps:$4 sm:$0xff]  }
 0x149   :  { %2254 = vmatprep.subr.bf16.mxu1 %v12114_v10  ;;  %v12204_v10 = vld [vmem:[#allocation8 + $0x554] ss:$24 sps:$4 sm:$0xff]  }
 0x14b   :  { %2212 = vmatpush2.bf16.msra.mxu0 %v12109_v11  ;;  %v12199_v11 = vld [vmem:[#allocation8 + $0x250] ss:$24 sps:$4 sm:$0xff]  }
 0x14c   :  { %2255 = vmatpush2.bf16.msra.mxu1 %v12112_v14  ;;  %2213 = vmatprep.subr.bf16.mxu0 %v12117_v15  ;;  %v12202_v14 = vld [vmem:[#allocation8 + $0x550] ss:$24 sps:$4 sm:$0xff]   ;;  %v12207_v15 = vld [vmem:[#allocation8 + $0x224] ss:$24 sps:$4 sm:$0xff]  }
 0x14d   :  { %2256 = vmatprep.subr.bf16.mxu1 %v12120_v16  ;;  %v12210_v16 = vld [vmem:[#allocation8 + $0x524] ss:$24 sps:$4 sm:$0xff]  }
 0x14f   :  { %2214 = vmatpush2.bf16.msra.mxu0 %v12115_v17  ;;  %v12205_v17 = vld [vmem:[#allocation8 + $0x220] ss:$24 sps:$4 sm:$0xff]  }
 0x150   :  { %2257 = vmatpush2.bf16.msra.mxu1 %v12118_v18  ;;  %2215 = vmatprep.subr.bf16.mxu0 %v12123_v19  ;;  %v12208_v18 = vld [vmem:[#allocation8 + $0x520] ss:$24 sps:$4 sm:$0xff]   ;;  %v12213_v19 = vld [vmem:[#allocation8 + $0x1f4] ss:$24 sps:$4 sm:$0xff]  }
 0x151   :  { %2258 = vmatprep.subr.bf16.mxu1 %v12126_v20  ;;  %v12216_v20 = vld [vmem:[#allocation8 + $0x4f4] ss:$24 sps:$4 sm:$0xff]  }
 0x153   :  { %2216 = vmatpush2.bf16.msra.mxu0 %v12121_v21  ;;  %v12211_v21 = vld [vmem:[#allocation8 + $0x1f0] ss:$24 sps:$4 sm:$0xff]  }
 0x154   :  { %2259 = vmatpush2.bf16.msra.mxu1 %v12124_v22  ;;  %2217 = vmatprep.subr.bf16.mxu0 %v12129_v24  ;;  %v12214_v22 = vld [vmem:[#allocation8 + $0x4f0] ss:$24 sps:$4 sm:$0xff]   ;;  %v12219_v24 = vld [vmem:[#allocation8 + $0x1c4] ss:$24 sps:$4 sm:$0xff]  }
 0x155   :  { %2260 = vmatprep.subr.bf16.mxu1 %v12132_v25  ;;  %v12222_v25 = vld [vmem:[#allocation8 + $0x4c4] ss:$24 sps:$4 sm:$0xff]  }
 0x157   :  { %2218 = vmatpush2.bf16.msra.mxu0 %v12127_v26  ;;  %v12217_v26 = vld [vmem:[#allocation8 + $0x1c0] ss:$24 sps:$4 sm:$0xff]  }
 0x158   :  { %2261 = vmatpush2.bf16.msra.mxu1 %v12130_v27  ;;  %2273 = vmatprep.subr.bf16.mxu0 %v12135_v28  ;;  %v12220_v27 = vld [vmem:[#allocation8 + $0x4c0] ss:$24 sps:$4 sm:$0xff]   ;;  %v12225_v28 = vld [vmem:[#allocation8 + $0x194] ss:$24 sps:$4 sm:$0xff]  }
 0x159   :  { %2316 = vmatprep.subr.bf16.mxu1 %v12138_v29  ;;  %v12228_v29 = vld [vmem:[#allocation8 + $0x494] ss:$24 sps:$4 sm:$0xff]  }
 0x15a   :  { %2220 = vmatmul.mubr.bf16.vlgmr.msra.gmra.mxu0 %v14081_v13 }
 0x15b   :  { %2263 = vmatmul.mubr.bf16.vlgmr.msra.gmra.mxu1 %v14089_v23  ;;  %2274 = vmatpush1.bf16.msra.mxu0 %v12133_v30  ;;  %v545_v30 = vlaneseq }
 0x15c   :  { %2317 = vmatpush1.bf16.msra.mxu1 %v12136_v31  ;;  %2275 = vmatprep.subr.bf16.mxu0 %v12141_v32  ;;  %v12223_v31 = vld [vmem:[#allocation8 + $0x190] ss:$24 sps:$4 sm:$0xff]  }
 0x15d   :  { %2318 = vmatprep.subr.bf16.mxu1 %v12144_v33  ;;  %2305 = vmatprep.mubr.bf16.mxu0 %v14073_v53  ;;  %v12160_v53 = vld [vmem:[#allocation8 + $0x3a0] ss:$24 sps:$4 sm:$0xff]   ;;  %v12226_v32 = vld [vmem:[#allocation8 + $0x490] ss:$24 sps:$4 sm:$0xff]   ;;  %v12231_v33 = vld [vmem:[#allocation8 + $0x764] ss:$24 sps:$4 sm:$0xff]  }
 0x15e   :  { %2348 = vmatprep.mubr.bf16.mxu1 %v14075_v54  ;;  %v12165_v54 = vld [vmem:[#allocation8 + $0x74] ss:$24 sps:$4 sm:$0xff]  }
 0x15f   :  { %2276 = vmatpush1.bf16.msra.mxu0 %v12139_v34  ;;  %v12234_v34 = vld [vmem:[#allocation11 + $0x154] ss:$24 sps:$4 sm:$0xff]  }
 0x160   :  { %2319 = vmatpush1.bf16.msra.mxu1 %v12142_v35  ;;  %2277 = vmatprep.subr.bf16.mxu0 %v12147_v36  ;;  %v14099_v35 = vshrl.u32 %v545_v30, 7  ;;  %v12229_v36 = vld [vmem:[#allocation8 + $0x760] ss:$24 sps:$4 sm:$0xff]  }
 0x161   :  { %2320 = vmatprep.subr.bf16.mxu1 %v12150_v37  ;;  %v224_v37 = vld [vmem:[#allocation5 + $0x8] sm:$0xff] }
 0x162   :  { %v12286_v30 = vld [vmem:[#allocation11 + $0x2a0] ss:$24 sps:$4 sm:$0xff]  }
 0x163   :  { %2278 = vmatpush1.bf16.msra.mxu0 %v12145_v38  ;;  %v231_v38 = vld [vmem:[#allocation5 + $0x38] sm:$0xff] }
 0x164   :  { %2321 = vmatpush1.bf16.msra.mxu1 %v12148_v39  ;;  %2279 = vmatprep.subr.bf16.mxu0 %v12153_v40  ;;  %v12232_v39 = vld [vmem:[#allocation11 + $0x150] ss:$24 sps:$4 sm:$0xff]  }
 0x165   :  { %2322 = vmatprep.subr.bf16.mxu1 %v12156_v41  ;;  %v12237_v40 = vld [vmem:[#allocation8 + $0x734] ss:$24 sps:$4 sm:$0xff]  }
 0x166   :  { %v12240_v41 = vld [vmem:[#allocation11 + $0x124] ss:$24 sps:$4 sm:$0xff]  }
 0x167   :  { %2280 = vmatpush1.bf16.msra.mxu0 %v12151_v42  ;;  %v14102_v42 = vsub.s32 0, %v14099_v35 }
 0x168   :  { %2323 = vmatpush1.bf16.msra.mxu1 %v12154_v43  ;;  %2281 = vmatprep.subr.bf16.mxu0 %v12159_v45  ;;  %v14104_v43 = vpack.c.bf16 %v231_v38, %v224_v37  ;;  %v14106_v45 = vld [vmem:[#allocation10] sm:$0x3f]  ;;  %v12295_v38 = vld [vmem:[#allocation8 + $0x850] ss:$24 sps:$4 sm:$0xff]  }
 0x169   :  { %2324 = vmatprep.subr.bf16.mxu1 %v12162_v46  ;;  %v12300_v37 = vld [vmem:[#allocation11 + $0x244] ss:$24 sps:$4 sm:$0xff]  }
 0x16b   :  { %2282 = vmatpush1.bf16.msra.mxu0 %v12157_v47 }
 0x16c   :  { %2325 = vmatpush1.bf16.msra.mxu1 %v12160_v53  ;;  %2283 = vmatprep.subr.bf16.mxu0 %v12165_v54  ;;  %v12235_v53 = vld [vmem:[#allocation8 + $0x730] ss:$24 sps:$4 sm:$0xff]   ;;  %v14115_v54 = vsub.s32 1, %v14099_v35 }
 0x16d   :  { %2326 = vmatprep.subr.bf16.mxu1 %v12168_v48  ;;  %v12238_v48 = vld [vmem:[#allocation11 + $0x120] ss:$24 sps:$4 sm:$0xff]  }
 0x16f   :  { %2284 = vmatpush1.bf16.msra.mxu0 %v12163_v49  ;;  %v12243_v49 = vld [vmem:[#allocation8 + $0x704] ss:$24 sps:$4 sm:$0xff]  }
 0x170   :  { %2327 = vmatpush1.bf16.msra.mxu1 %v12166_v50  ;;  %2285 = vmatprep.subr.bf16.mxu0 %v12171_v51 }
 0x171   :  { %2328 = vmatprep.subr.bf16.mxu1 %v12174_v52  ;;  %v12246_v52 = vld [vmem:[#allocation11 + $0xf4] ss:$24 sps:$4 sm:$0xff]  }
 0x173   :  { %2286 = vmatpush1.bf16.msra.mxu0 %v12169_v55 }
 0x174   :  { %2329 = vmatpush1.bf16.msra.mxu1 %v12172_v56  ;;  %2287 = vmatprep.subr.bf16.mxu0 %v12177_v57  ;;  %v14129_v56 = vrot.slane %v14106_v45, %v14115_v54 }
 0x175   :  { %2330 = vmatprep.subr.bf16.mxu1 %v12180_v58  ;;  %v12241_v58 = vld [vmem:[#allocation8 + $0x700] ss:$24 sps:$4 sm:$0xff]  }
 0x177   :  { %2288 = vmatpush1.bf16.msra.mxu0 %v12175_v59  ;;  %v12244_v59 = vld [vmem:[#allocation11 + $0xf0] ss:$24 sps:$4 sm:$0xff]  }
 0x178   :  { %2331 = vmatpush1.bf16.msra.mxu1 %v12178_v60  ;;  %2289 = vmatprep.subr.bf16.mxu0 %v12183_v61  ;;  %v12249_v60 = vld [vmem:[#allocation8 + $0x6d4] ss:$24 sps:$4 sm:$0xff]  }
 0x179   :  { %2332 = vmatprep.subr.bf16.mxu1 %v12186_v62  ;;  %v12252_v62 = vld [vmem:[#allocation11 + $0xc4] ss:$24 sps:$4 sm:$0xff]  }
 0x17b   :  { %2290 = vmatpush2.bf16.msra.mxu0 %v12181_v63 }
 0x17c   :  { %2333 = vmatpush2.bf16.msra.mxu1 %v12184_v0  ;;  %2291 = vmatprep.subr.bf16.mxu0 %v12189_v1  ;;  %v12247_v1 = vld [vmem:[#allocation8 + $0x6d0] ss:$24 sps:$4 sm:$0xff]  }
 0x17d   :  { %2334 = vmatprep.subr.bf16.mxu1 %v12192_v2 }
 0x17f   :  { %2292 = vmatpush2.bf16.msra.mxu0 %v12187_v3  ;;  %v12250_v3 = vld [vmem:[#allocation11 + $0xc0] ss:$24 sps:$4 sm:$0xff]  }
 0x180   :  { %2335 = vmatpush2.bf16.msra.mxu1 %v12190_v4  ;;  %2293 = vmatprep.subr.bf16.mxu0 %v12195_v5  ;;  %v12255_v4 = vld [vmem:[#allocation8 + $0x6a4] ss:$24 sps:$4 sm:$0xff]  }
 0x181   :  { %2336 = vmatprep.subr.bf16.mxu1 %v12198_v6  ;;  %v12258_v5 = vld [vmem:[#allocation11 + $0x94] ss:$24 sps:$4 sm:$0xff]  }
 0x182   :  { %v12253_v6 = vld [vmem:[#allocation8 + $0x6a0] ss:$24 sps:$4 sm:$0xff]  }
 0x183   :  { %2294 = vmatpush2.bf16.msra.mxu0 %v12193_v7  ;;  %v12256_v7 = vld [vmem:[#allocation11 + $0x90] ss:$24 sps:$4 sm:$0xff]  }
 0x184   :  { %2337 = vmatpush2.bf16.msra.mxu1 %v12196_v8  ;;  %2295 = vmatprep.subr.bf16.mxu0 %v12201_v9  ;;  %v12261_v8 = vld [vmem:[#allocation8 + $0x674] ss:$24 sps:$4 sm:$0xff]  }
 0x185   :  { %2338 = vmatprep.subr.bf16.mxu1 %v12204_v10  ;;  %v12264_v9 = vld [vmem:[#allocation11 + $0x64] ss:$24 sps:$4 sm:$0xff]  }
 0x186   :  { %v12259_v10 = vld [vmem:[#allocation8 + $0x670] ss:$24 sps:$4 sm:$0xff]  }
 0x187   :  { %2296 = vmatpush2.bf16.msra.mxu0 %v12199_v11  ;;  %v12262_v11 = vld [vmem:[#allocation11 + $0x60] ss:$24 sps:$4 sm:$0xff]  }
 0x188   :  { %2339 = vmatpush2.bf16.msra.mxu1 %v12202_v14  ;;  %2297 = vmatprep.subr.bf16.mxu0 %v12207_v15  ;;  %v12267_v14 = vld [vmem:[#allocation8 + $0x644] ss:$24 sps:$4 sm:$0xff]  }
 0x189   :  { %2340 = vmatprep.subr.bf16.mxu1 %v12210_v16  ;;  %v12270_v15 = vld [vmem:[#allocation11 + $0x34] ss:$24 sps:$4 sm:$0xff]  }
 0x18a   :  { %v12265_v16 = vld [vmem:[#allocation8 + $0x640] ss:$24 sps:$4 sm:$0xff]  }
 0x18b   :  { %2298 = vmatpush2.bf16.msra.mxu0 %v12205_v17  ;;  %v12268_v17 = vld [vmem:[#allocation11 + $0x30] ss:$24 sps:$4 sm:$0xff]  }
 0x18c   :  { %2341 = vmatpush2.bf16.msra.mxu1 %v12208_v18  ;;  %2299 = vmatprep.subr.bf16.mxu0 %v12213_v19  ;;  %v12273_v18 = vld [vmem:[#allocation8 + $0x614] ss:$24 sps:$4 sm:$0xff]  }
 0x18d   :  { %2342 = vmatprep.subr.bf16.mxu1 %v12216_v20  ;;  %v12276_v19 = vld [vmem:[#allocation11 + $0x4] ss:$24 sps:$4 sm:$0xff]  }
 0x18e   :  { %v12271_v20 = vld [vmem:[#allocation8 + $0x610] ss:$24 sps:$4 sm:$0xff]  }
 0x18f   :  { %2300 = vmatpush2.bf16.msra.mxu0 %v12211_v21  ;;  %v12274_v21 = vld [vmem:[#allocation11] ss:$24 sps:$4 sm:$0xff]  }
 0x190   :  { %2343 = vmatpush2.bf16.msra.mxu1 %v12214_v22  ;;  %2301 = vmatprep.subr.bf16.mxu0 %v12219_v24  ;;  %v12279_v22 = vld [vmem:[#allocation8 + $0x8e4] ss:$24 sps:$4 sm:$0xff]  }
 0x191   :  { %2344 = vmatprep.subr.bf16.mxu1 %v12222_v25  ;;  %v12282_v24 = vld [vmem:[#allocation11 + $0x2d4] ss:$24 sps:$4 sm:$0xff]  }
 0x192   :  { %v12277_v25 = vld [vmem:[#allocation8 + $0x8e0] ss:$24 sps:$4 sm:$0xff]  }
 0x193   :  { %2302 = vmatpush2.bf16.msra.mxu0 %v12217_v26  ;;  %v12280_v26 = vld [vmem:[#allocation11 + $0x2d0] ss:$24 sps:$4 sm:$0xff]  }
 0x194   :  { %2345 = vmatpush2.bf16.msra.mxu1 %v12220_v27  ;;  %2303 = vmatprep.subr.bf16.mxu0 %v12225_v28  ;;  %v12285_v27 = vld [vmem:[#allocation8 + $0x8b4] ss:$24 sps:$4 sm:$0xff]  }
 0x195   :  { %2346 = vmatprep.subr.bf16.mxu1 %v12228_v29  ;;  %v12288_v28 = vld [vmem:[#allocation11 + $0x2a4] ss:$24 sps:$4 sm:$0xff]  }
 0x196   :  { %v12283_v29 = vld [vmem:[#allocation8 + $0x8b0] ss:$24 sps:$4 sm:$0xff]  }
 0x197   :  { %2304 = vmatpush2.bf16.msra.mxu0 %v12223_v31  ;;  %v12291_v31 = vld [vmem:[#allocation8 + $0x884] ss:$24 sps:$4 sm:$0xff]  }
 0x198   :  { %2347 = vmatpush2.bf16.msra.mxu1 %v12226_v32  ;;  %2359 = vmatprep.subr.bf16.mxu0 %v12231_v33  ;;  %v12294_v32 = vld [vmem:[#allocation11 + $0x274] ss:$24 sps:$4 sm:$0xff]  }
 0x199   :  { %4168 = vmatprep.subr.bf16.mxu1 %v12234_v34  ;;  %v12289_v33 = vld [vmem:[#allocation8 + $0x880] ss:$24 sps:$4 sm:$0xff]  }
 0x19a   :  { %v14108_v46 = vpop.f32.mrf.mxu0  ;;  %2306 = vmatmul.mubr.bf16.vlgmr.msra.gmra.mxu0 %v14079_v12  ;;  %v14123_v12 = vrot.slane %v14106_v45, %v14102_v42  ;;  %v12292_v34 = vld [vmem:[#allocation11 + $0x270] ss:$24 sps:$4 sm:$0xff]  }
 0x19b   :  { %v14110_v47 = vpop.f32.mrf.mxu1  ;;  %2349 = vmatmul.mubr.bf16.vlgmr.msra.gmra.mxu1 %v14081_v13  ;;  %2360 = vmatpush1.bf16.msra.mxu0 %v12229_v36  ;;  %v12297_v36 = vld [vmem:[#allocation8 + $0x854] ss:$24 sps:$4 sm:$0xff]  }
 0x19c   :  { %4169 = vmatpush1.bf16.msra.mxu1 %v12232_v39  ;;  %v14117_v50 = vpop.f32.mrf.mxu0  ;;  %2361 = vmatprep.subr.bf16.mxu0 %v12237_v40  ;;  %v12298_v39 = vld [vmem:[#allocation11 + $0x240] ss:$24 sps:$4 sm:$0xff]  }
 0x19d   :  { %v14119_v51 = vpop.f32.mrf.mxu1  ;;  %4170 = vmatprep.subr.bf16.mxu1 %v12240_v41  ;;  %2391 = vmatprep.mubr.bf16.mxu0 %v14086_v44  ;;  %v12303_v40 = vld [vmem:[#allocation8 + $0x824] ss:$24 sps:$4 sm:$0xff]  }
 0x19e   :  { %4200 = vmatprep.mubr.bf16.mxu1 %v14104_v43  ;;  %v2053_v13 = vpop.f32.mrf.mxu0  ;;  %v12306_v41 = vld [vmem:[#allocation11 + $0x214] ss:$24 sps:$4 sm:$0xff]  }
 0x19f   :  { %v2096_v55 = vpop.f32.mrf.mxu1  ;;  %v2054_v57 = vadd.f32 %v2053_v13, %v14123_v12  ;;  %2362 = vmatpush1.bf16.msra.mxu0 %v12235_v53  ;;  %v12301_v53 = vld [vmem:[#allocation8 + $0x820] ss:$24 sps:$4 sm:$0xff]   ;;  %v12307_v13 = vld [vmem:[#allocation8 + $0x7f0] ss:$24 sps:$4 sm:$0xff]  }
 0x1a0   :  { %4171 = vmatpush1.bf16.msra.mxu1 %v12238_v48  ;;  %v2055_v61 = vpop.f32.mrf.mxu0  ;;  %2363 = vmatprep.subr.bf16.mxu0 %v12243_v49  ;;  %v12304_v48 = vld [vmem:[#allocation11 + $0x210] ss:$24 sps:$4 sm:$0xff]  }
 0x1a1   :  { %4172 = vmatprep.subr.bf16.mxu1 %v12246_v52  ;;  %v14132_v44 = vadd.f32 %v2096_v55, %v2054_v57  ;;  %v2056_v63 = vadd.f32 %v2055_v61, %v14129_v56  ;;  %v2098_v0 = vpop.f32.mrf.mxu1  ;;  %v12309_v49 = vld [vmem:[#allocation8 + $0x7f4] ss:$24 sps:$4 sm:$0xff]   ;;  %v12310_v55 = vld [vmem:[#allocation11 + $0x1e0] ss:$24 sps:$4 sm:$0xff]  }
 0x1a2   :  { %v12312_v52 = vld [vmem:[#allocation11 + $0x1e4] ss:$24 sps:$4 sm:$0xff]  }
 0x1a3   :  { %v14135_v2 = vadd.f32 %v2098_v0, %v2056_v63  ;;  %2364 = vmatpush1.bf16.msra.mxu0 %v12241_v58  ;;  %v12315_v57 = vld [vmem:[#allocation8 + $0x7c4] ss:$24 sps:$4 sm:$0xff]   ;;  %v12321_v61 = vld [vmem:[#allocation8 + $0x794] ss:$24 sps:$4 sm:$0xff]   ;;  %v12319_v63 = vld [vmem:[#allocation8 + $0x790] ss:$24 sps:$4 sm:$0xff]  }
 0x1a4   :  { %4173 = vmatpush1.bf16.msra.mxu1 %v12244_v59  ;;  %2365 = vmatprep.subr.bf16.mxu0 %v12249_v60  ;;  %v12318_v58 = vld [vmem:[#allocation11 + $0x1b4] ss:$24 sps:$4 sm:$0xff]   ;;  %v12316_v60 = vld [vmem:[#allocation11 + $0x1b0] ss:$24 sps:$4 sm:$0xff]   ;;  %v12322_v0 = vld [vmem:[#allocation11 + $0x180] ss:$24 sps:$4 sm:$0xff]  }
 0x1a5   :  { %4174 = vmatprep.subr.bf16.mxu1 %v12252_v62  ;;  %v12313_v59 = vld [vmem:[#allocation8 + $0x7c0] ss:$24 sps:$4 sm:$0xff]  }
 0x1a6   :  { %v12324_v62 = vld [vmem:[#allocation11 + $0x184] ss:$24 sps:$4 sm:$0xff]  }
 0x1a7   :  { %2366 = vmatpush1.bf16.msra.mxu0 %v12247_v1  ;;  %v223_v1 = vld [vmem:[#allocation5] sm:$0xff] }
 0x1a8   :  { %4175 = vmatpush1.bf16.msra.mxu1 %v12250_v3  ;;  %2367 = vmatprep.subr.bf16.mxu0 %v12255_v4  ;;  %v230_v3 = vld [vmem:[#allocation5 + $0x30] sm:$0xff] }
 0x1a9   :  { %4176 = vmatprep.subr.bf16.mxu1 %v12258_v5  ;;  %v12327_v4 = vld [vmem:[#allocation11 + $0x454] ss:$24 sps:$4 sm:$0xff]  }
 0x1aa   :  { %v12330_v5 = vld [vmem:[#allocation11 + $0x754] ss:$24 sps:$4 sm:$0xff]  }
 0x1ab   :  { %2368 = vmatpush1.bf16.msra.mxu0 %v12253_v6  ;;  %v226_v6 = vld [vmem:[#allocation5 + $0x18] sm:$0xff] }
 0x1ac   :  { %4177 = vmatpush1.bf16.msra.mxu1 %v12256_v7  ;;  %2369 = vmatprep.subr.bf16.mxu0 %v12261_v8  ;;  %v233_v7 = vld [vmem:[#allocation5 + $0x48] sm:$0xff] }
 0x1ad   :  { %4178 = vmatprep.subr.bf16.mxu1 %v12264_v9  ;;  %v228_v8 = vld [vmem:[#allocation5 + $0x28] sm:$0xff]  ;;  %v235_v9 = vld [vmem:[#allocation5 + $0x58] sm:$0xff] }
 0x1af   :  { %2370 = vmatpush1.bf16.msra.mxu0 %v12259_v10  ;;  %v12325_v10 = vld [vmem:[#allocation11 + $0x450] ss:$24 sps:$4 sm:$0xff]  }
 0x1b0   :  { %4179 = vmatpush1.bf16.msra.mxu1 %v12262_v11  ;;  %2371 = vmatprep.subr.bf16.mxu0 %v12267_v14  ;;  %v12328_v11 = vld [vmem:[#allocation11 + $0x750] ss:$24 sps:$4 sm:$0xff]   ;;  %v14137_v14 = vpack.c.bf16 %v230_v3, %v223_v1  ;;  %v12372_v1 = vld [vmem:[#allocation11 + $0x604] ss:$24 sps:$4 sm:$0xff]   ;;  %v12367_v3 = vld [vmem:[#allocation11 + $0x300] ss:$24 sps:$4 sm:$0xff]  }
 0x1b1   :  { %4180 = vmatprep.subr.bf16.mxu1 %v12270_v15  ;;  %v12333_v15 = vld [vmem:[#allocation11 + $0x424] ss:$24 sps:$4 sm:$0xff]  }
 0x1b3   :  { %2372 = vmatpush1.bf16.msra.mxu0 %v12265_v16  ;;  %v12336_v16 = vld [vmem:[#allocation11 + $0x724] ss:$24 sps:$4 sm:$0xff]  }
 0x1b4   :  { %4181 = vmatpush1.bf16.msra.mxu1 %v12268_v17  ;;  %2373 = vmatprep.subr.bf16.mxu0 %v12273_v18  ;;  %v14140_v17 = vsub.s32 2, %v14099_v35  ;;  %v12331_v18 = vld [vmem:[#allocation11 + $0x420] ss:$24 sps:$4 sm:$0xff]  }
 0x1b5   :  { %4182 = vmatprep.subr.bf16.mxu1 %v12276_v19  ;;  %v12334_v19 = vld [vmem:[#allocation11 + $0x720] ss:$24 sps:$4 sm:$0xff]  }
 0x1b7   :  { %2374 = vmatpush1.bf16.msra.mxu0 %v12271_v20  ;;  %v14142_v20 = vpack.c.bf16 %v233_v7, %v226_v6  ;;  %v12378_v6 = vld [vmem:[#allocation11 + $0x8d4] ss:$24 sps:$4 sm:$0xff]   ;;  %v12373_v7 = vld [vmem:[#allocation11 + $0x5d0] ss:$24 sps:$4 sm:$0xff]  }
 0x1b8   :  { %4183 = vmatpush1.bf16.msra.mxu1 %v12274_v21  ;;  %2375 = vmatprep.subr.bf16.mxu0 %v12279_v22  ;;  %v14144_v21 = vpack.c.bf16 %v235_v9, %v228_v8  ;;  %v12376_v8 = vld [vmem:[#allocation11 + $0x8d0] ss:$24 sps:$4 sm:$0xff]   ;;  %v12381_v9 = vld [vmem:[#allocation11 + $0x5a4] ss:$24 sps:$4 sm:$0xff]  }
 0x1b9   :  { %4184 = vmatprep.subr.bf16.mxu1 %v12282_v24 }
 0x1bb   :  { %2376 = vmatpush2.bf16.msra.mxu0 %v12277_v25  ;;  %v14153_v25 = vsub.s32 3, %v14099_v35 }
 0x1bc   :  { %4185 = vmatpush2.bf16.msra.mxu1 %v12280_v26  ;;  %2377 = vmatprep.subr.bf16.mxu0 %v12285_v27 }
 0x1bd   :  { %4186 = vmatprep.subr.bf16.mxu1 %v12288_v28  ;;  %v12339_v28 = vld [vmem:[#allocation11 + $0x3f4] ss:$24 sps:$4 sm:$0xff]  }
 0x1bf   :  { %2378 = vmatpush2.bf16.msra.mxu0 %v12283_v29  ;;  %v12342_v29 = vld [vmem:[#allocation11 + $0x6f4] ss:$24 sps:$4 sm:$0xff]  }
 0x1c0   :  { %4187 = vmatpush2.bf16.msra.mxu1 %v12286_v30  ;;  %2379 = vmatprep.subr.bf16.mxu0 %v12291_v31  ;;  %v14161_v30 = vrot.slane %v14106_v45, %v14140_v17  ;;  %v12340_v31 = vld [vmem:[#allocation11 + $0x6f0] ss:$24 sps:$4 sm:$0xff]  }
 0x1c1   :  { %4188 = vmatprep.subr.bf16.mxu1 %v12294_v32 }
 0x1c3   :  { %2380 = vmatpush2.bf16.msra.mxu0 %v12289_v33 }
 0x1c4   :  { %4189 = vmatpush2.bf16.msra.mxu1 %v12292_v34  ;;  %2381 = vmatprep.subr.bf16.mxu0 %v12297_v36  ;;  %v14167_v34 = vrot.slane %v14106_v45, %v14153_v25 }
 0x1c5   :  { %4190 = vmatprep.subr.bf16.mxu1 %v12300_v37 }
 0x1c7   :  { %2382 = vmatpush2.bf16.msra.mxu0 %v12295_v38 }
 0x1c8   :  { %4191 = vmatpush2.bf16.msra.mxu1 %v12298_v39  ;;  %2383 = vmatprep.subr.bf16.mxu0 %v12303_v40  ;;  %v12345_v40 = vld [vmem:[#allocation11 + $0x3c4] ss:$24 sps:$4 sm:$0xff]  }
 0x1c9   :  { %4192 = vmatprep.subr.bf16.mxu1 %v12306_v41  ;;  %v12348_v41 = vld [vmem:[#allocation11 + $0x6c4] ss:$24 sps:$4 sm:$0xff]  }
 0x1cb   :  { %2384 = vmatpush2.bf16.msra.mxu0 %v12301_v53 }
 0x1cc   :  { %4193 = vmatpush2.bf16.msra.mxu1 %v12304_v48  ;;  %2385 = vmatprep.subr.bf16.mxu0 %v12309_v49  ;;  %v12346_v48 = vld [vmem:[#allocation11 + $0x6c0] ss:$24 sps:$4 sm:$0xff]   ;;  %v12351_v49 = vld [vmem:[#allocation11 + $0x394] ss:$24 sps:$4 sm:$0xff]  }
 0x1cd   :  { %4194 = vmatprep.subr.bf16.mxu1 %v12312_v52  ;;  %v12354_v52 = vld [vmem:[#allocation11 + $0x694] ss:$24 sps:$4 sm:$0xff]  }
 0x1cf   :  { %2386 = vmatpush2.bf16.msra.mxu0 %v12307_v13  ;;  %v12349_v13 = vld [vmem:[#allocation11 + $0x390] ss:$24 sps:$4 sm:$0xff]  }
 0x1d0   :  { %4195 = vmatpush2.bf16.msra.mxu1 %v12310_v55  ;;  %2387 = vmatprep.subr.bf16.mxu0 %v12315_v57  ;;  %v12352_v55 = vld [vmem:[#allocation11 + $0x690] ss:$24 sps:$4 sm:$0xff]   ;;  %v12357_v57 = vld [vmem:[#allocation11 + $0x364] ss:$24 sps:$4 sm:$0xff]  }
 0x1d1   :  { %4196 = vmatprep.subr.bf16.mxu1 %v12318_v58  ;;  %v12355_v58 = vld [vmem:[#allocation11 + $0x360] ss:$24 sps:$4 sm:$0xff]  }
 0x1d3   :  { %2388 = vmatpush2.bf16.msra.mxu0 %v12313_v59  ;;  %v12358_v59 = vld [vmem:[#allocation11 + $0x660] ss:$24 sps:$4 sm:$0xff]  }
 0x1d4   :  { %4197 = vmatpush2.bf16.msra.mxu1 %v12316_v60  ;;  %2389 = vmatprep.subr.bf16.mxu0 %v12321_v61  ;;  %v12363_v60 = vld [vmem:[#allocation11 + $0x334] ss:$24 sps:$4 sm:$0xff]  }
 0x1d5   :  { %4198 = vmatprep.subr.bf16.mxu1 %v12324_v62  ;;  %v12366_v61 = vld [vmem:[#allocation11 + $0x634] ss:$24 sps:$4 sm:$0xff]   ;;  %v12361_v62 = vld [vmem:[#allocation11 + $0x330] ss:$24 sps:$4 sm:$0xff]  }
 0x1d7   :  { %2390 = vmatpush2.bf16.msra.mxu0 %v12319_v63  ;;  %v12364_v63 = vld [vmem:[#allocation11 + $0x630] ss:$24 sps:$4 sm:$0xff]  }
 0x1d8   :  { %4199 = vmatpush2.bf16.msra.mxu1 %v12322_v0  ;;  %4211 = vmatprep.subr.bf16.mxu0 %v12327_v4  ;;  %v12369_v0 = vld [vmem:[#allocation11 + $0x304] ss:$24 sps:$4 sm:$0xff]   ;;  %v12370_v4 = vld [vmem:[#allocation11 + $0x600] ss:$24 sps:$4 sm:$0xff]  }
 0x1d9   :  { %4254 = vmatprep.subr.bf16.mxu1 %v12330_v5  ;;  %v12375_v5 = vld [vmem:[#allocation11 + $0x5d4] ss:$24 sps:$4 sm:$0xff]  }
 0x1da   :  { %v14146_v22 = vpop.f32.mrf.mxu0  ;;  %2392 = vmatmul.mubr.bf16.vlgmr.msra.gmra.mxu0 %v14089_v23  ;;  %v12337_v23 = vld [vmem:[#allocation11 + $0x3f0] ss:$24 sps:$4 sm:$0xff]  }
 0x1db   :  { %v14148_v24 = vpop.f32.mrf.mxu1  ;;  %4201 = vmatmul.mubr.bf16.vlgmr.msra.gmra.mxu1 %v14137_v14  ;;  %4212 = vmatpush1.bf16.msra.mxu0 %v12325_v10  ;;  %v12384_v10 = vld [vmem:[#allocation11 + $0x8a4] ss:$24 sps:$4 sm:$0xff]  }
 0x1dc   :  { %4255 = vmatpush1.bf16.msra.mxu1 %v12328_v11  ;;  %v14155_v26 = vpop.f32.mrf.mxu0  ;;  %4213 = vmatprep.subr.bf16.mxu0 %v12333_v15  ;;  %v12379_v11 = vld [vmem:[#allocation11 + $0x5a0] ss:$24 sps:$4 sm:$0xff]  }
 0x1dd   :  { %v14157_v27 = vpop.f32.mrf.mxu1  ;;  %4256 = vmatprep.subr.bf16.mxu1 %v12336_v16  ;;  %4243 = vmatprep.mubr.bf16.mxu0 %v14142_v20  ;;  %v12382_v15 = vld [vmem:[#allocation11 + $0x8a0] ss:$24 sps:$4 sm:$0xff]   ;;  %v12387_v16 = vld [vmem:[#allocation11 + $0x574] ss:$24 sps:$4 sm:$0xff]  }
 0x1de   :  { %4286 = vmatprep.mubr.bf16.mxu1 %v14144_v21  ;;  %v2139_v32 = vpop.f32.mrf.mxu0 }
 0x1df   :  { %v2182_v33 = vpop.f32.mrf.mxu1  ;;  %v14170_v36 = vadd.f32 %v2139_v32, %v14132_v44  ;;  %4214 = vmatpush1.bf16.msra.mxu0 %v12331_v18  ;;  %v12343_v44 = vld [vmem:[#allocation11 + $0x3c0] ss:$24 sps:$4 sm:$0xff]   ;;  %v12390_v18 = vld [vmem:[#allocation11 + $0x874] ss:$24 sps:$4 sm:$0xff]  }
 0x1e0   :  { %v14173_v37 = vadd.f32 %v2182_v33, %v14161_v30  ;;  %4257 = vmatpush1.bf16.msra.mxu1 %v12334_v19  ;;  %v2141_v38 = vpop.f32.mrf.mxu0  ;;  %4215 = vmatprep.subr.bf16.mxu0 %v12339_v28  ;;  %v12385_v19 = vld [vmem:[#allocation11 + $0x570] ss:$24 sps:$4 sm:$0xff]   ;;  %v12394_v32 = vld [vmem:[#allocation11 + $0x840] ss:$24 sps:$4 sm:$0xff]   ;;  %v12399_v33 = vld [vmem:[#allocation11 + $0x514] ss:$24 sps:$4 sm:$0xff]  }
 0x1e1   :  { %v2184_v39 = vpop.f32.mrf.mxu1  ;;  %4258 = vmatprep.subr.bf16.mxu1 %v12342_v29  ;;  %v14176_v53 = vadd.f32 %v2141_v38, %v14135_v2  ;;  %v12360_v2 = vld [vmem:[#allocation11 + $0x664] ss:$24 sps:$4 sm:$0xff]   ;;  %v12388_v28 = vld [vmem:[#allocation11 + $0x870] ss:$24 sps:$4 sm:$0xff]   ;;  %v12402_v38 = vld [vmem:[#allocation11 + $0x814] ss:$24 sps:$4 sm:$0xff]  }
 0x1e2   :  { %v14179_v45 = vadd.f32 %v2184_v39, %v14167_v34  ;;  %v12393_v29 = vld [vmem:[#allocation11 + $0x544] ss:$24 sps:$4 sm:$0xff]   ;;  %v12397_v39 = vld [vmem:[#allocation11 + $0x510] ss:$24 sps:$4 sm:$0xff]  }
 0x1e3   :  { %4216 = vmatpush1.bf16.msra.mxu0 %v12337_v23  ;;  %v12396_v23 = vld [vmem:[#allocation11 + $0x844] ss:$24 sps:$4 sm:$0xff]  }
 0x1e4   :  { %4259 = vmatpush1.bf16.msra.mxu1 %v12340_v31  ;;  %4217 = vmatprep.subr.bf16.mxu0 %v12345_v40  ;;  %v12391_v31 = vld [vmem:[#allocation11 + $0x540] ss:$24 sps:$4 sm:$0xff]   ;;  %v12400_v40 = vld [vmem:[#allocation11 + $0x810] ss:$24 sps:$4 sm:$0xff]  }
 0x1e5   :  { %4260 = vmatprep.subr.bf16.mxu1 %v12348_v41  ;;  %v12405_v41 = vld [vmem:[#allocation11 + $0x4e4] ss:$24 sps:$4 sm:$0xff]  }
 0x1e7   :  { %4218 = vmatpush1.bf16.msra.mxu0 %v12343_v44  ;;  %v12408_v44 = vld [vmem:[#allocation11 + $0x7e4] ss:$24 sps:$4 sm:$0xff]  }
 0x1e8   :  { %4261 = vmatpush1.bf16.msra.mxu1 %v12346_v48  ;;  %4219 = vmatprep.subr.bf16.mxu0 %v12351_v49  ;;  %v12403_v48 = vld [vmem:[#allocation11 + $0x4e0] ss:$24 sps:$4 sm:$0xff]  }
 0x1e9   :  { %4262 = vmatprep.subr.bf16.mxu1 %v12354_v52  ;;  %v12406_v49 = vld [vmem:[#allocation11 + $0x7e0] ss:$24 sps:$4 sm:$0xff]   ;;  %v12411_v52 = vld [vmem:[#allocation11 + $0x4b4] ss:$24 sps:$4 sm:$0xff]  }
 0x1eb   :  { %4220 = vmatpush1.bf16.msra.mxu0 %v12349_v13  ;;  %v12414_v13 = vld [vmem:[#allocation11 + $0x7b4] ss:$24 sps:$4 sm:$0xff]  }
 0x1ec   :  { %4263 = vmatpush1.bf16.msra.mxu1 %v12352_v55  ;;  %4221 = vmatprep.subr.bf16.mxu0 %v12357_v57  ;;  %v12409_v55 = vld [vmem:[#allocation11 + $0x4b0] ss:$24 sps:$4 sm:$0xff]  }
 0x1ed   :  { %4264 = vmatprep.subr.bf16.mxu1 %v12360_v2  ;;  %v12412_v57 = vld [vmem:[#allocation11 + $0x7b0] ss:$24 sps:$4 sm:$0xff]   ;;  %v12417_v2 = vld [vmem:[#allocation11 + $0x484] ss:$24 sps:$4 sm:$0xff]  }
 0x1ef   :  { %4222 = vmatpush1.bf16.msra.mxu0 %v12355_v58  ;;  %v12420_v58 = vld [vmem:[#allocation11 + $0x784] ss:$24 sps:$4 sm:$0xff]  }
 0x1f0   :  { %4265 = vmatpush1.bf16.msra.mxu1 %v12358_v59  ;;  %4223 = vmatprep.subr.bf16.mxu0 %v12363_v60  ;;  %v12415_v59 = vld [vmem:[#allocation11 + $0x480] ss:$24 sps:$4 sm:$0xff]  }
 0x1f1   :  { %4266 = vmatprep.subr.bf16.mxu1 %v12366_v61  ;;  %v12418_v60 = vld [vmem:[#allocation11 + $0x780] ss:$24 sps:$4 sm:$0xff]   ;;  %v225_v61 = vld [vmem:[#allocation5 + $0x10] sm:$0xff] }
 0x1f3   :  { %4224 = vmatpush1.bf16.msra.mxu0 %v12361_v62  ;;  %v232_v62 = vld [vmem:[#allocation5 + $0x40] sm:$0xff] }
 0x1f4   :  { %4267 = vmatpush1.bf16.msra.mxu1 %v12364_v63  ;;  %4225 = vmatprep.subr.bf16.mxu0 %v12369_v0  ;;  %v227_v63 = vld [vmem:[#allocation5 + $0x20] sm:$0xff]  ;;  %v234_v0 = vld [vmem:[#allocation5 + $0x50] sm:$0xff] }
 0x1f5   :  { %4268 = vmatprep.subr.bf16.mxu1 %v12372_v1  ;;  %v12423_v1 = vld [vmem:[#allocation11 + $0x15c] ss:$24 sps:$4 sm:$0xff]  }
 0x1f7   :  { %4226 = vmatpush1.bf16.msra.mxu0 %v12367_v3  ;;  %v12426_v3 = vld [vmem:[#allocation11 + $0x45c] ss:$24 sps:$4 sm:$0xff]  }
 0x1f8   :  { %4269 = vmatpush1.bf16.msra.mxu1 %v12370_v4  ;;  %4227 = vmatprep.subr.bf16.mxu0 %v12375_v5  ;;  %v12421_v4 = vld [vmem:[#allocation11 + $0x158] ss:$24 sps:$4 sm:$0xff]  }
 0x1f9   :  { %4270 = vmatprep.subr.bf16.mxu1 %v12378_v6  ;;  %v12424_v5 = vld [vmem:[#allocation11 + $0x458] ss:$24 sps:$4 sm:$0xff]   ;;  %v14181_v6 = vpack.c.bf16 %v232_v62, %v225_v61  ;;  %v12453_v61 = vld [vmem:[#allocation11 + $0x6c] ss:$24 sps:$4 sm:$0xff]  }
 0x1fa   :  { %v12456_v62 = vld [vmem:[#allocation11 + $0x36c] ss:$24 sps:$4 sm:$0xff]  }
 0x1fb   :  { %4228 = vmatpush2.bf16.msra.mxu0 %v12373_v7  ;;  %v14183_v7 = vpack.c.bf16 %v234_v0, %v227_v63  ;;  %v12454_v63 = vld [vmem:[#allocation11 + $0x368] ss:$24 sps:$4 sm:$0xff]   ;;  %v12459_v0 = vld [vmem:[#allocation11 + $0x3c] ss:$24 sps:$4 sm:$0xff]  }
 0x1fc   :  { %4271 = vmatpush2.bf16.msra.mxu1 %v12376_v8  ;;  %4229 = vmatprep.subr.bf16.mxu0 %v12381_v9  ;;  %v12429_v8 = vld [vmem:[#allocation11 + $0x12c] ss:$24 sps:$4 sm:$0xff]  }
 0x1fd   :  { %4272 = vmatprep.subr.bf16.mxu1 %v12384_v10  ;;  %v12432_v9 = vld [vmem:[#allocation11 + $0x42c] ss:$24 sps:$4 sm:$0xff]   ;;  %v2179_v10 = vadd.f32 %v14148_v24, %v14161_v30  ;;  %v12438_v24 = vld [vmem:[#allocation11 + $0x3fc] ss:$24 sps:$4 sm:$0xff]  }
 0x1ff   :  { %4230 = vmatpush2.bf16.msra.mxu0 %v12379_v11  ;;  %v12427_v11 = vld [vmem:[#allocation11 + $0x128] ss:$24 sps:$4 sm:$0xff]  }
 0x200   :  { %4273 = vmatpush2.bf16.msra.mxu1 %v12382_v15  ;;  %4231 = vmatprep.subr.bf16.mxu0 %v12387_v16  ;;  %v12430_v15 = vld [vmem:[#allocation11 + $0x428] ss:$24 sps:$4 sm:$0xff]  }
 0x201   :  { %4274 = vmatprep.subr.bf16.mxu1 %v12390_v18 }
 0x203   :  { %4232 = vmatpush2.bf16.msra.mxu0 %v12385_v19  ;;  %v2181_v19 = vadd.f32 %v14157_v27, %v14167_v34 }
 0x204   :  { %4275 = vmatpush2.bf16.msra.mxu1 %v12388_v28  ;;  %4233 = vmatprep.subr.bf16.mxu0 %v12393_v29 }
 0x205   :  { %4276 = vmatprep.subr.bf16.mxu1 %v12396_v23 }
 0x207   :  { %4234 = vmatpush2.bf16.msra.mxu0 %v12391_v31  ;;  %v12435_v31 = vld [vmem:[#allocation11 + $0xfc] ss:$24 sps:$4 sm:$0xff]  }
 0x208   :  { %4277 = vmatpush2.bf16.msra.mxu1 %v12394_v32  ;;  %4235 = vmatprep.subr.bf16.mxu0 %v12399_v33  ;;  %v12433_v33 = vld [vmem:[#allocation11 + $0xf8] ss:$24 sps:$4 sm:$0xff]  }
 0x209   :  { %4278 = vmatprep.subr.bf16.mxu1 %v12402_v38  ;;  %v12436_v38 = vld [vmem:[#allocation11 + $0x3f8] ss:$24 sps:$4 sm:$0xff]  }
 0x20b   :  { %4236 = vmatpush2.bf16.msra.mxu0 %v12397_v39 }
 0x20c   :  { %4279 = vmatpush2.bf16.msra.mxu1 %v12400_v40  ;;  %4237 = vmatprep.subr.bf16.mxu0 %v12405_v41 }
 0x20d   :  { %4280 = vmatprep.subr.bf16.mxu1 %v12408_v44  ;;  %v12441_v44 = vld [vmem:[#allocation11 + $0xcc] ss:$24 sps:$4 sm:$0xff]  }
 0x20f   :  { %4238 = vmatpush2.bf16.msra.mxu0 %v12403_v48  ;;  %v12444_v48 = vld [vmem:[#allocation11 + $0x3cc] ss:$24 sps:$4 sm:$0xff]  }
 0x210   :  { %4281 = vmatpush2.bf16.msra.mxu1 %v12406_v49  ;;  %4239 = vmatprep.subr.bf16.mxu0 %v12411_v52 }
 0x211   :  { %4282 = vmatprep.subr.bf16.mxu1 %v12414_v13 }
 0x213   :  { %4240 = vmatpush2.bf16.msra.mxu0 %v12409_v55 }
 0x214   :  { %4283 = vmatpush2.bf16.msra.mxu1 %v12412_v57  ;;  %4241 = vmatprep.subr.bf16.mxu0 %v12417_v2  ;;  %v12439_v57 = vld [vmem:[#allocation11 + $0xc8] ss:$24 sps:$4 sm:$0xff]  }
 0x215   :  { %4284 = vmatprep.subr.bf16.mxu1 %v12420_v58  ;;  %v12442_v2 = vld [vmem:[#allocation11 + $0x3c8] ss:$24 sps:$4 sm:$0xff]   ;;  %v12450_v58 = vld [vmem:[#allocation11 + $0x39c] ss:$24 sps:$4 sm:$0xff]  }
 0x217   :  { %4242 = vmatpush2.bf16.msra.mxu0 %v12415_v59  ;;  %v12445_v59 = vld [vmem:[#allocation11 + $0x98] ss:$24 sps:$4 sm:$0xff]  }
 0x218   :  { %4285 = vmatpush2.bf16.msra.mxu1 %v12418_v60  ;;  %4297 = vmatprep.subr.bf16.mxu0 %v12423_v1  ;;  %v12448_v60 = vld [vmem:[#allocation11 + $0x398] ss:$24 sps:$4 sm:$0xff]   ;;  %v12462_v1 = vld [vmem:[#allocation11 + $0x33c] ss:$24 sps:$4 sm:$0xff]  }
 0x219   :  { %4340 = vmatprep.subr.bf16.mxu1 %v12426_v3  ;;  %v12457_v3 = vld [vmem:[#allocation11 + $0x38] ss:$24 sps:$4 sm:$0xff]  }
 0x21a   :  { %v2221_v16 = vpop.f32.mrf.mxu0  ;;  %4244 = vmatmul.mubr.bf16.vlgmr.msra.gmra.mxu0 %v14181_v6 }
 0x21b   :  { %v2264_v18 = vpop.f32.mrf.mxu1  ;;  %4287 = vmatmul.mubr.bf16.vlgmr.msra.gmra.mxu1 %v14183_v7  ;;  %v2222_v28 = vadd.f32 %v2221_v16, %v2179_v10  ;;  %4298 = vmatpush1.bf16.msra.mxu0 %v12421_v4  ;;  %v12460_v4 = vld [vmem:[#allocation11 + $0x338] ss:$24 sps:$4 sm:$0xff]   ;;  %v12466_v10 = vld [vmem:[#allocation11 + $0x308] ss:$24 sps:$4 sm:$0xff]  }
 0x21c   :  { %4341 = vmatpush1.bf16.msra.mxu1 %v12424_v5  ;;  %v2223_v29 = vpop.f32.mrf.mxu0  ;;  %4299 = vmatprep.subr.bf16.mxu0 %v12429_v8  ;;  %v12465_v5 = vld [vmem:[#allocation11 + $0xc] ss:$24 sps:$4 sm:$0xff]   ;;  %v12469_v16 = vld [vmem:[#allocation11 + $0x2d8] ss:$24 sps:$4 sm:$0xff]  }
 0x21d   :  { %v2266_v23 = vpop.f32.mrf.mxu1  ;;  %4342 = vmatprep.subr.bf16.mxu1 %v12432_v9  ;;  %v14191_v30 = vadd.f32 %v2264_v18, %v2222_v28  ;;  %v2224_v32 = vadd.f32 %v2223_v29, %v2181_v19  ;;  %4329 = vmatprep.mubr.bf16.mxu0 %v14104_v43  ;;  %v12468_v8 = vld [vmem:[#allocation11 + $0x30c] ss:$24 sps:$4 sm:$0xff]   ;;  %v12463_v9 = vld [vmem:[#allocation11 + $0x8] ss:$24 sps:$4 sm:$0xff]   ;;  %v12472_v18 = vld [vmem:[#allocation11 + $0x5d8] ss:$24 sps:$4 sm:$0xff]  }
 0x21e   :  { %4372 = vmatprep.mubr.bf16.mxu1 %v14142_v20  ;;  %v2225_v39 = vpop.f32.mrf.mxu0  ;;  %v12477_v19 = vld [vmem:[#allocation11 + $0x2ac] ss:$24 sps:$4 sm:$0xff]   ;;  %v12475_v29 = vld [vmem:[#allocation11 + $0x2a8] ss:$24 sps:$4 sm:$0xff]  }
 0x21f   :  { %v2268_v27 = vpop.f32.mrf.mxu1  ;;  %v14195_v34 = vadd.f32 %v2266_v23, %v2224_v32  ;;  %v2226_v40 = vadd.f32 %v2225_v39, %v14173_v37  ;;  %4300 = vmatpush1.bf16.msra.mxu0 %v12427_v11  ;;  %v12447_v37 = vld [vmem:[#allocation11 + $0x9c] ss:$24 sps:$4 sm:$0xff]   ;;  %v12480_v28 = vld [vmem:[#allocation11 + $0x5ac] ss:$24 sps:$4 sm:$0xff]   ;;  %v12478_v23 = vld [vmem:[#allocation11 + $0x5a8] ss:$24 sps:$4 sm:$0xff]  }
 0x220   :  { %4343 = vmatpush1.bf16.msra.mxu1 %v12430_v15  ;;  %v2227_v41 = vpop.f32.mrf.mxu0  ;;  %4301 = vmatprep.subr.bf16.mxu0 %v12435_v31  ;;  %v12471_v11 = vld [vmem:[#allocation11 + $0x2dc] ss:$24 sps:$4 sm:$0xff]   ;;  %v12481_v32 = vld [vmem:[#allocation11 + $0x278] ss:$24 sps:$4 sm:$0xff]   ;;  %v12492_v39 = vld [vmem:[#allocation11 + $0x54c] ss:$24 sps:$4 sm:$0xff]  }
 0x221   :  { %14810 = vst [vmem:[#allocation32_spill] sm:$0xff] %v14195_v34  ;;  %4344 = vmatprep.subr.bf16.mxu1 %v12438_v24  ;;  %v14198_v49 = vadd.f32 %v2268_v27, %v2226_v40  ;;  %v2228_v52 = vadd.f32 %v2227_v41, %v14179_v45  ;;  %v2270_v13 = vpop.f32.mrf.mxu1  ;;  %v12451_v45 = vld [vmem:[#allocation11 + $0x68] ss:$24 sps:$4 sm:$0xff]   ;;  %v12474_v15 = vld [vmem:[#allocation11 + $0x5dc] ss:$24 sps:$4 sm:$0xff]  }
 0x222   :  { %v12483_v31 = vld [vmem:[#allocation11 + $0x27c] ss:$24 sps:$4 sm:$0xff]   ;;  %v12487_v27 = vld [vmem:[#allocation11 + $0x248] ss:$24 sps:$4 sm:$0xff]  }
 0x223   :  { %v14201_v55 = vadd.f32 %v2270_v13, %v2228_v52  ;;  %4302 = vmatpush1.bf16.msra.mxu0 %v12433_v33  ;;  %v12486_v24 = vld [vmem:[#allocation11 + $0x57c] ss:$24 sps:$4 sm:$0xff]   ;;  %v12484_v33 = vld [vmem:[#allocation11 + $0x578] ss:$24 sps:$4 sm:$0xff]   ;;  %v12490_v40 = vld [vmem:[#allocation11 + $0x548] ss:$24 sps:$4 sm:$0xff]  }
 0x224   :  { %4345 = vmatpush1.bf16.msra.mxu1 %v12436_v38  ;;  %4303 = vmatprep.subr.bf16.mxu0 %v12441_v44  ;;  %v12489_v38 = vld [vmem:[#allocation11 + $0x24c] ss:$24 sps:$4 sm:$0xff]   ;;  %v12495_v41 = vld [vmem:[#allocation11 + $0x21c] ss:$24 sps:$4 sm:$0xff]   ;;  %v12496_v52 = vld [vmem:[#allocation11 + $0x518] ss:$24 sps:$4 sm:$0xff]  }
 0x225   :  { %14811 = vst [vmem:[#allocation33_spill] sm:$0xff] %v14201_v55  ;;  %4346 = vmatprep.subr.bf16.mxu1 %v12444_v48  ;;  %v12498_v44 = vld [vmem:[#allocation11 + $0x51c] ss:$24 sps:$4 sm:$0xff]   ;;  %v12493_v48 = vld [vmem:[#allocation11 + $0x218] ss:$24 sps:$4 sm:$0xff]  }
 0x226   :  { %v12501_v13 = vld [vmem:[#allocation11 + $0x1ec] ss:$24 sps:$4 sm:$0xff]  }
 0x227   :  { %4304 = vmatpush1.bf16.msra.mxu0 %v12439_v57  ;;  %v12504_v57 = vld [vmem:[#allocation11 + $0x4ec] ss:$24 sps:$4 sm:$0xff]  }
 0x228   :  { %4347 = vmatpush1.bf16.msra.mxu1 %v12442_v2  ;;  %4305 = vmatprep.subr.bf16.mxu0 %v12447_v37  ;;  %v12499_v2 = vld [vmem:[#allocation11 + $0x1e8] ss:$24 sps:$4 sm:$0xff]  }
 0x229   :  { %4348 = vmatprep.subr.bf16.mxu1 %v12450_v58  ;;  %v12502_v37 = vld [vmem:[#allocation11 + $0x4e8] ss:$24 sps:$4 sm:$0xff]   ;;  %v12507_v58 = vld [vmem:[#allocation11 + $0x1bc] ss:$24 sps:$4 sm:$0xff]  }
 0x22a   :  { %v12826_v55 = vld [vmem:[#allocation14 + $0xc8] ss:$24 sps:$4 sm:$0xff]  }
 0x22b   :  { %4306 = vmatpush1.bf16.msra.mxu0 %v12445_v59  ;;  %v12510_v59 = vld [vmem:[#allocation11 + $0x4bc] ss:$24 sps:$4 sm:$0xff]  }
 0x22c   :  { %4349 = vmatpush1.bf16.msra.mxu1 %v12448_v60  ;;  %4307 = vmatprep.subr.bf16.mxu0 %v12453_v61  ;;  %v12505_v60 = vld [vmem:[#allocation11 + $0x1b8] ss:$24 sps:$4 sm:$0xff]  }
 0x22d   :  { %4350 = vmatprep.subr.bf16.mxu1 %v12456_v62  ;;  %v12508_v61 = vld [vmem:[#allocation11 + $0x4b8] ss:$24 sps:$4 sm:$0xff]   ;;  %v12513_v62 = vld [vmem:[#allocation11 + $0x18c] ss:$24 sps:$4 sm:$0xff]  }
 0x22f   :  { %4308 = vmatpush1.bf16.msra.mxu0 %v12451_v45  ;;  %v12516_v45 = vld [vmem:[#allocation11 + $0x48c] ss:$24 sps:$4 sm:$0xff]  }
 0x230   :  { %4351 = vmatpush1.bf16.msra.mxu1 %v12454_v63  ;;  %4309 = vmatprep.subr.bf16.mxu0 %v12459_v0  ;;  %v12511_v63 = vld [vmem:[#allocation11 + $0x188] ss:$24 sps:$4 sm:$0xff]  }
 0x231   :  { %4352 = vmatprep.subr.bf16.mxu1 %v12462_v1  ;;  %v12514_v0 = vld [vmem:[#allocation11 + $0x488] ss:$24 sps:$4 sm:$0xff]   ;;  %v14204_v1 = vsub.s32 4, %v14099_v35 }
 0x233   :  { %4310 = vmatpush1.bf16.msra.mxu0 %v12457_v3  ;;  %v12519_v3 = vld [vmem:[#allocation11 + $0x75c] ss:$24 sps:$4 sm:$0xff]  }
 0x234   :  { %4353 = vmatpush1.bf16.msra.mxu1 %v12460_v4  ;;  %4311 = vmatprep.subr.bf16.mxu0 %v12465_v5  ;;  %v12522_v4 = vld [vmem:[#allocation11 + $0x164] ss:$24 sps:$4 sm:$0xff]   ;;  %v12517_v5 = vld [vmem:[#allocation11 + $0x758] ss:$24 sps:$4 sm:$0xff]  }
 0x235   :  { %4354 = vmatprep.subr.bf16.mxu1 %v12468_v8  ;;  %v12520_v8 = vld [vmem:[#allocation11 + $0x160] ss:$24 sps:$4 sm:$0xff]  }
 0x237   :  { %4312 = vmatpush1.bf16.msra.mxu0 %v12463_v9  ;;  %v14207_v9 = vsub.s32 5, %v14099_v35 }
 0x238   :  { %4355 = vmatpush1.bf16.msra.mxu1 %v12466_v10  ;;  %4313 = vmatprep.subr.bf16.mxu0 %v12471_v11  ;;  %v13613_v10 = vld [vmem:[#allocation10] sm:$0x3f] }
 0x239   :  { %4356 = vmatprep.subr.bf16.mxu1 %v12474_v15  ;;  %v564_v11 = vrot.slane %v13613_v10, %v14204_v1  ;;  %v12525_v15 = vld [vmem:[#allocation11 + $0x72c] ss:$24 sps:$4 sm:$0xff]  }
 0x23b   :  { %4314 = vmatpush2.bf16.msra.mxu0 %v12469_v16  ;;  %v12528_v16 = vld [vmem:[#allocation11 + $0x134] ss:$24 sps:$4 sm:$0xff]  }
 0x23c   :  { %4357 = vmatpush2.bf16.msra.mxu1 %v12472_v18  ;;  %4315 = vmatprep.subr.bf16.mxu0 %v12477_v19  ;;  %v568_v18 = vrot.slane %v13613_v10, %v14207_v9  ;;  %v12523_v19 = vld [vmem:[#allocation11 + $0x728] ss:$24 sps:$4 sm:$0xff]   ;;  %v12555_v10 = vld [vmem:[#allocation11 + $0x63c] ss:$24 sps:$4 sm:$0xff]  }
 0x23d   :  { %4358 = vmatprep.subr.bf16.mxu1 %v12480_v28  ;;  %v12526_v28 = vld [vmem:[#allocation11 + $0x130] ss:$24 sps:$4 sm:$0xff]  }
 0x23f   :  { %4316 = vmatpush2.bf16.msra.mxu0 %v12475_v29 }
 0x240   :  { %4359 = vmatpush2.bf16.msra.mxu1 %v12478_v23  ;;  %4317 = vmatprep.subr.bf16.mxu0 %v12483_v31 }
 0x241   :  { %4360 = vmatprep.subr.bf16.mxu1 %v12486_v24 }
 0x243   :  { %4318 = vmatpush2.bf16.msra.mxu0 %v12481_v32  ;;  %v12531_v32 = vld [vmem:[#allocation11 + $0x6fc] ss:$24 sps:$4 sm:$0xff]  }
 0x244   :  { %4361 = vmatpush2.bf16.msra.mxu1 %v12484_v33  ;;  %4319 = vmatprep.subr.bf16.mxu0 %v12489_v38  ;;  %v12534_v33 = vld [vmem:[#allocation11 + $0x104] ss:$24 sps:$4 sm:$0xff]  }
 0x245   :  { %4362 = vmatprep.subr.bf16.mxu1 %v12492_v39 }
 0x247   :  { %4320 = vmatpush2.bf16.msra.mxu0 %v12487_v27  ;;  %v12529_v27 = vld [vmem:[#allocation11 + $0x6f8] ss:$24 sps:$4 sm:$0xff]  }
 0x248   :  { %4363 = vmatpush2.bf16.msra.mxu1 %v12490_v40  ;;  %4321 = vmatprep.subr.bf16.mxu0 %v12495_v41  ;;  %v12532_v40 = vld [vmem:[#allocation11 + $0x100] ss:$24 sps:$4 sm:$0xff]  }
 0x249   :  { %4364 = vmatprep.subr.bf16.mxu1 %v12498_v44 }
 0x24b   :  { %4322 = vmatpush2.bf16.msra.mxu0 %v12493_v48 }
 0x24c   :  { %4365 = vmatpush2.bf16.msra.mxu1 %v12496_v52  ;;  %4323 = vmatprep.subr.bf16.mxu0 %v12501_v13 }
 0x24d   :  { %4366 = vmatprep.subr.bf16.mxu1 %v12504_v57  ;;  %v12537_v57 = vld [vmem:[#allocation11 + $0x6cc] ss:$24 sps:$4 sm:$0xff]  }
 0x24f   :  { %4324 = vmatpush2.bf16.msra.mxu0 %v12499_v2  ;;  %v12540_v2 = vld [vmem:[#allocation11 + $0xd4] ss:$24 sps:$4 sm:$0xff]  }
 0x250   :  { %4367 = vmatpush2.bf16.msra.mxu1 %v12502_v37  ;;  %4325 = vmatprep.subr.bf16.mxu0 %v12507_v58 }
 0x251   :  { %4368 = vmatprep.subr.bf16.mxu1 %v12510_v59 }
 0x253   :  { %4326 = vmatpush2.bf16.msra.mxu0 %v12505_v60 }
 0x254   :  { %4369 = vmatpush2.bf16.msra.mxu1 %v12508_v61  ;;  %4327 = vmatprep.subr.bf16.mxu0 %v12513_v62  ;;  %v12538_v61 = vld [vmem:[#allocation11 + $0xd0] ss:$24 sps:$4 sm:$0xff]   ;;  %v12543_v62 = vld [vmem:[#allocation11 + $0x69c] ss:$24 sps:$4 sm:$0xff]  }
 0x255   :  { %4370 = vmatprep.subr.bf16.mxu1 %v12516_v45  ;;  %v12546_v45 = vld [vmem:[#allocation11 + $0xa4] ss:$24 sps:$4 sm:$0xff]  }
 0x257   :  { %4328 = vmatpush2.bf16.msra.mxu0 %v12511_v63  ;;  %v12541_v63 = vld [vmem:[#allocation11 + $0x698] ss:$24 sps:$4 sm:$0xff]  }
 0x258   :  { %4371 = vmatpush2.bf16.msra.mxu1 %v12514_v0  ;;  %4383 = vmatprep.subr.bf16.mxu0 %v12519_v3  ;;  %v12544_v0 = vld [vmem:[#allocation11 + $0xa0] ss:$24 sps:$4 sm:$0xff]   ;;  %v12549_v3 = vld [vmem:[#allocation11 + $0x66c] ss:$24 sps:$4 sm:$0xff]  }
 0x259   :  { %4426 = vmatprep.subr.bf16.mxu1 %v12522_v4  ;;  %v12552_v4 = vld [vmem:[#allocation11 + $0x74] ss:$24 sps:$4 sm:$0xff]  }
 0x25a   :  { %v2307_v29 = vpop.f32.mrf.mxu0  ;;  %4330 = vmatmul.mubr.bf16.vlgmr.msra.gmra.mxu0 %v14137_v14 }
 0x25b   :  { %v2350_v23 = vpop.f32.mrf.mxu1  ;;  %4373 = vmatmul.mubr.bf16.vlgmr.msra.gmra.mxu1 %v14181_v6  ;;  %v2308_v35 = vadd.f32 %v2307_v29, %v564_v11  ;;  %4384 = vmatpush1.bf16.msra.mxu0 %v12517_v5  ;;  %v12547_v5 = vld [vmem:[#allocation11 + $0x668] ss:$24 sps:$4 sm:$0xff]  }
 0x25c   :  { %4427 = vmatpush1.bf16.msra.mxu1 %v12520_v8  ;;  %v2309_v31 = vpop.f32.mrf.mxu0  ;;  %4385 = vmatprep.subr.bf16.mxu0 %v12525_v15  ;;  %v12550_v8 = vld [vmem:[#allocation11 + $0x70] ss:$24 sps:$4 sm:$0xff]  }
 0x25d   :  { %v2352_v24 = vpop.f32.mrf.mxu1  ;;  %4428 = vmatprep.subr.bf16.mxu1 %v12528_v16  ;;  %v14213_v38 = vadd.f32 %v2350_v23, %v2308_v35  ;;  %v2310_v39 = vadd.f32 %v2309_v31, %v568_v18  ;;  %4415 = vmatprep.mubr.bf16.mxu0 %v14144_v21  ;;  %v12553_v15 = vld [vmem:[#allocation11 + $0x638] ss:$24 sps:$4 sm:$0xff]   ;;  %v12567_v23 = vld [vmem:[#allocation11 + $0x8dc] ss:$24 sps:$4 sm:$0xff]  }
 0x25e   :  { %4458 = vmatprep.mubr.bf16.mxu1 %v14104_v43  ;;  %v2311_v41 = vpop.f32.mrf.mxu0  ;;  %v12535_v43 = vld [vmem:[#allocation11 + $0x6c8] ss:$24 sps:$4 sm:$0xff]   ;;  %v12570_v35 = vld [vmem:[#allocation11 + $0x2e4] ss:$24 sps:$4 sm:$0xff]   ;;  %v12565_v31 = vld [vmem:[#allocation11 + $0x8d8] ss:$24 sps:$4 sm:$0xff]  }
 0x25f   :  { %v2354_v44 = vpop.f32.mrf.mxu1  ;;  %v14217_v48 = vadd.f32 %v2352_v24, %v2310_v39  ;;  %v2312_v52 = vadd.f32 %v2311_v41, %v564_v11  ;;  %4386 = vmatpush1.bf16.msra.mxu0 %v12523_v19  ;;  %v12558_v11 = vld [vmem:[#allocation11 + $0x44] ss:$24 sps:$4 sm:$0xff]   ;;  %v12556_v16 = vld [vmem:[#allocation11 + $0x40] ss:$24 sps:$4 sm:$0xff]   ;;  %v12564_v19 = vld [vmem:[#allocation11 + $0x14] ss:$24 sps:$4 sm:$0xff]  }
 0x260   :  { %4429 = vmatpush1.bf16.msra.mxu1 %v12526_v28  ;;  %v2313_v13 = vpop.f32.mrf.mxu0  ;;  %4387 = vmatprep.subr.bf16.mxu0 %v12531_v32  ;;  %v12559_v28 = vld [vmem:[#allocation11 + $0x608] ss:$24 sps:$4 sm:$0xff]   ;;  %v12573_v32 = vld [vmem:[#allocation11 + $0x8ac] ss:$24 sps:$4 sm:$0xff]  }
 0x261   :  { %4430 = vmatprep.subr.bf16.mxu1 %v12534_v33  ;;  %v14219_v37 = vadd.f32 %v2354_v44, %v2312_v52  ;;  %v2314_v58 = vadd.f32 %v2313_v13, %v568_v18  ;;  %v2356_v59 = vpop.f32.mrf.mxu1  ;;  %v12561_v18 = vld [vmem:[#allocation11 + $0x60c] ss:$24 sps:$4 sm:$0xff]   ;;  %v12562_v29 = vld [vmem:[#allocation11 + $0x10] ss:$24 sps:$4 sm:$0xff]   ;;  %v12568_v24 = vld [vmem:[#allocation11 + $0x2e0] ss:$24 sps:$4 sm:$0xff]  }
 0x262   :  { %v12576_v33 = vld [vmem:[#allocation11 + $0x2b4] ss:$24 sps:$4 sm:$0xff]   ;;  %v12571_v39 = vld [vmem:[#allocation11 + $0x8a8] ss:$24 sps:$4 sm:$0xff]   ;;  %v12582_v41 = vld [vmem:[#allocation11 + $0x284] ss:$24 sps:$4 sm:$0xff]  }
 0x263   :  { %v14221_v60 = vadd.f32 %v2356_v59, %v2314_v58  ;;  %4388 = vmatpush1.bf16.msra.mxu0 %v12529_v27  ;;  %v12574_v27 = vld [vmem:[#allocation11 + $0x2b0] ss:$24 sps:$4 sm:$0xff]   ;;  %v12580_v52 = vld [vmem:[#allocation11 + $0x280] ss:$24 sps:$4 sm:$0xff]   ;;  %v12585_v13 = vld [vmem:[#allocation11 + $0x84c] ss:$24 sps:$4 sm:$0xff]  }
 0x264   :  { %4431 = vmatpush1.bf16.msra.mxu1 %v12532_v40  ;;  %4389 = vmatprep.subr.bf16.mxu0 %v12537_v57  ;;  %v12579_v40 = vld [vmem:[#allocation11 + $0x87c] ss:$24 sps:$4 sm:$0xff]   ;;  %v12577_v44 = vld [vmem:[#allocation11 + $0x878] ss:$24 sps:$4 sm:$0xff]  }
 0x265   :  { %4432 = vmatprep.subr.bf16.mxu1 %v12540_v2  ;;  %v12588_v57 = vld [vmem:[#allocation11 + $0x254] ss:$24 sps:$4 sm:$0xff]   ;;  %v12583_v2 = vld [vmem:[#allocation11 + $0x848] ss:$24 sps:$4 sm:$0xff]  }
 0x266   :  { %v12586_v58 = vld [vmem:[#allocation11 + $0x250] ss:$24 sps:$4 sm:$0xff]   ;;  %v12591_v59 = vld [vmem:[#allocation11 + $0x81c] ss:$24 sps:$4 sm:$0xff]  }
 0x267   :  { %4390 = vmatpush1.bf16.msra.mxu0 %v12535_v43  ;;  %v12594_v43 = vld [vmem:[#allocation11 + $0x224] ss:$24 sps:$4 sm:$0xff]  }
 0x268   :  { %4433 = vmatpush1.bf16.msra.mxu1 %v12538_v61  ;;  %4391 = vmatprep.subr.bf16.mxu0 %v12543_v62  ;;  %v12589_v61 = vld [vmem:[#allocation11 + $0x818] ss:$24 sps:$4 sm:$0xff]  }
 0x269   :  { %4434 = vmatprep.subr.bf16.mxu1 %v12546_v45  ;;  %v12592_v62 = vld [vmem:[#allocation11 + $0x220] ss:$24 sps:$4 sm:$0xff]   ;;  %v12597_v45 = vld [vmem:[#allocation11 + $0x7ec] ss:$24 sps:$4 sm:$0xff]  }
 0x26b   :  { %4392 = vmatpush1.bf16.msra.mxu0 %v12541_v63  ;;  %v12600_v63 = vld [vmem:[#allocation11 + $0x1f4] ss:$24 sps:$4 sm:$0xff]  }
 0x26c   :  { %4435 = vmatpush1.bf16.msra.mxu1 %v12544_v0  ;;  %4393 = vmatprep.subr.bf16.mxu0 %v12549_v3  ;;  %v12595_v0 = vld [vmem:[#allocation11 + $0x7e8] ss:$24 sps:$4 sm:$0xff]  }
 0x26d   :  { %4436 = vmatprep.subr.bf16.mxu1 %v12552_v4  ;;  %v12598_v3 = vld [vmem:[#allocation11 + $0x1f0] ss:$24 sps:$4 sm:$0xff]   ;;  %v12603_v4 = vld [vmem:[#allocation11 + $0x7bc] ss:$24 sps:$4 sm:$0xff]  }
 0x26f   :  { %4394 = vmatpush1.bf16.msra.mxu0 %v12547_v5  ;;  %v12606_v5 = vld [vmem:[#allocation11 + $0x1c4] ss:$24 sps:$4 sm:$0xff]  }
 0x270   :  { %4437 = vmatpush1.bf16.msra.mxu1 %v12550_v8  ;;  %4395 = vmatprep.subr.bf16.mxu0 %v12555_v10  ;;  %v12601_v8 = vld [vmem:[#allocation11 + $0x7b8] ss:$24 sps:$4 sm:$0xff]  }
 0x271   :  { %4438 = vmatprep.subr.bf16.mxu1 %v12558_v11  ;;  %v12604_v10 = vld [vmem:[#allocation11 + $0x1c0] ss:$24 sps:$4 sm:$0xff]   ;;  %v12609_v11 = vld [vmem:[#allocation11 + $0x78c] ss:$24 sps:$4 sm:$0xff]  }
 0x273   :  { %4396 = vmatpush1.bf16.msra.mxu0 %v12553_v15  ;;  %v12612_v15 = vld [vmem:[#allocation11 + $0x194] ss:$24 sps:$4 sm:$0xff]  }
 0x274   :  { %4439 = vmatpush1.bf16.msra.mxu1 %v12556_v16  ;;  %4397 = vmatprep.subr.bf16.mxu0 %v12561_v18  ;;  %v12607_v16 = vld [vmem:[#allocation11 + $0x788] ss:$24 sps:$4 sm:$0xff]  }
 0x275   :  { %4440 = vmatprep.subr.bf16.mxu1 %v12564_v19  ;;  %v12610_v18 = vld [vmem:[#allocation11 + $0x190] ss:$24 sps:$4 sm:$0xff]   ;;  %v12615_v19 = vld [vmem:[#allocation11 + $0x464] ss:$24 sps:$4 sm:$0xff]  }
 0x277   :  { %4398 = vmatpush1.bf16.msra.mxu0 %v12559_v28  ;;  %v12618_v28 = vld [vmem:[#allocation11 + $0x764] ss:$24 sps:$4 sm:$0xff]  }
 0x278   :  { %4441 = vmatpush1.bf16.msra.mxu1 %v12562_v29  ;;  %4399 = vmatprep.subr.bf16.mxu0 %v12567_v23  ;;  %v12613_v29 = vld [vmem:[#allocation11 + $0x460] ss:$24 sps:$4 sm:$0xff]  }
 0x279   :  { %4442 = vmatprep.subr.bf16.mxu1 %v12570_v35  ;;  %v12616_v23 = vld [vmem:[#allocation11 + $0x760] ss:$24 sps:$4 sm:$0xff]   ;;  %v12621_v35 = vld [vmem:[#allocation11 + $0x434] ss:$24 sps:$4 sm:$0xff]  }
 0x27b   :  { %4400 = vmatpush2.bf16.msra.mxu0 %v12565_v31  ;;  %v12624_v31 = vld [vmem:[#allocation11 + $0x734] ss:$24 sps:$4 sm:$0xff]  }
 0x27c   :  { %4443 = vmatpush2.bf16.msra.mxu1 %v12568_v24  ;;  %4401 = vmatprep.subr.bf16.mxu0 %v12573_v32  ;;  %v2696_v24 = vld [vmem:[#allocation13] sm:$0x3f]  ;;  %v12619_v32 = vld [vmem:[#allocation11 + $0x430] ss:$24 sps:$4 sm:$0xff]  }
 0x27d   :  { %4444 = vmatprep.subr.bf16.mxu1 %v12576_v33  ;;  %v12622_v33 = vld [vmem:[#allocation11 + $0x730] ss:$24 sps:$4 sm:$0xff]  }
 0x27f   :  { %4402 = vmatpush2.bf16.msra.mxu0 %v12571_v39 }
 0x280   :  { %4445 = vmatpush2.bf16.msra.mxu1 %v12574_v27  ;;  %4403 = vmatprep.subr.bf16.mxu0 %v12579_v40 }
 0x281   :  { %4446 = vmatprep.subr.bf16.mxu1 %v12582_v41 }
 0x283   :  { %4404 = vmatpush2.bf16.msra.mxu0 %v12577_v44 }
 0x284   :  { %4447 = vmatpush2.bf16.msra.mxu1 %v12580_v52  ;;  %4405 = vmatprep.subr.bf16.mxu0 %v12585_v13  ;;  %v12627_v52 = vld [vmem:[#allocation11 + $0x404] ss:$24 sps:$4 sm:$0xff]  }
 0x285   :  { %4448 = vmatprep.subr.bf16.mxu1 %v12588_v57  ;;  %v12630_v13 = vld [vmem:[#allocation11 + $0x704] ss:$24 sps:$4 sm:$0xff]   ;;  %v14233_v57 = vrot.slane %v2696_v24, %v14102_v42 }
 0x287   :  { %4406 = vmatpush2.bf16.msra.mxu0 %v12583_v2 }
 0x288   :  { %4449 = vmatpush2.bf16.msra.mxu1 %v12586_v58  ;;  %4407 = vmatprep.subr.bf16.mxu0 %v12591_v59  ;;  %v12625_v58 = vld [vmem:[#allocation11 + $0x400] ss:$24 sps:$4 sm:$0xff]  }
 0x289   :  { %4450 = vmatprep.subr.bf16.mxu1 %v12594_v43  ;;  %v14241_v43 = vrot.slane %v2696_v24, %v14115_v54  ;;  %v12658_v24 = vld [vmem:[#allocation11 + $0x610] ss:$24 sps:$4 sm:$0xff]  }
 0x28b   :  { %4408 = vmatpush2.bf16.msra.mxu0 %v12589_v61 }
 0x28c   :  { %4451 = vmatpush2.bf16.msra.mxu1 %v12592_v62  ;;  %4409 = vmatprep.subr.bf16.mxu0 %v12597_v45 }
 0x28d   :  { %4452 = vmatprep.subr.bf16.mxu1 %v12600_v63  ;;  %v12636_v63 = vld [vmem:[#allocation11 + $0x6d4] ss:$24 sps:$4 sm:$0xff]  }
 0x28f   :  { %4410 = vmatpush2.bf16.msra.mxu0 %v12595_v0 }
 0x290   :  { %4453 = vmatpush2.bf16.msra.mxu1 %v12598_v3  ;;  %4411 = vmatprep.subr.bf16.mxu0 %v12603_v4  ;;  %v12634_v3 = vld [vmem:[#allocation11 + $0x6d0] ss:$24 sps:$4 sm:$0xff]   ;;  %v12639_v4 = vld [vmem:[#allocation11 + $0x3a4] ss:$24 sps:$4 sm:$0xff]  }
 0x291   :  { %4454 = vmatprep.subr.bf16.mxu1 %v12606_v5  ;;  %v12642_v5 = vld [vmem:[#allocation11 + $0x6a4] ss:$24 sps:$4 sm:$0xff]  }
 0x293   :  { %4412 = vmatpush2.bf16.msra.mxu0 %v12601_v8  ;;  %v12637_v8 = vld [vmem:[#allocation11 + $0x3a0] ss:$24 sps:$4 sm:$0xff]  }
 0x294   :  { %4455 = vmatpush2.bf16.msra.mxu1 %v12604_v10  ;;  %4413 = vmatprep.subr.bf16.mxu0 %v12609_v11  ;;  %v12640_v10 = vld [vmem:[#allocation11 + $0x6a0] ss:$24 sps:$4 sm:$0xff]   ;;  %v12645_v11 = vld [vmem:[#allocation11 + $0x374] ss:$24 sps:$4 sm:$0xff]  }
 0x295   :  { %4456 = vmatprep.subr.bf16.mxu1 %v12612_v15  ;;  %v12643_v15 = vld [vmem:[#allocation11 + $0x370] ss:$24 sps:$4 sm:$0xff]  }
 0x297   :  { %4414 = vmatpush2.bf16.msra.mxu0 %v12607_v16  ;;  %v12646_v16 = vld [vmem:[#allocation11 + $0x670] ss:$24 sps:$4 sm:$0xff]  }
 0x298   :  { %4457 = vmatpush2.bf16.msra.mxu1 %v12610_v18  ;;  %4469 = vmatprep.subr.bf16.mxu0 %v12615_v19  ;;  %v12651_v18 = vld [vmem:[#allocation11 + $0x344] ss:$24 sps:$4 sm:$0xff]  }
 0x299   :  { %4512 = vmatprep.subr.bf16.mxu1 %v12618_v28  ;;  %v12654_v19 = vld [vmem:[#allocation11 + $0x644] ss:$24 sps:$4 sm:$0xff]   ;;  %v12649_v28 = vld [vmem:[#allocation11 + $0x340] ss:$24 sps:$4 sm:$0xff]  }
 0x29a   :  { %v2393_v39 = vpop.f32.mrf.mxu0  ;;  %4416 = vmatmul.mubr.bf16.vlgmr.msra.gmra.mxu0 %v14183_v7 }
 0x29b   :  { %v14223_v27 = vpop.f32.mrf.mxu1  ;;  %4459 = vmatmul.mubr.bf16.vlgmr.msra.gmra.mxu1 %v14137_v14  ;;  %v14228_v40 = vadd.f32 %v2393_v39, %v14213_v38  ;;  %4470 = vmatpush1.bf16.msra.mxu0 %v12613_v29  ;;  %v12628_v14 = vld [vmem:[#allocation11 + $0x700] ss:$24 sps:$4 sm:$0xff]  }
 0x29c   :  { %4513 = vmatpush1.bf16.msra.mxu1 %v12616_v23  ;;  %v2395_v41 = vpop.f32.mrf.mxu0  ;;  %4471 = vmatprep.subr.bf16.mxu0 %v12621_v35  ;;  %v12652_v29 = vld [vmem:[#allocation11 + $0x640] ss:$24 sps:$4 sm:$0xff]   ;;  %v12657_v23 = vld [vmem:[#allocation11 + $0x314] ss:$24 sps:$4 sm:$0xff]  }
 0x29d   :  { %v14230_v44 = vpop.f32.mrf.mxu1  ;;  %4514 = vmatprep.subr.bf16.mxu1 %v12624_v31  ;;  %v14236_v2 = vadd.f32 %v2395_v41, %v14217_v48  ;;  %4501 = vmatprep.mubr.bf16.mxu0 %v14142_v20  ;;  %v12633_v20 = vld [vmem:[#allocation11 + $0x3d4] ss:$24 sps:$4 sm:$0xff]   ;;  %v12655_v31 = vld [vmem:[#allocation11 + $0x310] ss:$24 sps:$4 sm:$0xff]   ;;  %v12661_v39 = vld [vmem:[#allocation11 + $0x5e0] ss:$24 sps:$4 sm:$0xff]  }
 0x29e   :  { %4544 = vmatprep.mubr.bf16.mxu1 %v14144_v21  ;;  %v2397_v38 = vpop.f32.mrf.mxu0  ;;  %v12660_v35 = vld [vmem:[#allocation11 + $0x614] ss:$24 sps:$4 sm:$0xff]   ;;  %v12664_v41 = vld [vmem:[#allocation11 + $0x8e0] ss:$24 sps:$4 sm:$0xff]  }
 0x29f   :  { %14812 = vst [vmem:[#allocation34_spill] sm:$0xff] %v14236_v2  ;;  %v4206_v59 = vpop.f32.mrf.mxu1  ;;  %v14244_v61 = vadd.f32 %v2397_v38, %v14219_v37  ;;  %4472 = vmatpush1.bf16.msra.mxu0 %v12619_v32  ;;  %v12631_v37 = vld [vmem:[#allocation11 + $0x3d0] ss:$24 sps:$4 sm:$0xff]   ;;  %v12663_v32 = vld [vmem:[#allocation11 + $0x5e4] ss:$24 sps:$4 sm:$0xff]  }
 0x2a0   :  { %v14247_v62 = vadd.f32 %v4206_v59, %v14233_v57  ;;  %4515 = vmatpush1.bf16.msra.mxu1 %v12622_v33  ;;  %v2399_v48 = vpop.f32.mrf.mxu0  ;;  %4473 = vmatprep.subr.bf16.mxu0 %v12627_v52  ;;  %v12666_v33 = vld [vmem:[#allocation11 + $0x8e4] ss:$24 sps:$4 sm:$0xff]   ;;  %v12669_v52 = vld [vmem:[#allocation11 + $0x5b4] ss:$24 sps:$4 sm:$0xff]  }
 0x2a1   :  { %14813 = vst [vmem:[#allocation35_spill] sm:$0xff] %v14244_v61  ;;  %v4208_v45 = vpop.f32.mrf.mxu1  ;;  %4516 = vmatprep.subr.bf16.mxu1 %v12630_v13  ;;  %v14250_v21 = vadd.f32 %v2399_v48, %v14221_v60  ;;  %v12648_v60 = vld [vmem:[#allocation11 + $0x674] ss:$24 sps:$4 sm:$0xff]   ;;  %v12675_v38 = vld [vmem:[#allocation11 + $0x584] ss:$24 sps:$4 sm:$0xff]  }
 0x2a2   :  { %v14253_v0 = vadd.f32 %v4208_v45, %v14241_v43  ;;  %v12672_v13 = vld [vmem:[#allocation11 + $0x8b4] ss:$24 sps:$4 sm:$0xff]   ;;  %v12678_v59 = vld [vmem:[#allocation11 + $0x884] ss:$24 sps:$4 sm:$0xff]   ;;  %v12673_v48 = vld [vmem:[#allocation11 + $0x580] ss:$24 sps:$4 sm:$0xff]  }
 0x2a3   :  { %14814 = vst [vmem:[#allocation36_spill] sm:$0xff] %v14250_v21  ;;  %4474 = vmatpush1.bf16.msra.mxu0 %v12625_v58  ;;  %v12667_v58 = vld [vmem:[#allocation11 + $0x5b0] ss:$24 sps:$4 sm:$0xff]   ;;  %v12676_v45 = vld [vmem:[#allocation11 + $0x880] ss:$24 sps:$4 sm:$0xff]  }
 0x2a4   :  { %4517 = vmatpush1.bf16.msra.mxu1 %v12628_v14  ;;  %4475 = vmatprep.subr.bf16.mxu0 %v12633_v20  ;;  %v12670_v14 = vld [vmem:[#allocation11 + $0x8b0] ss:$24 sps:$4 sm:$0xff]   ;;  %v12681_v20 = vld [vmem:[#allocation11 + $0x554] ss:$24 sps:$4 sm:$0xff]  }
 0x2a5   :  { %4518 = vmatprep.subr.bf16.mxu1 %v12636_v63  ;;  %v12684_v63 = vld [vmem:[#allocation11 + $0x854] ss:$24 sps:$4 sm:$0xff]   ;;  %v12823_v21 = vld [vmem:[#allocation14 + $0x6c0] ss:$24 sps:$4 sm:$0xff]  }
 0x2a7   :  { %4476 = vmatpush1.bf16.msra.mxu0 %v12631_v37  ;;  %v12679_v37 = vld [vmem:[#allocation11 + $0x550] ss:$24 sps:$4 sm:$0xff]  }
 0x2a8   :  { %4519 = vmatpush1.bf16.msra.mxu1 %v12634_v3  ;;  %4477 = vmatprep.subr.bf16.mxu0 %v12639_v4  ;;  %v12682_v3 = vld [vmem:[#allocation11 + $0x850] ss:$24 sps:$4 sm:$0xff]   ;;  %v12687_v4 = vld [vmem:[#allocation11 + $0x524] ss:$24 sps:$4 sm:$0xff]  }
 0x2a9   :  { %4520 = vmatprep.subr.bf16.mxu1 %v12642_v5  ;;  %v12690_v5 = vld [vmem:[#allocation11 + $0x824] ss:$24 sps:$4 sm:$0xff]  }
 0x2ab   :  { %4478 = vmatpush1.bf16.msra.mxu0 %v12637_v8  ;;  %v12685_v8 = vld [vmem:[#allocation11 + $0x520] ss:$24 sps:$4 sm:$0xff]  }
 0x2ac   :  { %4521 = vmatpush1.bf16.msra.mxu1 %v12640_v10  ;;  %4479 = vmatprep.subr.bf16.mxu0 %v12645_v11  ;;  %v12688_v10 = vld [vmem:[#allocation11 + $0x820] ss:$24 sps:$4 sm:$0xff]   ;;  %v12693_v11 = vld [vmem:[#allocation11 + $0x4f4] ss:$24 sps:$4 sm:$0xff]  }
 0x2ad   :  { %4522 = vmatprep.subr.bf16.mxu1 %v12648_v60  ;;  %v12696_v60 = vld [vmem:[#allocation11 + $0x7f4] ss:$24 sps:$4 sm:$0xff]  }
 0x2af   :  { %4480 = vmatpush1.bf16.msra.mxu0 %v12643_v15  ;;  %v12691_v15 = vld [vmem:[#allocation11 + $0x4f0] ss:$24 sps:$4 sm:$0xff]  }
 0x2b0   :  { %4523 = vmatpush1.bf16.msra.mxu1 %v12646_v16  ;;  %4481 = vmatprep.subr.bf16.mxu0 %v12651_v18  ;;  %v12694_v16 = vld [vmem:[#allocation11 + $0x7f0] ss:$24 sps:$4 sm:$0xff]   ;;  %v12699_v18 = vld [vmem:[#allocation11 + $0x4c4] ss:$24 sps:$4 sm:$0xff]  }
 0x2b1   :  { %4524 = vmatprep.subr.bf16.mxu1 %v12654_v19  ;;  %v12702_v19 = vld [vmem:[#allocation11 + $0x7c4] ss:$24 sps:$4 sm:$0xff]  }
 0x2b3   :  { %4482 = vmatpush1.bf16.msra.mxu0 %v12649_v28  ;;  %v12697_v28 = vld [vmem:[#allocation11 + $0x4c0] ss:$24 sps:$4 sm:$0xff]  }
 0x2b4   :  { %4525 = vmatpush1.bf16.msra.mxu1 %v12652_v29  ;;  %4483 = vmatprep.subr.bf16.mxu0 %v12657_v23  ;;  %v12700_v29 = vld [vmem:[#allocation11 + $0x7c0] ss:$24 sps:$4 sm:$0xff]   ;;  %v12705_v23 = vld [vmem:[#allocation11 + $0x494] ss:$24 sps:$4 sm:$0xff]  }
 0x2b5   :  { %4526 = vmatprep.subr.bf16.mxu1 %v12660_v35  ;;  %v12708_v35 = vld [vmem:[#allocation11 + $0x794] ss:$24 sps:$4 sm:$0xff]  }
 0x2b7   :  { %4484 = vmatpush1.bf16.msra.mxu0 %v12655_v31  ;;  %v12703_v31 = vld [vmem:[#allocation11 + $0x490] ss:$24 sps:$4 sm:$0xff]  }
 0x2b8   :  { %4527 = vmatpush1.bf16.msra.mxu1 %v12658_v24  ;;  %4485 = vmatprep.subr.bf16.mxu0 %v12663_v32  ;;  %v12706_v24 = vld [vmem:[#allocation11 + $0x790] ss:$24 sps:$4 sm:$0xff]  }
 0x2b9   :  { %4528 = vmatprep.subr.bf16.mxu1 %v12666_v33  ;;  %v12711_v32 = vld [vmem:[#allocation14 + $0x154] ss:$24 sps:$4 sm:$0xff]  }
 0x2ba   :  { %v12714_v33 = vld [vmem:[#allocation14 + $0x454] ss:$24 sps:$4 sm:$0xff]  }
 0x2bb   :  { %4486 = vmatpush2.bf16.msra.mxu0 %v12661_v39  ;;  %v237_v39 = vld [vmem:[#allocation7 + $0x8] sm:$0xff] }
 0x2bc   :  { %4529 = vmatpush2.bf16.msra.mxu1 %v12664_v41  ;;  %4487 = vmatprep.subr.bf16.mxu0 %v12669_v52  ;;  %v244_v41 = vld [vmem:[#allocation7 + $0x38] sm:$0xff] }
 0x2bd   :  { %4530 = vmatprep.subr.bf16.mxu1 %v12672_v13  ;;  %v239_v52 = vld [vmem:[#allocation7 + $0x18] sm:$0xff]  ;;  %v246_v13 = vld [vmem:[#allocation7 + $0x48] sm:$0xff] }
 0x2bf   :  { %4488 = vmatpush2.bf16.msra.mxu0 %v12667_v58  ;;  %v12709_v58 = vld [vmem:[#allocation14 + $0x150] ss:$24 sps:$4 sm:$0xff]  }
 0x2c0   :  { %4531 = vmatpush2.bf16.msra.mxu1 %v12670_v14  ;;  %4489 = vmatprep.subr.bf16.mxu0 %v12675_v38  ;;  %v12712_v14 = vld [vmem:[#allocation14 + $0x450] ss:$24 sps:$4 sm:$0xff]   ;;  %v12717_v38 = vld [vmem:[#allocation14 + $0x124] ss:$24 sps:$4 sm:$0xff]  }
 0x2c1   :  { %4532 = vmatprep.subr.bf16.mxu1 %v12678_v59  ;;  %v12720_v59 = vld [vmem:[#allocation14 + $0x424] ss:$24 sps:$4 sm:$0xff]  }
 0x2c3   :  { %4490 = vmatpush2.bf16.msra.mxu0 %v12673_v48  ;;  %v12715_v48 = vld [vmem:[#allocation14 + $0x120] ss:$24 sps:$4 sm:$0xff]  }
 0x2c4   :  { %4533 = vmatpush2.bf16.msra.mxu1 %v12676_v45  ;;  %4491 = vmatprep.subr.bf16.mxu0 %v12681_v20  ;;  %v12718_v45 = vld [vmem:[#allocation14 + $0x420] ss:$24 sps:$4 sm:$0xff]   ;;  %v14255_v20 = vpack.c.bf16 %v244_v41, %v237_v39  ;;  %v12747_v41 = vld [vmem:[#allocation14 + $0x34] ss:$24 sps:$4 sm:$0xff]  }
 0x2c5   :  { %4534 = vmatprep.subr.bf16.mxu1 %v12684_v63  ;;  %v14257_v63 = vpack.c.bf16 %v246_v13, %v239_v52  ;;  %v12742_v39 = vld [vmem:[#allocation14 + $0x360] ss:$24 sps:$4 sm:$0xff]   ;;  %v12750_v52 = vld [vmem:[#allocation14 + $0x334] ss:$24 sps:$4 sm:$0xff]   ;;  %v12745_v13 = vld [vmem:[#allocation14 + $0x30] ss:$24 sps:$4 sm:$0xff]  }
 0x2c7   :  { %4492 = vmatpush2.bf16.msra.mxu0 %v12679_v37 }
 0x2c8   :  { %4535 = vmatpush2.bf16.msra.mxu1 %v12682_v3  ;;  %4493 = vmatprep.subr.bf16.mxu0 %v12687_v4 }
 0x2c9   :  { %4536 = vmatprep.subr.bf16.mxu1 %v12690_v5 }
 0x2cb   :  { %4494 = vmatpush2.bf16.msra.mxu0 %v12685_v8  ;;  %v12723_v8 = vld [vmem:[#allocation14 + $0xf4] ss:$24 sps:$4 sm:$0xff]  }
 0x2cc   :  { %4537 = vmatpush2.bf16.msra.mxu1 %v12688_v10  ;;  %4495 = vmatprep.subr.bf16.mxu0 %v12693_v11  ;;  %v12726_v10 = vld [vmem:[#allocation14 + $0x3f4] ss:$24 sps:$4 sm:$0xff]   ;;  %v12721_v11 = vld [vmem:[#allocation14 + $0xf0] ss:$24 sps:$4 sm:$0xff]  }
 0x2cd   :  { %4538 = vmatprep.subr.bf16.mxu1 %v12696_v60  ;;  %v12724_v60 = vld [vmem:[#allocation14 + $0x3f0] ss:$24 sps:$4 sm:$0xff]  }
 0x2cf   :  { %4496 = vmatpush2.bf16.msra.mxu0 %v12691_v15 }
 0x2d0   :  { %4539 = vmatpush2.bf16.msra.mxu1 %v12694_v16  ;;  %4497 = vmatprep.subr.bf16.mxu0 %v12699_v18  ;;  %v12729_v16 = vld [vmem:[#allocation14 + $0xc4] ss:$24 sps:$4 sm:$0xff]  }
 0x2d1   :  { %4540 = vmatprep.subr.bf16.mxu1 %v12702_v19  ;;  %v12732_v18 = vld [vmem:[#allocation14 + $0x3c4] ss:$24 sps:$4 sm:$0xff]  }
 0x2d3   :  { %4498 = vmatpush2.bf16.msra.mxu0 %v12697_v28  ;;  %v12727_v28 = vld [vmem:[#allocation14 + $0xc0] ss:$24 sps:$4 sm:$0xff]  }
 0x2d4   :  { %4541 = vmatpush2.bf16.msra.mxu1 %v12700_v29  ;;  %4499 = vmatprep.subr.bf16.mxu0 %v12705_v23  ;;  %v12730_v29 = vld [vmem:[#allocation14 + $0x3c0] ss:$24 sps:$4 sm:$0xff]   ;;  %v12735_v23 = vld [vmem:[#allocation14 + $0x94] ss:$24 sps:$4 sm:$0xff]  }
 0x2d5   :  { %4542 = vmatprep.subr.bf16.mxu1 %v12708_v35  ;;  %v12738_v35 = vld [vmem:[#allocation14 + $0x394] ss:$24 sps:$4 sm:$0xff]  }
 0x2d7   :  { %4500 = vmatpush2.bf16.msra.mxu0 %v12703_v31  ;;  %v12736_v31 = vld [vmem:[#allocation14 + $0x390] ss:$24 sps:$4 sm:$0xff]  }
 0x2d8   :  { %4543 = vmatpush2.bf16.msra.mxu1 %v12706_v24  ;;  %6321 = vmatprep.subr.bf16.mxu0 %v12711_v32  ;;  %v12741_v24 = vld [vmem:[#allocation14 + $0x64] ss:$24 sps:$4 sm:$0xff]  }
 0x2d9   :  { %6364 = vmatprep.subr.bf16.mxu1 %v12714_v33  ;;  %v12744_v32 = vld [vmem:[#allocation14 + $0x364] ss:$24 sps:$4 sm:$0xff]   ;;  %v12739_v33 = vld [vmem:[#allocation14 + $0x60] ss:$24 sps:$4 sm:$0xff]  }
 0x2da   :  { %v14259_v37 = vpop.f32.mrf.mxu0  ;;  %4502 = vmatmul.mubr.bf16.vlgmr.msra.gmra.mxu0 %v14181_v6 }
 0x2db   :  { %v14261_v3 = vpop.f32.mrf.mxu1  ;;  %4545 = vmatmul.mubr.bf16.vlgmr.msra.gmra.mxu1 %v14183_v7  ;;  %6322 = vmatpush1.bf16.msra.mxu0 %v12709_v58  ;;  %v12748_v58 = vld [vmem:[#allocation14 + $0x330] ss:$24 sps:$4 sm:$0xff]  }
 0x2dc   :  { %6365 = vmatpush1.bf16.msra.mxu1 %v12712_v14  ;;  %v14265_v4 = vpop.f32.mrf.mxu0  ;;  %6323 = vmatprep.subr.bf16.mxu0 %v12717_v38  ;;  %v12753_v14 = vld [vmem:[#allocation14 + $0x4] ss:$24 sps:$4 sm:$0xff]  }
 0x2dd   :  { %v14267_v5 = vpop.f32.mrf.mxu1  ;;  %6366 = vmatprep.subr.bf16.mxu1 %v12720_v59  ;;  %6353 = vmatprep.mubr.bf16.mxu0 %v14255_v20  ;;  %v12756_v38 = vld [vmem:[#allocation14 + $0x304] ss:$24 sps:$4 sm:$0xff]   ;;  %v12751_v59 = vld [vmem:[#allocation14] ss:$24 sps:$4 sm:$0xff]  }
 0x2de   :  { %6396 = vmatprep.mubr.bf16.mxu1 %v14257_v63  ;;  %v4249_v15 = vpop.f32.mrf.mxu0 }
 0x2df   :  { %v4250_v6 = vadd.f32 %v4249_v15, %v14247_v62  ;;  %6324 = vmatpush1.bf16.msra.mxu0 %v12715_v48  ;;  %v4292_v7 = vpop.f32.mrf.mxu1  ;;  %v12733_v62 = vld [vmem:[#allocation14 + $0x90] ss:$24 sps:$4 sm:$0xff]   ;;  %v12754_v48 = vld [vmem:[#allocation14 + $0x300] ss:$24 sps:$4 sm:$0xff]   ;;  %v12768_v15 = vld [vmem:[#allocation14 + $0x5a4] ss:$24 sps:$4 sm:$0xff]  }
 0x2e0   :  { %6367 = vmatpush1.bf16.msra.mxu1 %v12718_v45  ;;  %6325 = vmatprep.subr.bf16.mxu0 %v12723_v8  ;;  %v12759_v45 = vld [vmem:[#allocation14 + $0x2d4] ss:$24 sps:$4 sm:$0xff]  }
 0x2e1   :  { %6368 = vmatprep.subr.bf16.mxu1 %v12726_v10  ;;  %v14272_v19 = vadd.f32 %v4292_v7, %v4250_v6  ;;  %v12762_v8 = vld [vmem:[#allocation14 + $0x5d4] ss:$24 sps:$4 sm:$0xff]   ;;  %v12757_v10 = vld [vmem:[#allocation14 + $0x2d0] ss:$24 sps:$4 sm:$0xff]   ;;  %v12763_v6 = vld [vmem:[#allocation14 + $0x2a0] ss:$24 sps:$4 sm:$0xff]  }
 0x2e2   :  { %v12766_v7 = vld [vmem:[#allocation14 + $0x5a0] ss:$24 sps:$4 sm:$0xff]  }
 0x2e3   :  { %6326 = vmatpush1.bf16.msra.mxu0 %v12721_v11  ;;  %v12760_v11 = vld [vmem:[#allocation14 + $0x5d0] ss:$24 sps:$4 sm:$0xff]  }
 0x2e4   :  { %6369 = vmatpush1.bf16.msra.mxu1 %v12724_v60  ;;  %6327 = vmatprep.subr.bf16.mxu0 %v12729_v16  ;;  %v12765_v60 = vld [vmem:[#allocation14 + $0x2a4] ss:$24 sps:$4 sm:$0xff]   ;;  %v12771_v16 = vld [vmem:[#allocation14 + $0x274] ss:$24 sps:$4 sm:$0xff]  }
 0x2e5   :  { %6370 = vmatprep.subr.bf16.mxu1 %v12732_v18  ;;  %v12774_v18 = vld [vmem:[#allocation14 + $0x574] ss:$24 sps:$4 sm:$0xff]  }
 0x2e7   :  { %6328 = vmatpush1.bf16.msra.mxu0 %v12727_v28  ;;  %v12769_v28 = vld [vmem:[#allocation14 + $0x270] ss:$24 sps:$4 sm:$0xff]  }
 0x2e8   :  { %6371 = vmatpush1.bf16.msra.mxu1 %v12730_v29  ;;  %6329 = vmatprep.subr.bf16.mxu0 %v12735_v23  ;;  %v12772_v29 = vld [vmem:[#allocation14 + $0x570] ss:$24 sps:$4 sm:$0xff]   ;;  %v12777_v23 = vld [vmem:[#allocation14 + $0x244] ss:$24 sps:$4 sm:$0xff]  }
 0x2e9   :  { %6372 = vmatprep.subr.bf16.mxu1 %v12738_v35  ;;  %v12780_v35 = vld [vmem:[#allocation14 + $0x544] ss:$24 sps:$4 sm:$0xff]  }
 0x2eb   :  { %6330 = vmatpush1.bf16.msra.mxu0 %v12733_v62  ;;  %v12775_v62 = vld [vmem:[#allocation14 + $0x240] ss:$24 sps:$4 sm:$0xff]  }
 0x2ec   :  { %6373 = vmatpush1.bf16.msra.mxu1 %v12736_v31  ;;  %6331 = vmatprep.subr.bf16.mxu0 %v12741_v24  ;;  %v12778_v31 = vld [vmem:[#allocation14 + $0x540] ss:$24 sps:$4 sm:$0xff]   ;;  %v12783_v24 = vld [vmem:[#allocation14 + $0x214] ss:$24 sps:$4 sm:$0xff]  }
 0x2ed   :  { %6374 = vmatprep.subr.bf16.mxu1 %v12744_v32  ;;  %v12786_v32 = vld [vmem:[#allocation14 + $0x514] ss:$24 sps:$4 sm:$0xff]  }
 0x2ef   :  { %6332 = vmatpush1.bf16.msra.mxu0 %v12739_v33  ;;  %v12781_v33 = vld [vmem:[#allocation14 + $0x210] ss:$24 sps:$4 sm:$0xff]  }
 0x2f0   :  { %6375 = vmatpush1.bf16.msra.mxu1 %v12742_v39  ;;  %6333 = vmatprep.subr.bf16.mxu0 %v12747_v41  ;;  %v12784_v39 = vld [vmem:[#allocation14 + $0x510] ss:$24 sps:$4 sm:$0xff]   ;;  %v12789_v41 = vld [vmem:[#allocation14 + $0x1e4] ss:$24 sps:$4 sm:$0xff]  }
 0x2f1   :  { %6376 = vmatprep.subr.bf16.mxu1 %v12750_v52  ;;  %v12792_v52 = vld [vmem:[#allocation14 + $0x4e4] ss:$24 sps:$4 sm:$0xff]  }
 0x2f3   :  { %6334 = vmatpush1.bf16.msra.mxu0 %v12745_v13  ;;  %v12787_v13 = vld [vmem:[#allocation14 + $0x1e0] ss:$24 sps:$4 sm:$0xff]  }
 0x2f4   :  { %6377 = vmatpush1.bf16.msra.mxu1 %v12748_v58  ;;  %6335 = vmatprep.subr.bf16.mxu0 %v12753_v14  ;;  %v12790_v58 = vld [vmem:[#allocation14 + $0x4e0] ss:$24 sps:$4 sm:$0xff]   ;;  %v12795_v14 = vld [vmem:[#allocation14 + $0x1b4] ss:$24 sps:$4 sm:$0xff]  }
 0x2f5   :  { %6378 = vmatprep.subr.bf16.mxu1 %v12756_v38  ;;  %v12798_v38 = vld [vmem:[#allocation14 + $0x4b4] ss:$24 sps:$4 sm:$0xff]  }
 0x2f7   :  { %6336 = vmatpush1.bf16.msra.mxu0 %v12751_v59  ;;  %v12793_v59 = vld [vmem:[#allocation14 + $0x1b0] ss:$24 sps:$4 sm:$0xff]  }
 0x2f8   :  { %6379 = vmatpush1.bf16.msra.mxu1 %v12754_v48  ;;  %6337 = vmatprep.subr.bf16.mxu0 %v12759_v45  ;;  %v12796_v48 = vld [vmem:[#allocation14 + $0x4b0] ss:$24 sps:$4 sm:$0xff]   ;;  %v12801_v45 = vld [vmem:[#allocation14 + $0x184] ss:$24 sps:$4 sm:$0xff]  }
 0x2f9   :  { %6380 = vmatprep.subr.bf16.mxu1 %v12762_v8  ;;  %v12804_v8 = vld [vmem:[#allocation14 + $0x484] ss:$24 sps:$4 sm:$0xff]  }
 0x2fb   :  { %6338 = vmatpush2.bf16.msra.mxu0 %v12757_v10  ;;  %v12799_v10 = vld [vmem:[#allocation14 + $0x180] ss:$24 sps:$4 sm:$0xff]  }
 0x2fc   :  { %6381 = vmatpush2.bf16.msra.mxu1 %v12760_v11  ;;  %6339 = vmatprep.subr.bf16.mxu0 %v12765_v60  ;;  %v12802_v11 = vld [vmem:[#allocation14 + $0x480] ss:$24 sps:$4 sm:$0xff]  }
 0x2fd   :  { %6382 = vmatprep.subr.bf16.mxu1 %v12768_v15  ;;  %v236_v60 = vld [vmem:[#allocation7] sm:$0xff]  ;;  %v243_v15 = vld [vmem:[#allocation7 + $0x30] sm:$0xff] }
 0x2ff   :  { %6340 = vmatpush2.bf16.msra.mxu0 %v12763_v6  ;;  %v238_v6 = vld [vmem:[#allocation7 + $0x10] sm:$0xff] }
 0x300   :  { %6383 = vmatpush2.bf16.msra.mxu1 %v12766_v7  ;;  %6341 = vmatprep.subr.bf16.mxu0 %v12771_v16  ;;  %v245_v7 = vld [vmem:[#allocation7 + $0x40] sm:$0xff] }
 0x301   :  { %6384 = vmatprep.subr.bf16.mxu1 %v12774_v18  ;;  %v12807_v16 = vld [vmem:[#allocation14 + $0x754] ss:$24 sps:$4 sm:$0xff]  }
 0x302   :  { %v12810_v18 = vld [vmem:[#allocation14 + $0x15c] ss:$24 sps:$4 sm:$0xff]  }
 0x303   :  { %6342 = vmatpush2.bf16.msra.mxu0 %v12769_v28  ;;  %v241_v28 = vld [vmem:[#allocation7 + $0x28] sm:$0xff] }
 0x304   :  { %6385 = vmatpush2.bf16.msra.mxu1 %v12772_v29  ;;  %6343 = vmatprep.subr.bf16.mxu0 %v12777_v23  ;;  %v248_v29 = vld [vmem:[#allocation7 + $0x58] sm:$0xff] }
 0x305   :  { %6386 = vmatprep.subr.bf16.mxu1 %v12780_v35  ;;  %v12805_v23 = vld [vmem:[#allocation14 + $0x750] ss:$24 sps:$4 sm:$0xff]  }
 0x306   :  { %v12808_v35 = vld [vmem:[#allocation14 + $0x158] ss:$24 sps:$4 sm:$0xff]  }
 0x307   :  { %6344 = vmatpush2.bf16.msra.mxu0 %v12775_v62  ;;  %v14274_v62 = vpack.c.bf16 %v243_v15, %v236_v60  ;;  %v12822_v60 = vld [vmem:[#allocation14 + $0xfc] ss:$24 sps:$4 sm:$0xff]  }
 0x308   :  { %6387 = vmatpush2.bf16.msra.mxu1 %v12778_v31  ;;  %6345 = vmatprep.subr.bf16.mxu0 %v12783_v24  ;;  %v14276_v31 = vpack.c.bf16 %v245_v7, %v238_v6  ;;  %v14278_v24 = vld [vmem:[#allocation13] sm:$0x3f]  ;;  %v12817_v7 = vld [vmem:[#allocation14 + $0x6f0] ss:$24 sps:$4 sm:$0xff]  }
 0x309   :  { %6388 = vmatprep.subr.bf16.mxu1 %v12786_v32  ;;  %v2709_v32 = vrot.slane %v14278_v24, %v14140_v17 }
 0x30b   :  { %6346 = vmatpush2.bf16.msra.mxu0 %v12781_v33  ;;  %v14282_v33 = vpop.f32.mrf.mxu0 }
 0x30c   :  { %6389 = vmatpush2.bf16.msra.mxu1 %v12784_v39  ;;  %6347 = vmatprep.subr.bf16.mxu0 %v12789_v41  ;;  %v14284_v39 = vpop.f32.mrf.mxu1  ;;  %v12813_v41 = vld [vmem:[#allocation14 + $0x724] ss:$24 sps:$4 sm:$0xff]  }
 0x30d   :  { %6390 = vmatprep.subr.bf16.mxu1 %v12792_v52  ;;  %v12816_v52 = vld [vmem:[#allocation14 + $0x12c] ss:$24 sps:$4 sm:$0xff]  }
 0x30f   :  { %6348 = vmatpush2.bf16.msra.mxu0 %v12787_v13  ;;  %v2713_v13 = vrot.slane %v14278_v24, %v14153_v25 }
 0x310   :  { %6391 = vmatpush2.bf16.msra.mxu1 %v12790_v58  ;;  %6349 = vmatprep.subr.bf16.mxu0 %v12795_v14  ;;  %v12811_v58 = vld [vmem:[#allocation14 + $0x720] ss:$24 sps:$4 sm:$0xff]  }
 0x311   :  { %6392 = vmatprep.subr.bf16.mxu1 %v12798_v38  ;;  %v12814_v14 = vld [vmem:[#allocation14 + $0x128] ss:$24 sps:$4 sm:$0xff]   ;;  %v14288_v38 = vpack.c.bf16 %v248_v29, %v241_v28 }
 0x313   :  { %6350 = vmatpush2.bf16.msra.mxu0 %v12793_v59 }
 0x314   :  { %6393 = vmatpush2.bf16.msra.mxu1 %v12796_v48  ;;  %6351 = vmatprep.subr.bf16.mxu0 %v12801_v45 }
 0x315   :  { %6394 = vmatprep.subr.bf16.mxu1 %v12804_v8 }
 0x317   :  { %6352 = vmatpush2.bf16.msra.mxu0 %v12799_v10 }
 0x318   :  { %6395 = vmatpush2.bf16.msra.mxu1 %v12802_v11  ;;  %6407 = vmatprep.subr.bf16.mxu0 %v12807_v16  ;;  %v12819_v11 = vld [vmem:[#allocation14 + $0x6f4] ss:$24 sps:$4 sm:$0xff]   ;;  %v12820_v16 = vld [vmem:[#allocation14 + $0xf8] ss:$24 sps:$4 sm:$0xff]  }
 0x319   :  { %6450 = vmatprep.subr.bf16.mxu1 %v12810_v18 }
 0x31a   :  { %v4331_v59 = vpop.f32.mrf.mxu0  ;;  %6354 = vmatmul.mubr.bf16.vlgmr.msra.gmra.mxu0 %v14274_v62 }
 0x31b   :  { %v4374_v48 = vpop.f32.mrf.mxu1  ;;  %6397 = vmatmul.mubr.bf16.vlgmr.msra.gmra.mxu1 %v14276_v31  ;;  %v4332_v45 = vadd.f32 %v4331_v59, %v2709_v32  ;;  %6408 = vmatpush1.bf16.msra.mxu0 %v12805_v23 }
 0x31c   :  { %6451 = vmatpush1.bf16.msra.mxu1 %v12808_v35  ;;  %v4333_v8 = vpop.f32.mrf.mxu0  ;;  %6409 = vmatprep.subr.bf16.mxu0 %v12813_v41  ;;  %v12825_v41 = vld [vmem:[#allocation14 + $0x6c4] ss:$24 sps:$4 sm:$0xff]  }
 0x31d   :  { %v4376_v10 = vpop.f32.mrf.mxu1  ;;  %6452 = vmatprep.subr.bf16.mxu1 %v12816_v52  ;;  %v14292_v15 = vadd.f32 %v4374_v48, %v4332_v45  ;;  %v4334_v6 = vadd.f32 %v4333_v8, %v2713_v13  ;;  %6439 = vmatprep.mubr.bf16.mxu0 %v14288_v38  ;;  %v12828_v52 = vld [vmem:[#allocation14 + $0xcc] ss:$24 sps:$4 sm:$0xff]  }
 0x31e   :  { %6482 = vmatprep.mubr.bf16.mxu1 %v14255_v20  ;;  %v4335_v18 = vpop.f32.mrf.mxu0 }
 0x31f   :  { %v4378_v28 = vpop.f32.mrf.mxu1  ;;  %v14296_v29 = vadd.f32 %v4376_v10, %v4334_v6  ;;  %v4336_v23 = vadd.f32 %v4335_v18, %v2709_v32  ;;  %6410 = vmatpush1.bf16.msra.mxu0 %v12811_v58  ;;  %v12831_v32 = vld [vmem:[#allocation14 + $0x694] ss:$24 sps:$4 sm:$0xff]   ;;  %v12832_v10 = vld [vmem:[#allocation14 + $0x98] ss:$24 sps:$4 sm:$0xff]   ;;  %v12838_v6 = vld [vmem:[#allocation14 + $0x68] ss:$24 sps:$4 sm:$0xff]  }
 0x320   :  { %6453 = vmatpush1.bf16.msra.mxu1 %v12814_v14  ;;  %v4337_v35 = vpop.f32.mrf.mxu0  ;;  %6411 = vmatprep.subr.bf16.mxu0 %v12819_v11  ;;  %v12834_v58 = vld [vmem:[#allocation14 + $0x9c] ss:$24 sps:$4 sm:$0xff]   ;;  %v12829_v14 = vld [vmem:[#allocation14 + $0x690] ss:$24 sps:$4 sm:$0xff]  }
 0x321   :  { %6454 = vmatprep.subr.bf16.mxu1 %v12822_v60  ;;  %v14298_v59 = vadd.f32 %v4378_v28, %v4336_v23  ;;  %v4338_v48 = vadd.f32 %v4337_v35, %v2713_v13  ;;  %v4380_v45 = vpop.f32.mrf.mxu1  ;;  %v12837_v11 = vld [vmem:[#allocation14 + $0x664] ss:$24 sps:$4 sm:$0xff]   ;;  %v12835_v13 = vld [vmem:[#allocation14 + $0x660] ss:$24 sps:$4 sm:$0xff]   ;;  %v12841_v18 = vld [vmem:[#allocation14 + $0x630] ss:$24 sps:$4 sm:$0xff]  }
 0x322   :  { %v12840_v60 = vld [vmem:[#allocation14 + $0x6c] ss:$24 sps:$4 sm:$0xff]   ;;  %v12844_v28 = vld [vmem:[#allocation14 + $0x38] ss:$24 sps:$4 sm:$0xff]   ;;  %v12850_v35 = vld [vmem:[#allocation14 + $0x8] ss:$24 sps:$4 sm:$0xff]  }
 0x323   :  { %v14300_v8 = vadd.f32 %v4380_v45, %v4338_v48  ;;  %6412 = vmatpush1.bf16.msra.mxu0 %v12817_v7  ;;  %v12843_v7 = vld [vmem:[#allocation14 + $0x634] ss:$24 sps:$4 sm:$0xff]   ;;  %v12847_v23 = vld [vmem:[#allocation14 + $0x600] ss:$24 sps:$4 sm:$0xff]   ;;  %v12853_v48 = vld [vmem:[#allocation14 + $0x8d0] ss:$24 sps:$4 sm:$0xff]  }
 0x324   :  { %6455 = vmatpush1.bf16.msra.mxu1 %v12820_v16  ;;  %6413 = vmatprep.subr.bf16.mxu0 %v12825_v41  ;;  %v12846_v16 = vld [vmem:[#allocation14 + $0x3c] ss:$24 sps:$4 sm:$0xff]   ;;  %v12856_v45 = vld [vmem:[#allocation14 + $0x2d8] ss:$24 sps:$4 sm:$0xff]  }
 0x325   :  { %6456 = vmatprep.subr.bf16.mxu1 %v12828_v52  ;;  %v12855_v41 = vld [vmem:[#allocation14 + $0x8d4] ss:$24 sps:$4 sm:$0xff]  }
 0x326   :  { %v12858_v52 = vld [vmem:[#allocation14 + $0x2dc] ss:$24 sps:$4 sm:$0xff]  }
 0x327   :  { %6414 = vmatpush1.bf16.msra.mxu0 %v12823_v21  ;;  %v12852_v21 = vld [vmem:[#allocation14 + $0xc] ss:$24 sps:$4 sm:$0xff]  }
 0x328   :  { %6457 = vmatpush1.bf16.msra.mxu1 %v12826_v55  ;;  %6415 = vmatprep.subr.bf16.mxu0 %v12831_v32  ;;  %v12849_v55 = vld [vmem:[#allocation14 + $0x604] ss:$24 sps:$4 sm:$0xff]  }
 0x329   :  { %6458 = vmatprep.subr.bf16.mxu1 %v12834_v58  ;;  %v12861_v32 = vld [vmem:[#allocation14 + $0x8a4] ss:$24 sps:$4 sm:$0xff]  }
 0x32a   :  { %v12864_v58 = vld [vmem:[#allocation14 + $0x2ac] ss:$24 sps:$4 sm:$0xff]  }
 0x32b   :  { %6416 = vmatpush1.bf16.msra.mxu0 %v12829_v14  ;;  %v12859_v14 = vld [vmem:[#allocation14 + $0x8a0] ss:$24 sps:$4 sm:$0xff]  }
 0x32c   :  { %6459 = vmatpush1.bf16.msra.mxu1 %v12832_v10  ;;  %6417 = vmatprep.subr.bf16.mxu0 %v12837_v11  ;;  %v12862_v10 = vld [vmem:[#allocation14 + $0x2a8] ss:$24 sps:$4 sm:$0xff]   ;;  %v12867_v11 = vld [vmem:[#allocation14 + $0x874] ss:$24 sps:$4 sm:$0xff]  }
 0x32d   :  { %6460 = vmatprep.subr.bf16.mxu1 %v12840_v60  ;;  %v12870_v60 = vld [vmem:[#allocation14 + $0x27c] ss:$24 sps:$4 sm:$0xff]  }
 0x32f   :  { %6418 = vmatpush1.bf16.msra.mxu0 %v12835_v13  ;;  %v12865_v13 = vld [vmem:[#allocation14 + $0x870] ss:$24 sps:$4 sm:$0xff]  }
 0x330   :  { %6461 = vmatpush1.bf16.msra.mxu1 %v12838_v6  ;;  %6419 = vmatprep.subr.bf16.mxu0 %v12843_v7  ;;  %v12868_v6 = vld [vmem:[#allocation14 + $0x278] ss:$24 sps:$4 sm:$0xff]   ;;  %v12873_v7 = vld [vmem:[#allocation14 + $0x844] ss:$24 sps:$4 sm:$0xff]  }
 0x331   :  { %6462 = vmatprep.subr.bf16.mxu1 %v12846_v16  ;;  %v12876_v16 = vld [vmem:[#allocation14 + $0x24c] ss:$24 sps:$4 sm:$0xff]  }
 0x333   :  { %6420 = vmatpush1.bf16.msra.mxu0 %v12841_v18  ;;  %v12871_v18 = vld [vmem:[#allocation14 + $0x840] ss:$24 sps:$4 sm:$0xff]  }
 0x334   :  { %6463 = vmatpush1.bf16.msra.mxu1 %v12844_v28  ;;  %6421 = vmatprep.subr.bf16.mxu0 %v12849_v55  ;;  %v12874_v28 = vld [vmem:[#allocation14 + $0x248] ss:$24 sps:$4 sm:$0xff]   ;;  %v12879_v55 = vld [vmem:[#allocation14 + $0x814] ss:$24 sps:$4 sm:$0xff]  }
 0x335   :  { %6464 = vmatprep.subr.bf16.mxu1 %v12852_v21  ;;  %v12882_v21 = vld [vmem:[#allocation14 + $0x21c] ss:$24 sps:$4 sm:$0xff]  }
 0x337   :  { %6422 = vmatpush1.bf16.msra.mxu0 %v12847_v23  ;;  %v12877_v23 = vld [vmem:[#allocation14 + $0x810] ss:$24 sps:$4 sm:$0xff]  }
 0x338   :  { %6465 = vmatpush1.bf16.msra.mxu1 %v12850_v35  ;;  %6423 = vmatprep.subr.bf16.mxu0 %v12855_v41  ;;  %v12880_v35 = vld [vmem:[#allocation14 + $0x218] ss:$24 sps:$4 sm:$0xff]   ;;  %v12885_v41 = vld [vmem:[#allocation14 + $0x7e4] ss:$24 sps:$4 sm:$0xff]  }
 0x339   :  { %6466 = vmatprep.subr.bf16.mxu1 %v12858_v52  ;;  %v12888_v52 = vld [vmem:[#allocation14 + $0x1ec] ss:$24 sps:$4 sm:$0xff]  }
 0x33b   :  { %6424 = vmatpush2.bf16.msra.mxu0 %v12853_v48  ;;  %v12883_v48 = vld [vmem:[#allocation14 + $0x7e0] ss:$24 sps:$4 sm:$0xff]  }
 0x33c   :  { %6467 = vmatpush2.bf16.msra.mxu1 %v12856_v45  ;;  %6425 = vmatprep.subr.bf16.mxu0 %v12861_v32  ;;  %v12886_v45 = vld [vmem:[#allocation14 + $0x1e8] ss:$24 sps:$4 sm:$0xff]   ;;  %v12891_v32 = vld [vmem:[#allocation14 + $0x7b4] ss:$24 sps:$4 sm:$0xff]  }
 0x33d   :  { %6468 = vmatprep.subr.bf16.mxu1 %v12864_v58  ;;  %v12894_v58 = vld [vmem:[#allocation14 + $0x1bc] ss:$24 sps:$4 sm:$0xff]  }
 0x33f   :  { %6426 = vmatpush2.bf16.msra.mxu0 %v12859_v14  ;;  %v12889_v14 = vld [vmem:[#allocation14 + $0x7b0] ss:$24 sps:$4 sm:$0xff]  }
 0x340   :  { %6469 = vmatpush2.bf16.msra.mxu1 %v12862_v10  ;;  %6427 = vmatprep.subr.bf16.mxu0 %v12867_v11  ;;  %v12892_v10 = vld [vmem:[#allocation14 + $0x1b8] ss:$24 sps:$4 sm:$0xff]   ;;  %v12897_v11 = vld [vmem:[#allocation14 + $0x784] ss:$24 sps:$4 sm:$0xff]  }
 0x341   :  { %6470 = vmatprep.subr.bf16.mxu1 %v12870_v60  ;;  %v12900_v60 = vld [vmem:[#allocation14 + $0x18c] ss:$24 sps:$4 sm:$0xff]  }
 0x343   :  { %6428 = vmatpush2.bf16.msra.mxu0 %v12865_v13  ;;  %v12895_v13 = vld [vmem:[#allocation14 + $0x780] ss:$24 sps:$4 sm:$0xff]  }
 0x344   :  { %6471 = vmatpush2.bf16.msra.mxu1 %v12868_v6  ;;  %6429 = vmatprep.subr.bf16.mxu0 %v12873_v7  ;;  %v12898_v6 = vld [vmem:[#allocation14 + $0x188] ss:$24 sps:$4 sm:$0xff]   ;;  %v240_v7 = vld [vmem:[#allocation7 + $0x20] sm:$0xff] }
 0x345   :  { %6472 = vmatprep.subr.bf16.mxu1 %v12876_v16  ;;  %v247_v16 = vld [vmem:[#allocation7 + $0x50] sm:$0xff] }
 0x347   :  { %6430 = vmatpush2.bf16.msra.mxu0 %v12871_v18  ;;  %v12903_v18 = vld [vmem:[#allocation14 + $0x45c] ss:$24 sps:$4 sm:$0xff]  }
 0x348   :  { %6473 = vmatpush2.bf16.msra.mxu1 %v12874_v28  ;;  %6431 = vmatprep.subr.bf16.mxu0 %v12879_v55  ;;  %v12906_v28 = vld [vmem:[#allocation14 + $0x75c] ss:$24 sps:$4 sm:$0xff]   ;;  %v14302_v55 = vpack.c.bf16 %v247_v16, %v240_v7  ;;  %v12921_v16 = vld [vmem:[#allocation14 + $0x3cc] ss:$24 sps:$4 sm:$0xff]  }
 0x349   :  { %6474 = vmatprep.subr.bf16.mxu1 %v12882_v21  ;;  %v12901_v21 = vld [vmem:[#allocation14 + $0x458] ss:$24 sps:$4 sm:$0xff]  }
 0x34b   :  { %6432 = vmatpush2.bf16.msra.mxu0 %v12877_v23  ;;  %v12904_v23 = vld [vmem:[#allocation14 + $0x758] ss:$24 sps:$4 sm:$0xff]  }
 0x34c   :  { %6475 = vmatpush2.bf16.msra.mxu1 %v12880_v35  ;;  %6433 = vmatprep.subr.bf16.mxu0 %v12885_v41  ;;  %v12909_v35 = vld [vmem:[#allocation14 + $0x42c] ss:$24 sps:$4 sm:$0xff]  }
 0x34d   :  { %6476 = vmatprep.subr.bf16.mxu1 %v12888_v52  ;;  %v12912_v41 = vld [vmem:[#allocation14 + $0x72c] ss:$24 sps:$4 sm:$0xff]  }
 0x34f   :  { %6434 = vmatpush2.bf16.msra.mxu0 %v12883_v48 }
 0x350   :  { %6477 = vmatpush2.bf16.msra.mxu1 %v12886_v45  ;;  %6435 = vmatprep.subr.bf16.mxu0 %v12891_v32  ;;  %v12907_v45 = vld [vmem:[#allocation14 + $0x428] ss:$24 sps:$4 sm:$0xff]  }
 0x351   :  { %6478 = vmatprep.subr.bf16.mxu1 %v12894_v58  ;;  %v12910_v32 = vld [vmem:[#allocation14 + $0x728] ss:$24 sps:$4 sm:$0xff]  }
 0x353   :  { %6436 = vmatpush2.bf16.msra.mxu0 %v12889_v14  ;;  %v12915_v14 = vld [vmem:[#allocation14 + $0x3fc] ss:$24 sps:$4 sm:$0xff]  }
 0x354   :  { %6479 = vmatpush2.bf16.msra.mxu1 %v12892_v10  ;;  %6437 = vmatprep.subr.bf16.mxu0 %v12897_v11  ;;  %v12918_v10 = vld [vmem:[#allocation14 + $0x6fc] ss:$24 sps:$4 sm:$0xff]  }
 0x355   :  { %6480 = vmatprep.subr.bf16.mxu1 %v12900_v60 }
 0x357   :  { %6438 = vmatpush2.bf16.msra.mxu0 %v12895_v13  ;;  %v12913_v13 = vld [vmem:[#allocation14 + $0x3f8] ss:$24 sps:$4 sm:$0xff]  }
 0x358   :  { %6481 = vmatpush2.bf16.msra.mxu1 %v12898_v6  ;;  %6493 = vmatprep.subr.bf16.mxu0 %v12903_v18  ;;  %v12916_v6 = vld [vmem:[#allocation14 + $0x6f8] ss:$24 sps:$4 sm:$0xff]   ;;  %v12924_v18 = vld [vmem:[#allocation14 + $0x6cc] ss:$24 sps:$4 sm:$0xff]  }
 0x359   :  { %6536 = vmatprep.subr.bf16.mxu1 %v12906_v28  ;;  %v12919_v28 = vld [vmem:[#allocation14 + $0x3c8] ss:$24 sps:$4 sm:$0xff]  }
 0x35a   :  { %v4417_v52 = vpop.f32.mrf.mxu0  ;;  %6440 = vmatmul.mubr.bf16.vlgmr.msra.gmra.mxu0 %v14302_v55 }
 0x35b   :  { %6483 = vmatmul.mubr.bf16.vlgmr.msra.gmra.mxu1 %v14274_v62  ;;  %v14307_v48 = vadd.f32 %v4417_v52, %v14292_v15  ;;  %6494 = vmatpush1.bf16.msra.mxu0 %v12901_v21  ;;  %v12922_v21 = vld [vmem:[#allocation14 + $0x6c8] ss:$24 sps:$4 sm:$0xff]   ;;  %v12933_v52 = vld [vmem:[#allocation14 + $0x36c] ss:$24 sps:$4 sm:$0xff]  }
 0x35c   :  { %6537 = vmatpush1.bf16.msra.mxu1 %v12904_v23  ;;  %v4419_v58 = vpop.f32.mrf.mxu0  ;;  %6495 = vmatprep.subr.bf16.mxu0 %v12909_v35  ;;  %v12930_v23 = vld [vmem:[#allocation14 + $0x69c] ss:$24 sps:$4 sm:$0xff]   ;;  %v12925_v35 = vld [vmem:[#allocation14 + $0x398] ss:$24 sps:$4 sm:$0xff]  }
 0x35d   :  { %6538 = vmatprep.subr.bf16.mxu1 %v12912_v41  ;;  %v14310_v11 = vadd.f32 %v4419_v58, %v14296_v29  ;;  %6525 = vmatprep.mubr.bf16.mxu0 %v14257_v63  ;;  %v12928_v41 = vld [vmem:[#allocation14 + $0x698] ss:$24 sps:$4 sm:$0xff]   ;;  %v12939_v58 = vld [vmem:[#allocation14 + $0x33c] ss:$24 sps:$4 sm:$0xff]  }
 0x35e   :  { %6568 = vmatprep.mubr.bf16.mxu1 %v14288_v38  ;;  %v4421_v60 = vpop.f32.mrf.mxu0 }
 0x35f   :  { %v14315_v15 = vadd.f32 %v4421_v60, %v14298_v59  ;;  %6496 = vmatpush1.bf16.msra.mxu0 %v12907_v45  ;;  %v12927_v59 = vld [vmem:[#allocation14 + $0x39c] ss:$24 sps:$4 sm:$0xff]   ;;  %v12936_v45 = vld [vmem:[#allocation14 + $0x66c] ss:$24 sps:$4 sm:$0xff]   ;;  %v12940_v60 = vld [vmem:[#allocation14 + $0x638] ss:$24 sps:$4 sm:$0xff]  }
 0x360   :  { %6539 = vmatpush1.bf16.msra.mxu1 %v12910_v32  ;;  %v4423_v7 = vpop.f32.mrf.mxu0  ;;  %6497 = vmatprep.subr.bf16.mxu0 %v12915_v14  ;;  %v12934_v32 = vld [vmem:[#allocation14 + $0x668] ss:$24 sps:$4 sm:$0xff]   ;;  %v12942_v14 = vld [vmem:[#allocation14 + $0x63c] ss:$24 sps:$4 sm:$0xff]  }
 0x361   :  { %6540 = vmatprep.subr.bf16.mxu1 %v12918_v10  ;;  %v14318_v29 = vadd.f32 %v4423_v7, %v14300_v8  ;;  %v12931_v8 = vld [vmem:[#allocation14 + $0x368] ss:$24 sps:$4 sm:$0xff]   ;;  %v12937_v10 = vld [vmem:[#allocation14 + $0x338] ss:$24 sps:$4 sm:$0xff]  }
 0x362   :  { %v12943_v7 = vld [vmem:[#allocation14 + $0x308] ss:$24 sps:$4 sm:$0xff]  }
 0x363   :  { %14815 = vst [vmem:[#allocation37_spill] sm:$0xff] %v14318_v29  ;;  %6498 = vmatpush1.bf16.msra.mxu0 %v12913_v13  ;;  %v12945_v13 = vld [vmem:[#allocation14 + $0x30c] ss:$24 sps:$4 sm:$0xff]  }
 0x364   :  { %6541 = vmatpush1.bf16.msra.mxu1 %v12916_v6  ;;  %6499 = vmatprep.subr.bf16.mxu0 %v12921_v16  ;;  %v12948_v6 = vld [vmem:[#allocation14 + $0x60c] ss:$24 sps:$4 sm:$0xff]   ;;  %v12946_v16 = vld [vmem:[#allocation14 + $0x608] ss:$24 sps:$4 sm:$0xff]  }
 0x365   :  { %6542 = vmatprep.subr.bf16.mxu1 %v12924_v18  ;;  %v12951_v18 = vld [vmem:[#allocation14 + $0x5dc] ss:$24 sps:$4 sm:$0xff]  }
 0x367   :  { %6500 = vmatpush1.bf16.msra.mxu0 %v12919_v28  ;;  %v12954_v28 = vld [vmem:[#allocation14 + $0x8dc] ss:$24 sps:$4 sm:$0xff]  }
 0x368   :  { %6543 = vmatpush1.bf16.msra.mxu1 %v12922_v21  ;;  %6501 = vmatprep.subr.bf16.mxu0 %v12927_v59  ;;  %v12949_v21 = vld [vmem:[#allocation14 + $0x5d8] ss:$24 sps:$4 sm:$0xff]  }
 0x369   :  { %6544 = vmatprep.subr.bf16.mxu1 %v12930_v23  ;;  %v12952_v59 = vld [vmem:[#allocation14 + $0x8d8] ss:$24 sps:$4 sm:$0xff]   ;;  %v12957_v23 = vld [vmem:[#allocation14 + $0x5ac] ss:$24 sps:$4 sm:$0xff]  }
 0x36b   :  { %6502 = vmatpush1.bf16.msra.mxu0 %v12925_v35  ;;  %v12960_v35 = vld [vmem:[#allocation14 + $0x8ac] ss:$24 sps:$4 sm:$0xff]  }
 0x36c   :  { %6545 = vmatpush1.bf16.msra.mxu1 %v12928_v41  ;;  %6503 = vmatprep.subr.bf16.mxu0 %v12933_v52  ;;  %v12955_v41 = vld [vmem:[#allocation14 + $0x5a8] ss:$24 sps:$4 sm:$0xff]  }
 0x36d   :  { %6546 = vmatprep.subr.bf16.mxu1 %v12936_v45  ;;  %v12958_v52 = vld [vmem:[#allocation14 + $0x8a8] ss:$24 sps:$4 sm:$0xff]   ;;  %v12963_v45 = vld [vmem:[#allocation14 + $0x57c] ss:$24 sps:$4 sm:$0xff]  }
 0x36f   :  { %6504 = vmatpush1.bf16.msra.mxu0 %v12931_v8  ;;  %v12966_v8 = vld [vmem:[#allocation14 + $0x87c] ss:$24 sps:$4 sm:$0xff]  }
 0x370   :  { %6547 = vmatpush1.bf16.msra.mxu1 %v12934_v32  ;;  %6505 = vmatprep.subr.bf16.mxu0 %v12939_v58  ;;  %v12961_v32 = vld [vmem:[#allocation14 + $0x578] ss:$24 sps:$4 sm:$0xff]  }
 0x371   :  { %6548 = vmatprep.subr.bf16.mxu1 %v12942_v14  ;;  %v12964_v58 = vld [vmem:[#allocation14 + $0x878] ss:$24 sps:$4 sm:$0xff]   ;;  %v12969_v14 = vld [vmem:[#allocation14 + $0x54c] ss:$24 sps:$4 sm:$0xff]  }
 0x373   :  { %6506 = vmatpush1.bf16.msra.mxu0 %v12937_v10  ;;  %v12972_v10 = vld [vmem:[#allocation14 + $0x84c] ss:$24 sps:$4 sm:$0xff]  }
 0x374   :  { %6549 = vmatpush1.bf16.msra.mxu1 %v12940_v60  ;;  %6507 = vmatprep.subr.bf16.mxu0 %v12945_v13  ;;  %v12967_v60 = vld [vmem:[#allocation14 + $0x548] ss:$24 sps:$4 sm:$0xff]  }
 0x375   :  { %6550 = vmatprep.subr.bf16.mxu1 %v12948_v6  ;;  %v12970_v13 = vld [vmem:[#allocation14 + $0x848] ss:$24 sps:$4 sm:$0xff]   ;;  %v12975_v6 = vld [vmem:[#allocation14 + $0x51c] ss:$24 sps:$4 sm:$0xff]  }
 0x377   :  { %6508 = vmatpush1.bf16.msra.mxu0 %v12943_v7  ;;  %v12978_v7 = vld [vmem:[#allocation14 + $0x81c] ss:$24 sps:$4 sm:$0xff]  }
 0x378   :  { %6551 = vmatpush1.bf16.msra.mxu1 %v12946_v16  ;;  %6509 = vmatprep.subr.bf16.mxu0 %v12951_v18  ;;  %v12973_v16 = vld [vmem:[#allocation14 + $0x518] ss:$24 sps:$4 sm:$0xff]  }
 0x379   :  { %6552 = vmatprep.subr.bf16.mxu1 %v12954_v28  ;;  %v12976_v18 = vld [vmem:[#allocation14 + $0x818] ss:$24 sps:$4 sm:$0xff]   ;;  %v12981_v28 = vld [vmem:[#allocation14 + $0x4ec] ss:$24 sps:$4 sm:$0xff]  }
 0x37b   :  { %6510 = vmatpush2.bf16.msra.mxu0 %v12949_v21  ;;  %v12984_v21 = vld [vmem:[#allocation14 + $0x7ec] ss:$24 sps:$4 sm:$0xff]  }
 0x37c   :  { %6553 = vmatpush2.bf16.msra.mxu1 %v12952_v59  ;;  %6511 = vmatprep.subr.bf16.mxu0 %v12957_v23  ;;  %v12979_v59 = vld [vmem:[#allocation14 + $0x4e8] ss:$24 sps:$4 sm:$0xff]  }
 0x37d   :  { %6554 = vmatprep.subr.bf16.mxu1 %v12960_v35  ;;  %v12982_v23 = vld [vmem:[#allocation14 + $0x7e8] ss:$24 sps:$4 sm:$0xff]   ;;  %v4460_v35 = vpop.f32.mrf.mxu1 }
 0x37f   :  { %6512 = vmatpush2.bf16.msra.mxu0 %v12955_v41  ;;  %v12987_v41 = vld [vmem:[#allocation14 + $0x4bc] ss:$24 sps:$4 sm:$0xff]  }
 0x380   :  { %6555 = vmatpush2.bf16.msra.mxu1 %v12958_v52  ;;  %6513 = vmatprep.subr.bf16.mxu0 %v12963_v45  ;;  %v12990_v52 = vld [vmem:[#allocation14 + $0x7bc] ss:$24 sps:$4 sm:$0xff]   ;;  %v12985_v45 = vld [vmem:[#allocation14 + $0x4b8] ss:$24 sps:$4 sm:$0xff]  }
 0x381   :  { %6556 = vmatprep.subr.bf16.mxu1 %v12966_v8  ;;  %v12988_v8 = vld [vmem:[#allocation14 + $0x7b8] ss:$24 sps:$4 sm:$0xff]  }
 0x383   :  { %6514 = vmatpush2.bf16.msra.mxu0 %v12961_v32  ;;  %v4462_v32 = vpop.f32.mrf.mxu1 }
 0x384   :  { %6557 = vmatpush2.bf16.msra.mxu1 %v12964_v58  ;;  %6515 = vmatprep.subr.bf16.mxu0 %v12969_v14  ;;  %v12993_v58 = vld [vmem:[#allocation14 + $0x48c] ss:$24 sps:$4 sm:$0xff]  }
 0x385   :  { %6558 = vmatprep.subr.bf16.mxu1 %v12972_v10  ;;  %v12996_v14 = vld [vmem:[#allocation14 + $0x78c] ss:$24 sps:$4 sm:$0xff]   ;;  %v12991_v10 = vld [vmem:[#allocation14 + $0x488] ss:$24 sps:$4 sm:$0xff]  }
 0x387   :  { %6516 = vmatpush2.bf16.msra.mxu0 %v12967_v60  ;;  %v12994_v60 = vld [vmem:[#allocation14 + $0x788] ss:$24 sps:$4 sm:$0xff]  }
 0x388   :  { %6559 = vmatpush2.bf16.msra.mxu1 %v12970_v13  ;;  %6517 = vmatprep.subr.bf16.mxu0 %v12975_v6  ;;  %v4464_v13 = vpop.f32.mrf.mxu1  ;;  %v12999_v6 = vld [vmem:[#allocation14 + $0x164] ss:$24 sps:$4 sm:$0xff]  }
 0x389   :  { %6560 = vmatprep.subr.bf16.mxu1 %v12978_v7  ;;  %v13002_v7 = vld [vmem:[#allocation14 + $0x464] ss:$24 sps:$4 sm:$0xff]  }
 0x38b   :  { %6518 = vmatpush2.bf16.msra.mxu0 %v12973_v16  ;;  %v2717_v16 = vrot.slane %v14278_v24, %v14204_v1 }
 0x38c   :  { %6561 = vmatpush2.bf16.msra.mxu1 %v12976_v18  ;;  %6519 = vmatprep.subr.bf16.mxu0 %v12981_v28  ;;  %v2721_v18 = vrot.slane %v14278_v24, %v14207_v9  ;;  %v12997_v28 = vld [vmem:[#allocation14 + $0x160] ss:$24 sps:$4 sm:$0xff]   ;;  %v13003_v24 = vld [vmem:[#allocation14 + $0x130] ss:$24 sps:$4 sm:$0xff]  }
 0x38d   :  { %6562 = vmatprep.subr.bf16.mxu1 %v12984_v21  ;;  %v13000_v21 = vld [vmem:[#allocation14 + $0x460] ss:$24 sps:$4 sm:$0xff]   ;;  %v4465_v29 = vadd.f32 %v4464_v13, %v2717_v16  ;;  %v13017_v13 = vld [vmem:[#allocation14 + $0xd4] ss:$24 sps:$4 sm:$0xff]  }
 0x38f   :  { %6520 = vmatpush2.bf16.msra.mxu0 %v12979_v59  ;;  %v4466_v59 = vpop.f32.mrf.mxu1 }
 0x390   :  { %6563 = vmatpush2.bf16.msra.mxu1 %v12982_v23  ;;  %6521 = vmatprep.subr.bf16.mxu0 %v12987_v41  ;;  %v13005_v23 = vld [vmem:[#allocation14 + $0x134] ss:$24 sps:$4 sm:$0xff]  }
 0x391   :  { %6564 = vmatprep.subr.bf16.mxu1 %v12990_v52  ;;  %v13008_v41 = vld [vmem:[#allocation14 + $0x434] ss:$24 sps:$4 sm:$0xff]   ;;  %v4461_v52 = vadd.f32 %v4460_v35, %v2717_v16 }
 0x392   :  { %v13020_v16 = vld [vmem:[#allocation14 + $0x3d4] ss:$24 sps:$4 sm:$0xff]  }
 0x393   :  { %6522 = vmatpush2.bf16.msra.mxu0 %v12985_v45 }
 0x394   :  { %6565 = vmatpush2.bf16.msra.mxu1 %v12988_v8  ;;  %6523 = vmatprep.subr.bf16.mxu0 %v12993_v58  ;;  %v4463_v58 = vadd.f32 %v4462_v32, %v2721_v18 }
 0x395   :  { %6566 = vmatprep.subr.bf16.mxu1 %v12996_v14 }
 0x397   :  { %6524 = vmatpush2.bf16.msra.mxu0 %v12991_v10  ;;  %v13006_v10 = vld [vmem:[#allocation14 + $0x430] ss:$24 sps:$4 sm:$0xff]  }
 0x398   :  { %6567 = vmatpush2.bf16.msra.mxu1 %v12994_v60  ;;  %6579 = vmatprep.subr.bf16.mxu0 %v12999_v6  ;;  %v13011_v6 = vld [vmem:[#allocation14 + $0x104] ss:$24 sps:$4 sm:$0xff]  }
 0x399   :  { %6622 = vmatprep.subr.bf16.mxu1 %v13002_v7  ;;  %v13014_v7 = vld [vmem:[#allocation14 + $0x404] ss:$24 sps:$4 sm:$0xff]  }
 0x39a   :  { %v4503_v45 = vpop.f32.mrf.mxu0  ;;  %6526 = vmatmul.mubr.bf16.vlgmr.msra.gmra.mxu0 %v14276_v31 }
 0x39b   :  { %v4546_v8 = vpop.f32.mrf.mxu1  ;;  %6569 = vmatmul.mubr.bf16.vlgmr.msra.gmra.mxu1 %v14302_v55  ;;  %v4504_v14 = vadd.f32 %v4503_v45, %v4461_v52  ;;  %6580 = vmatpush1.bf16.msra.mxu0 %v12997_v28  ;;  %v4467_v28 = vadd.f32 %v4466_v59, %v2721_v18  ;;  %v13026_v18 = vld [vmem:[#allocation14 + $0x3a4] ss:$24 sps:$4 sm:$0xff]   ;;  %v13021_v59 = vld [vmem:[#allocation14 + $0xa0] ss:$24 sps:$4 sm:$0xff]  }
 0x39c   :  { %6623 = vmatpush1.bf16.msra.mxu1 %v13000_v21  ;;  %v4505_v60 = vpop.f32.mrf.mxu0  ;;  %6581 = vmatprep.subr.bf16.mxu0 %v13005_v23  ;;  %v13009_v23 = vld [vmem:[#allocation14 + $0x100] ss:$24 sps:$4 sm:$0xff]  }
 0x39d   :  { %v4548_v61 = vpop.f32.mrf.mxu1  ;;  %6624 = vmatprep.subr.bf16.mxu1 %v13008_v41  ;;  %v14326_v35 = vadd.f32 %v4546_v8, %v4504_v14  ;;  %v4506_v2 = vadd.f32 %v4505_v60, %v4463_v58  ;;  %6611 = vmatprep.mubr.bf16.mxu0 %v14255_v20  ;;  %v13012_v41 = vld [vmem:[#allocation14 + $0x400] ss:$24 sps:$4 sm:$0xff]   ;;  %v13030_v60 = vld [vmem:[#allocation14 + $0x370] ss:$24 sps:$4 sm:$0xff]  }
 0x39e   :  { %6654 = vmatprep.mubr.bf16.mxu1 %v14257_v63  ;;  %v4507_v32 = vpop.f32.mrf.mxu0  ;;  %v13024_v14 = vld [vmem:[#allocation14 + $0x3a0] ss:$24 sps:$4 sm:$0xff]  }
 0x39f   :  { %v4550_v52 = vpop.f32.mrf.mxu1  ;;  %v14330_v21 = vadd.f32 %v4548_v61, %v4506_v2  ;;  %v4508_v45 = vadd.f32 %v4507_v32, %v4465_v29  ;;  %6582 = vmatpush1.bf16.msra.mxu0 %v13003_v24  ;;  %v13015_v2 = vld [vmem:[#allocation14 + $0xd0] ss:$24 sps:$4 sm:$0xff]   ;;  %v13023_v29 = vld [vmem:[#allocation14 + $0xa4] ss:$24 sps:$4 sm:$0xff]   ;;  %v13029_v24 = vld [vmem:[#allocation14 + $0x74] ss:$24 sps:$4 sm:$0xff]  }
 0x3a0   :  { %6625 = vmatpush1.bf16.msra.mxu1 %v13006_v10  ;;  %v4509_v34 = vpop.f32.mrf.mxu0  ;;  %6583 = vmatprep.subr.bf16.mxu0 %v13011_v6  ;;  %v13018_v61 = vld [vmem:[#allocation14 + $0x3d0] ss:$24 sps:$4 sm:$0xff]   ;;  %v13032_v10 = vld [vmem:[#allocation14 + $0x374] ss:$24 sps:$4 sm:$0xff]   ;;  %v13035_v6 = vld [vmem:[#allocation14 + $0x44] ss:$24 sps:$4 sm:$0xff]  }
 0x3a1   :  { %6626 = vmatprep.subr.bf16.mxu1 %v13014_v7  ;;  %v14332_v8 = vadd.f32 %v4550_v52, %v4508_v45  ;;  %v4510_v20 = vadd.f32 %v4509_v34, %v4467_v28  ;;  %v4552_v58 = vpop.f32.mrf.mxu1  ;;  %v13027_v34 = vld [vmem:[#allocation14 + $0x70] ss:$24 sps:$4 sm:$0xff]   ;;  %v13038_v7 = vld [vmem:[#allocation14 + $0x344] ss:$24 sps:$4 sm:$0xff]   ;;  %v13033_v32 = vld [vmem:[#allocation14 + $0x40] ss:$24 sps:$4 sm:$0xff]  }
 0x3a2   :  { %v13036_v52 = vld [vmem:[#allocation14 + $0x340] ss:$24 sps:$4 sm:$0xff]   ;;  %v13041_v28 = vld [vmem:[#allocation14 + $0x14] ss:$24 sps:$4 sm:$0xff]  }
 0x3a3   :  { %v14334_v63 = vadd.f32 %v4552_v58, %v4510_v20  ;;  %6584 = vmatpush1.bf16.msra.mxu0 %v13009_v23  ;;  %v13044_v45 = vld [vmem:[#allocation14 + $0x314] ss:$24 sps:$4 sm:$0xff]   ;;  %v13039_v23 = vld [vmem:[#allocation14 + $0x10] ss:$24 sps:$4 sm:$0xff]   ;;  %v13045_v20 = vld [vmem:[#allocation14 + $0x2e0] ss:$24 sps:$4 sm:$0xff]  }
 0x3a4   :  { %6627 = vmatpush1.bf16.msra.mxu1 %v13012_v41  ;;  %6585 = vmatprep.subr.bf16.mxu0 %v13017_v13  ;;  %v13042_v41 = vld [vmem:[#allocation14 + $0x310] ss:$24 sps:$4 sm:$0xff]   ;;  %v13047_v13 = vld [vmem:[#allocation14 + $0x2e4] ss:$24 sps:$4 sm:$0xff]   ;;  %v13048_v58 = vld [vmem:[#allocation14 + $0x5e0] ss:$24 sps:$4 sm:$0xff]  }
 0x3a5   :  { %6628 = vmatprep.subr.bf16.mxu1 %v13020_v16  ;;  %v13050_v16 = vld [vmem:[#allocation14 + $0x5e4] ss:$24 sps:$4 sm:$0xff]  }
 0x3a7   :  { %6586 = vmatpush1.bf16.msra.mxu0 %v13015_v2  ;;  %v13053_v2 = vld [vmem:[#allocation14 + $0x2b4] ss:$24 sps:$4 sm:$0xff]  }
 0x3a8   :  { %6629 = vmatpush1.bf16.msra.mxu1 %v13018_v61  ;;  %6587 = vmatprep.subr.bf16.mxu0 %v13023_v29  ;;  %v13056_v61 = vld [vmem:[#allocation14 + $0x5b4] ss:$24 sps:$4 sm:$0xff]   ;;  %v13051_v29 = vld [vmem:[#allocation14 + $0x2b0] ss:$24 sps:$4 sm:$0xff]  }
 0x3a9   :  { %6630 = vmatprep.subr.bf16.mxu1 %v13026_v18  ;;  %v13054_v18 = vld [vmem:[#allocation14 + $0x5b0] ss:$24 sps:$4 sm:$0xff]  }
 0x3ab   :  { %6588 = vmatpush1.bf16.msra.mxu0 %v13021_v59  ;;  %v13059_v59 = vld [vmem:[#allocation14 + $0x284] ss:$24 sps:$4 sm:$0xff]  }
 0x3ac   :  { %6631 = vmatpush1.bf16.msra.mxu1 %v13024_v14  ;;  %6589 = vmatprep.subr.bf16.mxu0 %v13029_v24  ;;  %v13062_v14 = vld [vmem:[#allocation14 + $0x584] ss:$24 sps:$4 sm:$0xff]   ;;  %v13057_v24 = vld [vmem:[#allocation14 + $0x280] ss:$24 sps:$4 sm:$0xff]  }
 0x3ad   :  { %6632 = vmatprep.subr.bf16.mxu1 %v13032_v10  ;;  %v13060_v10 = vld [vmem:[#allocation14 + $0x580] ss:$24 sps:$4 sm:$0xff]  }
 0x3af   :  { %6590 = vmatpush1.bf16.msra.mxu0 %v13027_v34  ;;  %v13065_v34 = vld [vmem:[#allocation14 + $0x254] ss:$24 sps:$4 sm:$0xff]  }
 0x3b0   :  { %6633 = vmatpush1.bf16.msra.mxu1 %v13030_v60  ;;  %6591 = vmatprep.subr.bf16.mxu0 %v13035_v6  ;;  %v13068_v60 = vld [vmem:[#allocation14 + $0x554] ss:$24 sps:$4 sm:$0xff]   ;;  %v13063_v6 = vld [vmem:[#allocation14 + $0x250] ss:$24 sps:$4 sm:$0xff]  }
 0x3b1   :  { %6634 = vmatprep.subr.bf16.mxu1 %v13038_v7  ;;  %v13066_v7 = vld [vmem:[#allocation14 + $0x550] ss:$24 sps:$4 sm:$0xff]  }
 0x3b3   :  { %6592 = vmatpush1.bf16.msra.mxu0 %v13033_v32  ;;  %v13071_v32 = vld [vmem:[#allocation14 + $0x224] ss:$24 sps:$4 sm:$0xff]  }
 0x3b4   :  { %6635 = vmatpush1.bf16.msra.mxu1 %v13036_v52  ;;  %6593 = vmatprep.subr.bf16.mxu0 %v13041_v28  ;;  %v13074_v52 = vld [vmem:[#allocation14 + $0x524] ss:$24 sps:$4 sm:$0xff]   ;;  %v13069_v28 = vld [vmem:[#allocation14 + $0x220] ss:$24 sps:$4 sm:$0xff]  }
 0x3b5   :  { %6636 = vmatprep.subr.bf16.mxu1 %v13044_v45  ;;  %v13072_v45 = vld [vmem:[#allocation14 + $0x520] ss:$24 sps:$4 sm:$0xff]  }
 0x3b7   :  { %6594 = vmatpush1.bf16.msra.mxu0 %v13039_v23  ;;  %v13077_v23 = vld [vmem:[#allocation14 + $0x1f4] ss:$24 sps:$4 sm:$0xff]  }
 0x3b8   :  { %6637 = vmatpush1.bf16.msra.mxu1 %v13042_v41  ;;  %6595 = vmatprep.subr.bf16.mxu0 %v13047_v13  ;;  %v13080_v41 = vld [vmem:[#allocation14 + $0x4f4] ss:$24 sps:$4 sm:$0xff]   ;;  %v13075_v13 = vld [vmem:[#allocation14 + $0x1f0] ss:$24 sps:$4 sm:$0xff]  }
 0x3b9   :  { %6638 = vmatprep.subr.bf16.mxu1 %v13050_v16  ;;  %v13078_v16 = vld [vmem:[#allocation14 + $0x4f0] ss:$24 sps:$4 sm:$0xff]  }
 0x3bb   :  { %6596 = vmatpush2.bf16.msra.mxu0 %v13045_v20  ;;  %v13083_v20 = vld [vmem:[#allocation14 + $0x1c4] ss:$24 sps:$4 sm:$0xff]  }
 0x3bc   :  { %6639 = vmatpush2.bf16.msra.mxu1 %v13048_v58  ;;  %6597 = vmatprep.subr.bf16.mxu0 %v13053_v2  ;;  %v13086_v58 = vld [vmem:[#allocation14 + $0x4c4] ss:$24 sps:$4 sm:$0xff]   ;;  %v13081_v2 = vld [vmem:[#allocation14 + $0x1c0] ss:$24 sps:$4 sm:$0xff]  }
 0x3bd   :  { %6640 = vmatprep.subr.bf16.mxu1 %v13056_v61  ;;  %v13084_v61 = vld [vmem:[#allocation14 + $0x4c0] ss:$24 sps:$4 sm:$0xff]  }
 0x3bf   :  { %6598 = vmatpush2.bf16.msra.mxu0 %v13051_v29  ;;  %v4205_v29 = vadd.f32 %v14230_v44, %v14241_v43 }
 0x3c0   :  { %6641 = vmatpush2.bf16.msra.mxu1 %v13054_v18  ;;  %6599 = vmatprep.subr.bf16.mxu0 %v13059_v59  ;;  %v13089_v18 = vld [vmem:[#allocation14 + $0x194] ss:$24 sps:$4 sm:$0xff]  }
 0x3c1   :  { %6642 = vmatprep.subr.bf16.mxu1 %v13062_v14  ;;  %v13092_v59 = vld [vmem:[#allocation14 + $0x494] ss:$24 sps:$4 sm:$0xff]   ;;  %v4248_v14 = vadd.f32 %v14265_v4, %v4205_v29  ;;  %v13093_v4 = vld [vmem:[#allocation14 + $0x760] ss:$24 sps:$4 sm:$0xff]  }
 0x3c2   :  { %v13105_v29 = vld [vmem:[#allocation14 + $0x6a0] ss:$24 sps:$4 sm:$0xff]  }
 0x3c3   :  { %6600 = vmatpush2.bf16.msra.mxu0 %v13057_v24  ;;  %v4203_v24 = vadd.f32 %v14223_v27, %v14233_v57  ;;  %v14345_v43 = vadd.f32 %v14267_v5, %v4248_v14  ;;  %v13098_v57 = vld [vmem:[#allocation14 + $0x734] ss:$24 sps:$4 sm:$0xff]   ;;  %v14356_v5 = vld [vmem:[#allocation16] sm:$0x3f] }
 0x3c4   :  { %6643 = vmatpush2.bf16.msra.mxu1 %v13060_v10  ;;  %6601 = vmatprep.subr.bf16.mxu0 %v13065_v34  ;;  %v13087_v10 = vld [vmem:[#allocation14 + $0x190] ss:$24 sps:$4 sm:$0xff]   ;;  %v13111_v14 = vld [vmem:[#allocation14 + $0x640] ss:$24 sps:$4 sm:$0xff]  }
 0x3c5   :  { %6644 = vmatprep.subr.bf16.mxu1 %v13068_v60  ;;  %v13090_v34 = vld [vmem:[#allocation14 + $0x490] ss:$24 sps:$4 sm:$0xff]   ;;  %v2052_v60 = vadd.f32 %v14117_v50, %v14129_v56  ;;  %v4246_v44 = vadd.f32 %v14259_v37, %v4203_v24  ;;  %v2050_v56 = vadd.f32 %v14108_v46, %v14123_v12  ;;  %v13116_v24 = vld [vmem:[#allocation14 + $0x614] ss:$24 sps:$4 sm:$0xff]  }
 0x3c7   :  { %6602 = vmatpush2.bf16.msra.mxu0 %v13063_v6  ;;  %v13095_v6 = vld [vmem:[#allocation14 + $0x764] ss:$24 sps:$4 sm:$0xff]   ;;  %v2095_v27 = vadd.f32 %v14119_v51, %v2052_v60  ;;  %v4289_v50 = vadd.f32 %v14261_v3, %v4246_v44  ;;  %v13096_v51 = vld [vmem:[#allocation14 + $0x730] ss:$24 sps:$4 sm:$0xff]   ;;  %v14372_v3 = vrot.slane %v14356_v5, %v14102_v42  ;;  %v13117_v60 = vld [vmem:[#allocation14 + $0x8e0] ss:$24 sps:$4 sm:$0xff]  }
 0x3c8   :  { %6645 = vmatpush2.bf16.msra.mxu1 %v13066_v7  ;;  %6603 = vmatprep.subr.bf16.mxu0 %v13071_v32  ;;  %v13120_v44 = vld [vmem:[#allocation14 + $0x8b0] ss:$24 sps:$4 sm:$0xff]  }
 0x3c9   :  { %6646 = vmatprep.subr.bf16.mxu1 %v13074_v52  ;;  %v14354_v37 = vadd.f32 %v14155_v26, %v2095_v27  ;;  %v13101_v26 = vld [vmem:[#allocation14 + $0x704] ss:$24 sps:$4 sm:$0xff]   ;;  %v13123_v27 = vld [vmem:[#allocation14 + $0x880] ss:$24 sps:$4 sm:$0xff]  }
 0x3cb   :  { %6604 = vmatpush2.bf16.msra.mxu0 %v13069_v28  ;;  %v14378_v28 = vrot.slane %v14356_v5, %v14115_v54 }
 0x3cc   :  { %6647 = vmatpush2.bf16.msra.mxu1 %v13072_v45  ;;  %6605 = vmatprep.subr.bf16.mxu0 %v13077_v23  ;;  %v13099_v23 = vld [vmem:[#allocation14 + $0x700] ss:$24 sps:$4 sm:$0xff]  }
 0x3cd   :  { %6648 = vmatprep.subr.bf16.mxu1 %v13080_v41 }
 0x3cf   :  { %6606 = vmatpush2.bf16.msra.mxu0 %v13075_v13 }
 0x3d0   :  { %6649 = vmatpush2.bf16.msra.mxu1 %v13078_v16  ;;  %6607 = vmatprep.subr.bf16.mxu0 %v13083_v20  ;;  %v13104_v16 = vld [vmem:[#allocation14 + $0x6d4] ss:$24 sps:$4 sm:$0xff]  }
 0x3d1   :  { %6650 = vmatprep.subr.bf16.mxu1 %v13086_v58 }
 0x3d3   :  { %6608 = vmatpush2.bf16.msra.mxu0 %v13081_v2  ;;  %v13102_v2 = vld [vmem:[#allocation14 + $0x6d0] ss:$24 sps:$4 sm:$0xff]  }
 0x3d4   :  { %6651 = vmatpush2.bf16.msra.mxu1 %v13084_v61  ;;  %6609 = vmatprep.subr.bf16.mxu0 %v13089_v18  ;;  %v13107_v61 = vld [vmem:[#allocation14 + $0x6a4] ss:$24 sps:$4 sm:$0xff]   ;;  %v13110_v18 = vld [vmem:[#allocation14 + $0x674] ss:$24 sps:$4 sm:$0xff]  }
 0x3d5   :  { %6652 = vmatprep.subr.bf16.mxu1 %v13092_v59  ;;  %v13113_v59 = vld [vmem:[#allocation14 + $0x644] ss:$24 sps:$4 sm:$0xff]  }
 0x3d7   :  { %6610 = vmatpush2.bf16.msra.mxu0 %v13087_v10  ;;  %v13114_v10 = vld [vmem:[#allocation14 + $0x610] ss:$24 sps:$4 sm:$0xff]  }
 0x3d8   :  { %6653 = vmatpush2.bf16.msra.mxu1 %v13090_v34  ;;  %6665 = vmatprep.subr.bf16.mxu0 %v13095_v6  ;;  %v13119_v34 = vld [vmem:[#allocation14 + $0x8e4] ss:$24 sps:$4 sm:$0xff]   ;;  %v13122_v6 = vld [vmem:[#allocation14 + $0x8b4] ss:$24 sps:$4 sm:$0xff]  }
 0x3d9   :  { %11501 = vmatprep.subr.msk.mxu1 %vm6708_vm0, %v14345_v43 }
 0x3da   :  { %v14358_v7 = vpop.f32.mrf.mxu0  ;;  %6612 = vmatmul.mubr.bf16.vlgmr.msra.gmra.mxu0 %v14274_v62  ;;  %v2093_v62 = vadd.f32 %v14110_v47, %v2050_v56  ;;  %v13131_v56 = vld [vmem:[#allocation14 + $0x824] ss:$24 sps:$4 sm:$0xff]  }
 0x3db   :  { %v14360_v32 = vpop.f32.mrf.mxu1  ;;  %6655 = vmatmul.mubr.bf16.vlgmr.msra.gmra.mxu1 %v14276_v31  ;;  %6666 = vmatpush1.bf16.msra.mxu0 %v13093_v4  ;;  %v13125_v4 = vld [vmem:[#allocation14 + $0x884] ss:$24 sps:$4 sm:$0xff]  }
 0x3dc   :  { %6746 = vmatpush1.xpose.msra.mxu1 %v4289_v50  ;;  %11502 = vmatprep.mubr.msk.f32.mxu1 %vm6708_vm0, %v14354_v37  ;;  %v14366_v46 = vpop.f32.mrf.mxu0  ;;  %v2136_v41 = vadd.f32 %v14146_v22, %v2093_v62  ;;  %v13108_v22 = vld [vmem:[#allocation14 + $0x670] ss:$24 sps:$4 sm:$0xff]  }
 0x3dd   :  { %v14368_v12 = vpop.f32.mrf.mxu1  ;;  %6667 = vmatprep.subr.bf16.mxu0 %v13098_v57  ;;  %6697 = vmatprep.mubr.bf16.mxu0 %v14288_v38  ;;  %v13128_v57 = vld [vmem:[#allocation14 + $0x854] ss:$24 sps:$4 sm:$0xff]   ;;  %v13126_v50 = vld [vmem:[#allocation14 + $0x850] ss:$24 sps:$4 sm:$0xff]  }
 0x3de   :  { %v6359_v31 = vpop.f32.mrf.mxu0  ;;  %v13132_v62 = vld [vmem:[#allocation14 + $0x7f0] ss:$24 sps:$4 sm:$0xff]  }
 0x3df   :  { %v6402_v52 = vpop.f32.mrf.mxu1  ;;  %v6360_v45 = vadd.f32 %v6359_v31, %v14372_v3  ;;  %6668 = vmatpush1.bf16.msra.mxu0 %v13096_v51  ;;  %v13129_v51 = vld [vmem:[#allocation14 + $0x820] ss:$24 sps:$4 sm:$0xff]   ;;  %v13137_v31 = vld [vmem:[#allocation14 + $0x7c4] ss:$24 sps:$4 sm:$0xff]  }
 0x3e0   :  { %v6361_v13 = vpop.f32.mrf.mxu0  ;;  %6669 = vmatprep.subr.bf16.mxu0 %v13101_v26  ;;  %v13134_v26 = vld [vmem:[#allocation14 + $0x7f4] ss:$24 sps:$4 sm:$0xff]  }
 0x3e1   :  { %v14382_v20 = vadd.f32 %v6402_v52, %v6360_v45  ;;  %v6362_v38 = vadd.f32 %v6361_v13, %v14378_v28  ;;  %v6404_v47 = vpop.f32.mrf.mxu1  ;;  %v13135_v52 = vld [vmem:[#allocation14 + $0x7c0] ss:$24 sps:$4 sm:$0xff]   ;;  %v13140_v45 = vld [vmem:[#allocation14 + $0x794] ss:$24 sps:$4 sm:$0xff]   ;;  %v6356_v13 = vadd.f32 %v14358_v7, %v14372_v3 }
 0x3e3   :  { %6780 = vmatmul.mubr.f32.vlgmr.msra.gmra.mxu1 %v2136_v41  ;;  %v14385_v58 = vadd.f32 %v6404_v47, %v6362_v38  ;;  %6670 = vmatpush1.bf16.msra.mxu0 %v13099_v23  ;;  %v13138_v23 = vld [vmem:[#allocation14 + $0x790] ss:$24 sps:$4 sm:$0xff]   ;;  %v6358_v41 = vadd.f32 %v14366_v46, %v14378_v28  ;;  %v4252_v47 = vadd.f32 %v14282_v33, %v14253_v0 }
 0x3e4   :  { %6671 = vmatprep.subr.bf16.mxu0 %v13104_v16  ;;  %v4862_v46 = vrot.slane %v14356_v5, %v14140_v17 }
 0x3e5   :  { %v14401_v3 = vadd.f32 %v14284_v39, %v4252_v47 }
 0x3e7   :  { %6672 = vmatpush1.bf16.msra.mxu0 %v13102_v2  ;;  %v6401_v2 = vadd.f32 %v14368_v12, %v6358_v41 }
 0x3e8   :  { %6673 = vmatprep.subr.bf16.mxu0 %v13107_v61  ;;  %v6399_v61 = vadd.f32 %v14360_v32, %v6356_v13 }
 0x3eb   :  { %6674 = vmatpush1.bf16.msra.mxu0 %v13105_v29 }
 0x3ec   :  { %6675 = vmatprep.subr.bf16.mxu0 %v13110_v18 }
 0x3ef   :  { %6676 = vmatpush1.bf16.msra.mxu0 %v13108_v22 }
 0x3f0   :  { %6677 = vmatprep.subr.bf16.mxu0 %v13113_v59 }
 0x3f3   :  { %6678 = vmatpush1.bf16.msra.mxu0 %v13111_v14 }
 0x3f4   :  { %6679 = vmatprep.subr.bf16.mxu0 %v13116_v24 }
 0x3f7   :  { %6680 = vmatpush1.bf16.msra.mxu0 %v13114_v10 }
 0x3f8   :  { %6681 = vmatprep.subr.bf16.mxu0 %v13119_v34 }
 0x3fb   :  { %6682 = vmatpush2.bf16.msra.mxu0 %v13117_v60 }
 0x3fc   :  { %6683 = vmatprep.subr.bf16.mxu0 %v13122_v6 }
 0x3ff   :  { %6684 = vmatpush2.bf16.msra.mxu0 %v13120_v44 }
 0x400   :  { %6685 = vmatprep.subr.bf16.mxu0 %v13125_v4 }
 0x403   :  { %6686 = vmatpush2.bf16.msra.mxu0 %v13123_v27 }
 0x404   :  { %6687 = vmatprep.subr.bf16.mxu0 %v13128_v57 }
 0x407   :  { %6688 = vmatpush2.bf16.msra.mxu0 %v13126_v50 }
 0x408   :  { %6689 = vmatprep.subr.bf16.mxu0 %v13131_v56 }
 0x40b   :  { %6690 = vmatpush2.bf16.msra.mxu0 %v13129_v51 }
 0x40c   :  { %6691 = vmatprep.subr.bf16.mxu0 %v13134_v26 }
 0x40f   :  { %6692 = vmatpush2.bf16.msra.mxu0 %v13132_v62 }
 0x410   :  { %6693 = vmatprep.subr.bf16.mxu0 %v13137_v31 }
 0x413   :  { %6694 = vmatpush2.bf16.msra.mxu0 %v13135_v52 }
 0x414   :  { %6695 = vmatprep.subr.bf16.mxu0 %v13140_v45  ;;  %v4874_v45 = vrot.slane %v14356_v5, %v14207_v9 }
 0x417   :  { %6696 = vmatpush2.bf16.msra.mxu0 %v13138_v23 }
 0x41a   :  { %v6441_v16 = vpop.f32.mrf.mxu0  ;;  %6698 = vmatmul.mubr.bf16.vlgmr.msra.gmra.mxu0 %v14302_v55  ;;  %v4866_v55 = vrot.slane %v14356_v5, %v14153_v25 }
 0x41b   :  { %v6484_v38 = vpop.f32.mrf.mxu1  ;;  %v6442_v22 = vadd.f32 %v6441_v16, %v6399_v61 }
 0x41c   :  { %v6443_v29 = vpop.f32.mrf.mxu0  ;;  %v6485_v14 = vadd.f32 %v6484_v38, %v4862_v46  ;;  %v14424_v38 = vrot.slane %v14356_v5, %v14204_v1 }
 0x41d   :  { %v6486_v18 = vpop.f32.mrf.mxu1  ;;  %v14398_v28 = vadd.f32 %v6443_v29, %v6401_v2 }
 0x41e   :  { %v6445_v12 = vpop.f32.mrf.mxu0  ;;  %v6487_v34 = vadd.f32 %v6486_v18, %v4866_v55 }
 0x41f   :  { %v6488_v7 = vpop.f32.mrf.mxu1  ;;  %6830 = vmatprep.subr.mxu1 %v14398_v28 }
 0x420   :  { %v6489_v0 = vadd.f32 %v6488_v7, %v4862_v46  ;;  %6831 = vmatpush1.msra.mxu1 %v6442_v22  ;;  %v6447_v59 = vpop.f32.mrf.mxu0 }
 0x421   :  { %v6490_v33 = vpop.f32.mrf.mxu1  ;;  %11504 = vmatprep.subr.msk.mxu1 %vm6708_vm0, %v14401_v3 }
 0x422   :  { %v6491_v32 = vadd.f32 %v6490_v33, %v4866_v55 }
 0x45a   :  { %v6527_v24 = vpop.f32.mrf.mxu0 }
 0x45b   :  { %v6570_v10 = vpop.f32.mrf.mxu1  ;;  %v6528_v39 = vadd.f32 %v6527_v24, %v6485_v14 }
 0x45c   :  { %v6529_v60 = vpop.f32.mrf.mxu0 }
 0x45d   :  { %v6572_v6 = vpop.f32.mrf.mxu1  ;;  %v14408_v44 = vadd.f32 %v6570_v10, %v6528_v39  ;;  %v6530_v4 = vadd.f32 %v6529_v60, %v6487_v34  ;;  %v13940_v60 = vmov 0.0  }
 0x45e   :  { %v6531_v27 = vpop.f32.mrf.mxu0  ;;  %6864 = vmatprep.mubr.f32.mxu1 %v13940_v60 }
 0x45f   :  { %v6574_v57 = vpop.f32.mrf.mxu1  ;;  %v14410_v50 = vadd.f32 %v6572_v6, %v6530_v4  ;;  %v6532_v56 = vadd.f32 %v6531_v27, %v6489_v0 }
 0x460   :  { %v6533_v51 = vpop.f32.mrf.mxu0 }
 0x461   :  { %v14412_v26 = vadd.f32 %v6574_v57, %v6532_v56  ;;  %v6534_v62 = vadd.f32 %v6533_v51, %v6491_v32  ;;  %v6576_v31 = vpop.f32.mrf.mxu1  ;;  %v14439_v57 = vadd.f32 %v6447_v59, %v14385_v58  ;;  %v6446_v56 = vadd.f32 %v6445_v12, %v14382_v20 }
 0x463   :  { %v14414_v52 = vadd.f32 %v6576_v31, %v6534_v62 }
 0x49a   :  { %v14418_v23 = vpop.f32.mrf.mxu0 }
 0x49b   :  { %v14420_v41 = vpop.f32.mrf.mxu1 }
 0x49c   :  { %v6615_v13 = vpop.f32.mrf.mxu0 }
 0x49d   :  { %v6658_v16 = vpop.f32.mrf.mxu1  ;;  %v6616_v47 = vadd.f32 %v6615_v13, %v4874_v45 }
 0x49e   :  { %v6617_v2 = vpop.f32.mrf.mxu0 }
 0x49f   :  { %v6660_v61 = vpop.f32.mrf.mxu1  ;;  %v14426_v29 = vadd.f32 %v6658_v16, %v6616_v47  ;;  %v6618_v18 = vadd.f32 %v6617_v2, %v14424_v38 }
 0x4a0   :  { %v6619_v46 = vpop.f32.mrf.mxu0 }
 0x4a1   :  { %v6662_v22 = vpop.f32.mrf.mxu1  ;;  %v14429_v7 = vadd.f32 %v6660_v61, %v6618_v18  ;;  %v6620_v55 = vadd.f32 %v6619_v46, %v4874_v45 }
 0x4a3   :  { %v6781_v0 = vpop.f32.mrf.mxu1  ;;  %v14431_v33 = vadd.f32 %v6662_v22, %v6620_v55 }
 0x4a4   :  { %v6786_v32 = vsel %vm6785_vm1, %v6781_v0, -inf }
 0x4a5   :  { %6787 = vmax.xlane.f32.xlu0 %v6786_v32  ;;  %v6783_v5 = vpop.f32.mrf.mxu1 }
 0x52e   :  { %v6788_v14 = vpop.xlane.xlu0 %6787 }
 0x52f   :  { %v6789_v24 = vsub.f32 %v6781_v0, %v6788_v14 }
 0x531   :  { %v6790_v10 = vmul.f32 1.442695, %v6789_v24 }
 0x533   :  { %13573 = vpow2.f32 %v6790_v10 }
 0x540   :  { %v13574_v34 = vpop.eup %13573 }
 0x541   :  { %v6792_v39 = vsel %vm6785_vm1, %v13574_v34, 0.0 }
 0x542   :  { %6793 = vadd.xlane.f32.xlu0 %v6792_v39 }
 0x558   :  { %7114 = vrot.lane.b32.xlu0 %v14345_v43, %s13941_s10 }
 0x5cb   :  { %v6794_v6 = vpop.xlane.xlu0 %6793 }
 0x5cc   :  { %13575 = vrcp.f32 %v6794_v6 }
 0x5cf   :  { %v7115_v2 = vpop.permute.xlu0 %7114 }
 0x5d9   :  { %v13576_v4 = vpop.eup %13575 }
 0x5da   :  { %v6796_v27 = vmul.f32 %v13576_v4, %v13574_v34 }
 0x5dc   :  { %11503 = vmatmul.mubr.msk.f32.vlgmr.msra.gmra.mxu1 %vm6785_vm1, %v6796_v27 }
 0x5dd   :  { %6908 = vmatpush1.xpose.msra.mxu1 %v14272_v19  ;;  %11505 = vmatprep.mubr.msk.f32.mxu1 %vm6708_vm0, %v14176_v53 }
 0x5de   :  { %6991 = vmatprep.subr.mxu1 %v14439_v57 }
 0x5e0   :  { %6942 = vmatmul.mubr.f32.vlgmr.msra.gmra.mxu1 %v14170_v36 }
 0x5e1   :  { %6992 = vmatpush1.msra.mxu1 %v6446_v56  ;;  %7025 = vmatprep.mubr.f32.mxu1 %v13940_v60 }
 0x69c   :  { %v14449_v43 = vpop.f32.mrf.mxu1 }
 0x69e   :  { %v14451_v58 = vpop.f32.mrf.mxu1 }
 0x6a0   :  { %v6943_v59 = vpop.f32.mrf.mxu1 }
 0x6a1   :  { %v6947_v51 = vsel %vm6785_vm1, %v6943_v59, -inf }
 0x6a2   :  { %6948 = vmax.xlane.f32.xlu1 %v6947_v51  ;;  %v6945_v19 = vpop.f32.mrf.mxu1 }
 0x6b3   :  { %7116 = vrot.lane.b32.xlu1 %v14307_v48, %s13941_s10 }
 0x6b7   :  { %7107 = vrot.lane.b32.xlu1 %v14354_v37, %s13941_s10 }
 0x72b   :  { %v6949_v20 = vpop.xlane.xlu1 %6948 }
 0x72c   :  { %v6950_v36 = vsub.f32 %v6943_v59, %v6949_v20 }
 0x72e   :  { %v6951_v12 = vmul.f32 1.442695, %v6950_v36 }
 0x72f   :  { %v7117_v62 = vpop.permute.xlu1 %7116 }
 0x730   :  { %13577 = vpow2.f32 %v6951_v12  ;;  %11507 = vmatprep.subr.msk.mxu1 %vm6708_vm0, %v7117_v62  ;;  %v7118_v61 = vsel %vm6708_vm0, %v7115_v2, %v7117_v62  ;;  %v13158_v2 = vld [vmem:[#allocation17 + $0x33c] ss:$24 sps:$4 sm:$0xff]  }
 0x733   :  { %v7108_v48 = vpop.permute.xlu1 %7107 }
 0x73d   :  { %v13578_v31 = vpop.eup %13577 }
 0x73e   :  { %v6953_v45 = vsel %vm6785_vm1, %v13578_v31, 0.0 }
 0x73f   :  { %6954 = vadd.xlane.f32.xlu1 %v6953_v45 }
 0x750   :  { %7109 = vrot.lane.b32.xlu1 %v14191_v30, %s13941_s10 }
 0x754   :  { %7209 = vrot.lane.b32.xlu1 %v14408_v44, %s13941_s10 }
 0x758   :  { %7298 = vrot.lane.b32.xlu1 %v14315_v15, %s13941_s10 }
 0x7c8   :  { %v6955_v37 = vpop.xlane.xlu1 %6954 }
 0x7c9   :  { %13579 = vrcp.f32 %v6955_v37  ;;  %v13144_v37 = vld [vmem:[#allocation17 + $0x398] ss:$24 sps:$4 sm:$0xff]  }
 0x7cc   :  { %v7110_v13 = vpop.permute.xlu1 %7109 }
 0x7cd   :  { %v7111_v30 = vsel %vm6708_vm0, %v7108_v48, %v7110_v13 }
 0x7d0   :  { %v7210_v18 = vpop.permute.xlu1 %7209 }
 0x7d4   :  { %v7299_v10 = vpop.permute.xlu1 %7298 }
 0x7d6   :  { %v13580_v16 = vpop.eup %13579 }
 0x7d7   :  { %v6957_v47 = vmul.f32 %v13580_v16, %v13578_v31  ;;  %v13152_v16 = vld [vmem:[#allocation17 + $0x36c] ss:$24 sps:$4 sm:$0xff]  }
 0x7d9   :  { %11506 = vmatmul.mubr.msk.f32.vlgmr.msra.gmra.mxu1 %vm6785_vm1, %v6957_v47  ;;  %v13150_v47 = vld [vmem:[#allocation17 + $0x368] ss:$24 sps:$4 sm:$0xff]  }
 0x7da   :  { %7155 = vmatpush1.xpose.msra.mxu1 %v7118_v61  ;;  %11508 = vmatprep.mubr.msk.f32.mxu1 %vm6708_vm0, %v7110_v13  ;;  %v13146_v13 = vld [vmem:[#allocation17 + $0x39c] ss:$24 sps:$4 sm:$0xff]   ;;  %v13164_v61 = vld [vmem:[#allocation17 + $0x30c] ss:$24 sps:$4 sm:$0xff]  }
 0x7db   :  { %7247 = vmatprep.subr.mxu1 %v7210_v18  ;;  %7950 = vmatprep.subr.bf16.mxu0 %v13146_v13  ;;  %v13165_v13 = vld [vmem:[#allocation17 + $0x2d0] ss:$24 sps:$4 sm:$0xff]  }
 0x7dc   :  { %7951 = vmatpush1.bf16.msra.mxu0 %v13144_v37  ;;  %v13167_v37 = vld [vmem:[#allocation17 + $0x2d4] ss:$24 sps:$4 sm:$0xff]  }
 0x7dd   :  { %7189 = vmatmul.mubr.f32.vlgmr.msra.gmra.mxu1 %v7111_v30  ;;  %7952 = vmatprep.subr.bf16.mxu0 %v13152_v16  ;;  %v13170_v30 = vld [vmem:[#allocation17 + $0x2dc] ss:$24 sps:$4 sm:$0xff]  }
 0x7de   :  { %7281 = vmatprep.mubr.f32.mxu1 %v13940_v60  ;;  %v13173_v16 = vld [vmem:[#allocation17 + $0x2a4] ss:$24 sps:$4 sm:$0xff]  }
 0x7e0   :  { %7953 = vmatpush1.bf16.msra.mxu0 %v13150_v47  ;;  %v13179_v47 = vld [vmem:[#allocation17 + $0x274] ss:$24 sps:$4 sm:$0xff]  }
 0x7e1   :  { %7954 = vmatprep.subr.bf16.mxu0 %v13158_v2  ;;  %v13177_v2 = vld [vmem:[#allocation17 + $0x270] ss:$24 sps:$4 sm:$0xff]  }
 0x899   :  { %v14471_v15 = vpop.f32.mrf.mxu1 }
 0x89b   :  { %v14473_v44 = vpop.f32.mrf.mxu1 }
 0x89d   :  { %v7190_v46 = vpop.f32.mrf.mxu1 }
 0x89e   :  { %v7194_v22 = vsel %vm6785_vm1, %v7190_v46, -inf }
 0x89f   :  { %7195 = vmax.xlane.f32.xlu0 %v7194_v22  ;;  %v7192_v55 = vpop.f32.mrf.mxu1  ;;  %v13174_v22 = vld [vmem:[#allocation17 + $0x2a8] ss:$24 sps:$4 sm:$0xff]  }
 0x8a0   :  { %v13182_v55 = vld [vmem:[#allocation17 + $0x27c] ss:$24 sps:$4 sm:$0xff]  }
 0x8b5   :  { %7207 = vrot.lane.b32.xlu0 %v14398_v28, %s13941_s10 }
 0x8b9   :  { %7296 = vrot.lane.b32.xlu0 %v14401_v3, %s13941_s10 }
 0x8bd   :  { %7289 = vrot.lane.b32.xlu0 %v14176_v53, %s13941_s10 }
 0x928   :  { %v7196_v0 = vpop.xlane.xlu0 %7195 }
 0x929   :  { %v7197_v32 = vsub.f32 %v7190_v46, %v7196_v0  ;;  %v13168_v46 = vld [vmem:[#allocation17 + $0x2d8] ss:$24 sps:$4 sm:$0xff]  }
 0x92a   :  { %v13180_v0 = vld [vmem:[#allocation17 + $0x278] ss:$24 sps:$4 sm:$0xff]  }
 0x92b   :  { %v7198_v5 = vmul.f32 1.442695, %v7197_v32  ;;  %v13188_v32 = vld [vmem:[#allocation17 + $0x24c] ss:$24 sps:$4 sm:$0xff]  }
 0x92c   :  { %v7208_v14 = vpop.permute.xlu0 %7207 }
 0x92d   :  { %13581 = vpow2.f32 %v7198_v5  ;;  %v7211_v24 = vsel %vm6708_vm0, %v7208_v14, %v7210_v18  ;;  %v13162_v18 = vld [vmem:[#allocation17 + $0x308] ss:$24 sps:$4 sm:$0xff]   ;;  %v13194_v14 = vld [vmem:[#allocation17 + $0x45c] ss:$24 sps:$4 sm:$0xff]  }
 0x92e   :  { %7248 = vmatpush1.msra.mxu1 %v7211_v24  ;;  %v13186_v5 = vld [vmem:[#allocation17 + $0x248] ss:$24 sps:$4 sm:$0xff]   ;;  %v13192_v24 = vld [vmem:[#allocation17 + $0x458] ss:$24 sps:$4 sm:$0xff]  }
 0x92f   :  { %11510 = vmatprep.subr.msk.mxu1 %vm6708_vm0, %v7299_v10 }
 0x930   :  { %v7297_v53 = vpop.permute.xlu0 %7296 }
 0x931   :  { %v7300_v4 = vsel %vm6708_vm0, %v7297_v53, %v7299_v10  ;;  %v13200_v10 = vld [vmem:[#allocation17 + $0x42c] ss:$24 sps:$4 sm:$0xff]  }
 0x934   :  { %v7290_v56 = vpop.permute.xlu0 %7289 }
 0x93a   :  { %v13582_v34 = vpop.eup %13581 }
 0x93b   :  { %v7200_v28 = vsel %vm6785_vm1, %v13582_v34, 0.0 }
 0x93c   :  { %7201 = vadd.xlane.f32.xlu1 %v7200_v28  ;;  %v13206_v28 = vld [vmem:[#allocation17 + $0x3fc] ss:$24 sps:$4 sm:$0xff]  }
 0x94d   :  { %7291 = vrot.lane.b32.xlu1 %v14198_v49, %s13941_s10 }
 0x9c5   :  { %v7202_v3 = vpop.xlane.xlu1 %7201 }
 0x9c6   :  { %13583 = vrcp.f32 %v7202_v3  ;;  %v13204_v3 = vld [vmem:[#allocation17 + $0x3f8] ss:$24 sps:$4 sm:$0xff]  }
 0x9c9   :  { %v7292_v27 = vpop.permute.xlu1 %7291 }
 0x9ca   :  { %v7293_v59 = vsel %vm6708_vm0, %v7290_v56, %v7292_v27 }
 0x9d3   :  { %v13584_v39 = vpop.eup %13583 }
 0x9d4   :  { %v7204_v6 = vmul.f32 %v13584_v39, %v13582_v34  ;;  %v13198_v34 = vld [vmem:[#allocation17 + $0x428] ss:$24 sps:$4 sm:$0xff]   ;;  %v13143_v39 = vld [vmem:[#allocation17 + $0x394] ss:$24 sps:$4 sm:$0xff]  }
 0x9d6   :  { %11509 = vmatmul.mubr.msk.f32.vlgmr.msra.gmra.mxu1 %vm6785_vm1, %v7204_v6 }
 0x9d7   :  { %7337 = vmatpush1.xpose.msra.mxu1 %v7300_v4  ;;  %11511 = vmatprep.mubr.msk.f32.mxu1 %vm6708_vm0, %v7292_v27 }
 0x9da   :  { %7371 = vmatmul.mubr.f32.vlgmr.msra.gmra.mxu1 %v7293_v59  ;;  %v13141_v59 = vld [vmem:[#allocation17 + $0x390] ss:$24 sps:$4 sm:$0xff]  }
 0x9db   :  { %7463 = vmatprep.mubr.f32.mxu1 %v13940_v60 }
 0xa96   :  { %v14492_v49 = vpop.f32.mrf.mxu1 }
 0xa98   :  { %v14494_v51 = vpop.f32.mrf.mxu1 }
 0xa9a   :  { %v7372_v19 = vpop.f32.mrf.mxu1 }
 0xa9b   :  { %v7376_v20 = vsel %vm6785_vm1, %v7372_v19, -inf }
 0xa9c   :  { %7377 = vmax.xlane.f32.xlu0 %v7376_v20  ;;  %v7374_v36 = vpop.f32.mrf.mxu1  ;;  %v13149_v20 = vld [vmem:[#allocation17 + $0x364] ss:$24 sps:$4 sm:$0xff]  }
 0xa9d   :  { %v13147_v36 = vld [vmem:[#allocation17 + $0x360] ss:$24 sps:$4 sm:$0xff]  }
 0xab2   :  { %7389 = vrot.lane.b32.xlu0 %v14439_v57, %s13941_s10  ;;  %v13156_v57 = vld [vmem:[#allocation17 + $0x338] ss:$24 sps:$4 sm:$0xff]  }
 0xab3   :  { %7955 = vmatpush1.bf16.msra.mxu0 %v13156_v57  ;;  %v13185_v57 = vld [vmem:[#allocation17 + $0x244] ss:$24 sps:$4 sm:$0xff]  }
 0xab4   :  { %7956 = vmatprep.subr.bf16.mxu0 %v13164_v61  ;;  %v13183_v61 = vld [vmem:[#allocation17 + $0x240] ss:$24 sps:$4 sm:$0xff]  }
 0xab7   :  { %7957 = vmatpush1.bf16.msra.mxu0 %v13162_v18  ;;  %v13191_v18 = vld [vmem:[#allocation17 + $0x454] ss:$24 sps:$4 sm:$0xff]  }
 0xab8   :  { %7958 = vmatprep.subr.bf16.mxu0 %v13170_v30  ;;  %v13189_v30 = vld [vmem:[#allocation17 + $0x450] ss:$24 sps:$4 sm:$0xff]  }
 0xabb   :  { %7959 = vmatpush1.bf16.msra.mxu0 %v13168_v46  ;;  %v13197_v46 = vld [vmem:[#allocation17 + $0x424] ss:$24 sps:$4 sm:$0xff]  }
 0xb25   :  { %v7378_v12 = vpop.xlane.xlu0 %7377 }
 0xb26   :  { %v7379_v62 = vsub.f32 %v7372_v19, %v7378_v12  ;;  %v13155_v12 = vld [vmem:[#allocation17 + $0x334] ss:$24 sps:$4 sm:$0xff]  }
 0xb28   :  { %v7380_v31 = vmul.f32 1.442695, %v7379_v62  ;;  %v13153_v62 = vld [vmem:[#allocation17 + $0x330] ss:$24 sps:$4 sm:$0xff]  }
 0xb29   :  { %v7390_v6 = vpop.permute.xlu0 %7389 }
 0xb2a   :  { %13585 = vpow2.f32 %v7380_v31  ;;  %v13161_v31 = vld [vmem:[#allocation17 + $0x304] ss:$24 sps:$4 sm:$0xff]  }
 0xb37   :  { %v13586_v45 = vpop.eup %13585 }
 0xb38   :  { %v7382_v48 = vsel %vm6785_vm1, %v13586_v45, 0.0 }
 0xb39   :  { %7383 = vadd.xlane.f32.xlu1 %v7382_v48  ;;  %v13159_v48 = vld [vmem:[#allocation17 + $0x300] ss:$24 sps:$4 sm:$0xff]  }
 0xb4a   :  { %7391 = vrot.lane.b32.xlu1 %v14412_v26, %s13941_s10  ;;  %v13176_v26 = vld [vmem:[#allocation17 + $0x2ac] ss:$24 sps:$4 sm:$0xff]  }
 0xb4b   :  { %7960 = vmatprep.subr.bf16.mxu0 %v13176_v26  ;;  %v13195_v26 = vld [vmem:[#allocation17 + $0x420] ss:$24 sps:$4 sm:$0xff]  }
 0xb4c   :  { %7961 = vmatpush1.bf16.msra.mxu0 %v13174_v22  ;;  %v13203_v22 = vld [vmem:[#allocation17 + $0x3f4] ss:$24 sps:$4 sm:$0xff]  }
 0xb4d   :  { %7962 = vmatprep.subr.bf16.mxu0 %v13182_v55  ;;  %v13201_v55 = vld [vmem:[#allocation17 + $0x3f0] ss:$24 sps:$4 sm:$0xff]  }
 0xb50   :  { %7963 = vmatpush1.bf16.msra.mxu0 %v13180_v0  ;;  %v13209_v0 = vld [vmem:[#allocation17 + $0x3c4] ss:$24 sps:$4 sm:$0xff]  }
 0xb51   :  { %7964 = vmatprep.subr.bf16.mxu0 %v13188_v32  ;;  %v13212_v32 = vld [vmem:[#allocation17 + $0x3cc] ss:$24 sps:$4 sm:$0xff]  }
 0xb54   :  { %7965 = vmatpush1.bf16.msra.mxu0 %v13186_v5  ;;  %v13207_v5 = vld [vmem:[#allocation17 + $0x3c0] ss:$24 sps:$4 sm:$0xff]  }
 0xb55   :  { %7974 = vmatprep.subr.bf16.mxu0 %v13194_v14  ;;  %v13210_v14 = vld [vmem:[#allocation17 + $0x3c8] ss:$24 sps:$4 sm:$0xff]  }
 0xb58   :  { %7975 = vmatpush2.bf16.msra.mxu0 %v13192_v24  ;;  %v13215_v24 = vld [vmem:[#allocation17 + $0x3a4] ss:$24 sps:$4 sm:$0xff]  }
 0xb59   :  { %7976 = vmatprep.subr.bf16.mxu0 %v13200_v10  ;;  %v13218_v10 = vld [vmem:[#allocation17 + $0x154] ss:$24 sps:$4 sm:$0xff]  }
 0xb5c   :  { %7977 = vmatpush2.bf16.msra.mxu0 %v13198_v34 }
 0xb5d   :  { %7978 = vmatprep.subr.bf16.mxu0 %v13206_v28 }
 0xb60   :  { %7979 = vmatpush2.bf16.msra.mxu0 %v13204_v3 }
 0xb61   :  { %7980 = vmatprep.subr.bf16.mxu0 %v13212_v32  ;;  %v13266_v32 = vld [vmem:[#allocation17 + $0x214] ss:$24 sps:$4 sm:$0xff]  }
 0xb64   :  { %7981 = vmatpush2.bf16.msra.mxu0 %v13210_v14  ;;  %v13264_v14 = vld [vmem:[#allocation17 + $0x210] ss:$24 sps:$4 sm:$0xff]  }
 0xb65   :  { %8399 = vmatprep.subr.bf16.mxu0 %v13218_v10  ;;  %v13272_v10 = vld [vmem:[#allocation17 + $0x1e4] ss:$24 sps:$4 sm:$0xff]  }
 0xbc2   :  { %v7384_v53 = vpop.xlane.xlu1 %7383 }
 0xbc3   :  { %13587 = vrcp.f32 %v7384_v53  ;;  %v13213_v53 = vld [vmem:[#allocation17 + $0x3a0] ss:$24 sps:$4 sm:$0xff]  }
 0xbc6   :  { %v7392_v4 = vpop.permute.xlu1 %7391 }
 0xbc7   :  { %v7393_v27 = vsel %vm6708_vm0, %v7390_v6, %v7392_v4  ;;  %7429 = vmatprep.subr.mxu1 %v7392_v4  ;;  %v13221_v4 = vld [vmem:[#allocation17 + $0x374] ss:$24 sps:$4 sm:$0xff]  }
 0xbc8   :  { %7430 = vmatpush1.msra.mxu1 %v7393_v27  ;;  %v13224_v27 = vld [vmem:[#allocation17 + $0x124] ss:$24 sps:$4 sm:$0xff]  }
 0xbc9   :  { %7907 = vmatprep.subr.bf16.mxu1 %v13143_v39  ;;  %v13216_v39 = vld [vmem:[#allocation17 + $0x150] ss:$24 sps:$4 sm:$0xff]  }
 0xbd0   :  { %v13588_v56 = vpop.eup %13587 }
 0xbd1   :  { %v7386_v19 = vmul.f32 %v13588_v56, %v13586_v45  ;;  %v13171_v45 = vld [vmem:[#allocation17 + $0x2a0] ss:$24 sps:$4 sm:$0xff]   ;;  %v14512_v56 = vpack.c.bf16 %v14473_v44, %v14451_v58  ;;  %v13228_v44 = vld [vmem:[#allocation17 + $0xf0] ss:$24 sps:$4 sm:$0xff]  }
 0xbd2   :  { %v13225_v58 = vld [vmem:[#allocation17 + $0x340] ss:$24 sps:$4 sm:$0xff]  }
 0xbd3   :  { %11512 = vmatmul.mubr.msk.f32.vlgmr.msra.gmra.mxu1 %vm6785_vm1, %v7386_v19  ;;  %v13230_v19 = vld [vmem:[#allocation17 + $0xf4] ss:$24 sps:$4 sm:$0xff]  }
 0xbd4   :  { %7908 = vmatpush1.bf16.msra.mxu1 %v13141_v59  ;;  %v13222_v59 = vld [vmem:[#allocation17 + $0x120] ss:$24 sps:$4 sm:$0xff]  }
 0xbd5   :  { %7909 = vmatprep.subr.bf16.mxu1 %v13149_v20  ;;  %v13233_v20 = vld [vmem:[#allocation17 + $0x314] ss:$24 sps:$4 sm:$0xff]  }
 0xbd8   :  { %7910 = vmatpush1.bf16.msra.mxu1 %v13147_v36  ;;  %v13236_v36 = vld [vmem:[#allocation17 + $0xc4] ss:$24 sps:$4 sm:$0xff]  }
 0xbd9   :  { %7911 = vmatprep.subr.bf16.mxu1 %v13155_v12  ;;  %v13231_v12 = vld [vmem:[#allocation17 + $0x310] ss:$24 sps:$4 sm:$0xff]  }
 0xbdc   :  { %7912 = vmatpush1.bf16.msra.mxu1 %v13153_v62  ;;  %v13234_v62 = vld [vmem:[#allocation17 + $0xc0] ss:$24 sps:$4 sm:$0xff]  }
 0xbdd   :  { %7913 = vmatprep.subr.bf16.mxu1 %v13161_v31  ;;  %v13239_v31 = vld [vmem:[#allocation17 + $0x2e4] ss:$24 sps:$4 sm:$0xff]  }
 0xbe0   :  { %7914 = vmatpush1.bf16.msra.mxu1 %v13159_v48  ;;  %v13242_v48 = vld [vmem:[#allocation17 + $0x94] ss:$24 sps:$4 sm:$0xff]  }
 0xbe1   :  { %7915 = vmatprep.subr.bf16.mxu1 %v13167_v37  ;;  %v13237_v37 = vld [vmem:[#allocation17 + $0x2e0] ss:$24 sps:$4 sm:$0xff]  }
 0xbe4   :  { %7916 = vmatpush1.bf16.msra.mxu1 %v13165_v13  ;;  %v13240_v13 = vld [vmem:[#allocation17 + $0x90] ss:$24 sps:$4 sm:$0xff]  }
 0xbe5   :  { %7917 = vmatprep.subr.bf16.mxu1 %v13173_v16  ;;  %v13245_v16 = vld [vmem:[#allocation17 + $0x2b4] ss:$24 sps:$4 sm:$0xff]  }
 0xbe8   :  { %7918 = vmatpush1.bf16.msra.mxu1 %v13171_v45  ;;  %v13248_v45 = vld [vmem:[#allocation17 + $0x64] ss:$24 sps:$4 sm:$0xff]  }
 0xbe9   :  { %7919 = vmatprep.subr.bf16.mxu1 %v13179_v47  ;;  %v13243_v47 = vld [vmem:[#allocation17 + $0x2b0] ss:$24 sps:$4 sm:$0xff]  }
 0xbec   :  { %7920 = vmatpush1.bf16.msra.mxu1 %v13177_v2  ;;  %v13246_v2 = vld [vmem:[#allocation17 + $0x60] ss:$24 sps:$4 sm:$0xff]  }
 0xbed   :  { %7921 = vmatprep.subr.bf16.mxu1 %v13185_v57  ;;  %v13251_v57 = vld [vmem:[#allocation17 + $0x284] ss:$24 sps:$4 sm:$0xff]  }
 0xbf0   :  { %7922 = vmatpush1.bf16.msra.mxu1 %v13183_v61  ;;  %v13254_v61 = vld [vmem:[#allocation17 + $0x34] ss:$24 sps:$4 sm:$0xff]  }
 0xbf1   :  { %7931 = vmatprep.subr.bf16.mxu1 %v13191_v18  ;;  %v13249_v18 = vld [vmem:[#allocation17 + $0x280] ss:$24 sps:$4 sm:$0xff]  }
 0xbf4   :  { %7932 = vmatpush2.bf16.msra.mxu1 %v13189_v30  ;;  %v13252_v30 = vld [vmem:[#allocation17 + $0x30] ss:$24 sps:$4 sm:$0xff]  }
 0xbf5   :  { %7933 = vmatprep.subr.bf16.mxu1 %v13197_v46  ;;  %v13257_v46 = vld [vmem:[#allocation17 + $0x254] ss:$24 sps:$4 sm:$0xff]  }
 0xbf8   :  { %7934 = vmatpush2.bf16.msra.mxu1 %v13195_v26  ;;  %v13260_v26 = vld [vmem:[#allocation17 + $0x4] ss:$24 sps:$4 sm:$0xff]  }
 0xbf9   :  { %7935 = vmatprep.subr.bf16.mxu1 %v13203_v22  ;;  %v13255_v22 = vld [vmem:[#allocation17 + $0x250] ss:$24 sps:$4 sm:$0xff]  }
 0xbfc   :  { %7936 = vmatpush2.bf16.msra.mxu1 %v13201_v55  ;;  %v13258_v55 = vld [vmem:[#allocation17] ss:$24 sps:$4 sm:$0xff]  }
 0xbfd   :  { %7937 = vmatprep.subr.bf16.mxu1 %v13209_v0  ;;  %v13263_v0 = vld [vmem:[#allocation17 + $0x464] ss:$24 sps:$4 sm:$0xff]  }
 0xc00   :  { %7938 = vmatpush2.bf16.msra.mxu1 %v13207_v5  ;;  %v13261_v5 = vld [vmem:[#allocation17 + $0x460] ss:$24 sps:$4 sm:$0xff]  }
 0xc01   :  { %7993 = vmatprep.subr.bf16.mxu1 %v13215_v24  ;;  %v13269_v24 = vld [vmem:[#allocation17 + $0x434] ss:$24 sps:$4 sm:$0xff]  }
 0xc93   :  { %v7465_v34 = vpop.f32.mrf.mxu1 }
 0xc94   :  { %v14506_v6 = vpack.c.bf16 %v7465_v34, %v14492_v49  ;;  %v13227_v49 = vld [vmem:[#allocation17 + $0x344] ss:$24 sps:$4 sm:$0xff]   ;;  %v13267_v34 = vld [vmem:[#allocation17 + $0x430] ss:$24 sps:$4 sm:$0xff]  }
 0xc95   :  { %v7467_v28 = vpop.f32.mrf.mxu1 }
 0xc96   :  { %v7471_v3 = vpack.c.bf16 %v7467_v28, %v14494_v51  ;;  %v13219_v51 = vld [vmem:[#allocation17 + $0x370] ss:$24 sps:$4 sm:$0xff]   ;;  %v13270_v28 = vld [vmem:[#allocation17 + $0x1e0] ss:$24 sps:$4 sm:$0xff]  }
 0xc98   :  { %11585 = vmatprep.mubr.msk.bf16.mxu1 %vm6708_vm0, %v7471_v3  ;;  %11586 = vmatprep.mubr.msk.bf16.mxu0 %vm6708_vm0, %v7471_v3 }
 0xc99   :  { %7940 = vmatmul.mubr.bf16.vlgmr.msra.gmra.mxu1 %v14506_v6  ;;  %7983 = vmatmul.mubr.bf16.vlgmr.msra.gmra.mxu0 %v14506_v6 }
 0xc9a   :  { %7994 = vmatpush1.bf16.msra.mxu1 %v13213_v53  ;;  %8400 = vmatpush1.bf16.msra.mxu0 %v13216_v39  ;;  %v13278_v53 = vld [vmem:[#allocation17 + $0x1b4] ss:$24 sps:$4 sm:$0xff]   ;;  %v13273_v39 = vld [vmem:[#allocation17 + $0x400] ss:$24 sps:$4 sm:$0xff]  }
 0xc9b   :  { %11587 = vmatprep.mubr.msk.bf16.mxu1 %vm6708_vm0, %v7471_v3  ;;  %11660 = vmatprep.mubr.msk.bf16.mxu0 %vm6708_vm0, %v14512_v56  ;;  %v13275_v3 = vld [vmem:[#allocation17 + $0x404] ss:$24 sps:$4 sm:$0xff]  }
 0xc9c   :  { %7995 = vmatprep.subr.bf16.mxu1 %v13221_v4  ;;  %8401 = vmatprep.subr.bf16.mxu0 %v13224_v27  ;;  %v13276_v4 = vld [vmem:[#allocation17 + $0x1b0] ss:$24 sps:$4 sm:$0xff]   ;;  %v13281_v27 = vld [vmem:[#allocation17 + $0x3d4] ss:$24 sps:$4 sm:$0xff]  }
 0xc9e   :  { %7996 = vmatpush1.bf16.msra.mxu1 %v13219_v51  ;;  %8402 = vmatpush1.bf16.msra.mxu0 %v13222_v59  ;;  %v13284_v51 = vld [vmem:[#allocation17 + $0x184] ss:$24 sps:$4 sm:$0xff]   ;;  %v13279_v59 = vld [vmem:[#allocation17 + $0x3d0] ss:$24 sps:$4 sm:$0xff]  }
 0xc9f   :  { %7997 = vmatprep.subr.bf16.mxu1 %v13227_v49  ;;  %8403 = vmatprep.subr.bf16.mxu0 %v13230_v19  ;;  %v13282_v49 = vld [vmem:[#allocation17 + $0x180] ss:$24 sps:$4 sm:$0xff]   ;;  %v13287_v19 = vld [vmem:[#allocation17 + $0x15c] ss:$24 sps:$4 sm:$0xff]  }
 0xca2   :  { %7998 = vmatpush1.bf16.msra.mxu1 %v13225_v58  ;;  %8404 = vmatpush1.bf16.msra.mxu0 %v13228_v44  ;;  %v13290_v58 = vld [vmem:[#allocation17 + $0x164] ss:$24 sps:$4 sm:$0xff]   ;;  %v13285_v44 = vld [vmem:[#allocation17 + $0x158] ss:$24 sps:$4 sm:$0xff]  }
 0xca3   :  { %7999 = vmatprep.subr.bf16.mxu1 %v13233_v20  ;;  %8405 = vmatprep.subr.bf16.mxu0 %v13236_v36  ;;  %v14521_v20 = vpack.c.bf16 %v14471_v15, %v14449_v43  ;;  %v13288_v36 = vld [vmem:[#allocation17 + $0x160] ss:$24 sps:$4 sm:$0xff]   ;;  %v13294_v43 = vld [vmem:[#allocation17 + $0x130] ss:$24 sps:$4 sm:$0xff]   ;;  %v13299_v15 = vld [vmem:[#allocation17 + $0xfc] ss:$24 sps:$4 sm:$0xff]  }
 0xca6   :  { %8000 = vmatpush1.bf16.msra.mxu1 %v13231_v12  ;;  %8406 = vmatpush1.bf16.msra.mxu0 %v13234_v62  ;;  %v13293_v12 = vld [vmem:[#allocation17 + $0x12c] ss:$24 sps:$4 sm:$0xff]  }
 0xca7   :  { %8001 = vmatprep.subr.bf16.mxu1 %v13239_v31  ;;  %8407 = vmatprep.subr.bf16.mxu0 %v13242_v48  ;;  %v13296_v62 = vld [vmem:[#allocation17 + $0x134] ss:$24 sps:$4 sm:$0xff]   ;;  %v13291_v31 = vld [vmem:[#allocation17 + $0x128] ss:$24 sps:$4 sm:$0xff]   ;;  %v13302_v48 = vld [vmem:[#allocation17 + $0x104] ss:$24 sps:$4 sm:$0xff]  }
 0xcaa   :  { %8002 = vmatpush1.bf16.msra.mxu1 %v13237_v37  ;;  %8408 = vmatpush1.bf16.msra.mxu0 %v13240_v13  ;;  %v13297_v37 = vld [vmem:[#allocation17 + $0xf8] ss:$24 sps:$4 sm:$0xff]   ;;  %v13305_v13 = vld [vmem:[#allocation17 + $0xcc] ss:$24 sps:$4 sm:$0xff]  }
 0xcab   :  { %8003 = vmatprep.subr.bf16.mxu1 %v13245_v16  ;;  %8409 = vmatprep.subr.bf16.mxu0 %v13248_v45  ;;  %v13308_v16 = vld [vmem:[#allocation17 + $0xd4] ss:$24 sps:$4 sm:$0xff]   ;;  %v13303_v45 = vld [vmem:[#allocation17 + $0xc8] ss:$24 sps:$4 sm:$0xff]  }
 0xcae   :  { %8004 = vmatpush1.bf16.msra.mxu1 %v13243_v47  ;;  %8410 = vmatpush1.bf16.msra.mxu0 %v13246_v2  ;;  %v13306_v47 = vld [vmem:[#allocation17 + $0xd0] ss:$24 sps:$4 sm:$0xff]   ;;  %v13311_v2 = vld [vmem:[#allocation17 + $0x9c] ss:$24 sps:$4 sm:$0xff]  }
 0xcaf   :  { %8005 = vmatprep.subr.bf16.mxu1 %v13251_v57  ;;  %8411 = vmatprep.subr.bf16.mxu0 %v13254_v61  ;;  %v13309_v57 = vld [vmem:[#allocation17 + $0x98] ss:$24 sps:$4 sm:$0xff]  }
 0xcb0   :  { %v13312_v61 = vld [vmem:[#allocation17 + $0xa0] ss:$24 sps:$4 sm:$0xff]  }
 0xcb2   :  { %8006 = vmatpush1.bf16.msra.mxu1 %v13249_v18  ;;  %8412 = vmatpush1.bf16.msra.mxu0 %v13252_v30  ;;  %v13317_v18 = vld [vmem:[#allocation17 + $0x6c] ss:$24 sps:$4 sm:$0xff]  }
 0xcb3   :  { %8007 = vmatprep.subr.bf16.mxu1 %v13257_v46  ;;  %8413 = vmatprep.subr.bf16.mxu0 %v13260_v26  ;;  %v13320_v30 = vld [vmem:[#allocation17 + $0x74] ss:$24 sps:$4 sm:$0xff]   ;;  %v13315_v46 = vld [vmem:[#allocation17 + $0x68] ss:$24 sps:$4 sm:$0xff]  }
 0xcb4   :  { %v13318_v26 = vld [vmem:[#allocation17 + $0x70] ss:$24 sps:$4 sm:$0xff]  }
 0xcb6   :  { %8008 = vmatpush1.bf16.msra.mxu1 %v13255_v22  ;;  %8414 = vmatpush1.bf16.msra.mxu0 %v13258_v55  ;;  %v13323_v22 = vld [vmem:[#allocation17 + $0x3c] ss:$24 sps:$4 sm:$0xff]  }
 0xcb7   :  { %8017 = vmatprep.subr.bf16.mxu1 %v13263_v0  ;;  %8423 = vmatprep.subr.bf16.mxu0 %v13266_v32  ;;  %v13326_v55 = vld [vmem:[#allocation17 + $0x44] ss:$24 sps:$4 sm:$0xff]   ;;  %v13321_v0 = vld [vmem:[#allocation17 + $0x38] ss:$24 sps:$4 sm:$0xff]  }
 0xcb8   :  { %v13324_v32 = vld [vmem:[#allocation17 + $0x40] ss:$24 sps:$4 sm:$0xff]  }
 0xcba   :  { %8018 = vmatpush2.bf16.msra.mxu1 %v13261_v5  ;;  %8424 = vmatpush2.bf16.msra.mxu0 %v13264_v14  ;;  %v13329_v5 = vld [vmem:[#allocation17 + $0xc] ss:$24 sps:$4 sm:$0xff]  }
 0xcbb   :  { %8019 = vmatprep.subr.bf16.mxu1 %v13269_v24  ;;  %8425 = vmatprep.subr.bf16.mxu0 %v13272_v10  ;;  %v13332_v14 = vld [vmem:[#allocation17 + $0x14] ss:$24 sps:$4 sm:$0xff]   ;;  %v13327_v24 = vld [vmem:[#allocation17 + $0x8] ss:$24 sps:$4 sm:$0xff]  }
 0xcbc   :  { %v13330_v10 = vld [vmem:[#allocation17 + $0x10] ss:$24 sps:$4 sm:$0xff]  }
 0xcbe   :  { %8020 = vmatpush2.bf16.msra.mxu1 %v13267_v34  ;;  %8426 = vmatpush2.bf16.msra.mxu0 %v13270_v28  ;;  %v13335_v34 = vld [vmem:[#allocation17 + $0x21c] ss:$24 sps:$4 sm:$0xff]  }
 0xcbf   :  { %8021 = vmatprep.subr.bf16.mxu1 %v13275_v3  ;;  %8427 = vmatprep.subr.bf16.mxu0 %v13278_v53  ;;  %v13338_v28 = vld [vmem:[#allocation17 + $0x224] ss:$24 sps:$4 sm:$0xff]   ;;  %v13333_v3 = vld [vmem:[#allocation17 + $0x218] ss:$24 sps:$4 sm:$0xff]  }
 0xcc0   :  { %v13336_v53 = vld [vmem:[#allocation17 + $0x220] ss:$24 sps:$4 sm:$0xff]  }
 0xcc2   :  { %8022 = vmatpush2.bf16.msra.mxu1 %v13273_v39  ;;  %8428 = vmatpush2.bf16.msra.mxu0 %v13276_v4  ;;  %v13341_v39 = vld [vmem:[#allocation17 + $0x1ec] ss:$24 sps:$4 sm:$0xff]  }
 0xcc3   :  { %8023 = vmatprep.subr.bf16.mxu1 %v13281_v27  ;;  %8429 = vmatprep.subr.bf16.mxu0 %v13284_v51  ;;  %v13344_v4 = vld [vmem:[#allocation17 + $0x1f4] ss:$24 sps:$4 sm:$0xff]   ;;  %v13339_v27 = vld [vmem:[#allocation17 + $0x1e8] ss:$24 sps:$4 sm:$0xff]  }
 0xcc4   :  { %v13342_v51 = vld [vmem:[#allocation17 + $0x1f0] ss:$24 sps:$4 sm:$0xff]  }
 0xcc6   :  { %8024 = vmatpush2.bf16.msra.mxu1 %v13279_v59  ;;  %8430 = vmatpush2.bf16.msra.mxu0 %v13282_v49  ;;  %v13347_v59 = vld [vmem:[#allocation17 + $0x1bc] ss:$24 sps:$4 sm:$0xff]  }
 0xcc7   :  { %8442 = vmatprep.subr.bf16.mxu1 %v13287_v19  ;;  %8485 = vmatprep.subr.bf16.mxu0 %v13290_v58  ;;  %v13350_v49 = vld [vmem:[#allocation17 + $0x1c4] ss:$24 sps:$4 sm:$0xff]   ;;  %v13345_v19 = vld [vmem:[#allocation17 + $0x1b8] ss:$24 sps:$4 sm:$0xff]  }
 0xcc8   :  { %v13348_v58 = vld [vmem:[#allocation17 + $0x1c0] ss:$24 sps:$4 sm:$0xff]  }
 0xcc9   :  { %8026 = vmatmul.mubr.bf16.vlgmr.msra.gmra.mxu1 %v14506_v6  ;;  %8432 = vmatmul.mubr.bf16.vlgmr.msra.gmra.mxu0 %v14521_v20  ;;  %v13300_v6 = vld [vmem:[#allocation17 + $0x100] ss:$24 sps:$4 sm:$0xff]  }
 0xcca   :  { %8443 = vmatpush1.bf16.msra.mxu1 %v13285_v44  ;;  %11661 = vmatprep.mubr.msk.bf16.mxu1 %vm6708_vm0, %v14512_v56  ;;  %v13353_v44 = vld [vmem:[#allocation17 + $0x18c] ss:$24 sps:$4 sm:$0xff]  }
 0xccb   :  { %8486 = vmatpush1.bf16.msra.mxu0 %v13288_v36  ;;  %11662 = vmatprep.mubr.msk.bf16.mxu0 %vm6708_vm0, %v14512_v56  ;;  %v13314_v56 = vld [vmem:[#allocation17 + $0xa4] ss:$24 sps:$4 sm:$0xff]   ;;  %v13356_v36 = vld [vmem:[#allocation17 + $0x194] ss:$24 sps:$4 sm:$0xff]  }
 0xccc   :  { %8444 = vmatprep.subr.bf16.mxu1 %v13293_v12  ;;  %8487 = vmatprep.subr.bf16.mxu0 %v13296_v62  ;;  %v13351_v12 = vld [vmem:[#allocation17 + $0x188] ss:$24 sps:$4 sm:$0xff]   ;;  %v6614_v62 = vadd.f32 %v14418_v23, %v14424_v38  ;;  %v14816_v23 = vld [vmem:[#allocation32_spill] sm:$0xff] }
 0xcce   :  { %8445 = vmatpush1.bf16.msra.mxu1 %v13291_v31  ;;  %v13354_v31 = vld [vmem:[#allocation17 + $0x190] ss:$24 sps:$4 sm:$0xff]  }
 0xccf   :  { %8488 = vmatpush1.bf16.msra.mxu0 %v13294_v43  ;;  %8446 = vmatprep.subr.bf16.mxu1 %v13299_v15  ;;  %v6699_v43 = vpop.f32.mrf.mxu0  ;;  %v6657_v15 = vadd.f32 %v14420_v41, %v6614_v62  ;;  %v14817_v62 = vld [vmem:[#allocation34_spill] sm:$0xff] }
 0xcd0   :  { %8489 = vmatprep.subr.bf16.mxu0 %v13302_v48 }
 0xcd1   :  { %v14534_v48 = vadd.f32 %v6699_v43, %v6657_v15  ;;  %v6701_v41 = vpop.f32.mrf.mxu0 }
 0xcd2   :  { %8447 = vmatpush1.bf16.msra.mxu1 %v13297_v37 }
 0xcd3   :  { %8490 = vmatpush1.bf16.msra.mxu0 %v13300_v6  ;;  %8448 = vmatprep.subr.bf16.mxu1 %v13305_v13  ;;  %v6703_v38 = vpop.f32.mrf.mxu0 }
 0xcd4   :  { %8491 = vmatprep.subr.bf16.mxu0 %v13308_v16 }
 0xcd5   :  { %v14547_v37 = vpop.f32.mrf.mxu0 }
 0xcd6   :  { %8449 = vmatpush1.bf16.msra.mxu1 %v13303_v45 }
 0xcd7   :  { %8492 = vmatpush1.bf16.msra.mxu0 %v13306_v47  ;;  %8450 = vmatprep.subr.bf16.mxu1 %v13311_v2 }
 0xcd8   :  { %8493 = vmatprep.subr.bf16.mxu0 %v13314_v56 }
 0xcda   :  { %8451 = vmatpush1.bf16.msra.mxu1 %v13309_v57 }
 0xcdb   :  { %8494 = vmatpush1.bf16.msra.mxu0 %v13312_v61  ;;  %8452 = vmatprep.subr.bf16.mxu1 %v13317_v18 }
 0xcdc   :  { %8495 = vmatprep.subr.bf16.mxu0 %v13320_v30 }
 0xcde   :  { %8453 = vmatpush1.bf16.msra.mxu1 %v13315_v46 }
 0xcdf   :  { %8496 = vmatpush1.bf16.msra.mxu0 %v13318_v26  ;;  %8454 = vmatprep.subr.bf16.mxu1 %v13323_v22 }
 0xce0   :  { %8497 = vmatprep.subr.bf16.mxu0 %v13326_v55 }
 0xce2   :  { %8455 = vmatpush1.bf16.msra.mxu1 %v13321_v0 }
 0xce3   :  { %8498 = vmatpush1.bf16.msra.mxu0 %v13324_v32  ;;  %8456 = vmatprep.subr.bf16.mxu1 %v13329_v5 }
 0xce4   :  { %8499 = vmatprep.subr.bf16.mxu0 %v13332_v14 }
 0xce6   :  { %8457 = vmatpush1.bf16.msra.mxu1 %v13327_v24 }
 0xce7   :  { %8500 = vmatpush1.bf16.msra.mxu0 %v13330_v10  ;;  %8466 = vmatprep.subr.bf16.mxu1 %v13335_v34 }
 0xce8   :  { %8509 = vmatprep.subr.bf16.mxu0 %v13338_v28 }
 0xcea   :  { %8467 = vmatpush2.bf16.msra.mxu1 %v13333_v3 }
 0xceb   :  { %8510 = vmatpush2.bf16.msra.mxu0 %v13336_v53  ;;  %8468 = vmatprep.subr.bf16.mxu1 %v13341_v39 }
 0xcec   :  { %8511 = vmatprep.subr.bf16.mxu0 %v13344_v4 }
 0xcee   :  { %8469 = vmatpush2.bf16.msra.mxu1 %v13339_v27 }
 0xcef   :  { %8512 = vmatpush2.bf16.msra.mxu0 %v13342_v51  ;;  %8470 = vmatprep.subr.bf16.mxu1 %v13347_v59 }
 0xcf0   :  { %8513 = vmatprep.subr.bf16.mxu0 %v13350_v49 }
 0xcf2   :  { %8471 = vmatpush2.bf16.msra.mxu1 %v13345_v19 }
 0xcf3   :  { %8514 = vmatpush2.bf16.msra.mxu0 %v13348_v58  ;;  %8472 = vmatprep.subr.bf16.mxu1 %v13353_v44 }
 0xcf4   :  { %8515 = vmatprep.subr.bf16.mxu0 %v13356_v36 }
 0xcf6   :  { %8473 = vmatpush2.bf16.msra.mxu1 %v13351_v12 }
 0xcf7   :  { %8516 = vmatpush2.bf16.msra.mxu0 %v13354_v31  ;;  %11663 = vmatprep.subr.msk.mxu1 %vm6708_vm0, %v14326_v35  ;;  %v6702_v31 = vadd.f32 %v6701_v41, %v14426_v29  ;;  %v14820_v29 = vld [vmem:[#allocation33_spill] sm:$0xff] }
 0xcf9   :  { %8475 = vmatmul.mubr.bf16.vlgmr.msra.gmra.mxu1 %v14521_v20 }
 0xcfa   :  { %8518 = vmatmul.mubr.bf16.vlgmr.msra.gmra.mxu0 %v14521_v20  ;;  %8565 = vmatpush1.xpose.msra.mxu1 %v14310_v11 }
 0xcfb   :  { %11664 = vmatprep.mubr.msk.f32.mxu1 %vm6708_vm0, %v14228_v40  ;;  %8648 = vmatprep.subr.mxu1 %v14534_v48 }
 0xd01   :  { %8599 = vmatmul.mubr.f32.vlgmr.msra.gmra.mxu1 %v14816_v23 }
 0xd02   :  { %8649 = vmatpush1.msra.mxu1 %v14410_v50  ;;  %8682 = vmatprep.mubr.f32.mxu1 %v13940_v60 }
 0xd03   :  { %11666 = vmatprep.subr.msk.mxu1 %vm6708_vm0, %v14332_v8 }
 0xd59   :  { %v14549_v20 = vpop.f32.mrf.mxu0  ;;  %v7941_v6 = vpop.f32.mrf.mxu1 }
 0xd5b   :  { %v14551_v11 = vpop.f32.mrf.mxu0  ;;  %v7943_v16 = vpop.f32.mrf.mxu1 }
 0xd5d   :  { %v14553_v13 = vpop.f32.mrf.mxu0  ;;  %v7945_v2 = vpop.f32.mrf.mxu1 }
 0xd5f   :  { %v7990_v45 = vpop.f32.mrf.mxu0  ;;  %v7947_v30 = vpop.f32.mrf.mxu1 }
 0xd89   :  { %v8433_v47 = vpop.f32.mrf.mxu0  ;;  %v8027_v22 = vpop.f32.mrf.mxu1 }
 0xd8a   :  { %v14555_v50 = vadd.f32 %v8433_v47, %v7941_v6  ;;  %v14592_v6 = vadd.f32 %v6703_v38, %v14429_v7 }
 0xd8b   :  { %v8435_v56 = vpop.f32.mrf.mxu0  ;;  %v8029_v55 = vpop.f32.mrf.mxu1 }
 0xd8c   :  { %v14557_v57 = vadd.f32 %v8435_v56, %v7943_v16 }
 0xd8d   :  { %v8437_v61 = vpop.f32.mrf.mxu0  ;;  %v8031_v0 = vpop.f32.mrf.mxu1 }
 0xd8e   :  { %v14559_v18 = vadd.f32 %v8437_v61, %v7945_v2 }
 0xd8f   :  { %v8439_v46 = vpop.f32.mrf.mxu0  ;;  %v14563_v32 = vpop.f32.mrf.mxu1 }
 0xd90   :  { %v14561_v26 = vadd.f32 %v8439_v46, %v7947_v30  ;;  %v13360_v30 = vld [vmem:[#allocation17 + $0x5d8] ss:$24 sps:$4 sm:$0xff]   ;;  %v13362_v46 = vld [vmem:[#allocation17 + $0x5dc] ss:$24 sps:$4 sm:$0xff]  }
 0xd91   :  { %9330 = vmatprep.subr.bf16.mxu0 %v13362_v46  ;;  %v13389_v46 = vld [vmem:[#allocation17 + $0x4e4] ss:$24 sps:$4 sm:$0xff]  }
 0xd92   :  { %9331 = vmatpush1.bf16.msra.mxu0 %v13360_v30  ;;  %v13381_v30 = vld [vmem:[#allocation17 + $0x510] ss:$24 sps:$4 sm:$0xff]  }
 0xdb9   :  { %v14565_v5 = vpop.f32.mrf.mxu1 }
 0xdba   :  { %v8519_v14 = vpop.f32.mrf.mxu0 }
 0xdbb   :  { %v14567_v24 = vadd.f32 %v8519_v14, %v8027_v22  ;;  %v14569_v10 = vpop.f32.mrf.mxu1  ;;  %v13366_v22 = vld [vmem:[#allocation17 + $0x5a8] ss:$24 sps:$4 sm:$0xff]   ;;  %v13374_v14 = vld [vmem:[#allocation17 + $0x57c] ss:$24 sps:$4 sm:$0xff]  }
 0xdbc   :  { %v8521_v34 = vpop.f32.mrf.mxu0 }
 0xdbd   :  { %v14571_v28 = vadd.f32 %v8521_v34, %v8029_v55  ;;  %v14573_v3 = vpop.f32.mrf.mxu1  ;;  %v13368_v55 = vld [vmem:[#allocation17 + $0x5ac] ss:$24 sps:$4 sm:$0xff]   ;;  %v13378_v34 = vld [vmem:[#allocation17 + $0x548] ss:$24 sps:$4 sm:$0xff]  }
 0xdbe   :  { %v8523_v53 = vpop.f32.mrf.mxu0  ;;  %9332 = vmatprep.subr.bf16.mxu0 %v13368_v55  ;;  %v13393_v55 = vld [vmem:[#allocation17 + $0x4b0] ss:$24 sps:$4 sm:$0xff]  }
 0xdbf   :  { %v14575_v39 = vadd.f32 %v8523_v53, %v8031_v0  ;;  %v8482_v4 = vpop.f32.mrf.mxu1  ;;  %9333 = vmatpush1.bf16.msra.mxu0 %v13366_v22  ;;  %v13372_v0 = vld [vmem:[#allocation17 + $0x578] ss:$24 sps:$4 sm:$0xff]   ;;  %v13380_v53 = vld [vmem:[#allocation17 + $0x54c] ss:$24 sps:$4 sm:$0xff]  }
 0xdc0   :  { %v14577_v27 = vadd.f32 %v8482_v4, %v7990_v45  ;;  %9334 = vmatprep.subr.bf16.mxu0 %v13374_v14  ;;  %v13384_v4 = vld [vmem:[#allocation17 + $0x518] ss:$24 sps:$4 sm:$0xff]   ;;  %v13395_v22 = vld [vmem:[#allocation17 + $0x4b4] ss:$24 sps:$4 sm:$0xff]  }
 0xdc1   :  { %v8600_v51 = vpop.f32.mrf.mxu1  ;;  %v13399_v14 = vld [vmem:[#allocation17 + $0x480] ss:$24 sps:$4 sm:$0xff]  }
 0xdc2   :  { %v8604_v59 = vsel %vm6785_vm1, %v8600_v51, -inf }
 0xdc3   :  { %8605 = vmax.xlane.f32.xlu0 %v8604_v59  ;;  %v8602_v49 = vpop.f32.mrf.mxu1  ;;  %9335 = vmatpush1.bf16.msra.mxu0 %v13372_v0  ;;  %v13392_v59 = vld [vmem:[#allocation17 + $0x4ec] ss:$24 sps:$4 sm:$0xff]  }
 0xdc4   :  { %9336 = vmatprep.subr.bf16.mxu0 %v13380_v53  ;;  %v13396_v49 = vld [vmem:[#allocation17 + $0x4b8] ss:$24 sps:$4 sm:$0xff]   ;;  %v13401_v0 = vld [vmem:[#allocation17 + $0x484] ss:$24 sps:$4 sm:$0xff]  }
 0xdc5   :  { %v13405_v53 = vld [vmem:[#allocation17 + $0x690] ss:$24 sps:$4 sm:$0xff]  }
 0xdc7   :  { %9337 = vmatpush1.bf16.msra.mxu0 %v13378_v34  ;;  %v13407_v34 = vld [vmem:[#allocation17 + $0x694] ss:$24 sps:$4 sm:$0xff]  }
 0xe4c   :  { %v8606_v19 = vpop.xlane.xlu0 %8605 }
 0xe4d   :  { %v8607_v58 = vsub.f32 %v8600_v51, %v8606_v19  ;;  %v13390_v51 = vld [vmem:[#allocation17 + $0x4e8] ss:$24 sps:$4 sm:$0xff]   ;;  %v13398_v19 = vld [vmem:[#allocation17 + $0x4bc] ss:$24 sps:$4 sm:$0xff]  }
 0xe4f   :  { %v8608_v44 = vmul.f32 1.442695, %v8607_v58  ;;  %v13402_v58 = vld [vmem:[#allocation17 + $0x488] ss:$24 sps:$4 sm:$0xff]  }
 0xe51   :  { %13589 = vpow2.f32 %v8608_v44  ;;  %v13404_v44 = vld [vmem:[#allocation17 + $0x48c] ss:$24 sps:$4 sm:$0xff]  }
 0xe5e   :  { %v13590_v36 = vpop.eup %13589 }
 0xe5f   :  { %v8610_v12 = vsel %vm6785_vm1, %v13590_v36, 0.0 }
 0xe60   :  { %8611 = vadd.xlane.f32.xlu1 %v8610_v12  ;;  %v13410_v12 = vld [vmem:[#allocation17 + $0x69c] ss:$24 sps:$4 sm:$0xff]  }
 0xe71   :  { %9438 = vrot.lane.b32.xlu1 %v14330_v21, %s13941_s10  ;;  %v14819_v21 = vld [vmem:[#allocation35_spill] sm:$0xff] }
 0xe75   :  { %9429 = vrot.lane.b32.xlu1 %v14228_v40, %s13941_s10  ;;  %v14818_v40 = vld [vmem:[#allocation37_spill] sm:$0xff] }
 0xe79   :  { %9431 = vrot.lane.b32.xlu1 %v14817_v62, %s13941_s10  ;;  %v13414_v62 = vld [vmem:[#allocation17 + $0x668] ss:$24 sps:$4 sm:$0xff]  }
 0xe7d   :  { %9531 = vrot.lane.b32.xlu1 %v6702_v31, %s13941_s10  ;;  %v13416_v31 = vld [vmem:[#allocation17 + $0x66c] ss:$24 sps:$4 sm:$0xff]  }
 0xe81   :  { %9620 = vrot.lane.b32.xlu1 %v14334_v63, %s13941_s10 }
 0xee9   :  { %v8612_v43 = vpop.xlane.xlu1 %8611 }
 0xeea   :  { %13591 = vrcp.f32 %v8612_v43  ;;  %v13420_v43 = vld [vmem:[#allocation17 + $0x638] ss:$24 sps:$4 sm:$0xff]  }
 0xef7   :  { %v13592_v15 = vpop.eup %13591 }
 0xef8   :  { %v8614_v23 = vmul.f32 %v13592_v15, %v13590_v36  ;;  %v13408_v36 = vld [vmem:[#allocation17 + $0x698] ss:$24 sps:$4 sm:$0xff]   ;;  %v13422_v15 = vld [vmem:[#allocation17 + $0x63c] ss:$24 sps:$4 sm:$0xff]  }
 0xefa   :  { %11665 = vmatmul.mubr.msk.f32.vlgmr.msra.gmra.mxu1 %vm6785_vm1, %v8614_v23 }
 0xefb   :  { %8726 = vmatpush1.xpose.msra.mxu1 %v14818_v40  ;;  %11667 = vmatprep.mubr.msk.f32.mxu1 %vm6708_vm0, %v14819_v21 }
 0xefc   :  { %8809 = vmatprep.subr.mxu1 %v14592_v6 }
 0xefe   :  { %8760 = vmatmul.mubr.f32.vlgmr.msra.gmra.mxu1 %v14820_v29  ;;  %v13357_v29 = vld [vmem:[#allocation17 + $0x5d0] ss:$24 sps:$4 sm:$0xff]  }
 0xeff   :  { %8810 = vmatpush1.msra.mxu1 %v14414_v52  ;;  %8843 = vmatprep.mubr.f32.mxu1 %v13940_v60  ;;  %v13359_v52 = vld [vmem:[#allocation17 + $0x5d4] ss:$24 sps:$4 sm:$0xff]  }
 0xf00   :  { %9287 = vmatprep.subr.bf16.mxu1 %v13359_v52  ;;  %v13383_v52 = vld [vmem:[#allocation17 + $0x514] ss:$24 sps:$4 sm:$0xff]  }
 0xfba   :  { %v14602_v63 = vpop.f32.mrf.mxu1 }
 0xfbc   :  { %v14604_v41 = vpop.f32.mrf.mxu1 }
 0xfbe   :  { %v8761_v7 = vpop.f32.mrf.mxu1 }
 0xfbf   :  { %v8765_v38 = vsel %vm6785_vm1, %v8761_v7, -inf }
 0xfc0   :  { %8766 = vmax.xlane.f32.xlu0 %v8765_v38  ;;  %v8763_v16 = vpop.f32.mrf.mxu1  ;;  %v13365_v38 = vld [vmem:[#allocation17 + $0x5a4] ss:$24 sps:$4 sm:$0xff]  }
 0xfc1   :  { %v13363_v16 = vld [vmem:[#allocation17 + $0x5a0] ss:$24 sps:$4 sm:$0xff]  }
0x1049   :  { %v8767_v45 = vpop.xlane.xlu0 %8766 }
0x104a   :  { %v8768_v47 = vsub.f32 %v8761_v7, %v8767_v45  ;;  %v13371_v45 = vld [vmem:[#allocation17 + $0x574] ss:$24 sps:$4 sm:$0xff]  }
0x104c   :  { %v8769_v2 = vmul.f32 1.442695, %v8768_v47  ;;  %v13369_v47 = vld [vmem:[#allocation17 + $0x570] ss:$24 sps:$4 sm:$0xff]  }
0x104e   :  { %13593 = vpow2.f32 %v8769_v2  ;;  %v13377_v2 = vld [vmem:[#allocation17 + $0x544] ss:$24 sps:$4 sm:$0xff]  }
0x105b   :  { %v13594_v56 = vpop.eup %13593 }
0x105c   :  { %v8771_v61 = vsel %vm6785_vm1, %v13594_v56, 0.0 }
0x105d   :  { %8772 = vadd.xlane.f32.xlu0 %v8771_v61  ;;  %v13375_v61 = vld [vmem:[#allocation17 + $0x540] ss:$24 sps:$4 sm:$0xff]  }
0x1073   :  { %9436 = vrot.lane.b32.xlu0 %v14326_v35, %s13941_s10  ;;  %v13386_v35 = vld [vmem:[#allocation17 + $0x51c] ss:$24 sps:$4 sm:$0xff]  }
0x1074   :  { %9338 = vmatprep.subr.bf16.mxu0 %v13386_v35  ;;  %v13411_v35 = vld [vmem:[#allocation17 + $0x660] ss:$24 sps:$4 sm:$0xff]  }
0x1075   :  { %9339 = vmatpush1.bf16.msra.mxu0 %v13384_v4  ;;  %v13413_v4 = vld [vmem:[#allocation17 + $0x664] ss:$24 sps:$4 sm:$0xff]  }
0x1076   :  { %9340 = vmatprep.subr.bf16.mxu0 %v13392_v59  ;;  %v13417_v59 = vld [vmem:[#allocation17 + $0x630] ss:$24 sps:$4 sm:$0xff]  }
0x1079   :  { %9341 = vmatpush1.bf16.msra.mxu0 %v13390_v51  ;;  %v13419_v51 = vld [vmem:[#allocation17 + $0x634] ss:$24 sps:$4 sm:$0xff]  }
0x107a   :  { %9342 = vmatprep.subr.bf16.mxu0 %v13398_v19  ;;  %v13423_v19 = vld [vmem:[#allocation17 + $0x600] ss:$24 sps:$4 sm:$0xff]  }
0x107d   :  { %9343 = vmatpush1.bf16.msra.mxu0 %v13396_v49  ;;  %v13425_v49 = vld [vmem:[#allocation17 + $0x604] ss:$24 sps:$4 sm:$0xff]  }
0x107e   :  { %9344 = vmatprep.subr.bf16.mxu0 %v13404_v44  ;;  %v13426_v44 = vld [vmem:[#allocation17 + $0x608] ss:$24 sps:$4 sm:$0xff]  }
0x1081   :  { %9345 = vmatpush1.bf16.msra.mxu0 %v13402_v58  ;;  %v13428_v58 = vld [vmem:[#allocation17 + $0x60c] ss:$24 sps:$4 sm:$0xff]  }
0x1082   :  { %9354 = vmatprep.subr.bf16.mxu0 %v13410_v12 }
0x1085   :  { %9355 = vmatpush2.bf16.msra.mxu0 %v13408_v36  ;;  %v13431_v36 = vld [vmem:[#allocation17 + $0x5e4] ss:$24 sps:$4 sm:$0xff]  }
0x1086   :  { %9356 = vmatprep.subr.bf16.mxu0 %v13416_v31 }
0x1089   :  { %9357 = vmatpush2.bf16.msra.mxu0 %v13414_v62 }
0x108a   :  { %9358 = vmatprep.subr.bf16.mxu0 %v13422_v15 }
0x108d   :  { %9359 = vmatpush2.bf16.msra.mxu0 %v13420_v43  ;;  %v13429_v43 = vld [vmem:[#allocation17 + $0x5e0] ss:$24 sps:$4 sm:$0xff]  }
0x108e   :  { %9360 = vmatprep.subr.bf16.mxu0 %v13428_v58 }
0x1091   :  { %9361 = vmatpush2.bf16.msra.mxu0 %v13426_v44  ;;  %v8525_v44 = vpop.f32.mrf.mxu0 }
0x10e6   :  { %v8773_v23 = vpop.xlane.xlu0 %8772 }
0x10e7   :  { %13595 = vrcp.f32 %v8773_v23  ;;  %v13434_v23 = vld [vmem:[#allocation17 + $0x5b4] ss:$24 sps:$4 sm:$0xff]  }
0x10f4   :  { %v13596_v40 = vpop.eup %13595 }
0x10f5   :  { %v8775_v7 = vmul.f32 %v13596_v40, %v13594_v56  ;;  %v13387_v56 = vld [vmem:[#allocation17 + $0x4e0] ss:$24 sps:$4 sm:$0xff]   ;;  %v13432_v40 = vld [vmem:[#allocation17 + $0x5b0] ss:$24 sps:$4 sm:$0xff]  }
0x10f7   :  { %11668 = vmatmul.mubr.msk.f32.vlgmr.msra.gmra.mxu1 %vm6785_vm1, %v8775_v7  ;;  %v13440_v7 = vld [vmem:[#allocation17 + $0x554] ss:$24 sps:$4 sm:$0xff]  }
0x10f8   :  { %9288 = vmatpush1.bf16.msra.mxu1 %v13357_v29  ;;  %v13437_v29 = vld [vmem:[#allocation17 + $0x584] ss:$24 sps:$4 sm:$0xff]  }
0x10f9   :  { %9289 = vmatprep.subr.bf16.mxu1 %v13365_v38  ;;  %v13443_v38 = vld [vmem:[#allocation17 + $0x524] ss:$24 sps:$4 sm:$0xff]  }
0x10fc   :  { %9290 = vmatpush1.bf16.msra.mxu1 %v13363_v16  ;;  %v13441_v16 = vld [vmem:[#allocation17 + $0x520] ss:$24 sps:$4 sm:$0xff]  }
0x10fd   :  { %9291 = vmatprep.subr.bf16.mxu1 %v13371_v45  ;;  %v13446_v45 = vld [vmem:[#allocation17 + $0x4f4] ss:$24 sps:$4 sm:$0xff]  }
0x1100   :  { %9292 = vmatpush1.bf16.msra.mxu1 %v13369_v47  ;;  %v13444_v47 = vld [vmem:[#allocation17 + $0x4f0] ss:$24 sps:$4 sm:$0xff]  }
0x1101   :  { %9293 = vmatprep.subr.bf16.mxu1 %v13377_v2  ;;  %v13449_v2 = vld [vmem:[#allocation17 + $0x4c4] ss:$24 sps:$4 sm:$0xff]  }
0x1104   :  { %9294 = vmatpush1.bf16.msra.mxu1 %v13375_v61  ;;  %v13447_v61 = vld [vmem:[#allocation17 + $0x4c0] ss:$24 sps:$4 sm:$0xff]  }
0x1105   :  { %9295 = vmatprep.subr.bf16.mxu1 %v13383_v52  ;;  %v13452_v52 = vld [vmem:[#allocation17 + $0x494] ss:$24 sps:$4 sm:$0xff]  }
0x1108   :  { %9296 = vmatpush1.bf16.msra.mxu1 %v13381_v30  ;;  %v13450_v30 = vld [vmem:[#allocation17 + $0x490] ss:$24 sps:$4 sm:$0xff]  }
0x1109   :  { %9297 = vmatprep.subr.bf16.mxu1 %v13389_v46  ;;  %v13455_v46 = vld [vmem:[#allocation17 + $0x6a4] ss:$24 sps:$4 sm:$0xff]  }
0x110c   :  { %9298 = vmatpush1.bf16.msra.mxu1 %v13387_v56  ;;  %v13453_v56 = vld [vmem:[#allocation17 + $0x6a0] ss:$24 sps:$4 sm:$0xff]  }
0x110d   :  { %9299 = vmatprep.subr.bf16.mxu1 %v13395_v22  ;;  %v13458_v22 = vld [vmem:[#allocation17 + $0x674] ss:$24 sps:$4 sm:$0xff]  }
0x1110   :  { %9300 = vmatpush1.bf16.msra.mxu1 %v13393_v55  ;;  %v9439_v55 = vpop.permute.xlu1 %9438 }
0x1111   :  { %9301 = vmatprep.subr.bf16.mxu1 %v13401_v0  ;;  %v13456_v0 = vld [vmem:[#allocation17 + $0x670] ss:$24 sps:$4 sm:$0xff]  }
0x1114   :  { %9302 = vmatpush1.bf16.msra.mxu1 %v13399_v14  ;;  %v13461_v14 = vld [vmem:[#allocation17 + $0x644] ss:$24 sps:$4 sm:$0xff]  }
0x1115   :  { %9311 = vmatprep.subr.bf16.mxu1 %v13407_v34  ;;  %v9430_v34 = vpop.permute.xlu1 %9429 }
0x1118   :  { %9312 = vmatpush2.bf16.msra.mxu1 %v13405_v53  ;;  %v13459_v53 = vld [vmem:[#allocation17 + $0x640] ss:$24 sps:$4 sm:$0xff]  }
0x1119   :  { %9313 = vmatprep.subr.bf16.mxu1 %v13413_v4  ;;  %v13464_v4 = vld [vmem:[#allocation17 + $0x614] ss:$24 sps:$4 sm:$0xff]  }
0x111c   :  { %9314 = vmatpush2.bf16.msra.mxu1 %v13411_v35  ;;  %v13462_v35 = vld [vmem:[#allocation17 + $0x610] ss:$24 sps:$4 sm:$0xff]  }
0x111d   :  { %9315 = vmatprep.subr.bf16.mxu1 %v13419_v51  ;;  %v9432_v51 = vpop.permute.xlu1 %9431 }
0x111e   :  { %v9433_v58 = vsel %vm6708_vm0, %v9430_v34, %v9432_v51 }
0x1120   :  { %9316 = vmatpush2.bf16.msra.mxu1 %v13417_v59  ;;  %v9437_v59 = vpop.permute.xlu0 %9436 }
0x1121   :  { %9317 = vmatprep.subr.bf16.mxu1 %v13425_v49  ;;  %v9440_v49 = vsel %vm6708_vm0, %v9437_v59, %v9439_v55 }
0x1124   :  { %9318 = vmatpush2.bf16.msra.mxu1 %v13423_v19  ;;  %v9532_v19 = vpop.permute.xlu1 %9531 }
0x1125   :  { %9373 = vmatprep.subr.bf16.mxu1 %v13431_v36  ;;  %v8477_v36 = vadd.f32 %v14565_v5, %v14549_v20 }
0x11b7   :  { %v8845_v12 = vpop.f32.mrf.mxu1 }
0x11b8   :  { %v8850_v15 = vpack.c.bf16 %v8845_v12, %v14602_v63  ;;  %v13438_v63 = vld [vmem:[#allocation17 + $0x550] ss:$24 sps:$4 sm:$0xff]  }
0x11b9   :  { %v8847_v62 = vpop.f32.mrf.mxu1 }
0x11ba   :  { %v8851_v31 = vpack.c.bf16 %v8847_v62, %v14604_v41  ;;  %v13435_v41 = vld [vmem:[#allocation17 + $0x580] ss:$24 sps:$4 sm:$0xff]  }
0x11bc   :  { %11741 = vmatprep.mubr.msk.bf16.mxu1 %vm6708_vm0, %v8851_v31  ;;  %11742 = vmatprep.mubr.msk.bf16.mxu0 %vm6708_vm0, %v8851_v31 }
0x11bd   :  { %9320 = vmatmul.mubr.bf16.vlgmr.msra.gmra.mxu1 %v8850_v15  ;;  %9363 = vmatmul.mubr.bf16.vlgmr.msra.gmra.mxu0 %v8850_v15 }
0x11be   :  { %9374 = vmatpush1.bf16.msra.mxu1 %v13429_v43  ;;  %11743 = vmatprep.mubr.msk.bf16.mxu1 %vm6708_vm0, %v8851_v31  ;;  %v8479_v31 = vadd.f32 %v14569_v10, %v14551_v11 }
0x11bf   :  { %9375 = vmatprep.subr.bf16.mxu1 %v13434_v23  ;;  %9785 = vmatprep.mubr.f32.mxu0 %v13940_v60 }
0x11c2   :  { %9376 = vmatpush1.bf16.msra.mxu1 %v13432_v40 }
0x11c3   :  { %9377 = vmatprep.subr.bf16.mxu1 %v13437_v29  ;;  %v8481_v29 = vadd.f32 %v14573_v3, %v14553_v13 }
0x11c6   :  { %9378 = vmatpush1.bf16.msra.mxu1 %v13435_v41 }
0x11c7   :  { %9379 = vmatprep.subr.bf16.mxu1 %v13440_v7 }
0x11ca   :  { %9380 = vmatpush1.bf16.msra.mxu1 %v13438_v63 }
0x11cb   :  { %9381 = vmatprep.subr.bf16.mxu1 %v13443_v38 }
0x11ce   :  { %9382 = vmatpush1.bf16.msra.mxu1 %v13441_v16  ;;  %v8526_v16 = vadd.f32 %v8525_v44, %v14563_v32 }
0x11cf   :  { %9383 = vmatprep.subr.bf16.mxu1 %v13446_v45 }
0x11d2   :  { %9384 = vmatpush1.bf16.msra.mxu1 %v13444_v47 }
0x11d3   :  { %9385 = vmatprep.subr.bf16.mxu1 %v13449_v2 }
0x11d6   :  { %9386 = vmatpush1.bf16.msra.mxu1 %v13447_v61 }
0x11d7   :  { %9387 = vmatprep.subr.bf16.mxu1 %v13452_v52 }
0x11da   :  { %9388 = vmatpush1.bf16.msra.mxu1 %v13450_v30  ;;  %v9621_v30 = vpop.permute.xlu1 %9620 }
0x11db   :  { %9397 = vmatprep.subr.bf16.mxu1 %v13455_v46 }
0x11de   :  { %9398 = vmatpush2.bf16.msra.mxu1 %v13453_v56 }
0x11df   :  { %9399 = vmatprep.subr.bf16.mxu1 %v13458_v22 }
0x11e2   :  { %9400 = vmatpush2.bf16.msra.mxu1 %v13456_v0 }
0x11e3   :  { %9401 = vmatprep.subr.bf16.mxu1 %v13461_v14 }
0x11e6   :  { %9402 = vmatpush2.bf16.msra.mxu1 %v13459_v53 }
0x11e7   :  { %9403 = vmatprep.subr.bf16.mxu1 %v13464_v4 }
0x11ea   :  { %9404 = vmatpush2.bf16.msra.mxu1 %v13462_v35 }
0x11eb   :  { %11744 = vmatprep.subr.msk.mxu1 %vm6708_vm0, %v9439_v55 }
0x11ed   :  { %9406 = vmatmul.mubr.bf16.vlgmr.msra.gmra.mxu1 %v8850_v15 }
0x11ee   :  { %9477 = vmatpush1.xpose.msra.mxu1 %v9440_v49  ;;  %11745 = vmatprep.mubr.msk.f32.mxu1 %vm6708_vm0, %v9432_v51 }
0x11ef   :  { %9569 = vmatprep.subr.mxu1 %v9532_v19 }
0x11f5   :  { %9511 = vmatmul.mubr.f32.vlgmr.msra.gmra.mxu1 %v9433_v58 }
0x11f6   :  { %9603 = vmatprep.mubr.f32.mxu1 %v13940_v60 }
0x127d   :  { %v9321_v12 = vpop.f32.mrf.mxu1  ;;  %v9364_v62 = vpop.f32.mrf.mxu0 }
0x127e   :  { %v14627_v43 = vadd.f32 %v9321_v12, %v14555_v50  ;;  %v14629_v15 = vadd.f32 %v9364_v62, %v8477_v36  ;;  %v6706_v62 = vadd.f32 %v14547_v37, %v14431_v33  ;;  %v13494_v33 = vld [vmem:[#allocation17 + $0x75c] ss:$24 sps:$4 sm:$0xff]   ;;  %v13498_v37 = vld [vmem:[#allocation17 + $0x728] ss:$24 sps:$4 sm:$0xff]  }
0x127f   :  { %v9323_v23 = vpop.f32.mrf.mxu1  ;;  %v9366_v40 = vpop.f32.mrf.mxu0 }
0x1280   :  { %v14634_v60 = vadd.f32 %v9323_v23, %v14557_v57  ;;  %v14636_v41 = vadd.f32 %v9366_v40, %v8479_v31  ;;  %v13468_v31 = vld [vmem:[#allocation17 + $0x818] ss:$24 sps:$4 sm:$0xff]   ;;  %v13470_v23 = vld [vmem:[#allocation17 + $0x81c] ss:$24 sps:$4 sm:$0xff]   ;;  %v13474_v40 = vld [vmem:[#allocation17 + $0x7e8] ss:$24 sps:$4 sm:$0xff]  }
0x1281   :  { %v9325_v20 = vpop.f32.mrf.mxu1  ;;  %v9368_v5 = vpop.f32.mrf.mxu0 }
0x1282   :  { %v14639_v7 = vadd.f32 %v9325_v20, %v14559_v18  ;;  %v14641_v11 = vadd.f32 %v9368_v5, %v8481_v29  ;;  %v13476_v29 = vld [vmem:[#allocation17 + $0x7ec] ss:$24 sps:$4 sm:$0xff]   ;;  %v13482_v20 = vld [vmem:[#allocation17 + $0x7bc] ss:$24 sps:$4 sm:$0xff]   ;;  %v13486_v5 = vld [vmem:[#allocation17 + $0x788] ss:$24 sps:$4 sm:$0xff]  }
0x1283   :  { %v9327_v50 = vpop.f32.mrf.mxu1 }
0x1284   :  { %v14644_v10 = vadd.f32 %v9327_v50, %v14561_v26  ;;  %v13488_v50 = vld [vmem:[#allocation17 + $0x78c] ss:$24 sps:$4 sm:$0xff]  }
0x12ad   :  { %v9407_v63 = vpop.f32.mrf.mxu1 }
0x12ae   :  { %v14647_v38 = vadd.f32 %v9407_v63, %v14567_v24  ;;  %v13492_v63 = vld [vmem:[#allocation17 + $0x758] ss:$24 sps:$4 sm:$0xff]  }
0x12af   :  { %v9409_v13 = vpop.f32.mrf.mxu1 }
0x12b0   :  { %v14650_v57 = vadd.f32 %v9409_v13, %v14571_v28  ;;  %v13500_v13 = vld [vmem:[#allocation17 + $0x72c] ss:$24 sps:$4 sm:$0xff]  }
0x12b1   :  { %v9411_v3 = vpop.f32.mrf.mxu1 }
0x12b2   :  { %v14654_v18 = vadd.f32 %v9411_v3, %v14575_v39  ;;  %v13504_v3 = vld [vmem:[#allocation17 + $0x6f8] ss:$24 sps:$4 sm:$0xff]  }
0x12b3   :  { %v9413_v45 = vpop.f32.mrf.mxu1 }
0x12b4   :  { %v14656_v47 = vadd.f32 %v9413_v45, %v8526_v16  ;;  %v13506_v16 = vld [vmem:[#allocation17 + $0x6fc] ss:$24 sps:$4 sm:$0xff]   ;;  %v13510_v45 = vld [vmem:[#allocation17 + $0x6c8] ss:$24 sps:$4 sm:$0xff]  }
0x12b5   :  { %v9512_v2 = vpop.f32.mrf.mxu1 }
0x12b6   :  { %v9516_v26 = vsel %vm6785_vm1, %v9512_v2, -inf }
0x12b7   :  { %9517 = vmax.xlane.f32.xlu0 %v9516_v26  ;;  %v9514_v61 = vpop.f32.mrf.mxu1  ;;  %v13516_v26 = vld [vmem:[#allocation17 + $0x8d8] ss:$24 sps:$4 sm:$0xff]  }
0x12b8   :  { %v13518_v61 = vld [vmem:[#allocation17 + $0x8dc] ss:$24 sps:$4 sm:$0xff]  }
0x12cd   :  { %9529 = vrot.lane.b32.xlu0 %v14534_v48, %s13941_s10 }
0x12d1   :  { %9618 = vrot.lane.b32.xlu0 %v14332_v8, %s13941_s10  ;;  %v14821_v8 = vld [vmem:[#allocation36_spill] sm:$0xff] }
0x12d5   :  { %9611 = vrot.lane.b32.xlu0 %v14819_v21, %s13941_s10 }
0x1340   :  { %v9518_v32 = vpop.xlane.xlu0 %9517 }
0x1341   :  { %v9519_v24 = vsub.f32 %v9512_v2, %v9518_v32  ;;  %v13512_v2 = vld [vmem:[#allocation17 + $0x6cc] ss:$24 sps:$4 sm:$0xff]   ;;  %v13522_v32 = vld [vmem:[#allocation17 + $0x8a8] ss:$24 sps:$4 sm:$0xff]  }
0x1343   :  { %v9520_v28 = vmul.f32 1.442695, %v9519_v24  ;;  %v13524_v24 = vld [vmem:[#allocation17 + $0x8ac] ss:$24 sps:$4 sm:$0xff]  }
0x1344   :  { %v9530_v39 = vpop.permute.xlu0 %9529 }
0x1345   :  { %13597 = vpow2.f32 %v9520_v28  ;;  %v9533_v52 = vsel %vm6708_vm0, %v9530_v39, %v9532_v19  ;;  %v13528_v28 = vld [vmem:[#allocation17 + $0x878] ss:$24 sps:$4 sm:$0xff]   ;;  %v13530_v39 = vld [vmem:[#allocation17 + $0x87c] ss:$24 sps:$4 sm:$0xff]  }
0x1346   :  { %9570 = vmatpush1.msra.mxu1 %v9533_v52 }
0x1347   :  { %11747 = vmatprep.subr.msk.mxu1 %vm6708_vm0, %v9621_v30 }
0x1348   :  { %v9619_v21 = vpop.permute.xlu0 %9618 }
0x1349   :  { %v9622_v0 = vsel %vm6708_vm0, %v9619_v21, %v9621_v30  ;;  %v13467_v30 = vld [vmem:[#allocation17 + $0x814] ss:$24 sps:$4 sm:$0xff]   ;;  %v13465_v21 = vld [vmem:[#allocation17 + $0x810] ss:$24 sps:$4 sm:$0xff]  }
0x134c   :  { %v9612_v34 = vpop.permute.xlu0 %9611 }
0x1352   :  { %v13598_v46 = vpop.eup %13597 }
0x1353   :  { %v9522_v48 = vsel %vm6785_vm1, %v13598_v46, 0.0 }
0x1354   :  { %9523 = vadd.xlane.f32.xlu1 %v9522_v48 }
0x1365   :  { %9613 = vrot.lane.b32.xlu1 %v14821_v8, %s13941_s10 }
0x13dd   :  { %v9524_v56 = vpop.xlane.xlu1 %9523 }
0x13de   :  { %13599 = vrcp.f32 %v9524_v56 }
0x13e1   :  { %v9614_v14 = vpop.permute.xlu1 %9613 }
0x13e2   :  { %v9615_v53 = vsel %vm6708_vm0, %v9612_v34, %v9614_v14  ;;  %v13477_v34 = vld [vmem:[#allocation17 + $0x7b0] ss:$24 sps:$4 sm:$0xff]  }
0x13eb   :  { %v13600_v22 = vpop.eup %13599 }
0x13ec   :  { %v9526_v55 = vmul.f32 %v13600_v22, %v13598_v46 }
0x13ee   :  { %11746 = vmatmul.mubr.msk.f32.vlgmr.msra.gmra.mxu1 %vm6785_vm1, %v9526_v55  ;;  %v13473_v55 = vld [vmem:[#allocation17 + $0x7e4] ss:$24 sps:$4 sm:$0xff]  }
0x13ef   :  { %9659 = vmatpush1.xpose.msra.mxu1 %v9622_v0  ;;  %11748 = vmatprep.mubr.msk.f32.mxu1 %vm6708_vm0, %v9614_v14  ;;  %v13471_v0 = vld [vmem:[#allocation17 + $0x7e0] ss:$24 sps:$4 sm:$0xff]   ;;  %v13479_v14 = vld [vmem:[#allocation17 + $0x7b4] ss:$24 sps:$4 sm:$0xff]  }
0x13f0   :  { %10272 = vmatprep.subr.bf16.mxu1 %v13470_v23  ;;  %v13513_v23 = vld [vmem:[#allocation17 + $0x8d0] ss:$24 sps:$4 sm:$0xff]  }
0x13f2   :  { %9693 = vmatmul.mubr.f32.vlgmr.msra.gmra.mxu1 %v9615_v53  ;;  %v13485_v53 = vld [vmem:[#allocation17 + $0x784] ss:$24 sps:$4 sm:$0xff]  }
0x13f3   :  { %10273 = vmatpush1.bf16.msra.mxu1 %v13468_v31  ;;  %v13515_v31 = vld [vmem:[#allocation17 + $0x8d4] ss:$24 sps:$4 sm:$0xff]  }
0x13f4   :  { %10274 = vmatprep.subr.bf16.mxu1 %v13476_v29  ;;  %v13519_v29 = vld [vmem:[#allocation17 + $0x8a0] ss:$24 sps:$4 sm:$0xff]  }
0x13f7   :  { %10275 = vmatpush1.bf16.msra.mxu1 %v13474_v40  ;;  %v13521_v40 = vld [vmem:[#allocation17 + $0x8a4] ss:$24 sps:$4 sm:$0xff]  }
0x13f8   :  { %10276 = vmatprep.subr.bf16.mxu1 %v13482_v20  ;;  %v13525_v20 = vld [vmem:[#allocation17 + $0x870] ss:$24 sps:$4 sm:$0xff]  }
0x14ae   :  { %v14674_v4 = vpop.f32.mrf.mxu1 }
0x14b0   :  { %v14676_v35 = vpop.f32.mrf.mxu1 }
0x14b2   :  { %v9694_v51 = vpop.f32.mrf.mxu1 }
0x14b3   :  { %v9698_v59 = vsel %vm6785_vm1, %v9694_v51, -inf }
0x14b4   :  { %9699 = vmax.xlane.f32.xlu0 %v9698_v59  ;;  %v9696_v49 = vpop.f32.mrf.mxu1  ;;  %v13491_v59 = vld [vmem:[#allocation17 + $0x754] ss:$24 sps:$4 sm:$0xff]  }
0x14b5   :  { %v13489_v49 = vld [vmem:[#allocation17 + $0x750] ss:$24 sps:$4 sm:$0xff]  }
0x14ca   :  { %9711 = vrot.lane.b32.xlu0 %v14592_v6, %s13941_s10  ;;  %v13480_v6 = vld [vmem:[#allocation17 + $0x7b8] ss:$24 sps:$4 sm:$0xff]  }
0x14cb   :  { %10277 = vmatpush1.bf16.msra.mxu1 %v13480_v6  ;;  %v13527_v6 = vld [vmem:[#allocation17 + $0x874] ss:$24 sps:$4 sm:$0xff]  }
0x14cc   :  { %10278 = vmatprep.subr.bf16.mxu1 %v13488_v50  ;;  %v13531_v50 = vld [vmem:[#allocation17 + $0x840] ss:$24 sps:$4 sm:$0xff]  }
0x14cf   :  { %10279 = vmatpush1.bf16.msra.mxu1 %v13486_v5  ;;  %v13533_v5 = vld [vmem:[#allocation17 + $0x844] ss:$24 sps:$4 sm:$0xff]  }
0x14d0   :  { %10280 = vmatprep.subr.bf16.mxu1 %v13494_v33  ;;  %v13534_v33 = vld [vmem:[#allocation17 + $0x848] ss:$24 sps:$4 sm:$0xff]  }
0x14d3   :  { %10281 = vmatpush1.bf16.msra.mxu1 %v13492_v63  ;;  %v13536_v63 = vld [vmem:[#allocation17 + $0x84c] ss:$24 sps:$4 sm:$0xff]  }
0x14d4   :  { %10282 = vmatprep.subr.bf16.mxu1 %v13500_v13  ;;  %v14687_v13 = vpop.f32.mrf.mxu0 }
0x14d7   :  { %10283 = vmatpush1.bf16.msra.mxu1 %v13498_v37  ;;  %v13539_v37 = vld [vmem:[#allocation17 + $0x824] ss:$24 sps:$4 sm:$0xff]  }
0x14d8   :  { %10284 = vmatprep.subr.bf16.mxu1 %v13506_v16 }
0x14db   :  { %10285 = vmatpush1.bf16.msra.mxu1 %v13504_v3 }
0x14dc   :  { %10286 = vmatprep.subr.bf16.mxu1 %v13512_v2  ;;  %v13537_v2 = vld [vmem:[#allocation17 + $0x820] ss:$24 sps:$4 sm:$0xff]  }
0x14df   :  { %10287 = vmatpush1.bf16.msra.mxu1 %v13510_v45 }
0x14e0   :  { %10296 = vmatprep.subr.bf16.mxu1 %v13518_v61  ;;  %v13542_v61 = vld [vmem:[#allocation17 + $0x7f4] ss:$24 sps:$4 sm:$0xff]  }
0x14e3   :  { %10297 = vmatpush2.bf16.msra.mxu1 %v13516_v26 }
0x14e4   :  { %10298 = vmatprep.subr.bf16.mxu1 %v13524_v24  ;;  %v13545_v24 = vld [vmem:[#allocation17 + $0x7c4] ss:$24 sps:$4 sm:$0xff]  }
0x14e7   :  { %10299 = vmatpush2.bf16.msra.mxu1 %v13522_v32  ;;  %v13540_v32 = vld [vmem:[#allocation17 + $0x7f0] ss:$24 sps:$4 sm:$0xff]  }
0x14e8   :  { %10300 = vmatprep.subr.bf16.mxu1 %v13530_v39  ;;  %v13546_v39 = vld [vmem:[#allocation17 + $0x790] ss:$24 sps:$4 sm:$0xff]  }
0x14eb   :  { %10301 = vmatpush2.bf16.msra.mxu1 %v13528_v28  ;;  %v13543_v28 = vld [vmem:[#allocation17 + $0x7c0] ss:$24 sps:$4 sm:$0xff]  }
0x14ec   :  { %10302 = vmatprep.subr.bf16.mxu1 %v13536_v63 }
0x14ef   :  { %10303 = vmatpush2.bf16.msra.mxu1 %v13534_v33 }
0x153d   :  { %v9700_v19 = vpop.xlane.xlu0 %9699 }
0x153e   :  { %v9701_v58 = vsub.f32 %v9694_v51, %v9700_v19  ;;  %v13483_v51 = vld [vmem:[#allocation17 + $0x780] ss:$24 sps:$4 sm:$0xff]   ;;  %v13497_v19 = vld [vmem:[#allocation17 + $0x724] ss:$24 sps:$4 sm:$0xff]  }
0x1540   :  { %v9702_v44 = vmul.f32 1.442695, %v9701_v58  ;;  %v13495_v58 = vld [vmem:[#allocation17 + $0x720] ss:$24 sps:$4 sm:$0xff]  }
0x1541   :  { %v9712_v46 = vpop.permute.xlu0 %9711 }
0x1542   :  { %13601 = vpow2.f32 %v9702_v44  ;;  %v13503_v44 = vld [vmem:[#allocation17 + $0x6f4] ss:$24 sps:$4 sm:$0xff]  }
0x154f   :  { %v13602_v36 = vpop.eup %13601 }
0x1550   :  { %v9704_v12 = vsel %vm6785_vm1, %v13602_v36, 0.0 }
0x1551   :  { %9705 = vadd.xlane.f32.xlu1 %v9704_v12  ;;  %v13509_v12 = vld [vmem:[#allocation17 + $0x6c4] ss:$24 sps:$4 sm:$0xff]  }
0x1562   :  { %9713 = vrot.lane.b32.xlu1 %v6706_v62, %s13941_s10  ;;  %v13507_v62 = vld [vmem:[#allocation17 + $0x6c0] ss:$24 sps:$4 sm:$0xff]  }
0x15da   :  { %v9706_v52 = vpop.xlane.xlu1 %9705 }
0x15db   :  { %13603 = vrcp.f32 %v9706_v52  ;;  %v13549_v52 = vld [vmem:[#allocation17 + $0x760] ss:$24 sps:$4 sm:$0xff]  }
0x15de   :  { %v9714_v48 = vpop.permute.xlu1 %9713 }
0x15df   :  { %v9715_v8 = vsel %vm6708_vm0, %v9712_v46, %v9714_v48  ;;  %9751 = vmatprep.subr.mxu0 %v9714_v48  ;;  %v13552_v46 = vld [vmem:[#allocation17 + $0x730] ss:$24 sps:$4 sm:$0xff]   ;;  %v13557_v48 = vld [vmem:[#allocation17 + $0x704] ss:$24 sps:$4 sm:$0xff]  }
0x15e0   :  { %9752 = vmatpush1.msra.mxu0 %v9715_v8  ;;  %v13555_v8 = vld [vmem:[#allocation17 + $0x700] ss:$24 sps:$4 sm:$0xff]  }
0x15e1   :  { %10229 = vmatprep.subr.bf16.mxu0 %v13467_v30  ;;  %v13554_v30 = vld [vmem:[#allocation17 + $0x734] ss:$24 sps:$4 sm:$0xff]  }
0x15e8   :  { %v13604_v56 = vpop.eup %13603 }
0x15e9   :  { %v9708_v22 = vmul.f32 %v13604_v56, %v13602_v36  ;;  %v13501_v36 = vld [vmem:[#allocation17 + $0x6f0] ss:$24 sps:$4 sm:$0xff]   ;;  %v13560_v56 = vld [vmem:[#allocation17 + $0x6d4] ss:$24 sps:$4 sm:$0xff]  }
0x15eb   :  { %11749 = vmatmul.mubr.msk.f32.vlgmr.msra.gmra.mxu0 %vm6785_vm1, %v9708_v22  ;;  %v13563_v22 = vld [vmem:[#allocation17 + $0x8e4] ss:$24 sps:$4 sm:$0xff]  }
0x15ec   :  { %10230 = vmatpush1.bf16.msra.mxu0 %v13465_v21  ;;  %v13558_v21 = vld [vmem:[#allocation17 + $0x6d0] ss:$24 sps:$4 sm:$0xff]  }
0x15ed   :  { %10231 = vmatprep.subr.bf16.mxu0 %v13473_v55  ;;  %v13561_v55 = vld [vmem:[#allocation17 + $0x8e0] ss:$24 sps:$4 sm:$0xff]  }
0x15f0   :  { %10232 = vmatpush1.bf16.msra.mxu0 %v13471_v0  ;;  %v13566_v0 = vld [vmem:[#allocation17 + $0x8b4] ss:$24 sps:$4 sm:$0xff]  }
0x15f1   :  { %10233 = vmatprep.subr.bf16.mxu0 %v13479_v14  ;;  %v13564_v14 = vld [vmem:[#allocation17 + $0x8b0] ss:$24 sps:$4 sm:$0xff]  }
0x15f4   :  { %10234 = vmatpush1.bf16.msra.mxu0 %v13477_v34  ;;  %v13569_v34 = vld [vmem:[#allocation17 + $0x884] ss:$24 sps:$4 sm:$0xff]  }
0x15f5   :  { %10235 = vmatprep.subr.bf16.mxu0 %v13485_v53  ;;  %v13567_v53 = vld [vmem:[#allocation17 + $0x880] ss:$24 sps:$4 sm:$0xff]  }
0x15f8   :  { %10236 = vmatpush1.bf16.msra.mxu0 %v13483_v51  ;;  %v13572_v51 = vld [vmem:[#allocation17 + $0x854] ss:$24 sps:$4 sm:$0xff]  }
0x15f9   :  { %10237 = vmatprep.subr.bf16.mxu0 %v13491_v59  ;;  %v13570_v59 = vld [vmem:[#allocation17 + $0x850] ss:$24 sps:$4 sm:$0xff]  }
0x15fc   :  { %10238 = vmatpush1.bf16.msra.mxu0 %v13489_v49 }
0x15fd   :  { %10239 = vmatprep.subr.bf16.mxu0 %v13497_v19 }
0x1600   :  { %10240 = vmatpush1.bf16.msra.mxu0 %v13495_v58 }
0x1601   :  { %10241 = vmatprep.subr.bf16.mxu0 %v13503_v44  ;;  %v10370_v44 = vld [vmem:[#allocation19] sm:$0x3f] }
0x1602   :  { %v10383_v63 = vrot.slane %v10370_v44, %v14140_v17 }
0x1604   :  { %10242 = vmatpush1.bf16.msra.mxu0 %v13501_v36 }
0x1605   :  { %10243 = vmatprep.subr.bf16.mxu0 %v13509_v12 }
0x1608   :  { %10244 = vmatpush1.bf16.msra.mxu0 %v13507_v62  ;;  %v10379_v62 = vrot.slane %v10370_v44, %v14115_v54 }
0x1609   :  { %10253 = vmatprep.subr.bf16.mxu0 %v13515_v31 }
0x160c   :  { %10254 = vmatpush2.bf16.msra.mxu0 %v13513_v23  ;;  %v10375_v23 = vrot.slane %v10370_v44, %v14102_v42 }
0x160d   :  { %10255 = vmatprep.subr.bf16.mxu0 %v13521_v40 }
0x1610   :  { %10256 = vmatpush2.bf16.msra.mxu0 %v13519_v29 }
0x1611   :  { %10257 = vmatprep.subr.bf16.mxu0 %v13527_v6 }
0x1614   :  { %10258 = vmatpush2.bf16.msra.mxu0 %v13525_v20 }
0x1615   :  { %10259 = vmatprep.subr.bf16.mxu0 %v13533_v5 }
0x1618   :  { %10260 = vmatpush2.bf16.msra.mxu0 %v13531_v50 }
0x1619   :  { %10315 = vmatprep.subr.bf16.mxu0 %v13539_v37 }
0x16ab   :  { %v9787_v3 = vpop.f32.mrf.mxu0 }
0x16ac   :  { %v9792_v26 = vpack.c.bf16 %v9787_v3, %v14674_v4  ;;  %v13551_v4 = vld [vmem:[#allocation17 + $0x764] ss:$24 sps:$4 sm:$0xff]  }
0x16ad   :  { %v9789_v16 = vpop.f32.mrf.mxu0 }
0x16ae   :  { %v9793_v45 = vpack.c.bf16 %v9789_v16, %v14676_v35  ;;  %v13548_v35 = vld [vmem:[#allocation17 + $0x794] ss:$24 sps:$4 sm:$0xff]  }
0x16b0   :  { %11822 = vmatprep.mubr.msk.bf16.mxu0 %vm6708_vm0, %v9793_v45  ;;  %11823 = vmatprep.mubr.msk.bf16.mxu1 %vm6708_vm0, %v9793_v45 }
0x16b1   :  { %10262 = vmatmul.mubr.bf16.vlgmr.msra.gmra.mxu0 %v9792_v26  ;;  %10305 = vmatmul.mubr.bf16.vlgmr.msra.gmra.mxu1 %v9792_v26 }
0x16b2   :  { %10316 = vmatpush1.bf16.msra.mxu0 %v13537_v2  ;;  %11824 = vmatprep.mubr.msk.bf16.mxu0 %vm6708_vm0, %v9793_v45 }
0x16b3   :  { %10317 = vmatprep.subr.bf16.mxu0 %v13542_v61  ;;  %v10387_v61 = vrot.slane %v10370_v44, %v14153_v25 }
0x16b6   :  { %10318 = vmatpush1.bf16.msra.mxu0 %v13540_v32 }
0x16b7   :  { %10319 = vmatprep.subr.bf16.mxu0 %v13545_v24  ;;  %v9425_v24 = vadd.f32 %v14687_v13, %v14577_v27  ;;  %v10395_v27 = vrot.slane %v10370_v44, %v14207_v9  ;;  %v13620_v13 = vld [vmem:[#allocation2 + $0x18] sm:$0xff] }
0x16ba   :  { %10320 = vmatpush1.bf16.msra.mxu0 %v13543_v28  ;;  %v13617_v28 = vld [vmem:[#allocation2 + $0x38] sm:$0xff] }
0x16bb   :  { %10321 = vmatprep.subr.bf16.mxu0 %v13548_v35 }
0x16be   :  { %10322 = vmatpush1.bf16.msra.mxu0 %v13546_v39  ;;  %v13618_v39 = vld [vmem:[#allocation2 + $0x10] sm:$0xff] }
0x16bf   :  { %10323 = vmatprep.subr.bf16.mxu0 %v13551_v4 }
0x16c2   :  { %10324 = vmatpush1.bf16.msra.mxu0 %v13549_v52 }
0x16c3   :  { %10325 = vmatprep.subr.bf16.mxu0 %v13554_v30 }
0x16c6   :  { %10326 = vmatpush1.bf16.msra.mxu0 %v13552_v46  ;;  %v13619_v46 = vld [vmem:[#allocation2 + $0x30] sm:$0xff] }
0x16c7   :  { %10327 = vmatprep.subr.bf16.mxu0 %v13557_v48 }
0x16ca   :  { %10328 = vmatpush1.bf16.msra.mxu0 %v13555_v8  ;;  %v10391_v8 = vrot.slane %v10370_v44, %v14204_v1 }
0x16cb   :  { %10329 = vmatprep.subr.bf16.mxu0 %v13560_v56 }
0x16ce   :  { %10330 = vmatpush1.bf16.msra.mxu0 %v13558_v21 }
0x16cf   :  { %10339 = vmatprep.subr.bf16.mxu0 %v13563_v22 }
0x16d2   :  { %10340 = vmatpush2.bf16.msra.mxu0 %v13561_v55 }
0x16d3   :  { %10341 = vmatprep.subr.bf16.mxu0 %v13566_v0 }
0x16d6   :  { %10342 = vmatpush2.bf16.msra.mxu0 %v13564_v14 }
0x16d7   :  { %10343 = vmatprep.subr.bf16.mxu0 %v13569_v34  ;;  %v13621_v34 = vld [vmem:[#allocation2 + $0x40] sm:$0xff] }
0x16da   :  { %10344 = vmatpush2.bf16.msra.mxu0 %v13567_v53 }
0x16db   :  { %10345 = vmatprep.subr.bf16.mxu0 %v13572_v51 }
0x16de   :  { %10346 = vmatpush2.bf16.msra.mxu0 %v13570_v59 }
0x16e1   :  { %10348 = vmatmul.mubr.bf16.vlgmr.msra.gmra.mxu0 %v9792_v26 }
0x1771   :  { %v10263_v49 = vpop.f32.mrf.mxu0  ;;  %v10306_v36 = vpop.f32.mrf.mxu1 }
0x1772   :  { %v10358_v31 = vadd.f32 %v10263_v49, %v14627_v43  ;;  %v10360_v50 = vadd.f32 %v10306_v36, %v14629_v15  ;;  %v13616_v43 = vld [vmem:[#allocation2] sm:$0xff] }
0x1773   :  { %v10265_v19 = vpop.f32.mrf.mxu0  ;;  %v10308_v29 = vpop.f32.mrf.mxu1 }
0x1774   :  { %v10359_v12 = vadd.f32 %v10265_v19, %v14634_v60  ;;  %v10402_v5 = vadd.f32 %v10375_v23, %v10358_v31  ;;  %v13615_v60 = vld [vmem:[#allocation2 + $0x8] sm:$0xff]  ;;  %v10404_v2 = vadd.f32 %v10383_v63, %v10360_v50  ;;  %v10361_v26 = vadd.f32 %v10308_v29, %v14636_v41  ;;  %v13625_v50 = vld [vmem:[#allocation2 + $0x50] sm:$0xff] }
0x1775   :  { %v10267_v58 = vpop.f32.mrf.mxu0  ;;  %v10310_v37 = vpop.f32.mrf.mxu1 }
0x1776   :  { %v10403_v6 = vadd.f32 %v10379_v62, %v10359_v12  ;;  %v10364_v33 = vadd.f32 %v10267_v58, %v14639_v7  ;;  %v10414_v45 = vadd.f32 %v13616_v43, %v10402_v5  ;;  %v10366_v32 = vadd.f32 %v10310_v37, %v14641_v11  ;;  %v13622_v58 = vld [vmem:[#allocation2 + $0x20] sm:$0xff] }
0x1777   :  { %v10269_v40 = vpop.f32.mrf.mxu0  ;;  %v10312_v15 = vpop.f32.mrf.mxu1  ;;  %v10416_v4 = vadd.f32 %v13618_v39, %v10404_v2  ;;  %v10405_v52 = vadd.f32 %v10387_v61, %v10361_v26 }
0x1778   :  { %v10365_v20 = vadd.f32 %v10269_v40, %v14644_v10  ;;  %v14702_v3 = vadd.f32 %v13615_v60, %v10403_v6  ;;  %v10408_v10 = vadd.f32 %v10375_v23, %v10364_v33  ;;  %v10367_v30 = vadd.f32 %v10312_v15, %v9425_v24  ;;  %v13624_v6 = vld [vmem:[#allocation2 + $0x28] sm:$0xff]  ;;  %v13626_v60 = vld [vmem:[#allocation2 + $0x58] sm:$0xff] }
0x1779   :  { %v10410_v41 = vadd.f32 %v10383_v63, %v10366_v32  ;;  %v10417_v55 = vadd.f32 %v13620_v13, %v10405_v52 }
0x177a   :  { %v10409_v16 = vadd.f32 %v10379_v62, %v10365_v20  ;;  %v10426_v7 = vadd.f32 %v14702_v3, %v10414_v45  ;;  %v10420_v48 = vadd.f32 %v13619_v46, %v10408_v10  ;;  %v10411_v0 = vadd.f32 %v10387_v61, %v10367_v30 }
0x177b   :  { %v10422_v53 = vadd.f32 %v13621_v34, %v10410_v41 }
0x177c   :  { %v10421_v35 = vadd.f32 %v13617_v28, %v10409_v16  ;;  %v10427_v21 = vadd.f32 %v10426_v7, %v10416_v4 }
0x177e   :  { %v10433_v11 = vadd.f32 %v10421_v35, %v10420_v48  ;;  %v10428_v19 = vadd.f32 %v10427_v21, %v10417_v55 }
0x1780   :  { %v10434_v31 = vadd.f32 %v10433_v11, %v10422_v53 }
0x17a1   :  { %v10349_v56 = vpop.f32.mrf.mxu0 }
0x17a2   :  { %v10362_v22 = vadd.f32 %v10349_v56, %v14647_v38  ;;  %v13623_v38 = vld [vmem:[#allocation2 + $0x48] sm:$0xff] }
0x17a3   :  { %v10351_v14 = vpop.f32.mrf.mxu0  ;;  %v10423_v23 = vadd.f32 %v13623_v38, %v10411_v0 }
0x17a4   :  { %v10406_v51 = vadd.f32 %v10391_v8, %v10362_v22  ;;  %v10363_v59 = vadd.f32 %v10351_v14, %v14650_v57 }
0x17a5   :  { %v10353_v49 = vpop.f32.mrf.mxu0  ;;  %v10435_v37 = vadd.f32 %v10434_v31, %v10423_v23 }
0x17a6   :  { %v10418_v36 = vadd.f32 %v13622_v58, %v10406_v51  ;;  %v10407_v12 = vadd.f32 %v10395_v27, %v10363_v59  ;;  %v10368_v62 = vadd.f32 %v10353_v49, %v14654_v18 }
0x17a7   :  { %v10355_v44 = vpop.f32.mrf.mxu0 }
0x17a8   :  { %v10412_v40 = vadd.f32 %v10391_v8, %v10368_v62  ;;  %v10369_v29 = vadd.f32 %v10355_v44, %v14656_v47  ;;  %v10419_v20 = vadd.f32 %v13624_v6, %v10407_v12  ;;  %v10429_v5 = vadd.f32 %v10428_v19, %v10418_v36 }
0x17aa   :  { %v10424_v63 = vadd.f32 %v13625_v50, %v10412_v40  ;;  %v10413_v57 = vadd.f32 %v10395_v27, %v10369_v29  ;;  %v10430_v33 = vadd.f32 %v10429_v5, %v10419_v20 }
0x17ac   :  { %10431 = vadd.xlane.f32.xlu0 %v10430_v33  ;;  %v10425_v16 = vadd.f32 %v13626_v60, %v10413_v57  ;;  %v10436_v43 = vadd.f32 %v10435_v37, %v10424_v63  ;;  %v10513_v60 = vld [vmem:[#allocation20] sm:$0x3f] }
0x17ae   :  { %v10437_v18 = vadd.f32 %v10436_v43, %v10425_v16  ;;  %v10518_v43 = vrot.slane %v10513_v60, %v14102_v42 }
0x17b0   :  { %10438 = vadd.xlane.f32.xlu1 %v10437_v18 }
0x1835   :  { %v10432_v2 = vpop.xlane.xlu0 %10431 }
0x1836   :  { %v10441_v26 = vmul.f32 0.0013020834, %v10432_v2  ;;  %v10522_v2 = vrot.slane %v10513_v60, %v14115_v54 }
0x1838   :  { %v14716_v61 = vsub.f32 %v10414_v45, %v10441_v26  ;;  %v14719_v47 = vsub.f32 %v14702_v3, %v10441_v26  ;;  %v14721_v10 = vsub.f32 %v10416_v4, %v10441_v26  ;;  %v14723_v15 = vsub.f32 %v10417_v55, %v10441_v26 }
0x1839   :  { %v10439_v32 = vpop.xlane.xlu1 %10438  ;;  %v14729_v39 = vsub.f32 %v10418_v36, %v10441_v26  ;;  %v14739_v46 = vsub.f32 %v10419_v20, %v10441_v26 }
0x183a   :  { %v10442_v24 = vmul.f32 0.0013020834, %v10439_v32  ;;  %v10455_v7 = vmul.f32 %v14716_v61, %v14716_v61  ;;  %v10456_v28 = vmul.f32 %v14719_v47, %v14719_v47  ;;  %v10457_v45 = vmul.f32 %v14721_v10, %v14721_v10 }
0x183b   :  { %v10458_v41 = vmul.f32 %v14723_v15, %v14723_v15  ;;  %v10460_v55 = vmul.f32 %v14739_v46, %v14739_v46  ;;  %v10526_v32 = vrot.slane %v10513_v60, %v14140_v17 }
0x183c   :  { %v10467_v52 = vadd.f32 %v10456_v28, %v10455_v7  ;;  %v14733_v3 = vsub.f32 %v10420_v48, %v10442_v24  ;;  %v14735_v4 = vsub.f32 %v10421_v35, %v10442_v24  ;;  %v14737_v30 = vsub.f32 %v10422_v53, %v10442_v24 }
0x183d   :  { %v14743_v56 = vsub.f32 %v10423_v23, %v10442_v24  ;;  %v10459_v35 = vmul.f32 %v14729_v39, %v14729_v39  ;;  %v14751_v22 = vsub.f32 %v10424_v63, %v10442_v24  ;;  %v14757_v14 = vsub.f32 %v10425_v16, %v10442_v24  ;;  %v10557_v16 = vld [vmem:[#allocation22] sm:$0x3f] }
0x183e   :  { %v10468_v8 = vadd.f32 %v10467_v52, %v10457_v45  ;;  %v10461_v21 = vmul.f32 %v14733_v3, %v14733_v3  ;;  %v10462_v11 = vmul.f32 %v14735_v4, %v14735_v4  ;;  %v10463_v27 = vmul.f32 %v14737_v30, %v14737_v30 }
0x183f   :  { %v10464_v34 = vmul.f32 %v14743_v56, %v14743_v56  ;;  %v10465_v59 = vmul.f32 %v14751_v22, %v14751_v22  ;;  %v10466_v19 = vmul.f32 %v14757_v14, %v14757_v14  ;;  %v10562_v18 = vrot.slane %v10557_v16, %v14102_v42 }
0x1840   :  { %v10469_v48 = vadd.f32 %v10468_v8, %v10458_v41  ;;  %v10474_v13 = vadd.f32 %v10462_v11, %v10461_v21  ;;  %v10566_v26 = vrot.slane %v10557_v16, %v14115_v54  ;;  %v10530_v24 = vrot.slane %v10513_v60, %v14153_v25 }
0x1841   :  { %v10570_v28 = vrot.slane %v10557_v16, %v14140_v17  ;;  %v10574_v45 = vrot.slane %v10557_v16, %v14153_v25  ;;  %v10534_v52 = vrot.slane %v10513_v60, %v14204_v1  ;;  %v10538_v41 = vrot.slane %v10513_v60, %v14207_v9 }
0x1842   :  { %v10470_v0 = vadd.f32 %v10469_v48, %v10459_v35  ;;  %v10475_v53 = vadd.f32 %v10474_v13, %v10463_v27  ;;  %v10578_v11 = vrot.slane %v10557_v16, %v14204_v1  ;;  %v10582_v35 = vrot.slane %v10557_v16, %v14207_v9 }
0x1844   :  { %v10471_v51 = vadd.f32 %v10470_v0, %v10460_v55  ;;  %v10476_v49 = vadd.f32 %v10475_v53, %v10464_v34 }
0x1846   :  { %10472 = vadd.xlane.f32.xlu0 %v10471_v51  ;;  %v10477_v58 = vadd.f32 %v10476_v49, %v10465_v59 }
0x1848   :  { %v10478_v36 = vadd.f32 %v10477_v58, %v10466_v19 }
0x184a   :  { %10479 = vadd.xlane.f32.xlu0 %v10478_v36 }
0x18cf   :  { %v10473_v12 = vpop.xlane.xlu0 %10472 }
0x18d0   :  { %v10481_v62 = vmul.f32 0.0013020834, %v10473_v12 }
0x18d2   :  { %v10483_v31 = vadd.f32 1e-05, %v10481_v62 }
0x18d3   :  { %v10480_v38 = vpop.xlane.xlu0 %10479 }
0x18d4   :  { %13605 = vrsqrt.f32 %v10483_v31  ;;  %v10482_v23 = vmul.f32 0.0013020834, %v10480_v38  ;;  %vm10487_vm2 = vcmp.eq.f32.partialorder %v10483_v31, inf  ;;  %v10490_v6 = vand.u32 2147483648, %v10483_v31 }
0x18d5   :  { %vm10489_vm3 = vcmp.eq.f32.partialorder %v10483_v31, 0.0 }
0x18d6   :  { %v10484_v44 = vadd.f32 1e-05, %v10482_v23 }
0x18d8   :  { %13607 = vrsqrt.f32 %v10484_v44  ;;  %vm10494_vm4 = vcmp.eq.f32.partialorder %v10484_v44, inf  ;;  %v10497_v57 = vand.u32 2147483648, %v10484_v44  ;;  %vm10496_vm5 = vcmp.eq.f32.partialorder %v10484_v44, 0.0 }
0x18e1   :  { %v13606_v40 = vpop.eup %13605 }
0x18e2   :  { %v10486_v29 = vmul.f32 %v13606_v40, %v10483_v31 }
0x18e4   :  { %v10488_v20 = vsel %vm10487_vm2, %v10483_v31, %v10486_v29 }
0x18e5   :  { %v10491_v5 = vsel %vm10489_vm3, %v10490_v6, %v10488_v20  ;;  %v13608_v50 = vpop.eup %13607 }
0x18e6   :  { %13609 = vrcp.f32 %v10491_v5  ;;  %v10493_v63 = vmul.f32 %v13608_v50, %v10484_v44 }
0x18e8   :  { %v10495_v33 = vsel %vm10494_vm4, %v10484_v44, %v10493_v63 }
0x18e9   :  { %v10498_v37 = vsel %vm10496_vm5, %v10497_v57, %v10495_v33 }
0x18ea   :  { %13611 = vrcp.f32 %v10498_v37 }
0x18f3   :  { %v13610_v7 = vpop.eup %13609 }
0x18f4   :  { %v10500_v8 = vmul.f32 %v13610_v7, %v14716_v61  ;;  %v10501_v42 = vmul.f32 %v13610_v7, %v14719_v47  ;;  %v10502_v21 = vmul.f32 %v13610_v7, %v14721_v10  ;;  %v10503_v54 = vmul.f32 %v13610_v7, %v14723_v15 }
0x18f5   :  { %v10504_v17 = vmul.f32 %v13610_v7, %v14729_v39  ;;  %v10505_v25 = vmul.f32 %v13610_v7, %v14739_v46 }
0x18f6   :  { %v10545_v48 = vmul.f32 %v10518_v43, %v10500_v8  ;;  %v10546_v27 = vmul.f32 %v10522_v2, %v10501_v42  ;;  %v10547_v13 = vmul.f32 %v10526_v32, %v10502_v21  ;;  %v10548_v55 = vmul.f32 %v10530_v24, %v10503_v54 }
0x18f7   :  { %v10549_v0 = vmul.f32 %v10534_v52, %v10504_v17  ;;  %v10550_v61 = vmul.f32 %v10538_v41, %v10505_v25  ;;  %v13612_v34 = vpop.eup %13611 }
0x18f8   :  { %v10589_v47 = vadd.f32 %v10562_v18, %v10545_v48  ;;  %v10590_v53 = vadd.f32 %v10566_v26, %v10546_v27  ;;  %v10591_v10 = vadd.f32 %v10570_v28, %v10547_v13  ;;  %v10592_v51 = vadd.f32 %v10574_v45, %v10548_v55 }
0x18f9   :  { %v10507_v15 = vmul.f32 %v13612_v34, %v14733_v3  ;;  %v10508_v1 = vmul.f32 %v13612_v34, %v14735_v4  ;;  %v10509_v9 = vmul.f32 %v13612_v34, %v14737_v30  ;;  %v10510_v39 = vmul.f32 %v13612_v34, %v14743_v56 }
0x18fa   :  { %v10511_v46 = vmul.f32 %v13612_v34, %v14751_v22  ;;  %v10512_v59 = vmul.f32 %v13612_v34, %v14757_v14  ;;  %v10593_v49 = vadd.f32 %v10578_v11, %v10549_v0  ;;  %v10594_v19 = vadd.f32 %v10582_v35, %v10550_v61  ;;  %10601 = vst [vmem:[#allocation23] sm:$0xff] %v10589_v47 }
0x18fb   :  { %10602 = vst [vmem:[#allocation23 + $0x8] sm:$0xff] %v10590_v53  ;;  %10603 = vst [vmem:[#allocation23 + $0x10] sm:$0xff] %v10591_v10  ;;  %v10551_v58 = vmul.f32 %v10518_v43, %v10507_v15  ;;  %v10552_v36 = vmul.f32 %v10522_v2, %v10508_v1  ;;  %v10553_v12 = vmul.f32 %v10526_v32, %v10509_v9 }
0x18fc   :  { %10604 = vst [vmem:[#allocation23 + $0x18] sm:$0xff] %v10592_v51  ;;  %v10554_v3 = vmul.f32 %v10530_v24, %v10510_v39  ;;  %v10555_v4 = vmul.f32 %v10534_v52, %v10511_v46  ;;  %v10556_v30 = vmul.f32 %v10538_v41, %v10512_v59  ;;  %10605 = vst [vmem:[#allocation23 + $0x20] sm:$0xff] %v10593_v49 }
0x18fd   :  { %10606 = vst [vmem:[#allocation23 + $0x28] sm:$0xff] %v10594_v19  ;;  %v10595_v56 = vadd.f32 %v10562_v18, %v10551_v58  ;;  %v10596_v22 = vadd.f32 %v10566_v26, %v10552_v36  ;;  %v10597_v62 = vadd.f32 %v10570_v28, %v10553_v12 }
0x18fe   :  { %v10598_v14 = vadd.f32 %v10574_v45, %v10554_v3  ;;  %v10599_v31 = vadd.f32 %v10578_v11, %v10555_v4  ;;  %v10600_v38 = vadd.f32 %v10582_v35, %v10556_v30 }
0x18ff   :  { %10608 = vst [vmem:[#allocation23 + $0x30] sm:$0xff] %v10595_v56  ;;  %10609 = vst [vmem:[#allocation23 + $0x38] sm:$0xff] %v10596_v22 }
0x1900   :  { %10610 = vst [vmem:[#allocation23 + $0x40] sm:$0xff] %v10597_v62  ;;  %10611 = vst [vmem:[#allocation23 + $0x48] sm:$0xff] %v10598_v14 }
0x1901   :  { %10612 = vst [vmem:[#allocation23 + $0x50] sm:$0xff] %v10599_v31  ;;  %10613 = vst [vmem:[#allocation23 + $0x58] sm:$0xff] %v10600_v38 }
0x1902   :  { %13898 = shalt.err (!%p13895_p13)
}
0x1903   :  { %10625 = dma.vmem_to_hbm [thread:$0]  %s10620_s28, 1536, %s14808_s13, [#allocation4], %s13925_s30, %s13925_s30, %s13926_s14  }
0x1904   :  { %13921 = dma.done.wait [#allocation4], 1536  }
0x1905   :  { %13922 = vsyncadd [#allocation4], 4294965760 }
0x1906   :  { %10629 = vsyncpa [#allocation3], 1 }
0x1907   :  { %10630 = vsyncpa [#allocation6], 1 }
0x1908   :  { %10631 = vsyncpa [#allocation9], 1 }
0x1909   :  { %10632 = vsyncpa [#allocation12], 1 }
0x190a   :  { %10633 = vsyncpa [#allocation15], 1 }
0x190b   :  { %10634 = vsyncpa [#allocation18], 1 }
0x190c   :  { %10635 = vsyncpa [#allocation21], 1 }
0x190d   :  { %10636 = vsyncpa [#allocation4], 1 }

</bundles_post_ra>
